<compile_context>
chip_gen: v6e
topology: v6e:2x2x1
jax: 0.10.0
libtpu: 0.0.40
codegen_flags: <defaults>
</compile_context>

<pallas_src>
import functools

import jax
import jax.numpy as jnp
from jax.experimental import pallas as pl
from jax.experimental.pallas import tpu as pltpu


# ------------------------- fused Pallas kernel -------------------------

def _fused_kernel(x_ref, w1_ref, b1_ref, sel_ref, gamma_ref, beta_ref,
                  w2_ref, b2_ref, w2fold_ref, w3t_ref, b3_ref,
                  o_ref, sum_acc, sq_acc, w2s_ref, b2eff_ref,
                  *, inv_count, n_pad):
    """grid = (2 passes, row tiles); both axes sequential (BN couples tiles).

    pass 0:           z = relu(x @ W1big + b1big); accumulate full-width column sums.
    pass 1, tile 0:   fold global BN stats into w2/b2 (w2_scaled, b2_eff) once.
    pass 1, any tile: recompute z, h = relu(z @ w2_scaled + b2_eff),
                      o = w3^T · h^T  stored lane-dense as (Cout, tile).
    """
    p = pl.program_id(0)
    i = pl.program_id(1)

    @pl.when((p == 0) & (i == 0))
    def _init():
        sum_acc[...] = jnp.zeros_like(sum_acc)
        sq_acc[...] = jnp.zeros_like(sq_acc)

    # Stage 1 (both passes): pointwise conv folded into block-diagonal W1big.
    # bf16 MXU operands, f32 accumulation; bias/ReLU/stats in f32.
    # z columns are ordered (k, t, c1).
    z = jnp.dot(x_ref[...], w1_ref[...], preferred_element_type=jnp.float32)
    z = jnp.maximum(z + b1_ref[...], 0.0)                        # (tile, F_mid) f32

    @pl.when(p == 0)
    def _stats():
        # Full-width one-pass statistics; folded to per-channel once in pass 1.
        sum_acc[...] += jnp.sum(z, axis=0, keepdims=True)
        sq_acc[...] += jnp.sum(z * z, axis=0, keepdims=True)

    @pl.when((p == 1) & (i == 0))
    def _fold():
        ch_sum = jnp.dot(sum_acc[...], sel_ref[...], preferred_element_type=jnp.float32)
        ch_sq = jnp.dot(sq_acc[...], sel_ref[...], preferred_element_type=jnp.float32)
        if n_pad:  # static: remove the zero-padded rows' relu(b1) from the stats
            relu_b1 = jnp.maximum(b1_ref[...], 0.0)
            ch_sum = ch_sum - float(n_pad) * jnp.dot(
                relu_b1, sel_ref[...], preferred_element_type=jnp.float32)
            ch_sq = ch_sq - float(n_pad) * jnp.dot(
                relu_b1 * relu_b1, sel_ref[...], preferred_element_type=jnp.float32)
        mean = ch_sum * inv_count                                # (1, C1)
        var = jnp.maximum(ch_sq * inv_count - mean * mean, 0.0)  # guard cancellation
        scale = gamma_ref[...] * jax.lax.rsqrt(var + 1e-5)       # (1, C1)
        shift = beta_ref[...] - mean * scale                     # (1, C1)
        # b2_eff = b2 + shift @ (sum_{k,t} w2)  (w2fold precomputed host-side).
        b2eff_ref[...] = b2_ref[...] + jnp.dot(
            shift, w2fold_ref[...], preferred_element_type=jnp.float32)
        # w2_scaled[f, c2] = scale[c1(f)] * w2[f, c2]  — BN affine folded into w2.
        s_col = jax.lax.dot_general(sel_ref[...], scale,
                                    dimension_numbers=(((1,), (1,)), ((), ())),
                                    preferred_element_type=jnp.float32)   # (F_mid, 1)
        w2s_ref[...] = (w2_ref[...].astype(jnp.float32) * s_col).astype(jnp.bfloat16)

    @pl.when(p == 1)
    def _compute():
        # Stage 2: Conv3d(32->64, (1,K,12)) == full (k,t,c1) contraction with
        # the BN-scaled weights (bf16 MXU operands, f32 accumulate).
        h = jnp.dot(z.astype(jnp.bfloat16), w2s_ref[...],
                    preferred_element_type=jnp.float32)
        h = jnp.maximum(h + b2eff_ref[...], 0.0)                 # (tile, C2) f32
        # Final 1x1x1 conv contracted on h's last dim (no materialized h.T);
        # store is lane-dense (Cout, tile) with rows along lanes.
        o = jax.lax.dot_general(w3t_ref[...], h,
                                dimension_numbers=(((1,), (1,)), ((), ())),
                                preferred_element_type=jnp.float32)
        o_ref[...] = o + b3_ref[...]


# ------------------------- wrapper -------------------------

def spatial_temporal_forward(x, packed, *, top_k, t_window=12):
    B, N, K, Cin, T = x.shape
    assert K == top_k
    # squeeze(-1) in the PyTorch module removes the temporal dim only when T == 12.
    assert T == t_window == 12

    C1 = packed["gamma"].shape[1]
    C2 = packed["b2"].shape[1]
    Cout = packed["w3_t"].shape[0]
    BN = B * N
    F_in = K * Cin * T          # (k, cin, t) flattened
    F_mid = K * T * C1          # (k, t, c1)  flattened

    # Lane-dense row tiling: pad B*N up to a multiple of the tile (<= 1024) so
    # every output store is an unmasked multiple-of-128 lane slab on every TPU
    # generation (the 1024 cap keeps v7x's 64 MiB VMEM comfortable).  Padded
    # rows' relu(b1) contribution is removed from the BN statistics in-kernel.
    tile = min(1024, pl.cdiv(BN, 128) * 128)
    bn_pad = pl.cdiv(BN, tile) * tile
    n_pad = bn_pad - BN
    n_tiles = bn_pad // tile
    inv_count = 1.0 / float(BN * K * T)   # true element count per channel

    # Pure row-major reshape (no transpose); bf16 halves x HBM traffic, which
    # is streamed twice (stats pass + compute pass).
    x_flat = x.reshape(BN, F_in).astype(jnp.bfloat16)
    if n_pad:
        x_flat = jnp.pad(x_flat, ((0, n_pad), (0, 0)))

    # VMEM limit per generation (v5e/v6e: 128 MiB physical, v7x: 64 MiB).
    try:
        vmem_cap = int(pltpu.get_tpu_info().vmem_capacity_bytes)
    except Exception:
        vmem_cap = 64 * 1024 * 1024
    vmem_limit = min(96 * 1024 * 1024, (3 * vmem_cap) // 4)

    kernel = functools.partial(_fused_kernel, inv_count=inv_count, n_pad=n_pad)

    out_t = pl.pallas_call(
        kernel,
        grid=(2, n_tiles),
        in_specs=[
            pl.BlockSpec((tile, F_in), lambda p, i: (i, 0)),      # x rows (bf16)
            pl.BlockSpec((F_in, F_mid), lambda p, i: (0, 0)),     # W1big   (bf16)
            pl.BlockSpec((1, F_mid), lambda p, i: (0, 0)),        # b1 broadcast (f32)
            pl.BlockSpec((F_mid, C1), lambda p, i: (0, 0)),       # selector (k,t,c1)->c1
            pl.BlockSpec((1, C1), lambda p, i: (0, 0)),           # gamma
            pl.BlockSpec((1, C1), lambda p, i: (0, 0)),           # beta
            pl.BlockSpec((F_mid, C2), lambda p, i: (0, 0)),       # w2 flattened (bf16)
            pl.BlockSpec((1, C2), lambda p, i: (0, 0)),           # b2
            pl.BlockSpec((C1, C2), lambda p, i: (0, 0)),          # w2 summed over (k,t)
            pl.BlockSpec((Cout, C2), lambda p, i: (0, 0)),        # w3^T
            pl.BlockSpec((Cout, 1), lambda p, i: (0, 0)),         # b3 column
        ],
        # (0, i*p): all pass-0 steps alias output block 0 -> no spurious HBM
        # writebacks of untouched output blocks during the statistics pass.
        out_specs=pl.BlockSpec((Cout, tile), lambda p, i: (0, i * p)),
        out_shape=jax.ShapeDtypeStruct((Cout, bn_pad), jnp.float32),
        scratch_shapes=[
            pltpu.VMEM((1, F_mid), jnp.float32),    # column sums
            pltpu.VMEM((1, F_mid), jnp.float32),    # column sums of squares
            pltpu.VMEM((F_mid, C2), jnp.bfloat16),  # BN-scaled w2
            pltpu.VMEM((1, C2), jnp.float32),       # BN-shifted b2
        ],
        compiler_params=pltpu.CompilerParams(
            # BN statistics couple all row tiles -> sequential on one core.
            # TODO(synk): v7x dual-TensorCore split (per-core partial stats +
            # cross-core combine before pass 1) is left unimplemented.
            dimension_semantics=("arbitrary", "arbitrary"),
            vmem_limit_bytes=vmem_limit,
        ),
    )(x_flat, packed["w1_big"], packed["b1_big"], packed["sel"],
      packed["gamma"], packed["beta"], packed["w2_flat"], packed["b2"],
      packed["w2_fold"], packed["w3_t"], packed["b3_col"])

    # (Cout, B*N [+pad]) -> (B, 12, N, 1)  == PyTorch output after squeeze(-1).
    return jnp.transpose(out_t[:, :BN].reshape(Cout, B, N), (1, 0, 2))[..., None]


# ------------------------- params (natural + packed) -------------------------

def init_params(key, in_dims, top_k, C1=32, C2=64, Cout=12, Tker=12):
    """PyTorch-layout parameters (same init style as nn.Conv3d defaults)."""
    ks = jax.random.split(key, 6)

    def u(k, shape, fan_in):
        b = 1.0 / jnp.sqrt(float(fan_in))
        return jax.random.uniform(k, shape, jnp.float32, -b, b)

    w1 = u(ks[0], (in_dims, C1), in_dims)                    # Conv3d(Cin->C1, 1x1x1)
    b1 = u(ks[1], (1, C1), in_dims)
    gamma = jnp.ones((1, C1), jnp.float32)                   # BatchNorm3d defaults
    beta = jnp.zeros((1, C1), jnp.float32)

    fan2 = C1 * 1 * top_k * Tker
    w2 = u(ks[2], (C2, C1, 1, top_k, Tker), fan2)            # Conv3d(C1->C2, (1,K,12))
    b2 = u(ks[3], (1, C2), fan2)

    w3 = u(ks[4], (C2, Cout), C2)                            # Conv3d(C2->12, 1x1x1)
    b3 = u(ks[5], (1, Cout), C2)
    return dict(w1=w1, b1=b1, gamma=gamma, beta=beta, w2=w2, b2=b2, w3=w3, b3=b3)


def pack_params(params, *, top_k, t_window):
    """One-time host-side repack of weights into the kernel's layouts."""
    Cin, C1 = params["w1"].shape
    C2 = params["w2"].shape[0]
    K, T = top_k, t_window

    # Block-diagonal pointwise-conv weight (bf16 MXU operand):
    #   W1big[(k,cin,t), (k2,t2,c1)] = w1[cin,c1] * d(k,k2) * d(t,t2)
    eye_k = jnp.eye(K, dtype=jnp.float32)
    eye_t = jnp.eye(T, dtype=jnp.float32)
    w1_big = jnp.einsum("kK,cd,tT->kctKTd", eye_k, params["w1"], eye_t)
    w1_big = w1_big.reshape(K * Cin * T, K * T * C1).astype(jnp.bfloat16)
    b1_big = jnp.tile(params["b1"], (1, K * T))                          # (1, K*T*C1) f32

    # 0/1 selector: fold (k,t) per channel c1 (stats reduction and scale broadcast).
    sel = jnp.tile(jnp.eye(C1, dtype=jnp.float32), (K * T, 1))           # (K*T*C1, C1)

    # Conv3d(C1->C2, (1,K,12)) weight flattened in (k, t, c1) order so it
    # matches the stage-1 output columns directly (bf16 MXU operand).
    w2_flat_f32 = jnp.transpose(params["w2"][:, :, 0], (2, 3, 1, 0)).reshape(K * T * C1, C2)
    w2_flat = w2_flat_f32.astype(jnp.bfloat16)
    # Per-channel (k,t)-summed w2 for the BN shift term:  (C1, C2), f32.
    w2_fold = jnp.transpose(jnp.sum(params["w2"][:, :, 0], axis=(2, 3)), (1, 0))

    w3_t = jnp.asarray(params["w3"].T)                                   # (Cout, C2)
    b3_col = jnp.asarray(params["b3"].T)                                 # (Cout, 1)

    return dict(w1_big=w1_big, b1_big=b1_big, sel=sel,
                gamma=params["gamma"], beta=params["beta"],
                w2_flat=w2_flat, b2=params["b2"], w2_fold=w2_fold,
                w3_t=w3_t, b3_col=b3_col)


# ------------------------- pure-JAX reference -------------------------

def reference(x, params):
    """Pure-JAX f32 reference of the PyTorch forward (T == 12, training-mode BN)."""
    xp = jnp.transpose(x, (0, 3, 1, 2, 4))                               # (B, Cin, N, K, T)
    z = jnp.einsum("bcnkt,cd->bdnkt", xp, params["w1"])
    z = z + params["b1"][0][None, :, None, None, None]
    z = jnp.maximum(z, 0.0)
    mean = jnp.mean(z, axis=(0, 2, 3, 4), keepdims=True)
    var = jnp.mean((z - mean) ** 2, axis=(0, 2, 3, 4), keepdims=True)
    z = (z - mean) / jnp.sqrt(var + 1e-5)
    z = z * params["gamma"][0][None, :, None, None, None] + params["beta"][0][None, :, None, None, None]
    h = jnp.einsum("bcnkt,dckt->bdn", z, params["w2"][:, :, 0])
    h = jnp.maximum(h + params["b2"][0][None, :, None], 0.0)
    o = jnp.einsum("bdn,de->ben", h, params["w3"]) + params["b3"][0][None, :, None]
    return o[..., None]                                                  # (B, 12, N, 1)


# ------------------------- main -------------------------

if __name__ == "__main__":
    B, N, K, Cin, T = 2, 16, 4, 4, 12   # batch, nodes, top_k_neighbors, in_dims, time
    key = jax.random.PRNGKey(0)
    kx, kp = jax.random.split(key)
    x = jax.random.normal(kx, (B, N, K, Cin, T), jnp.float32)

    params = init_params(kp, Cin, K)
    packed = pack_params(params, top_k=K, t_window=T)

    fwd = jax.jit(functools.partial(spatial_temporal_forward, top_k=K, t_window=T))
    out = jax.block_until_ready(fwd(x, packed))

    ref = reference(x, params)
    assert out.shape == (B, 12, N, 1), out.shape
    # Tolerance reflects the intentional bf16 MXU-operand precision (per the
    # perf review) vs. the pure-f32 reference; accumulation stays in f32.
    max_err = float(jnp.max(jnp.abs(out - ref)))
    assert jnp.allclose(out, ref, rtol=3e-2, atol=3e-2), max_err
    print("KERNEL_OK")
</pallas_src>

<mosaic_0001>
module attributes {stable_mosaic.version = 11 : i64} {
  func.func @_fused_kernel(%arg0: i32, %arg1: i32, %arg2: memref<128x192xbf16, #tpu.memory_space<vmem>>, %arg3: memref<192x1536xbf16, #tpu.memory_space<vmem>>, %arg4: memref<1x1536xf32, #tpu.memory_space<vmem>>, %arg5: memref<1536x32xf32, #tpu.memory_space<vmem>>, %arg6: memref<1x32xf32, #tpu.memory_space<vmem>>, %arg7: memref<1x32xf32, #tpu.memory_space<vmem>>, %arg8: memref<1536x64xbf16, #tpu.memory_space<vmem>>, %arg9: memref<1x64xf32, #tpu.memory_space<vmem>>, %arg10: memref<32x64xf32, #tpu.memory_space<vmem>>, %arg11: memref<12x64xf32, #tpu.memory_space<vmem>>, %arg12: memref<12x1xf32, #tpu.memory_space<vmem>>, %arg13: memref<12x128xf32, #tpu.memory_space<vmem>>, %arg14: memref<1x1536xf32, #tpu.memory_space<vmem>>, %arg15: memref<1x1536xf32, #tpu.memory_space<vmem>>, %arg16: memref<1536x64xbf16, #tpu.memory_space<vmem>>, %arg17: memref<1x64xf32, #tpu.memory_space<vmem>>) attributes {dimension_semantics = [#tpu.dimension_semantics<arbitrary>, #tpu.dimension_semantics<arbitrary>], iteration_bounds = array<i64: 2, 1>, scalar_prefetch = 0 : i64, scratch_operands = 4 : i64, tpu.core_type = #tpu.core_type<tc>, window_params = [{transform_indices = @transform_0, window_bounds = array<i64: 128, 192>}, {pipeline_mode = #tpu.pipeline_mode<synchronous>, transform_indices = @transform_1, window_bounds = array<i64: 192, 1536>}, {pipeline_mode = #tpu.pipeline_mode<synchronous>, transform_indices = @transform_2, window_bounds = array<i64: 1, 1536>}, {pipeline_mode = #tpu.pipeline_mode<synchronous>, transform_indices = @transform_3, window_bounds = array<i64: 1536, 32>}, {pipeline_mode = #tpu.pipeline_mode<synchronous>, transform_indices = @transform_4, window_bounds = array<i64: 1, 32>}, {pipeline_mode = #tpu.pipeline_mode<synchronous>, transform_indices = @transform_5, window_bounds = array<i64: 1, 32>}, {pipeline_mode = #tpu.pipeline_mode<synchronous>, transform_indices = @transform_6, window_bounds = array<i64: 1536, 64>}, {pipeline_mode = #tpu.pipeline_mode<synchronous>, transform_indices = @transform_7, window_bounds = array<i64: 1, 64>}, {pipeline_mode = #tpu.pipeline_mode<synchronous>, transform_indices = @transform_8, window_bounds = array<i64: 32, 64>}, {pipeline_mode = #tpu.pipeline_mode<synchronous>, transform_indices = @transform_9, window_bounds = array<i64: 12, 64>}, {pipeline_mode = #tpu.pipeline_mode<synchronous>, transform_indices = @transform_10, window_bounds = array<i64: 12, 1>}, {transform_indices = @transform_11, window_bounds = array<i64: 12, 128>}]} {
    %c0_i32 = arith.constant 0 : i32
    %0 = arith.cmpi eq, %arg0, %c0_i32 : i32
    %c0_i32_0 = arith.constant 0 : i32
    %1 = arith.cmpi eq, %arg1, %c0_i32_0 : i32
    %2 = arith.andi %0, %1 : i1
    %3 = arith.extui %2 : i1 to i32
    %c0_i32_1 = arith.constant 0 : i32
    %4 = arith.cmpi ne, %3, %c0_i32_1 : i32
    scf.if %4 {
      %cst_14 = arith.constant 0.000000e+00 : f32
      %24 = vector.broadcast %cst_14 : f32 to vector<1x1536xf32>
      %c0_15 = arith.constant 0 : index
      %c0_16 = arith.constant 0 : index
      %25 = vector.load %arg14[%c0_15, %c0_16] : memref<1x1536xf32, #tpu.memory_space<vmem>>, vector<1x1536xf32>
      tpu.vector_store %arg14[%c0_15, %c0_16], %24 {strides = array<i32>} : memref<1x1536xf32, #tpu.memory_space<vmem>>, vector<1x1536xf32>,
      %cst_17 = arith.constant 0.000000e+00 : f32
      %26 = vector.broadcast %cst_17 : f32 to vector<1x1536xf32>
      %c0_18 = arith.constant 0 : index
      %c0_19 = arith.constant 0 : index
      %27 = vector.load %arg15[%c0_18, %c0_19] : memref<1x1536xf32, #tpu.memory_space<vmem>>, vector<1x1536xf32>
      tpu.vector_store %arg15[%c0_18, %c0_19], %26 {strides = array<i32>} : memref<1x1536xf32, #tpu.memory_space<vmem>>, vector<1x1536xf32>,
    } else {
    }
    %c0 = arith.constant 0 : index
    %c0_2 = arith.constant 0 : index
    %5 = vector.load %arg2[%c0, %c0_2] : memref<128x192xbf16, #tpu.memory_space<vmem>>, vector<128x192xbf16>
    %c0_3 = arith.constant 0 : index
    %c0_4 = arith.constant 0 : index
    %6 = vector.load %arg3[%c0_3, %c0_4] : memref<192x1536xbf16, #tpu.memory_space<vmem>>, vector<192x1536xbf16>
    %cst = arith.constant dense<0.000000e+00> : vector<128x1536xf32>
    %7 = tpu.matmul %5, %6, %cst {dimension_numbers = #tpu.dot_dimension_numbers<[1], [0], [0], [1], [0, 0, 1, 1], [], []>} : vector<128x192xbf16>, vector<192x1536xbf16>, vector<128x1536xf32> -> vector<128x1536xf32>
    %c0_5 = arith.constant 0 : index
    %c0_6 = arith.constant 0 : index
    %8 = vector.load %arg4[%c0_5, %c0_6] : memref<1x1536xf32, #tpu.memory_space<vmem>>, vector<1x1536xf32>
    %9 = vector.broadcast %8 : vector<1x1536xf32> to vector<128x1536xf32>
    %10 = arith.addf %7, %9 : vector<128x1536xf32>
    %cst_7 = arith.constant 0.000000e+00 : f32
    %11 = vector.broadcast %cst_7 : f32 to vector<128x1536xf32>
    %12 = arith.maximumf %10, %11 : vector<128x1536xf32>
    %c0_i32_8 = arith.constant 0 : i32
    %13 = arith.cmpi eq, %arg0, %c0_i32_8 : i32
    %14 = arith.extui %13 : i1 to i32
    %c0_i32_9 = arith.constant 0 : i32
    %15 = arith.cmpi ne, %14, %c0_i32_9 : i32
    scf.if %15 {
      %c0_14 = arith.constant 0 : index
      %c0_15 = arith.constant 0 : index
      %24 = vector.load %arg14[%c0_14, %c0_15] : memref<1x1536xf32, #tpu.memory_space<vmem>>, vector<1x1536xf32>
      %cst_16 = arith.constant dense<0.000000e+00> : vector<1536xf32>
      %25 = vector.multi_reduction <add>, %12, %cst_16 [0] : vector<128x1536xf32> to vector<1536xf32>
      %26 = vector.shape_cast %25 : vector<1536xf32> to vector<1x1536xf32>
      %27 = arith.addf %24, %26 : vector<1x1536xf32>
      %c0_17 = arith.constant 0 : index
      %c0_18 = arith.constant 0 : index
      %28 = vector.load %arg14[%c0_17, %c0_18] : memref<1x1536xf32, #tpu.memory_space<vmem>>, vector<1x1536xf32>
      tpu.vector_store %arg14[%c0_17, %c0_18], %27 {strides = array<i32>} : memref<1x1536xf32, #tpu.memory_space<vmem>>, vector<1x1536xf32>,
      %c0_19 = arith.constant 0 : index
      %c0_20 = arith.constant 0 : index
      %29 = vector.load %arg15[%c0_19, %c0_20] : memref<1x1536xf32, #tpu.memory_space<vmem>>, vector<1x1536xf32>
      %30 = arith.mulf %12, %12 : vector<128x1536xf32>
      %cst_21 = arith.constant dense<0.000000e+00> : vector<1536xf32>
      %31 = vector.multi_reduction <add>, %30, %cst_21 [0] : vector<128x1536xf32> to vector<1536xf32>
      %32 = vector.shape_cast %31 : vector<1536xf32> to vector<1x1536xf32>
      %33 = arith.addf %29, %32 : vector<1x1536xf32>
      %c0_22 = arith.constant 0 : index
      %c0_23 = arith.constant 0 : index
      %34 = vector.load %arg15[%c0_22, %c0_23] : memref<1x1536xf32, #tpu.memory_space<vmem>>, vector<1x1536xf32>
      tpu.vector_store %arg15[%c0_22, %c0_23], %33 {strides = array<i32>} : memref<1x1536xf32, #tpu.memory_space<vmem>>, vector<1x1536xf32>,
    } else {
    }
    %c1_i32 = arith.constant 1 : i32
    %16 = arith.cmpi eq, %arg0, %c1_i32 : i32
    %c0_i32_10 = arith.constant 0 : i32
    %17 = arith.cmpi eq, %arg1, %c0_i32_10 : i32
    %18 = arith.andi %16, %17 : i1
    %19 = arith.extui %18 : i1 to i32
    %c0_i32_11 = arith.constant 0 : i32
    %20 = arith.cmpi ne, %19, %c0_i32_11 : i32
    scf.if %20 {
      %c0_14 = arith.constant 0 : index
      %c0_15 = arith.constant 0 : index
      %24 = vector.load %arg14[%c0_14, %c0_15] : memref<1x1536xf32, #tpu.memory_space<vmem>>, vector<1x1536xf32>
      %c0_16 = arith.constant 0 : index
      %c0_17 = arith.constant 0 : index
      %25 = vector.load %arg5[%c0_16, %c0_17] : memref<1536x32xf32, #tpu.memory_space<vmem>>, vector<1536x32xf32>
      %cst_18 = arith.constant dense<0.000000e+00> : vector<1x32xf32>
      %26 = tpu.matmul %24, %25, %cst_18 {dimension_numbers = #tpu.dot_dimension_numbers<[1], [0], [0], [1], [0, 0, 1, 1], [], []>} : vector<1x1536xf32>, vector<1536x32xf32>, vector<1x32xf32> -> vector<1x32xf32>
      %c0_19 = arith.constant 0 : index
      %c0_20 = arith.constant 0 : index
      %27 = vector.load %arg15[%c0_19, %c0_20] : memref<1x1536xf32, #tpu.memory_space<vmem>>, vector<1x1536xf32>
      %c0_21 = arith.constant 0 : index
      %c0_22 = arith.constant 0 : index
      %28 = vector.load %arg5[%c0_21, %c0_22] : memref<1536x32xf32, #tpu.memory_space<vmem>>, vector<1536x32xf32>
      %cst_23 = arith.constant dense<0.000000e+00> : vector<1x32xf32>
      %29 = tpu.matmul %27, %28, %cst_23 {dimension_numbers = #tpu.dot_dimension_numbers<[1], [0], [0], [1], [0, 0, 1, 1], [], []>} : vector<1x1536xf32>, vector<1536x32xf32>, vector<1x32xf32> -> vector<1x32xf32>
      %c0_24 = arith.constant 0 : index
      %c0_25 = arith.constant 0 : index
      %30 = vector.load %arg4[%c0_24, %c0_25] : memref<1x1536xf32, #tpu.memory_space<vmem>>, vector<1x1536xf32>
      %cst_26 = arith.constant 0.000000e+00 : f32
      %31 = vector.broadcast %cst_26 : f32 to vector<1x1536xf32>
      %32 = arith.maximumf %30, %31 : vector<1x1536xf32>
      %c0_27 = arith.constant 0 : index
      %c0_28 = arith.constant 0 : index
      %33 = vector.load %arg5[%c0_27, %c0_28] : memref<1536x32xf32, #tpu.memory_space<vmem>>, vector<1536x32xf32>
      %cst_29 = arith.constant dense<0.000000e+00> : vector<1x32xf32>
      %34 = tpu.matmul %32, %33, %cst_29 {dimension_numbers = #tpu.dot_dimension_numbers<[1], [0], [0], [1], [0, 0, 1, 1], [], []>} : vector<1x1536xf32>, vector<1536x32xf32>, vector<1x32xf32> -> vector<1x32xf32>
      %cst_30 = arith.constant 9.600000e+01 : f32
      %35 = vector.broadcast %cst_30 : f32 to vector<1x32xf32>
      %36 = arith.mulf %35, %34 : vector<1x32xf32>
      %37 = arith.subf %26, %36 : vector<1x32xf32>
      %38 = arith.mulf %32, %32 : vector<1x1536xf32>
      %c0_31 = arith.constant 0 : index
      %c0_32 = arith.constant 0 : index
      %39 = vector.load %arg5[%c0_31, %c0_32] : memref<1536x32xf32, #tpu.memory_space<vmem>>, vector<1536x32xf32>
      %cst_33 = arith.constant dense<0.000000e+00> : vector<1x32xf32>
      %40 = tpu.matmul %38, %39, %cst_33 {dimension_numbers = #tpu.dot_dimension_numbers<[1], [0], [0], [1], [0, 0, 1, 1], [], []>} : vector<1x1536xf32>, vector<1536x32xf32>, vector<1x32xf32> -> vector<1x32xf32>
      %cst_34 = arith.constant 9.600000e+01 : f32
      %41 = vector.broadcast %cst_34 : f32 to vector<1x32xf32>
      %42 = arith.mulf %41, %40 : vector<1x32xf32>
      %43 = arith.subf %29, %42 : vector<1x32xf32>
      %cst_35 = arith.constant 6.51041686E-4 : f32
      %44 = vector.broadcast %cst_35 : f32 to vector<1x32xf32>
      %45 = arith.mulf %37, %44 : vector<1x32xf32>
      %cst_36 = arith.constant 6.51041686E-4 : f32
      %46 = vector.broadcast %cst_36 : f32 to vector<1x32xf32>
      %47 = arith.mulf %43, %46 : vector<1x32xf32>
      %48 = arith.mulf %45, %45 : vector<1x32xf32>
      %49 = arith.subf %47, %48 : vector<1x32xf32>
      %cst_37 = arith.constant 0.000000e+00 : f32
      %50 = vector.broadcast %cst_37 : f32 to vector<1x32xf32>
      %51 = arith.maximumf %49, %50 : vector<1x32xf32>
      %c0_38 = arith.constant 0 : index
      %c0_39 = arith.constant 0 : index
      %52 = vector.load %arg6[%c0_38, %c0_39] : memref<1x32xf32, #tpu.memory_space<vmem>>, vector<1x32xf32>
      %cst_40 = arith.constant 9.99999974E-6 : f32
      %53 = vector.broadcast %cst_40 : f32 to vector<1x32xf32>
      %54 = arith.addf %51, %53 : vector<1x32xf32>
      %55 = math.rsqrt %54 : vector<1x32xf32>
      %56 = arith.mulf %52, %55 : vector<1x32xf32>
      %c0_41 = arith.constant 0 : index
      %c0_42 = arith.constant 0 : index
      %57 = vector.load %arg7[%c0_41, %c0_42] : memref<1x32xf32, #tpu.memory_space<vmem>>, vector<1x32xf32>
      %58 = arith.mulf %45, %56 : vector<1x32xf32>
      %59 = arith.subf %57, %58 : vector<1x32xf32>
      %c0_43 = arith.constant 0 : index
      %c0_44 = arith.constant 0 : index
      %60 = vector.load %arg9[%c0_43, %c0_44] : memref<1x64xf32, #tpu.memory_space<vmem>>, vector<1x64xf32>
      %c0_45 = arith.constant 0 : index
      %c0_46 = arith.constant 0 : index
      %61 = vector.load %arg10[%c0_45, %c0_46] : memref<32x64xf32, #tpu.memory_space<vmem>>, vector<32x64xf32>
      %cst_47 = arith.constant dense<0.000000e+00> : vector<1x64xf32>
      %62 = tpu.matmul %59, %61, %cst_47 {dimension_numbers = #tpu.dot_dimension_numbers<[1], [0], [0], [1], [0, 0, 1, 1], [], []>} : vector<1x32xf32>, vector<32x64xf32>, vector<1x64xf32> -> vector<1x64xf32>
      %63 = arith.addf %60, %62 : vector<1x64xf32>
      %c0_48 = arith.constant 0 : index
      %c0_49 = arith.constant 0 : index
      %64 = vector.load %arg17[%c0_48, %c0_49] : memref<1x64xf32, #tpu.memory_space<vmem>>, vector<1x64xf32>
      tpu.vector_store %arg17[%c0_48, %c0_49], %63 {strides = array<i32>} : memref<1x64xf32, #tpu.memory_space<vmem>>, vector<1x64xf32>,
      %c0_50 = arith.constant 0 : index
      %c0_51 = arith.constant 0 : index
      %65 = vector.load %arg5[%c0_50, %c0_51] : memref<1536x32xf32, #tpu.memory_space<vmem>>, vector<1536x32xf32>
      %cst_52 = arith.constant dense<0.000000e+00> : vector<1536x1xf32>
      %66 = tpu.matmul %65, %56, %cst_52 {dimension_numbers = #tpu.dot_dimension_numbers<[1], [1], [0], [0], [0, 0, 1, 0], [], []>} : vector<1536x32xf32>, vector<1x32xf32>, vector<1536x1xf32> -> vector<1536x1xf32>
      %c0_53 = arith.constant 0 : index
      %c0_54 = arith.constant 0 : index
      %67 = vector.load %arg8[%c0_53, %c0_54] : memref<1536x64xbf16, #tpu.memory_space<vmem>>, vector<1536x64xbf16>
      %68 = arith.extf %67 : vector<1536x64xbf16> to vector<1536x64xf32>
      %69 = vector.broadcast %66 : vector<1536x1xf32> to vector<1536x64xf32>
      %70 = arith.mulf %68, %69 : vector<1536x64xf32>
      %71 = arith.truncf %70 : vector<1536x64xf32> to vector<1536x64xbf16>
      %c0_55 = arith.constant 0 : index
      %c0_56 = arith.constant 0 : index
      %72 = vector.load %arg16[%c0_55, %c0_56] : memref<1536x64xbf16, #tpu.memory_space<vmem>>, vector<1536x64xbf16>
      tpu.vector_store %arg16[%c0_55, %c0_56], %71 {strides = array<i32>} : memref<1536x64xbf16, #tpu.memory_space<vmem>>, vector<1536x64xbf16>,
    } else {
    }
    %c1_i32_12 = arith.constant 1 : i32
    %21 = arith.cmpi eq, %arg0, %c1_i32_12 : i32
    %22 = arith.extui %21 : i1 to i32
    %c0_i32_13 = arith.constant 0 : i32
    %23 = arith.cmpi ne, %22, %c0_i32_13 : i32
    scf.if %23 {
      %24 = arith.truncf %12 : vector<128x1536xf32> to vector<128x1536xbf16>
      %c0_14 = arith.constant 0 : index
      %c0_15 = arith.constant 0 : index
      %25 = vector.load %arg16[%c0_14, %c0_15] : memref<1536x64xbf16, #tpu.memory_space<vmem>>, vector<1536x64xbf16>
      %cst_16 = arith.constant dense<0.000000e+00> : vector<128x64xf32>
      %26 = tpu.matmul %24, %25, %cst_16 {dimension_numbers = #tpu.dot_dimension_numbers<[1], [0], [0], [1], [0, 0, 1, 1], [], []>} : vector<128x1536xbf16>, vector<1536x64xbf16>, vector<128x64xf32> -> vector<128x64xf32>
      %c0_17 = arith.constant 0 : index
      %c0_18 = arith.constant 0 : index
      %27 = vector.load %arg17[%c0_17, %c0_18] : memref<1x64xf32, #tpu.memory_space<vmem>>, vector<1x64xf32>
      %28 = vector.broadcast %27 : vector<1x64xf32> to vector<128x64xf32>
      %29 = arith.addf %26, %28 : vector<128x64xf32>
      %cst_19 = arith.constant 0.000000e+00 : f32
      %30 = vector.broadcast %cst_19 : f32 to vector<128x64xf32>
      %31 = arith.maximumf %29, %30 : vector<128x64xf32>
      %c0_20 = arith.constant 0 : index
      %c0_21 = arith.constant 0 : index
      %32 = vector.load %arg11[%c0_20, %c0_21] : memref<12x64xf32, #tpu.memory_space<vmem>>, vector<12x64xf32>
      %cst_22 = arith.constant dense<0.000000e+00> : vector<12x128xf32>
      %33 = tpu.matmul %32, %31, %cst_22 {dimension_numbers = #tpu.dot_dimension_numbers<[1], [1], [0], [0], [0, 0, 1, 0], [], []>} : vector<12x64xf32>, vector<128x64xf32>, vector<12x128xf32> -> vector<12x128xf32>
      %c0_23 = arith.constant 0 : index
      %c0_24 = arith.constant 0 : index
      %34 = vector.load %arg12[%c0_23, %c0_24] : memref<12x1xf32, #tpu.memory_space<vmem>>, vector<12x1xf32>
      %35 = vector.broadcast %34 : vector<12x1xf32> to vector<12x128xf32>
      %36 = arith.addf %33, %35 : vector<12x128xf32>
      %c0_25 = arith.constant 0 : index
      %c0_26 = arith.constant 0 : index
      %37 = vector.load %arg13[%c0_25, %c0_26] : memref<12x128xf32, #tpu.memory_space<vmem>>, vector<12x128xf32>
      tpu.vector_store %arg13[%c0_25, %c0_26], %36 {strides = array<i32>} : memref<12x128xf32, #tpu.memory_space<vmem>>, vector<12x128xf32>,
    } else {
    }
    return
  }
  func.func @transform_0(%arg0: i32, %arg1: i32) -> (i32, i32) {
    %c0_i32 = arith.constant 0 : i32
    %c0_i32_0 = arith.constant 0 : i32
    return %arg1, %c0_i32 : i32, i32
  }
  func.func @transform_1(%arg0: i32, %arg1: i32) -> (i32, i32) {
    %c0_i32 = arith.constant 0 : i32
    %c0_i32_0 = arith.constant 0 : i32
    %c0_i32_1 = arith.constant 0 : i32
    return %c0_i32, %c0_i32_0 : i32, i32
  }
  func.func @transform_2(%arg0: i32, %arg1: i32) -> (i32, i32) {
    %c0_i32 = arith.constant 0 : i32
    %c0_i32_0 = arith.constant 0 : i32
    %c0_i32_1 = arith.constant 0 : i32
    return %c0_i32, %c0_i32_0 : i32, i32
  }
  func.func @transform_3(%arg0: i32, %arg1: i32) -> (i32, i32) {
    %c0_i32 = arith.constant 0 : i32
    %c0_i32_0 = arith.constant 0 : i32
    %c0_i32_1 = arith.constant 0 : i32
    return %c0_i32, %c0_i32_0 : i32, i32
  }
  func.func @transform_4(%arg0: i32, %arg1: i32) -> (i32, i32) {
    %c0_i32 = arith.constant 0 : i32
    %c0_i32_0 = arith.constant 0 : i32
    %c0_i32_1 = arith.constant 0 : i32
    return %c0_i32, %c0_i32_0 : i32, i32
  }
  func.func @transform_5(%arg0: i32, %arg1: i32) -> (i32, i32) {
    %c0_i32 = arith.constant 0 : i32
    %c0_i32_0 = arith.constant 0 : i32
    %c0_i32_1 = arith.constant 0 : i32
    return %c0_i32, %c0_i32_0 : i32, i32
  }
  func.func @transform_6(%arg0: i32, %arg1: i32) -> (i32, i32) {
    %c0_i32 = arith.constant 0 : i32
    %c0_i32_0 = arith.constant 0 : i32
    %c0_i32_1 = arith.constant 0 : i32
    return %c0_i32, %c0_i32_0 : i32, i32
  }
  func.func @transform_7(%arg0: i32, %arg1: i32) -> (i32, i32) {
    %c0_i32 = arith.constant 0 : i32
    %c0_i32_0 = arith.constant 0 : i32
    %c0_i32_1 = arith.constant 0 : i32
    return %c0_i32, %c0_i32_0 : i32, i32
  }
  func.func @transform_8(%arg0: i32, %arg1: i32) -> (i32, i32) {
    %c0_i32 = arith.constant 0 : i32
    %c0_i32_0 = arith.constant 0 : i32
    %c0_i32_1 = arith.constant 0 : i32
    return %c0_i32, %c0_i32_0 : i32, i32
  }
  func.func @transform_9(%arg0: i32, %arg1: i32) -> (i32, i32) {
    %c0_i32 = arith.constant 0 : i32
    %c0_i32_0 = arith.constant 0 : i32
    %c0_i32_1 = arith.constant 0 : i32
    return %c0_i32, %c0_i32_0 : i32, i32
  }
  func.func @transform_10(%arg0: i32, %arg1: i32) -> (i32, i32) {
    %c0_i32 = arith.constant 0 : i32
    %c0_i32_0 = arith.constant 0 : i32
    %c0_i32_1 = arith.constant 0 : i32
    return %c0_i32, %c0_i32_0 : i32, i32
  }
  func.func @transform_11(%arg0: i32, %arg1: i32) -> (i32, i32) {
    %0 = arith.muli %arg1, %arg0 : i32
    %c0_i32 = arith.constant 0 : i32
    %c0_i32_0 = arith.constant 0 : i32
    return %c0_i32, %0 : i32, i32
  }
}

</mosaic_0001>

<bundles_post_ra>
// kernel: spatial_temporal_forward.1
= control target key start
LH: loop header
LB: loop body
LE: loop exit
PB: predicated region body
PF: predicated region fallthrough
CT: control target
= control target key end

     0   :  { %s12787_s17 = smov 0   ;;  %s12789_s18 = smov 0   ;;  %s19683_s0 = inlined_call_operand.vmem [shape: bf16[128,192], index: 0, kind: input, shape index: {}]   ;;  %s19684_s1 = inlined_call_operand.vmem [shape: bf16[192,1536], index: 1, kind: input, shape index: {}]   ;;  %s19685_s2 = inlined_call_operand.vmem [shape: f32[1,1536], index: 2, kind: input, shape index: {}]   ;;  %s19686_s3 = inlined_call_operand.vmem [shape: f32[1536,32], index: 3, kind: input, shape index: {}]   ;;  %s19687_s4 = inlined_call_operand.vmem [shape: f32[1,32], index: 4, kind: input, shape index: {}]   ;;  %s19688_s5 = inlined_call_operand.vmem [shape: f32[1,32], index: 5, kind: input, shape index: {}]   ;;  %s19689_s6 = inlined_call_operand.vmem [shape: bf16[1536,64], index: 6, kind: input, shape index: {}]   ;;  %s19690_s7 = inlined_call_operand.vmem [shape: f32[1,64], index: 7, kind: input, shape index: {}]   ;;  %s19691_s8 = inlined_call_operand.vmem [shape: f32[32,64], index: 8, kind: input, shape index: {}]   ;;  %s19692_s9 = inlined_call_operand.vmem [shape: f32[12,64], index: 9, kind: input, shape index: {}]   ;;  %s19693_s10 = inlined_call_operand.vmem [shape: f32[12,1], index: 10, kind: input, shape index: {}]   ;;  %s19694_s11 = inlined_call_operand.vmem [shape: f32[12,128], index: 11, kind: output, shape index: {}]  }
   0x1   :  { %s12791_s19 = smov 0  }
   0x2 LB: > { %s33_s20 = sadd.s32 1, %s12716_s18  ;;  %p9647_p0 = scmp.ge.s32.totalorder %s12720_s19, 1  ;;  %s12720_s19 = sphi %s12791_s19, %s21_s19   ;;  %s12716_s18 = sphi %s12789_s18, %s21691_s18   ;;  %s12712_s17 = sphi %s12787_s17, %s21690_s17  }
   0x3   : > { %p35_p1 = scmp.ge.s32.totalorder %s33_s20, 2  ;;  %p353_p2 = scmp.lt.s32.totalorder %s12720_s19, 3 }
   0x5   : > { %s21693_s20 = smov (%p35_p1, %s33_s20), 0  ;;  %p354_p3 = pnand %p9647_p0, %p353_p2 }
   0x7   : > { %357 = sbr.rel (%p354_p3) target bundleno = 2564 (0xa04), region = 64 }
   0xc   : > { %p408_p4 = scmp.eq.s32.totalorder %s12712_s17, 0 }
   0xd   : > { %v415_v0 = vlaneseq (%p408_p4)  ;;  %v12722_v1 = vmov (%p408_p4), 0.0  }
   0xe   : > { %413 = sbr.rel (!%p408_p4) target bundleno = 19 (0x13), region = 68  ;;  %414 = vst [vmem:[#allocation2] sm:$0xff] (%p408_p4), %v12722_v1  ;;  %420 = vst [vmem:[#allocation3] sm:$0xff] (%p408_p4), %v12722_v1 }
   0xf   : > { %vm417_vm0 = vcmp.lt.s32.totalorder (%p408_p4), %v415_v0, 512 }
  0x10   : > { %419 = vst.msk [vmem:[#allocation2 + $0x8] sm:$0xf] (%p408_p4), %vm417_vm0, %v12722_v1  ;;  %421 = vst.msk [vmem:[#allocation3 + $0x8] sm:$0xf] (%p408_p4), %vm417_vm0, %v12722_v1 }
  0x13 PF: > { %v12167_v2 = vld [vmem:[%s19684_s1 + $0x2a4] ss:$48 sps:$4 sm:$0xff]   ;;  %v12169_v3 = vld [vmem:[%s19684_s1 + $0x2ac] ss:$48 sps:$4 sm:$0xff]   ;;  %v12171_v4 = vld [vmem:[%s19684_s1 + $0x2a0] ss:$48 sps:$4 sm:$0xff]  }
  0x14   : > { %1463 = vmatprep.subr.bf16.mxu0 %v12167_v2  ;;  %v12172_v5 = vld [vmem:[%s19684_s1 + $0x2a8] ss:$48 sps:$4 sm:$0xff]   ;;  %1576 = vmatprep.subr.bf16.mxu1 %v12169_v3  ;;  %v12173_v6 = vld [vmem:[%s19684_s1 + $0x244] ss:$48 sps:$4 sm:$0xff]   ;;  %v12175_v7 = vld [vmem:[%s19684_s1 + $0x24c] ss:$48 sps:$4 sm:$0xff]  }
  0x15   : > { %1464 = vmatpush1.bf16.msra.mxu0 %v12171_v4  ;;  %1577 = vmatpush1.bf16.msra.mxu1 %v12172_v5  ;;  %v12177_v8 = vld [vmem:[%s19684_s1 + $0x240] ss:$48 sps:$4 sm:$0xff]   ;;  %v12178_v9 = vld [vmem:[%s19684_s1 + $0x248] ss:$48 sps:$4 sm:$0xff]   ;;  %v12179_v10 = vld [vmem:[%s19684_s1 + $0x1e4] ss:$48 sps:$4 sm:$0xff]  }
  0x16   : > { %1465 = vmatprep.subr.bf16.mxu0 %v12173_v6  ;;  %1578 = vmatprep.subr.bf16.mxu1 %v12175_v7  ;;  %v12181_v11 = vld [vmem:[%s19684_s1 + $0x1ec] ss:$48 sps:$4 sm:$0xff]   ;;  %v12183_v12 = vld [vmem:[%s19684_s1 + $0x1e0] ss:$48 sps:$4 sm:$0xff]   ;;  %v12184_v13 = vld [vmem:[%s19684_s1 + $0x1e8] ss:$48 sps:$4 sm:$0xff]  }
  0x17   : > { %v12185_v14 = vld [vmem:[%s19684_s1 + $0x184] ss:$48 sps:$4 sm:$0xff]   ;;  %v12187_v15 = vld [vmem:[%s19684_s1 + $0x18c] ss:$48 sps:$4 sm:$0xff]   ;;  %v12189_v16 = vld [vmem:[%s19684_s1 + $0x180] ss:$48 sps:$4 sm:$0xff]  }
  0x18   : > { %v12190_v17 = vld [vmem:[%s19684_s1 + $0x188] ss:$48 sps:$4 sm:$0xff]   ;;  %v12191_v18 = vld [vmem:[%s19684_s1 + $0x124] ss:$48 sps:$4 sm:$0xff]   ;;  %v12193_v19 = vld [vmem:[%s19684_s1 + $0x12c] ss:$48 sps:$4 sm:$0xff]  }
  0x19   : > { %1466 = vmatpush1.bf16.msra.mxu0 %v12177_v8  ;;  %1579 = vmatpush1.bf16.msra.mxu1 %v12178_v9  ;;  %v12195_v20 = vld [vmem:[%s19684_s1 + $0x120] ss:$48 sps:$4 sm:$0xff]   ;;  %v12196_v21 = vld [vmem:[%s19684_s1 + $0x128] ss:$48 sps:$4 sm:$0xff]   ;;  %v12197_v22 = vld [vmem:[%s19684_s1 + $0xc4] ss:$48 sps:$4 sm:$0xff]  }
  0x1a   : > { %1467 = vmatprep.subr.bf16.mxu0 %v12179_v10  ;;  %1580 = vmatprep.subr.bf16.mxu1 %v12181_v11  ;;  %v12199_v23 = vld [vmem:[%s19684_s1 + $0xcc] ss:$48 sps:$4 sm:$0xff]   ;;  %v12201_v24 = vld [vmem:[%s19684_s1 + $0xc0] ss:$48 sps:$4 sm:$0xff]   ;;  %v12202_v25 = vld [vmem:[%s19684_s1 + $0xc8] ss:$48 sps:$4 sm:$0xff]  }
  0x1b   : > { %v12203_v26 = vld [vmem:[%s19684_s1 + $0x64] ss:$48 sps:$4 sm:$0xff]   ;;  %v12205_v27 = vld [vmem:[%s19684_s1 + $0x6c] ss:$48 sps:$4 sm:$0xff]   ;;  %v12207_v28 = vld [vmem:[%s19684_s1 + $0x60] ss:$48 sps:$4 sm:$0xff]  }
  0x1c   : > { %v12208_v29 = vld [vmem:[%s19684_s1 + $0x68] ss:$48 sps:$4 sm:$0xff]   ;;  %v12209_v30 = vld [vmem:[%s19684_s1 + $0x4] ss:$48 sps:$4 sm:$0xff]   ;;  %v12211_v31 = vld [vmem:[%s19684_s1 + $0xc] ss:$48 sps:$4 sm:$0xff]  }
  0x1d   : > { %1468 = vmatpush1.bf16.msra.mxu0 %v12183_v12  ;;  %1581 = vmatpush1.bf16.msra.mxu1 %v12184_v13  ;;  %v12213_v32 = vld [vmem:[%s19684_s1] ss:$48 sps:$4 sm:$0xff]   ;;  %v12214_v33 = vld [vmem:[%s19684_s1 + $0x8] ss:$48 sps:$4 sm:$0xff]   ;;  %v12215_v34 = vld [vmem:[%s19684_s1 + $0x424] ss:$48 sps:$4 sm:$0xff]  }
  0x1e   : > { %1469 = vmatprep.subr.bf16.mxu0 %v12185_v14  ;;  %1582 = vmatprep.subr.bf16.mxu1 %v12187_v15  ;;  %v12217_v35 = vld [vmem:[%s19684_s1 + $0x42c] ss:$48 sps:$4 sm:$0xff]   ;;  %vm1438_vm1 = vcmask 523264   ;;  %v12219_v36 = vld [vmem:[%s19684_s1 + $0x420] ss:$48 sps:$4 sm:$0xff]   ;;  %p9857_p5 = scmp.ne.s32.totalorder %s12712_s17, 0 }
  0x1f   : > { %v12220_v37 = vld [vmem:[%s19684_s1 + $0x428] ss:$48 sps:$4 sm:$0xff]   ;;  %v12221_v38 = vld [vmem:[%s19684_s1 + $0x3c4] ss:$48 sps:$4 sm:$0xff]   ;;  %v12223_v40 = vld [vmem:[%s19684_s1 + $0x3cc] ss:$48 sps:$4 sm:$0xff]  }
  0x20   : > { %v12922_v39 = vld [vmem:[%s19683_s0 + $0x4] ss:$8 sps:$4 sm:$0xff]   ;;  %v12225_v41 = vld [vmem:[%s19684_s1 + $0x3c0] ss:$48 sps:$4 sm:$0xff]   ;;  %v12226_v42 = vld [vmem:[%s19684_s1 + $0x3c8] ss:$48 sps:$4 sm:$0xff]  }
  0x21   : > { %1470 = vmatpush1.bf16.msra.mxu0 %v12189_v16  ;;  %1583 = vmatpush1.bf16.msra.mxu1 %v12190_v17  ;;  %v12227_v43 = vld [vmem:[%s19684_s1 + $0x364] ss:$48 sps:$4 sm:$0xff]   ;;  %v12229_v44 = vld [vmem:[%s19684_s1 + $0x36c] ss:$48 sps:$4 sm:$0xff]   ;;  %v12231_v45 = vld [vmem:[%s19684_s1 + $0x360] ss:$48 sps:$4 sm:$0xff]  }
  0x22   : > { %1471 = vmatprep.subr.bf16.mxu0 %v12191_v18  ;;  %1584 = vmatprep.subr.bf16.mxu1 %v12193_v19  ;;  %v12232_v46 = vld [vmem:[%s19684_s1 + $0x368] ss:$48 sps:$4 sm:$0xff]   ;;  %v12233_v47 = vld [vmem:[%s19684_s1 + $0x304] ss:$48 sps:$4 sm:$0xff]   ;;  %v12235_v48 = vld [vmem:[%s19684_s1 + $0x30c] ss:$48 sps:$4 sm:$0xff]  }
  0x23   : > { %9809 = vmatprep.mubr.msk.bf16.mxu0 %vm1438_vm1, %v12922_v39  ;;  %9817 = vmatprep.mubr.msk.bf16.mxu1 %vm1438_vm1, %v12922_v39  ;;  %v12237_v49 = vld [vmem:[%s19684_s1 + $0x300] ss:$48 sps:$4 sm:$0xff]   ;;  %v12238_v50 = vld [vmem:[%s19684_s1 + $0x308] ss:$48 sps:$4 sm:$0xff]   ;;  %v12244_v51 = vld [vmem:[%s19684_s1 + $0x2b4] ss:$48 sps:$4 sm:$0xff]  }
  0x24   : > { %v12247_v52 = vld [vmem:[%s19684_s1 + $0x2bc] ss:$48 sps:$4 sm:$0xff]   ;;  %v12970_v53 = vld [vmem:[%s19683_s0] ss:$8 sps:$4 sm:$0xff]   ;;  %v12250_v56 = vld [vmem:[%s19684_s1 + $0x254] ss:$48 sps:$4 sm:$0xff]  }
  0x25   : > { %1472 = vmatpush1.bf16.msra.mxu0 %v12195_v20  ;;  %1585 = vmatpush1.bf16.msra.mxu1 %v12196_v21  ;;  %v12242_v54 = vld [vmem:[%s19684_s1 + $0x2b0] ss:$48 sps:$4 sm:$0xff]   ;;  %v12245_v55 = vld [vmem:[%s19684_s1 + $0x2b8] ss:$48 sps:$4 sm:$0xff]   ;;  %v12253_v57 = vld [vmem:[%s19684_s1 + $0x25c] ss:$48 sps:$4 sm:$0xff]  }
  0x26   : > { %1473 = vmatprep.subr.bf16.mxu0 %v12197_v22  ;;  %1586 = vmatprep.subr.bf16.mxu1 %v12199_v23  ;;  %v12987_v58 = vld [vmem:[%s19683_s0 + $0x14] ss:$8 sps:$4 sm:$0xff]   ;;  %v12248_v59 = vld [vmem:[%s19684_s1 + $0x250] ss:$48 sps:$4 sm:$0xff]   ;;  %v12251_v60 = vld [vmem:[%s19684_s1 + $0x258] ss:$48 sps:$4 sm:$0xff]  }
  0x27   : > { %v12259_v61 = vld [vmem:[%s19684_s1 + $0x1f4] ss:$48 sps:$4 sm:$0xff]   ;;  %v12262_v62 = vld [vmem:[%s19684_s1 + $0x1fc] ss:$48 sps:$4 sm:$0xff]   ;;  %v13010_v63 = vld [vmem:[%s19683_s0 + $0x10] ss:$8 sps:$4 sm:$0xff]  }
  0x28   : > { %v12257_v0 = vld [vmem:[%s19684_s1 + $0x1f0] ss:$48 sps:$4 sm:$0xff]   ;;  %v12260_v1 = vld [vmem:[%s19684_s1 + $0x1f8] ss:$48 sps:$4 sm:$0xff]   ;;  %v13021_v2 = vld [vmem:[%s19683_s0 + $0x24] ss:$8 sps:$4 sm:$0xff]  }
  0x29   : > { %1474 = vmatpush1.bf16.msra.mxu0 %v12201_v24  ;;  %1587 = vmatpush1.bf16.msra.mxu1 %v12202_v25  ;;  %v12268_v3 = vld [vmem:[%s19684_s1 + $0x194] ss:$48 sps:$4 sm:$0xff]   ;;  %v12271_v4 = vld [vmem:[%s19684_s1 + $0x19c] ss:$48 sps:$4 sm:$0xff]   ;;  %v12266_v5 = vld [vmem:[%s19684_s1 + $0x190] ss:$48 sps:$4 sm:$0xff]  }
  0x2a   : > { %1475 = vmatprep.subr.bf16.mxu0 %v12203_v26  ;;  %1588 = vmatprep.subr.bf16.mxu1 %v12205_v27  ;;  %v12269_v6 = vld [vmem:[%s19684_s1 + $0x198] ss:$48 sps:$4 sm:$0xff]   ;;  %v12274_v7 = vld [vmem:[%s19684_s1 + $0x134] ss:$48 sps:$4 sm:$0xff]   ;;  %v12277_v8 = vld [vmem:[%s19684_s1 + $0x13c] ss:$48 sps:$4 sm:$0xff]  }
  0x2b   : > { %v13050_v9 = vld [vmem:[%s19683_s0 + $0x20] ss:$8 sps:$4 sm:$0xff]   ;;  %v13058_v11 = vld [vmem:[%s19683_s0 + $0x34] ss:$8 sps:$4 sm:$0xff]   ;;  %v13090_v19 = vld [vmem:[%s19683_s0 + $0x30] ss:$8 sps:$4 sm:$0xff]  }
  0x2c   : > { %v12272_v10 = vld [vmem:[%s19684_s1 + $0x130] ss:$48 sps:$4 sm:$0xff]   ;;  %v12275_v12 = vld [vmem:[%s19684_s1 + $0x138] ss:$48 sps:$4 sm:$0xff]   ;;  %v12283_v13 = vld [vmem:[%s19684_s1 + $0xd4] ss:$48 sps:$4 sm:$0xff]  }
  0x2d   : > { %1476 = vmatpush1.bf16.msra.mxu0 %v12207_v28  ;;  %1589 = vmatpush1.bf16.msra.mxu1 %v12208_v29  ;;  %v12286_v14 = vld [vmem:[%s19684_s1 + $0xdc] ss:$48 sps:$4 sm:$0xff]   ;;  %v12281_v15 = vld [vmem:[%s19684_s1 + $0xd0] ss:$48 sps:$4 sm:$0xff]   ;;  %v12284_v16 = vld [vmem:[%s19684_s1 + $0xd8] ss:$48 sps:$4 sm:$0xff]  }
  0x2e   : > { %1477 = vmatprep.subr.bf16.mxu0 %v12209_v30  ;;  %1590 = vmatprep.subr.bf16.mxu1 %v12211_v31  ;;  %v12292_v17 = vld [vmem:[%s19684_s1 + $0x74] ss:$48 sps:$4 sm:$0xff]   ;;  %v12295_v18 = vld [vmem:[%s19684_s1 + $0x7c] ss:$48 sps:$4 sm:$0xff]   ;;  %v12290_v21 = vld [vmem:[%s19684_s1 + $0x70] ss:$48 sps:$4 sm:$0xff]  }
  0x2f   : > { %v13095_v20 = vld [vmem:[%s19683_s0 + $0x44] ss:$8 sps:$4 sm:$0xff]   ;;  %v12293_v22 = vld [vmem:[%s19684_s1 + $0x78] ss:$48 sps:$4 sm:$0xff]   ;;  %v12296_v25 = vld [vmem:[%s19684_s1 + $0x10] ss:$48 sps:$4 sm:$0xff]  }
  0x30   : > { %v12298_v23 = vld [vmem:[%s19684_s1 + $0x14] ss:$48 sps:$4 sm:$0xff]   ;;  %v12301_v24 = vld [vmem:[%s19684_s1 + $0x1c] ss:$48 sps:$4 sm:$0xff]   ;;  %v12299_v26 = vld [vmem:[%s19684_s1 + $0x18] ss:$48 sps:$4 sm:$0xff]  }
  0x31   : > { %1478 = vmatpush1.bf16.msra.mxu0 %v12213_v32  ;;  %1591 = vmatpush1.bf16.msra.mxu1 %v12214_v33  ;;  %v12307_v27 = vld [vmem:[%s19684_s1 + $0x434] ss:$48 sps:$4 sm:$0xff]   ;;  %v12310_v28 = vld [vmem:[%s19684_s1 + $0x43c] ss:$48 sps:$4 sm:$0xff]   ;;  %v13130_v29 = vld [vmem:[%s19683_s0 + $0x40] ss:$8 sps:$4 sm:$0xff]  }
  0x32   : > { %1487 = vmatprep.subr.bf16.mxu0 %v12215_v34  ;;  %1600 = vmatprep.subr.bf16.mxu1 %v12217_v35  ;;  %v13135_v30 = vld [vmem:[%s19683_s0 + $0x54] ss:$8 sps:$4 sm:$0xff]   ;;  %v12305_v31 = vld [vmem:[%s19684_s1 + $0x430] ss:$48 sps:$4 sm:$0xff]   ;;  %v12308_v32 = vld [vmem:[%s19684_s1 + $0x438] ss:$48 sps:$4 sm:$0xff]  }
  0x33   : > { %v12316_v33 = vld [vmem:[%s19684_s1 + $0x3d4] ss:$48 sps:$4 sm:$0xff]   ;;  %v12319_v34 = vld [vmem:[%s19684_s1 + $0x3dc] ss:$48 sps:$4 sm:$0xff]   ;;  %v12314_v35 = vld [vmem:[%s19684_s1 + $0x3d0] ss:$48 sps:$4 sm:$0xff]  }
  0x35   : > { %1488 = vmatpush2.bf16.msra.mxu0 %v12219_v36  ;;  %1601 = vmatpush2.bf16.msra.mxu1 %v12220_v37  ;;  %v12317_v36 = vld [vmem:[%s19684_s1 + $0x3d8] ss:$48 sps:$4 sm:$0xff]   ;;  %v12322_v37 = vld [vmem:[%s19684_s1 + $0x374] ss:$48 sps:$4 sm:$0xff]  }
  0x36   : > { %1489 = vmatprep.subr.bf16.mxu0 %v12221_v38  ;;  %1602 = vmatprep.subr.bf16.mxu1 %v12223_v40  ;;  %v12325_v38 = vld [vmem:[%s19684_s1 + $0x37c] ss:$48 sps:$4 sm:$0xff]   ;;  %v13170_v40 = vld [vmem:[%s19683_s0 + $0x50] ss:$8 sps:$4 sm:$0xff]  }
  0x39   : > { %1490 = vmatpush2.bf16.msra.mxu0 %v12225_v41  ;;  %1603 = vmatpush2.bf16.msra.mxu1 %v12226_v42  ;;  %v13175_v41 = vld [vmem:[%s19683_s0 + $0x64] ss:$8 sps:$4 sm:$0xff]   ;;  %v12320_v42 = vld [vmem:[%s19684_s1 + $0x370] ss:$48 sps:$4 sm:$0xff]  }
  0x3a   : > { %1491 = vmatprep.subr.bf16.mxu0 %v12227_v43  ;;  %1604 = vmatprep.subr.bf16.mxu1 %v12229_v44  ;;  %v12323_v43 = vld [vmem:[%s19684_s1 + $0x378] ss:$48 sps:$4 sm:$0xff]   ;;  %v12331_v44 = vld [vmem:[%s19684_s1 + $0x314] ss:$48 sps:$4 sm:$0xff]  }
  0x3d   : > { %1492 = vmatpush2.bf16.msra.mxu0 %v12231_v45  ;;  %1605 = vmatpush2.bf16.msra.mxu1 %v12232_v46  ;;  %v12334_v45 = vld [vmem:[%s19684_s1 + $0x31c] ss:$48 sps:$4 sm:$0xff]   ;;  %v12329_v46 = vld [vmem:[%s19684_s1 + $0x310] ss:$48 sps:$4 sm:$0xff]  }
  0x3e   : > { %1493 = vmatprep.subr.bf16.mxu0 %v12233_v47  ;;  %1606 = vmatprep.subr.bf16.mxu1 %v12235_v48  ;;  %v12332_v47 = vld [vmem:[%s19684_s1 + $0x318] ss:$48 sps:$4 sm:$0xff]   ;;  %v12337_v48 = vld [vmem:[%s19684_s1 + $0x2c4] ss:$48 sps:$4 sm:$0xff]  }
  0x41   : > { %1494 = vmatpush2.bf16.msra.mxu0 %v12237_v49  ;;  %1607 = vmatpush2.bf16.msra.mxu1 %v12238_v50  ;;  %v12340_v49 = vld [vmem:[%s19684_s1 + $0x2cc] ss:$48 sps:$4 sm:$0xff]   ;;  %v13210_v50 = vld [vmem:[%s19683_s0 + $0x60] ss:$8 sps:$4 sm:$0xff]  }
  0x42   : > { %1689 = vmatprep.subr.bf16.mxu0 %v12244_v51  ;;  %1802 = vmatprep.subr.bf16.mxu1 %v12247_v52  ;;  %v13215_v51 = vld [vmem:[%s19683_s0 + $0x74] ss:$8 sps:$4 sm:$0xff]   ;;  %v13226_v52 = vld [vmem:[%s19683_s0 + $0x70] ss:$8 sps:$4 sm:$0xff]  }
  0x44   : > { %1496 = vmatmul.mubr.bf16.vlgmr.msra.gmra.mxu0 %v12970_v53  ;;  %1609 = vmatmul.mubr.bf16.vlgmr.msra.gmra.mxu1 %v12970_v53 }
  0x45   : > { %1690 = vmatpush1.bf16.msra.mxu0 %v12242_v54  ;;  %1803 = vmatpush1.bf16.msra.mxu1 %v12245_v55  ;;  %v12335_v54 = vld [vmem:[%s19684_s1 + $0x2c0] ss:$48 sps:$4 sm:$0xff]   ;;  %v12338_v55 = vld [vmem:[%s19684_s1 + $0x2c8] ss:$48 sps:$4 sm:$0xff]  }
  0x46   : > { %1691 = vmatprep.subr.bf16.mxu0 %v12250_v56  ;;  %1804 = vmatprep.subr.bf16.mxu1 %v12253_v57  ;;  %v12343_v56 = vld [vmem:[%s19684_s1 + $0x264] ss:$48 sps:$4 sm:$0xff]   ;;  %v12346_v57 = vld [vmem:[%s19684_s1 + $0x26c] ss:$48 sps:$4 sm:$0xff]  }
  0x47   : > { %9810 = vmatprep.mubr.msk.bf16.mxu0 %vm1438_vm1, %v12987_v58  ;;  %9818 = vmatprep.mubr.msk.bf16.mxu1 %vm1438_vm1, %v12987_v58 }
  0x49   : > { %1692 = vmatpush1.bf16.msra.mxu0 %v12248_v59  ;;  %1805 = vmatpush1.bf16.msra.mxu1 %v12251_v60  ;;  %v12341_v59 = vld [vmem:[%s19684_s1 + $0x260] ss:$48 sps:$4 sm:$0xff]   ;;  %v12344_v60 = vld [vmem:[%s19684_s1 + $0x268] ss:$48 sps:$4 sm:$0xff]  }
  0x4a   : > { %1693 = vmatprep.subr.bf16.mxu0 %v12259_v61  ;;  %1806 = vmatprep.subr.bf16.mxu1 %v12262_v62  ;;  %v12349_v61 = vld [vmem:[%s19684_s1 + $0x204] ss:$48 sps:$4 sm:$0xff]   ;;  %v12352_v62 = vld [vmem:[%s19684_s1 + $0x20c] ss:$48 sps:$4 sm:$0xff]  }
  0x4c   : > { %1506 = vmatmul.mubr.bf16.gmra.mxu0 %v13010_v63  ;;  %1619 = vmatmul.mubr.bf16.gmra.mxu1 %v13010_v63 }
  0x4d   : > { %1694 = vmatpush1.bf16.msra.mxu0 %v12257_v0  ;;  %1807 = vmatpush1.bf16.msra.mxu1 %v12260_v1  ;;  %v12347_v0 = vld [vmem:[%s19684_s1 + $0x200] ss:$48 sps:$4 sm:$0xff]   ;;  %v12350_v1 = vld [vmem:[%s19684_s1 + $0x208] ss:$48 sps:$4 sm:$0xff]  }
  0x4e   : > { %9811 = vmatprep.mubr.msk.bf16.mxu0 %vm1438_vm1, %v13021_v2  ;;  %9819 = vmatprep.mubr.msk.bf16.mxu1 %vm1438_vm1, %v13021_v2 }
  0x4f   : > { %1695 = vmatprep.subr.bf16.mxu0 %v12268_v3  ;;  %1808 = vmatprep.subr.bf16.mxu1 %v12271_v4  ;;  %v12355_v3 = vld [vmem:[%s19684_s1 + $0x1a4] ss:$48 sps:$4 sm:$0xff]   ;;  %v12358_v4 = vld [vmem:[%s19684_s1 + $0x1ac] ss:$48 sps:$4 sm:$0xff]  }
  0x51   : > { %1696 = vmatpush1.bf16.msra.mxu0 %v12266_v5  ;;  %1809 = vmatpush1.bf16.msra.mxu1 %v12269_v6  ;;  %v12353_v5 = vld [vmem:[%s19684_s1 + $0x1a0] ss:$48 sps:$4 sm:$0xff]   ;;  %v12356_v6 = vld [vmem:[%s19684_s1 + $0x1a8] ss:$48 sps:$4 sm:$0xff]  }
  0x52   : > { %1697 = vmatprep.subr.bf16.mxu0 %v12274_v7  ;;  %1810 = vmatprep.subr.bf16.mxu1 %v12277_v8  ;;  %v12361_v7 = vld [vmem:[%s19684_s1 + $0x144] ss:$48 sps:$4 sm:$0xff]   ;;  %v12364_v8 = vld [vmem:[%s19684_s1 + $0x14c] ss:$48 sps:$4 sm:$0xff]  }
  0x54   : > { %1516 = vmatmul.mubr.bf16.gmra.mxu0 %v13050_v9  ;;  %1629 = vmatmul.mubr.bf16.gmra.mxu1 %v13050_v9 }
  0x55   : > { %9812 = vmatprep.mubr.msk.bf16.mxu0 %vm1438_vm1, %v13058_v11  ;;  %9820 = vmatprep.mubr.msk.bf16.mxu1 %vm1438_vm1, %v13058_v11 }
  0x56   : > { %1698 = vmatpush1.bf16.msra.mxu0 %v12272_v10  ;;  %1811 = vmatpush1.bf16.msra.mxu1 %v12275_v12  ;;  %v12359_v10 = vld [vmem:[%s19684_s1 + $0x140] ss:$48 sps:$4 sm:$0xff]   ;;  %v12362_v12 = vld [vmem:[%s19684_s1 + $0x148] ss:$48 sps:$4 sm:$0xff]  }
  0x57   : > { %1699 = vmatprep.subr.bf16.mxu0 %v12283_v13  ;;  %1812 = vmatprep.subr.bf16.mxu1 %v12286_v14  ;;  %v12367_v13 = vld [vmem:[%s19684_s1 + $0xe4] ss:$48 sps:$4 sm:$0xff]   ;;  %v12370_v14 = vld [vmem:[%s19684_s1 + $0xec] ss:$48 sps:$4 sm:$0xff]  }
  0x5a   : > { %1700 = vmatpush1.bf16.msra.mxu0 %v12281_v15  ;;  %1813 = vmatpush1.bf16.msra.mxu1 %v12284_v16  ;;  %v12365_v15 = vld [vmem:[%s19684_s1 + $0xe0] ss:$48 sps:$4 sm:$0xff]   ;;  %v12368_v16 = vld [vmem:[%s19684_s1 + $0xe8] ss:$48 sps:$4 sm:$0xff]  }
  0x5b   : > { %1701 = vmatprep.subr.bf16.mxu0 %v12292_v17  ;;  %1814 = vmatprep.subr.bf16.mxu1 %v12295_v18  ;;  %v12373_v17 = vld [vmem:[%s19684_s1 + $0x84] ss:$48 sps:$4 sm:$0xff]   ;;  %v12376_v18 = vld [vmem:[%s19684_s1 + $0x8c] ss:$48 sps:$4 sm:$0xff]  }
  0x5c   : > { %1526 = vmatmul.mubr.bf16.gmra.mxu0 %v13090_v19  ;;  %1639 = vmatmul.mubr.bf16.gmra.mxu1 %v13090_v19 }
  0x5d   : > { %9813 = vmatprep.mubr.msk.bf16.mxu0 %vm1438_vm1, %v13095_v20  ;;  %9821 = vmatprep.mubr.msk.bf16.mxu1 %vm1438_vm1, %v13095_v20 }
  0x5e   : > { %1702 = vmatpush1.bf16.msra.mxu0 %v12290_v21  ;;  %1815 = vmatpush1.bf16.msra.mxu1 %v12293_v22  ;;  %v12371_v21 = vld [vmem:[%s19684_s1 + $0x80] ss:$48 sps:$4 sm:$0xff]   ;;  %v12374_v22 = vld [vmem:[%s19684_s1 + $0x88] ss:$48 sps:$4 sm:$0xff]  }
  0x5f   : > { %1703 = vmatprep.subr.bf16.mxu0 %v12298_v23  ;;  %1816 = vmatprep.subr.bf16.mxu1 %v12301_v24  ;;  %v12379_v23 = vld [vmem:[%s19684_s1 + $0x24] ss:$48 sps:$4 sm:$0xff]   ;;  %v12382_v24 = vld [vmem:[%s19684_s1 + $0x2c] ss:$48 sps:$4 sm:$0xff]  }
  0x62   : > { %1704 = vmatpush1.bf16.msra.mxu0 %v12296_v25  ;;  %1817 = vmatpush1.bf16.msra.mxu1 %v12299_v26  ;;  %v12377_v25 = vld [vmem:[%s19684_s1 + $0x20] ss:$48 sps:$4 sm:$0xff]   ;;  %v12380_v26 = vld [vmem:[%s19684_s1 + $0x28] ss:$48 sps:$4 sm:$0xff]  }
  0x63   : > { %1713 = vmatprep.subr.bf16.mxu0 %v12307_v27  ;;  %1826 = vmatprep.subr.bf16.mxu1 %v12310_v28  ;;  %v12385_v27 = vld [vmem:[%s19684_s1 + $0x444] ss:$48 sps:$4 sm:$0xff]   ;;  %v12388_v28 = vld [vmem:[%s19684_s1 + $0x44c] ss:$48 sps:$4 sm:$0xff]  }
  0x64   : > { %1536 = vmatmul.mubr.bf16.gmra.mxu0 %v13130_v29  ;;  %1649 = vmatmul.mubr.bf16.gmra.mxu1 %v13130_v29 }
  0x65   : > { %9814 = vmatprep.mubr.msk.bf16.mxu0 %vm1438_vm1, %v13135_v30  ;;  %9822 = vmatprep.mubr.msk.bf16.mxu1 %vm1438_vm1, %v13135_v30 }
  0x66   : > { %1714 = vmatpush2.bf16.msra.mxu0 %v12305_v31  ;;  %1827 = vmatpush2.bf16.msra.mxu1 %v12308_v32  ;;  %v12383_v31 = vld [vmem:[%s19684_s1 + $0x440] ss:$48 sps:$4 sm:$0xff]   ;;  %v12386_v32 = vld [vmem:[%s19684_s1 + $0x448] ss:$48 sps:$4 sm:$0xff]  }
  0x67   : > { %1715 = vmatprep.subr.bf16.mxu0 %v12316_v33  ;;  %1828 = vmatprep.subr.bf16.mxu1 %v12319_v34  ;;  %v12391_v33 = vld [vmem:[%s19684_s1 + $0x3e4] ss:$48 sps:$4 sm:$0xff]   ;;  %v12394_v34 = vld [vmem:[%s19684_s1 + $0x3ec] ss:$48 sps:$4 sm:$0xff]  }
  0x6a   : > { %1716 = vmatpush2.bf16.msra.mxu0 %v12314_v35  ;;  %1829 = vmatpush2.bf16.msra.mxu1 %v12317_v36  ;;  %v12389_v35 = vld [vmem:[%s19684_s1 + $0x3e0] ss:$48 sps:$4 sm:$0xff]   ;;  %v12392_v36 = vld [vmem:[%s19684_s1 + $0x3e8] ss:$48 sps:$4 sm:$0xff]  }
  0x6b   : > { %1717 = vmatprep.subr.bf16.mxu0 %v12322_v37  ;;  %1830 = vmatprep.subr.bf16.mxu1 %v12325_v38  ;;  %v12397_v37 = vld [vmem:[%s19684_s1 + $0x384] ss:$48 sps:$4 sm:$0xff]   ;;  %v12400_v38 = vld [vmem:[%s19684_s1 + $0x38c] ss:$48 sps:$4 sm:$0xff]  }
  0x6c   : > { %1546 = vmatmul.mubr.bf16.gmra.mxu0 %v13170_v40  ;;  %1659 = vmatmul.mubr.bf16.gmra.mxu1 %v13170_v40 }
  0x6d   : > { %9815 = vmatprep.mubr.msk.bf16.mxu0 %vm1438_vm1, %v13175_v41  ;;  %9823 = vmatprep.mubr.msk.bf16.mxu1 %vm1438_vm1, %v13175_v41 }
  0x6e   : > { %1718 = vmatpush2.bf16.msra.mxu0 %v12320_v42  ;;  %1831 = vmatpush2.bf16.msra.mxu1 %v12323_v43  ;;  %v12395_v42 = vld [vmem:[%s19684_s1 + $0x380] ss:$48 sps:$4 sm:$0xff]   ;;  %v12398_v43 = vld [vmem:[%s19684_s1 + $0x388] ss:$48 sps:$4 sm:$0xff]  }
  0x6f   : > { %1719 = vmatprep.subr.bf16.mxu0 %v12331_v44  ;;  %1832 = vmatprep.subr.bf16.mxu1 %v12334_v45  ;;  %v12403_v44 = vld [vmem:[%s19684_s1 + $0x324] ss:$48 sps:$4 sm:$0xff]   ;;  %v12406_v45 = vld [vmem:[%s19684_s1 + $0x32c] ss:$48 sps:$4 sm:$0xff]  }
  0x72   : > { %1720 = vmatpush2.bf16.msra.mxu0 %v12329_v46  ;;  %1833 = vmatpush2.bf16.msra.mxu1 %v12332_v47  ;;  %v12401_v46 = vld [vmem:[%s19684_s1 + $0x320] ss:$48 sps:$4 sm:$0xff]   ;;  %v12404_v47 = vld [vmem:[%s19684_s1 + $0x328] ss:$48 sps:$4 sm:$0xff]  }
  0x73   : > { %1915 = vmatprep.subr.bf16.mxu0 %v12337_v48  ;;  %2028 = vmatprep.subr.bf16.mxu1 %v12340_v49 }
  0x74   : > { %1556 = vmatmul.mubr.bf16.gmra.mxu0 %v13210_v50  ;;  %1669 = vmatmul.mubr.bf16.gmra.mxu1 %v13210_v50 }
  0x75   : > { %9816 = vmatprep.mubr.msk.bf16.mxu0 %vm1438_vm1, %v13215_v51  ;;  %9824 = vmatprep.mubr.msk.bf16.mxu1 %vm1438_vm1, %v13215_v51 }
  0x7c   : > { %1566 = vmatmul.mubr.bf16.gmra.mxu0 %v13226_v52  ;;  %1679 = vmatmul.mubr.bf16.gmra.mxu1 %v13226_v52 }
  0x7d   : > { %9825 = vmatprep.mubr.msk.bf16.mxu0 %vm1438_vm1, %v12922_v39  ;;  %9833 = vmatprep.mubr.msk.bf16.mxu1 %vm1438_vm1, %v12922_v39 }
  0x84   : > { %1722 = vmatmul.mubr.bf16.vlgmr.msra.gmra.mxu0 %v12970_v53  ;;  %1835 = vmatmul.mubr.bf16.vlgmr.msra.gmra.mxu1 %v12970_v53 }
  0x85   : > { %1916 = vmatpush1.bf16.msra.mxu0 %v12335_v54  ;;  %2029 = vmatpush1.bf16.msra.mxu1 %v12338_v55 }
  0x86   : > { %1917 = vmatprep.subr.bf16.mxu0 %v12343_v56  ;;  %2030 = vmatprep.subr.bf16.mxu1 %v12346_v57 }
  0x87   : > { %9826 = vmatprep.mubr.msk.bf16.mxu0 %vm1438_vm1, %v12987_v58  ;;  %9834 = vmatprep.mubr.msk.bf16.mxu1 %vm1438_vm1, %v12987_v58 }
  0x89   : > { %1918 = vmatpush1.bf16.msra.mxu0 %v12341_v59  ;;  %2031 = vmatpush1.bf16.msra.mxu1 %v12344_v60 }
  0x8a   : > { %1919 = vmatprep.subr.bf16.mxu0 %v12349_v61  ;;  %2032 = vmatprep.subr.bf16.mxu1 %v12352_v62 }
  0x8c   : > { %1732 = vmatmul.mubr.bf16.gmra.mxu0 %v13010_v63  ;;  %1845 = vmatmul.mubr.bf16.gmra.mxu1 %v13010_v63 }
  0x8d   : > { %1920 = vmatpush1.bf16.msra.mxu0 %v12347_v0  ;;  %2033 = vmatpush1.bf16.msra.mxu1 %v12350_v1 }
  0x8e   : > { %9827 = vmatprep.mubr.msk.bf16.mxu0 %vm1438_vm1, %v13021_v2  ;;  %9835 = vmatprep.mubr.msk.bf16.mxu1 %vm1438_vm1, %v13021_v2 }
  0x8f   : > { %1921 = vmatprep.subr.bf16.mxu0 %v12355_v3  ;;  %2034 = vmatprep.subr.bf16.mxu1 %v12358_v4 }
  0x91   : > { %1922 = vmatpush1.bf16.msra.mxu0 %v12353_v5  ;;  %2035 = vmatpush1.bf16.msra.mxu1 %v12356_v6 }
  0x92   : > { %1923 = vmatprep.subr.bf16.mxu0 %v12361_v7  ;;  %2036 = vmatprep.subr.bf16.mxu1 %v12364_v8 }
  0x94   : > { %1742 = vmatmul.mubr.bf16.gmra.mxu0 %v13050_v9  ;;  %1855 = vmatmul.mubr.bf16.gmra.mxu1 %v13050_v9 }
  0x95   : > { %9828 = vmatprep.mubr.msk.bf16.mxu0 %vm1438_vm1, %v13058_v11  ;;  %9836 = vmatprep.mubr.msk.bf16.mxu1 %vm1438_vm1, %v13058_v11 }
  0x96   : > { %1924 = vmatpush1.bf16.msra.mxu0 %v12359_v10  ;;  %2037 = vmatpush1.bf16.msra.mxu1 %v12362_v12 }
  0x97   : > { %1925 = vmatprep.subr.bf16.mxu0 %v12367_v13  ;;  %2038 = vmatprep.subr.bf16.mxu1 %v12370_v14 }
  0x9a   : > { %1926 = vmatpush1.bf16.msra.mxu0 %v12365_v15  ;;  %2039 = vmatpush1.bf16.msra.mxu1 %v12368_v16 }
  0x9b   : > { %1927 = vmatprep.subr.bf16.mxu0 %v12373_v17  ;;  %2040 = vmatprep.subr.bf16.mxu1 %v12376_v18 }
  0x9c   : > { %1752 = vmatmul.mubr.bf16.gmra.mxu0 %v13090_v19  ;;  %1865 = vmatmul.mubr.bf16.gmra.mxu1 %v13090_v19 }
  0x9d   : > { %9829 = vmatprep.mubr.msk.bf16.mxu0 %vm1438_vm1, %v13095_v20  ;;  %9837 = vmatprep.mubr.msk.bf16.mxu1 %vm1438_vm1, %v13095_v20 }
  0x9e   : > { %1928 = vmatpush1.bf16.msra.mxu0 %v12371_v21  ;;  %2041 = vmatpush1.bf16.msra.mxu1 %v12374_v22 }
  0x9f   : > { %1929 = vmatprep.subr.bf16.mxu0 %v12379_v23  ;;  %2042 = vmatprep.subr.bf16.mxu1 %v12382_v24 }
  0xa2   : > { %1930 = vmatpush1.bf16.msra.mxu0 %v12377_v25  ;;  %2043 = vmatpush1.bf16.msra.mxu1 %v12380_v26 }
  0xa3   : > { %1939 = vmatprep.subr.bf16.mxu0 %v12385_v27  ;;  %2052 = vmatprep.subr.bf16.mxu1 %v12388_v28 }
  0xa4   : > { %1762 = vmatmul.mubr.bf16.gmra.mxu0 %v13130_v29  ;;  %1875 = vmatmul.mubr.bf16.gmra.mxu1 %v13130_v29 }
  0xa5   : > { %9830 = vmatprep.mubr.msk.bf16.mxu0 %vm1438_vm1, %v13135_v30  ;;  %9838 = vmatprep.mubr.msk.bf16.mxu1 %vm1438_vm1, %v13135_v30 }
  0xa6   : > { %1940 = vmatpush2.bf16.msra.mxu0 %v12383_v31  ;;  %2053 = vmatpush2.bf16.msra.mxu1 %v12386_v32 }
  0xa7   : > { %1941 = vmatprep.subr.bf16.mxu0 %v12391_v33  ;;  %2054 = vmatprep.subr.bf16.mxu1 %v12394_v34 }
  0xaa   : > { %1942 = vmatpush2.bf16.msra.mxu0 %v12389_v35  ;;  %2055 = vmatpush2.bf16.msra.mxu1 %v12392_v36 }
  0xab   : > { %1943 = vmatprep.subr.bf16.mxu0 %v12397_v37  ;;  %2056 = vmatprep.subr.bf16.mxu1 %v12400_v38 }
  0xac   : > { %1772 = vmatmul.mubr.bf16.gmra.mxu0 %v13170_v40  ;;  %1885 = vmatmul.mubr.bf16.gmra.mxu1 %v13170_v40 }
  0xad   : > { %9831 = vmatprep.mubr.msk.bf16.mxu0 %vm1438_vm1, %v13175_v41  ;;  %9839 = vmatprep.mubr.msk.bf16.mxu1 %vm1438_vm1, %v13175_v41 }
  0xae   : > { %1944 = vmatpush2.bf16.msra.mxu0 %v12395_v42  ;;  %2057 = vmatpush2.bf16.msra.mxu1 %v12398_v43 }
  0xaf   : > { %1945 = vmatprep.subr.bf16.mxu0 %v12403_v44  ;;  %2058 = vmatprep.subr.bf16.mxu1 %v12406_v45 }
  0xb2   : > { %1946 = vmatpush2.bf16.msra.mxu0 %v12401_v46  ;;  %2059 = vmatpush2.bf16.msra.mxu1 %v12404_v47 }
  0xb4   : > { %1782 = vmatmul.mubr.bf16.gmra.mxu0 %v13210_v50  ;;  %1895 = vmatmul.mubr.bf16.gmra.mxu1 %v13210_v50 }
  0xb5   : > { %9832 = vmatprep.mubr.msk.bf16.mxu0 %vm1438_vm1, %v13215_v51  ;;  %9840 = vmatprep.mubr.msk.bf16.mxu1 %vm1438_vm1, %v13215_v51 }
  0xbc   : > { %1792 = vmatmul.mubr.bf16.gmra.mxu0 %v13226_v52  ;;  %1905 = vmatmul.mubr.bf16.gmra.mxu1 %v13226_v52 }
  0xbd   : > { %9841 = vmatprep.mubr.msk.bf16.mxu0 %vm1438_vm1, %v12922_v39  ;;  %9849 = vmatprep.mubr.msk.bf16.mxu1 %vm1438_vm1, %v12922_v39  ;;  %v19695_v39 = vlaneseq }
  0xc4   : > { %1948 = vmatmul.mubr.bf16.vlgmr.msra.gmra.mxu0 %v12970_v53  ;;  %2061 = vmatmul.mubr.bf16.vlgmr.msra.gmra.mxu1 %v12970_v53  ;;  %v13463_v53 = vshrl.u32 %v19695_v39, 7 }
  0xc5   : > { %9842 = vmatprep.mubr.msk.bf16.mxu0 %vm1438_vm1, %v12987_v58  ;;  %9850 = vmatprep.mubr.msk.bf16.mxu1 %vm1438_vm1, %v12987_v58 }
  0xc6   : > { %20232 = vst [vmem:[#allocation6_spill] sm:$0xff] %v13463_v53  ;;  %v13468_v58 = vsub.s32 0, %v13463_v53 }
  0xc8   : > { %20233 = vst [vmem:[#allocation7_spill] sm:$0xff] %v13468_v58 }
  0xcc   : > { %1958 = vmatmul.mubr.bf16.gmra.mxu0 %v13010_v63  ;;  %2071 = vmatmul.mubr.bf16.gmra.mxu1 %v13010_v63  ;;  %v13471_v63 = vsub.s32 2, %v13463_v53 }
  0xcd   : > { %9843 = vmatprep.mubr.msk.bf16.mxu0 %vm1438_vm1, %v13021_v2  ;;  %9851 = vmatprep.mubr.msk.bf16.mxu1 %vm1438_vm1, %v13021_v2  ;;  %v13476_v2 = vld [vmem:[%s19685_s2] sm:$0xff] }
  0xce   : > { %20234 = vst [vmem:[#allocation8_spill] sm:$0xff] %v13471_v63 }
  0xd4   : > { %1968 = vmatmul.mubr.bf16.gmra.mxu0 %v13050_v9  ;;  %2081 = vmatmul.mubr.bf16.gmra.mxu1 %v13050_v9  ;;  %v13479_v9 = vsub.s32 1, %v13463_v53 }
  0xd5   : > { %9844 = vmatprep.mubr.msk.bf16.mxu0 %vm1438_vm1, %v13058_v11  ;;  %9852 = vmatprep.mubr.msk.bf16.mxu1 %vm1438_vm1, %v13058_v11  ;;  %v13482_v11 = vsub.s32 3, %v13463_v53 }
  0xd6   : > { %20235 = vst [vmem:[#allocation9_spill] sm:$0xff] %v13479_v9 }
  0xd7   : > { %20236 = vst [vmem:[#allocation10_spill] sm:$0xff] %v13482_v11 }
  0xdc   : > { %1978 = vmatmul.mubr.bf16.gmra.mxu0 %v13090_v19  ;;  %2091 = vmatmul.mubr.bf16.gmra.mxu1 %v13090_v19  ;;  %v13486_v19 = vrot.slane %v13476_v2, %v13468_v58 }
  0xdd   : > { %9845 = vmatprep.mubr.msk.bf16.mxu0 %vm1438_vm1, %v13095_v20  ;;  %9853 = vmatprep.mubr.msk.bf16.mxu1 %vm1438_vm1, %v13095_v20  ;;  %v13490_v20 = vrot.slane %v13476_v2, %v13471_v63 }
  0xe4   : > { %1988 = vmatmul.mubr.bf16.gmra.mxu0 %v13130_v29  ;;  %2101 = vmatmul.mubr.bf16.gmra.mxu1 %v13130_v29  ;;  %v13494_v29 = vrot.slane %v13476_v2, %v13479_v9 }
  0xe5   : > { %9846 = vmatprep.mubr.msk.bf16.mxu0 %vm1438_vm1, %v13135_v30  ;;  %9854 = vmatprep.mubr.msk.bf16.mxu1 %vm1438_vm1, %v13135_v30  ;;  %v13498_v30 = vrot.slane %v13476_v2, %v13482_v11 }
  0xec   : > { %1998 = vmatmul.mubr.bf16.gmra.mxu0 %v13170_v40  ;;  %2111 = vmatmul.mubr.bf16.gmra.mxu1 %v13170_v40 }
  0xed   : > { %9847 = vmatprep.mubr.msk.bf16.mxu0 %vm1438_vm1, %v13175_v41  ;;  %9855 = vmatprep.mubr.msk.bf16.mxu1 %vm1438_vm1, %v13175_v41 }
  0xf4   : > { %2008 = vmatmul.mubr.bf16.gmra.mxu0 %v13210_v50  ;;  %2121 = vmatmul.mubr.bf16.gmra.mxu1 %v13210_v50 }
  0xf5   : > { %9848 = vmatprep.mubr.msk.bf16.mxu0 %vm1438_vm1, %v13215_v51  ;;  %9856 = vmatprep.mubr.msk.bf16.mxu1 %vm1438_vm1, %v13215_v51 }
  0xfc   : > { %2018 = vmatmul.mubr.bf16.gmra.mxu0 %v13226_v52  ;;  %2131 = vmatmul.mubr.bf16.gmra.mxu1 %v13226_v52 }
 0x104   : > { %v1497_v40 = vpop.f32.mrf.mxu0  ;;  %v1610_v41 = vpop.f32.mrf.mxu1 }
 0x105   : > { %v1498_v48 = vadd.f32 %v1497_v40, %v13486_v19  ;;  %v1611_v49 = vadd.f32 %v1610_v41, %v13490_v20 }
 0x106   : > { %v1499_v50 = vpop.f32.mrf.mxu0  ;;  %v1612_v51 = vpop.f32.mrf.mxu1 }
 0x107   : > { %v13502_v52 = vmax.f32 %v1498_v48, 0.0  ;;  %v13504_v54 = vmax.f32 %v1611_v49, 0.0  ;;  %v1500_v55 = vadd.f32 %v1499_v50, %v13494_v29  ;;  %v1613_v56 = vadd.f32 %v1612_v51, %v13498_v30 }
 0x108   : > { %v1501_v57 = vpop.f32.mrf.mxu0  ;;  %v1614_v59 = vpop.f32.mrf.mxu1 }
 0x109   : > { %20237 = vst [vmem:[#allocation11_spill] sm:$0xff] %v13502_v52  ;;  %20238 = vst [vmem:[#allocation12_spill] sm:$0xff] %v13504_v54  ;;  %v13508_v60 = vmax.f32 %v1500_v55, 0.0  ;;  %v13510_v61 = vmax.f32 %v1613_v56, 0.0  ;;  %v1502_v62 = vadd.f32 %v1501_v57, %v13486_v19  ;;  %v1615_v0 = vadd.f32 %v1614_v59, %v13490_v20 }
 0x10a   : > { %v1503_v1 = vpop.f32.mrf.mxu0  ;;  %v1616_v3 = vpop.f32.mrf.mxu1 }
 0x10b   : > { %20239 = vst [vmem:[#allocation13_spill] sm:$0xff] %v13508_v60  ;;  %20240 = vst [vmem:[#allocation14_spill] sm:$0xff] %v13510_v61  ;;  %v13514_v4 = vmax.f32 %v1502_v62, 0.0  ;;  %v13516_v5 = vmax.f32 %v1615_v0, 0.0  ;;  %v1504_v6 = vadd.f32 %v1503_v1, %v13494_v29  ;;  %v1617_v7 = vadd.f32 %v1616_v3, %v13498_v30 }
 0x10c   : > { %v1507_v8 = vpop.f32.mrf.mxu0  ;;  %v1620_v10 = vpop.f32.mrf.mxu1 }
 0x10d   : > { %20241 = vst [vmem:[#allocation15_spill] sm:$0xff] %v13514_v4  ;;  %20242 = vst [vmem:[#allocation16_spill] sm:$0xff] %v13516_v5  ;;  %v13520_v12 = vmax.f32 %v1504_v6, 0.0  ;;  %v13522_v13 = vmax.f32 %v1617_v7, 0.0  ;;  %v1508_v14 = vadd.f32 %v1507_v8, %v13486_v19  ;;  %v1621_v15 = vadd.f32 %v1620_v10, %v13490_v20 }
 0x10e   : > { %v1509_v16 = vpop.f32.mrf.mxu0  ;;  %v1622_v17 = vpop.f32.mrf.mxu1 }
 0x10f   : > { %20243 = vst [vmem:[#allocation17_spill] sm:$0xff] %v13520_v12  ;;  %20244 = vst [vmem:[#allocation18_spill] sm:$0xff] %v13522_v13  ;;  %v13526_v18 = vmax.f32 %v1508_v14, 0.0  ;;  %v13528_v21 = vmax.f32 %v1621_v15, 0.0  ;;  %v1510_v22 = vadd.f32 %v1509_v16, %v13494_v29  ;;  %v1623_v23 = vadd.f32 %v1622_v17, %v13498_v30 }
 0x110   : > { %v1511_v24 = vpop.f32.mrf.mxu0  ;;  %v1624_v25 = vpop.f32.mrf.mxu1 }
 0x111   : > { %20245 = vst [vmem:[#allocation19_spill] sm:$0xff] %v13526_v18  ;;  %20246 = vst [vmem:[#allocation20_spill] sm:$0xff] %v13528_v21  ;;  %v13532_v26 = vmax.f32 %v1510_v22, 0.0  ;;  %v13534_v27 = vmax.f32 %v1623_v23, 0.0  ;;  %v1512_v28 = vadd.f32 %v1511_v24, %v13486_v19  ;;  %v1625_v31 = vadd.f32 %v1624_v25, %v13490_v20 }
 0x112   : > { %v1513_v32 = vpop.f32.mrf.mxu0  ;;  %v1626_v33 = vpop.f32.mrf.mxu1 }
 0x113   : > { %20247 = vst [vmem:[#allocation21_spill] sm:$0xff] %v13532_v26  ;;  %20248 = vst [vmem:[#allocation22_spill] sm:$0xff] %v13534_v27  ;;  %v13538_v34 = vmax.f32 %v1512_v28, 0.0  ;;  %v13540_v35 = vmax.f32 %v1625_v31, 0.0  ;;  %v1514_v36 = vadd.f32 %v1513_v32, %v13494_v29  ;;  %v1627_v37 = vadd.f32 %v1626_v33, %v13498_v30 }
 0x114   : > { %v1517_v38 = vpop.f32.mrf.mxu0  ;;  %v1630_v42 = vpop.f32.mrf.mxu1 }
 0x115   : > { %20249 = vst [vmem:[#allocation23_spill] sm:$0xff] %v13538_v34  ;;  %20250 = vst [vmem:[#allocation24_spill] sm:$0xff] %v13540_v35  ;;  %v13544_v43 = vmax.f32 %v1514_v36, 0.0  ;;  %v13546_v44 = vmax.f32 %v1627_v37, 0.0  ;;  %v1518_v45 = vadd.f32 %v1517_v38, %v13486_v19  ;;  %v1631_v46 = vadd.f32 %v1630_v42, %v13490_v20 }
 0x116   : > { %v1519_v47 = vpop.f32.mrf.mxu0  ;;  %v1632_v40 = vpop.f32.mrf.mxu1 }
 0x117   : > { %20251 = vst [vmem:[#allocation25_spill] sm:$0xff] %v13544_v43  ;;  %20252 = vst [vmem:[#allocation26_spill] sm:$0xff] %v13546_v44  ;;  %v13550_v41 = vmax.f32 %v1518_v45, 0.0  ;;  %v13552_v48 = vmax.f32 %v1631_v46, 0.0  ;;  %v1520_v49 = vadd.f32 %v1519_v47, %v13494_v29  ;;  %v1633_v50 = vadd.f32 %v1632_v40, %v13498_v30 }
 0x118   : > { %v1521_v51 = vpop.f32.mrf.mxu0  ;;  %v1634_v55 = vpop.f32.mrf.mxu1 }
 0x119   : > { %20253 = vst [vmem:[#allocation27_spill] sm:$0xff] %v13550_v41  ;;  %20254 = vst [vmem:[#allocation28_spill] sm:$0xff] %v13552_v48  ;;  %v13556_v56 = vmax.f32 %v1520_v49, 0.0  ;;  %v13558_v57 = vmax.f32 %v1633_v50, 0.0  ;;  %v1522_v59 = vadd.f32 %v1521_v51, %v13486_v19  ;;  %v1635_v62 = vadd.f32 %v1634_v55, %v13490_v20 }
 0x11a   : > { %v1523_v0 = vpop.f32.mrf.mxu0  ;;  %v1636_v1 = vpop.f32.mrf.mxu1 }
 0x11b   : > { %20255 = vst [vmem:[#allocation29_spill] sm:$0xff] %v13556_v56  ;;  %20256 = vst [vmem:[#allocation30_spill] sm:$0xff] %v13558_v57  ;;  %v13562_v3 = vmax.f32 %v1522_v59, 0.0  ;;  %v13564_v6 = vmax.f32 %v1635_v62, 0.0  ;;  %v1524_v7 = vadd.f32 %v1523_v0, %v13494_v29  ;;  %v1637_v8 = vadd.f32 %v1636_v1, %v13498_v30 }
 0x11c   : > { %v1527_v10 = vpop.f32.mrf.mxu0  ;;  %v1640_v14 = vpop.f32.mrf.mxu1 }
 0x11d   : > { %20257 = vst [vmem:[#allocation31_spill] sm:$0xff] %v13562_v3  ;;  %20258 = vst [vmem:[#allocation32_spill] sm:$0xff] %v13564_v6  ;;  %v13568_v15 = vmax.f32 %v1524_v7, 0.0  ;;  %v13570_v16 = vmax.f32 %v1637_v8, 0.0  ;;  %v1528_v17 = vadd.f32 %v1527_v10, %v13486_v19  ;;  %v1641_v22 = vadd.f32 %v1640_v14, %v13490_v20 }
 0x11e   : > { %v1529_v23 = vpop.f32.mrf.mxu0  ;;  %v1642_v24 = vpop.f32.mrf.mxu1 }
 0x11f   : > { %20259 = vst [vmem:[#allocation33_spill] sm:$0xff] %v13568_v15  ;;  %20260 = vst [vmem:[#allocation34_spill] sm:$0xff] %v13570_v16  ;;  %v13574_v25 = vmax.f32 %v1528_v17, 0.0  ;;  %v13576_v28 = vmax.f32 %v1641_v22, 0.0  ;;  %v1530_v31 = vadd.f32 %v1529_v23, %v13494_v29  ;;  %v1643_v32 = vadd.f32 %v1642_v24, %v13498_v30 }
 0x120   : > { %v1531_v33 = vpop.f32.mrf.mxu0  ;;  %v1644_v36 = vpop.f32.mrf.mxu1 }
 0x121   : > { %20261 = vst [vmem:[#allocation35_spill] sm:$0xff] %v13574_v25  ;;  %20262 = vst [vmem:[#allocation36_spill] sm:$0xff] %v13576_v28  ;;  %v13580_v37 = vmax.f32 %v1530_v31, 0.0  ;;  %v13582_v38 = vmax.f32 %v1643_v32, 0.0  ;;  %v1532_v42 = vadd.f32 %v1531_v33, %v13486_v19  ;;  %v1645_v45 = vadd.f32 %v1644_v36, %v13490_v20 }
 0x122   : > { %v1533_v46 = vpop.f32.mrf.mxu0  ;;  %v1646_v47 = vpop.f32.mrf.mxu1 }
 0x123   : > { %20263 = vst [vmem:[#allocation37_spill] sm:$0xff] %v13580_v37  ;;  %20264 = vst [vmem:[#allocation38_spill] sm:$0xff] %v13582_v38  ;;  %v13586_v40 = vmax.f32 %v1532_v42, 0.0  ;;  %v13588_v49 = vmax.f32 %v1645_v45, 0.0  ;;  %v1534_v50 = vadd.f32 %v1533_v46, %v13494_v29  ;;  %v1647_v51 = vadd.f32 %v1646_v47, %v13498_v30 }
 0x124   : > { %v1537_v55 = vpop.f32.mrf.mxu0  ;;  %v1650_v59 = vpop.f32.mrf.mxu1 }
 0x125   : > { %20265 = vst [vmem:[#allocation39_spill] sm:$0xff] %v13586_v40  ;;  %20266 = vst [vmem:[#allocation40_spill] sm:$0xff] %v13588_v49  ;;  %v13592_v62 = vmax.f32 %v1534_v50, 0.0  ;;  %v13594_v0 = vmax.f32 %v1647_v51, 0.0  ;;  %v1538_v1 = vadd.f32 %v1537_v55, %v13486_v19  ;;  %v1651_v7 = vadd.f32 %v1650_v59, %v13490_v20 }
 0x126   : > { %v1539_v8 = vpop.f32.mrf.mxu0  ;;  %v1652_v10 = vpop.f32.mrf.mxu1 }
 0x127   : > { %20267 = vst [vmem:[#allocation41_spill] sm:$0xff] %v13592_v62  ;;  %20268 = vst [vmem:[#allocation42_spill] sm:$0xff] %v13594_v0  ;;  %v13598_v14 = vmax.f32 %v1538_v1, 0.0  ;;  %v13600_v17 = vmax.f32 %v1651_v7, 0.0  ;;  %v1540_v22 = vadd.f32 %v1539_v8, %v13494_v29  ;;  %v1653_v23 = vadd.f32 %v1652_v10, %v13498_v30 }
 0x128   : > { %v1541_v24 = vpop.f32.mrf.mxu0  ;;  %v1654_v31 = vpop.f32.mrf.mxu1 }
 0x129   : > { %20269 = vst [vmem:[#allocation43_spill] sm:$0xff] %v13598_v14  ;;  %20270 = vst [vmem:[#allocation44_spill] sm:$0xff] %v13600_v17  ;;  %v13604_v32 = vmax.f32 %v1540_v22, 0.0  ;;  %v13606_v33 = vmax.f32 %v1653_v23, 0.0  ;;  %v1542_v36 = vadd.f32 %v1541_v24, %v13486_v19  ;;  %v1655_v42 = vadd.f32 %v1654_v31, %v13490_v20 }
 0x12a   : > { %v1543_v45 = vpop.f32.mrf.mxu0  ;;  %v1656_v46 = vpop.f32.mrf.mxu1 }
 0x12b   : > { %20271 = vst [vmem:[#allocation45_spill] sm:$0xff] %v13604_v32  ;;  %20272 = vst [vmem:[#allocation46_spill] sm:$0xff] %v13606_v33  ;;  %v13610_v47 = vmax.f32 %v1542_v36, 0.0  ;;  %v13612_v50 = vmax.f32 %v1655_v42, 0.0  ;;  %v1544_v51 = vadd.f32 %v1543_v45, %v13494_v29  ;;  %v1657_v55 = vadd.f32 %v1656_v46, %v13498_v30 }
 0x12c   : > { %v1547_v59 = vpop.f32.mrf.mxu0  ;;  %v1660_v1 = vpop.f32.mrf.mxu1 }
 0x12d   : > { %20273 = vst [vmem:[#allocation47_spill] sm:$0xff] %v13610_v47  ;;  %20274 = vst [vmem:[#allocation48_spill] sm:$0xff] %v13612_v50  ;;  %v13616_v7 = vmax.f32 %v1544_v51, 0.0  ;;  %v13618_v8 = vmax.f32 %v1657_v55, 0.0  ;;  %v1548_v10 = vadd.f32 %v1547_v59, %v13486_v19  ;;  %v1661_v22 = vadd.f32 %v1660_v1, %v13490_v20 }
 0x12e   : > { %v1549_v23 = vpop.f32.mrf.mxu0  ;;  %v1662_v24 = vpop.f32.mrf.mxu1 }
 0x12f   : > { %20275 = vst [vmem:[#allocation49_spill] sm:$0xff] %v13616_v7  ;;  %20276 = vst [vmem:[#allocation50_spill] sm:$0xff] %v13618_v8  ;;  %v13622_v31 = vmax.f32 %v1548_v10, 0.0  ;;  %v13624_v36 = vmax.f32 %v1661_v22, 0.0  ;;  %v1550_v42 = vadd.f32 %v1549_v23, %v13494_v29  ;;  %v1663_v45 = vadd.f32 %v1662_v24, %v13498_v30 }
 0x130   : > { %v1551_v46 = vpop.f32.mrf.mxu0  ;;  %v1664_v39 = vpop.f32.mrf.mxu1 }
 0x131   : > { %20277 = vst [vmem:[#allocation51_spill] sm:$0xff] %v13622_v31  ;;  %20278 = vst [vmem:[#allocation52_spill] sm:$0xff] %v13624_v36  ;;  %v13628_v51 = vmax.f32 %v1550_v42, 0.0  ;;  %v13630_v55 = vmax.f32 %v1663_v45, 0.0  ;;  %v1552_v59 = vadd.f32 %v1551_v46, %v13486_v19  ;;  %v1665_v1 = vadd.f32 %v1664_v39, %v13490_v20 }
 0x132   : > { %v1553_v8 = vpop.f32.mrf.mxu0  ;;  %v1666_v50 = vpop.f32.mrf.mxu1 }
 0x133   : > { %20279 = vst [vmem:[#allocation53_spill] sm:$0xff] %v13628_v51  ;;  %20280 = vst [vmem:[#allocation54_spill] sm:$0xff] %v13630_v55  ;;  %v13634_v10 = vmax.f32 %v1552_v59, 0.0  ;;  %v13636_v22 = vmax.f32 %v1665_v1, 0.0  ;;  %v1554_v23 = vadd.f32 %v1553_v8, %v13494_v29  ;;  %v1667_v24 = vadd.f32 %v1666_v50, %v13498_v30 }
 0x134   : > { %v1557_v36 = vpop.f32.mrf.mxu0  ;;  %v1670_v31 = vpop.f32.mrf.mxu1 }
 0x135   : > { %20281 = vst [vmem:[#allocation55_spill] sm:$0xff] %v13634_v10  ;;  %20282 = vst [vmem:[#allocation56_spill] sm:$0xff] %v13636_v22  ;;  %v13640_v42 = vmax.f32 %v1554_v23, 0.0  ;;  %v13642_v45 = vmax.f32 %v1667_v24, 0.0  ;;  %v1558_v46 = vadd.f32 %v1557_v36, %v13486_v19  ;;  %v1671_v39 = vadd.f32 %v1670_v31, %v13490_v20 }
 0x136   : > { %v1559_v55 = vpop.f32.mrf.mxu0  ;;  %v1672_v51 = vpop.f32.mrf.mxu1 }
 0x137   : > { %20283 = vst [vmem:[#allocation57_spill] sm:$0xff] %v13640_v42  ;;  %20284 = vst [vmem:[#allocation58_spill] sm:$0xff] %v13642_v45  ;;  %v13646_v59 = vmax.f32 %v1558_v46, 0.0  ;;  %v13648_v1 = vmax.f32 %v1671_v39, 0.0  ;;  %v1560_v8 = vadd.f32 %v1559_v55, %v13494_v29  ;;  %v1673_v50 = vadd.f32 %v1672_v51, %v13498_v30 }
 0x138   : > { %v1561_v22 = vpop.f32.mrf.mxu0  ;;  %v1674_v10 = vpop.f32.mrf.mxu1 }
 0x139   : > { %20285 = vst [vmem:[#allocation59_spill] sm:$0xff] %v13646_v59  ;;  %20286 = vst [vmem:[#allocation60_spill] sm:$0xff] %v13648_v1  ;;  %v13652_v23 = vmax.f32 %v1560_v8, 0.0  ;;  %v13654_v24 = vmax.f32 %v1673_v50, 0.0  ;;  %v1562_v36 = vadd.f32 %v1561_v22, %v13486_v19  ;;  %v1675_v31 = vadd.f32 %v1674_v10, %v13490_v20 }
 0x13a   : > { %v1563_v45 = vpop.f32.mrf.mxu0  ;;  %v1676_v42 = vpop.f32.mrf.mxu1  ;;  %v13665_v8 = vsub.s32 4, %v13463_v53  ;;  %v13668_v50 = vsub.s32 6, %v13463_v53 }
 0x13b   : > { %20287 = vst [vmem:[#allocation61_spill] sm:$0xff] %v13652_v23  ;;  %20288 = vst [vmem:[#allocation62_spill] sm:$0xff] %v13654_v24  ;;  %v13658_v46 = vmax.f32 %v1562_v36, 0.0  ;;  %v13660_v39 = vmax.f32 %v1675_v31, 0.0  ;;  %v1564_v55 = vadd.f32 %v1563_v45, %v13494_v29  ;;  %v1677_v51 = vadd.f32 %v1676_v42, %v13498_v30 }
 0x13c   : > { %v1567_v1 = vpop.f32.mrf.mxu0  ;;  %v1680_v59 = vpop.f32.mrf.mxu1  ;;  %20291 = vst [vmem:[#allocation65_spill] sm:$0xff] %v13665_v8  ;;  %20292 = vst [vmem:[#allocation66_spill] sm:$0xff] %v13668_v50  ;;  %v13677_v42 = vsub.s32 5, %v13463_v53 }
 0x13d   : > { %20289 = vst [vmem:[#allocation63_spill] sm:$0xff] %v13658_v46  ;;  %20290 = vst [vmem:[#allocation64_spill] sm:$0xff] %v13660_v39  ;;  %v13670_v22 = vmax.f32 %v1564_v55, 0.0  ;;  %v13672_v10 = vmax.f32 %v1677_v51, 0.0  ;;  %v1568_v36 = vadd.f32 %v1567_v1, %v13486_v19  ;;  %v1681_v31 = vadd.f32 %v1680_v59, %v13490_v20 }
 0x13e   : > { %v1569_v39 = vpop.f32.mrf.mxu0  ;;  %v1682_v45 = vpop.f32.mrf.mxu1  ;;  %20295 = vst [vmem:[#allocation69_spill] sm:$0xff] %v13677_v42  ;;  %v13680_v46 = vsub.s32 7, %v13463_v53  ;;  %v13690_v59 = vrot.slane %v13476_v2, %v13665_v8 }
 0x13f   : > { %20293 = vst [vmem:[#allocation67_spill] sm:$0xff] %v13670_v22  ;;  %20294 = vst [vmem:[#allocation68_spill] sm:$0xff] %v13672_v10  ;;  %v13682_v24 = vmax.f32 %v1568_v36, 0.0  ;;  %v13684_v23 = vmax.f32 %v1681_v31, 0.0  ;;  %v1570_v55 = vadd.f32 %v1569_v39, %v13494_v29  ;;  %v1683_v51 = vadd.f32 %v1682_v45, %v13498_v30 }
 0x140   : > { %20296 = vst [vmem:[#allocation70_spill] sm:$0xff] %v13680_v46  ;;  %v1571_v10 = vpop.f32.mrf.mxu0  ;;  %v1684_v1 = vpop.f32.mrf.mxu1  ;;  %v13694_v22 = vrot.slane %v13476_v2, %v13668_v50  ;;  %v13708_v8 = vrot.slane %v13476_v2, %v13680_v46 }
 0x141   : > { %20297 = vst [vmem:[#allocation71_spill] sm:$0xff] %v13682_v24  ;;  %20298 = vst [vmem:[#allocation72_spill] sm:$0xff] %v13684_v23  ;;  %v13696_v53 = vmax.f32 %v1570_v55, 0.0  ;;  %v13698_v36 = vmax.f32 %v1683_v51, 0.0  ;;  %v1572_v31 = vadd.f32 %v1571_v10, %v13486_v19  ;;  %v1685_v39 = vadd.f32 %v1684_v1, %v13490_v20 }
 0x142   : > { %v1573_v23 = vpop.f32.mrf.mxu0  ;;  %v1686_v45 = vpop.f32.mrf.mxu1  ;;  %v13704_v24 = vrot.slane %v13476_v2, %v13677_v42 }
 0x143   : > { %20299 = vst [vmem:[#allocation73_spill] sm:$0xff] %v13696_v53  ;;  %20300 = vst [vmem:[#allocation74_spill] sm:$0xff] %v13698_v36  ;;  %v13710_v50 = vmax.f32 %v1572_v31, 0.0  ;;  %v13712_v55 = vmax.f32 %v1685_v39, 0.0  ;;  %v1574_v51 = vadd.f32 %v1573_v23, %v13494_v29  ;;  %v1687_v19 = vadd.f32 %v1686_v45, %v13498_v30 }
 0x144   : > { %v1723_v10 = vpop.f32.mrf.mxu0  ;;  %v1836_v20 = vpop.f32.mrf.mxu1 }
 0x145   : > { %20301 = vst [vmem:[#allocation75_spill] sm:$0xff] %v13710_v50  ;;  %20302 = vst [vmem:[#allocation76_spill] sm:$0xff] %v13712_v55  ;;  %v13716_v1 = vmax.f32 %v1574_v51, 0.0  ;;  %v13718_v36 = vmax.f32 %v1687_v19, 0.0  ;;  %v1724_v42 = vadd.f32 %v1723_v10, %v13690_v59  ;;  %v1837_v53 = vadd.f32 %v1836_v20, %v13694_v22 }
 0x146   : > { %v1725_v2 = vpop.f32.mrf.mxu0  ;;  %v1838_v46 = vpop.f32.mrf.mxu1 }
 0x147   : > { %20303 = vst [vmem:[#allocation77_spill] sm:$0xff] %v13716_v1  ;;  %20304 = vst [vmem:[#allocation78_spill] sm:$0xff] %v13718_v36  ;;  %v13722_v31 = vmax.f32 %v1724_v42, 0.0  ;;  %v13724_v39 = vmax.f32 %v1837_v53, 0.0  ;;  %v1726_v29 = vadd.f32 %v1725_v2, %v13704_v24  ;;  %v1839_v30 = vadd.f32 %v1838_v46, %v13708_v8 }
 0x148   : > { %v1727_v23 = vpop.f32.mrf.mxu0  ;;  %v1840_v45 = vpop.f32.mrf.mxu1 }
 0x149   : > { %20305 = vst [vmem:[#allocation79_spill] sm:$0xff] %v13722_v31  ;;  %20306 = vst [vmem:[#allocation80_spill] sm:$0xff] %v13724_v39  ;;  %v13728_v51 = vmax.f32 %v1726_v29, 0.0  ;;  %v13730_v19 = vmax.f32 %v1839_v30, 0.0  ;;  %v1728_v10 = vadd.f32 %v1727_v23, %v13690_v59  ;;  %v1841_v20 = vadd.f32 %v1840_v45, %v13694_v22 }
 0x14a   : > { %v1729_v36 = vpop.f32.mrf.mxu0  ;;  %v1842_v55 = vpop.f32.mrf.mxu1 }
 0x14b   : > { %20307 = vst [vmem:[#allocation81_spill] sm:$0xff] %v13728_v51  ;;  %20308 = vst [vmem:[#allocation82_spill] sm:$0xff] %v13730_v19  ;;  %v13734_v42 = vmax.f32 %v1728_v10, 0.0  ;;  %v13736_v53 = vmax.f32 %v1841_v20, 0.0  ;;  %v1730_v2 = vadd.f32 %v1729_v36, %v13704_v24  ;;  %v1843_v46 = vadd.f32 %v1842_v55, %v13708_v8 }
 0x14c   : > { %v1733_v1 = vpop.f32.mrf.mxu0  ;;  %v1846_v50 = vpop.f32.mrf.mxu1 }
 0x14d   : > { %20309 = vst [vmem:[#allocation83_spill] sm:$0xff] %v13734_v42  ;;  %20310 = vst [vmem:[#allocation84_spill] sm:$0xff] %v13736_v53  ;;  %v13740_v29 = vmax.f32 %v1730_v2, 0.0  ;;  %v13742_v30 = vmax.f32 %v1843_v46, 0.0  ;;  %v1734_v23 = vadd.f32 %v1733_v1, %v13690_v59  ;;  %v1847_v45 = vadd.f32 %v1846_v50, %v13694_v22 }
 0x14e   : > { %v1735_v7 = vpop.f32.mrf.mxu0  ;;  %v1848_v47 = vpop.f32.mrf.mxu1 }
 0x14f   : > { %20311 = vst [vmem:[#allocation85_spill] sm:$0xff] %v13740_v29  ;;  %20312 = vst [vmem:[#allocation86_spill] sm:$0xff] %v13742_v30  ;;  %v13746_v10 = vmax.f32 %v1734_v23, 0.0  ;;  %v13748_v20 = vmax.f32 %v1847_v45, 0.0  ;;  %v1736_v36 = vadd.f32 %v1735_v7, %v13704_v24  ;;  %v1849_v55 = vadd.f32 %v1848_v47, %v13708_v8 }
 0x150   : > { %v1737_v33 = vpop.f32.mrf.mxu0  ;;  %v1850_v17 = vpop.f32.mrf.mxu1 }
 0x151   : > { %20313 = vst [vmem:[#allocation87_spill] sm:$0xff] %v13746_v10  ;;  %20314 = vst [vmem:[#allocation88_spill] sm:$0xff] %v13748_v20  ;;  %v13752_v2 = vmax.f32 %v1736_v36, 0.0  ;;  %v13754_v46 = vmax.f32 %v1849_v55, 0.0  ;;  %v1738_v1 = vadd.f32 %v1737_v33, %v13690_v59  ;;  %v1851_v50 = vadd.f32 %v1850_v17, %v13694_v22 }
 0x152   : > { %v1739_v32 = vpop.f32.mrf.mxu0  ;;  %v1852_v14 = vpop.f32.mrf.mxu1 }
 0x153   : > { %20315 = vst [vmem:[#allocation89_spill] sm:$0xff] %v13752_v2  ;;  %20316 = vst [vmem:[#allocation90_spill] sm:$0xff] %v13754_v46  ;;  %v13758_v23 = vmax.f32 %v1738_v1, 0.0  ;;  %v13760_v45 = vmax.f32 %v1851_v50, 0.0  ;;  %v1740_v7 = vadd.f32 %v1739_v32, %v13704_v24  ;;  %v1853_v47 = vadd.f32 %v1852_v14, %v13708_v8 }
 0x154   : > { %v1743_v0 = vpop.f32.mrf.mxu0  ;;  %v1856_v49 = vpop.f32.mrf.mxu1 }
 0x155   : > { %20317 = vst [vmem:[#allocation91_spill] sm:$0xff] %v13758_v23  ;;  %20318 = vst [vmem:[#allocation92_spill] sm:$0xff] %v13760_v45  ;;  %v13764_v36 = vmax.f32 %v1740_v7, 0.0  ;;  %v13766_v55 = vmax.f32 %v1853_v47, 0.0  ;;  %v1744_v33 = vadd.f32 %v1743_v0, %v13690_v59  ;;  %v1857_v17 = vadd.f32 %v1856_v49, %v13694_v22 }
 0x156   : > { %v1745_v62 = vpop.f32.mrf.mxu0  ;;  %v1858_v40 = vpop.f32.mrf.mxu1 }
 0x157   : > { %20319 = vst [vmem:[#allocation93_spill] sm:$0xff] %v13764_v36  ;;  %20320 = vst [vmem:[#allocation94_spill] sm:$0xff] %v13766_v55  ;;  %v13770_v1 = vmax.f32 %v1744_v33, 0.0  ;;  %v13772_v50 = vmax.f32 %v1857_v17, 0.0  ;;  %v1746_v32 = vadd.f32 %v1745_v62, %v13704_v24  ;;  %v1859_v14 = vadd.f32 %v1858_v40, %v13708_v8 }
 0x158   : > { %v1747_v38 = vpop.f32.mrf.mxu0  ;;  %v1860_v28 = vpop.f32.mrf.mxu1 }
 0x159   : > { %20321 = vst [vmem:[#allocation95_spill] sm:$0xff] %v13770_v1  ;;  %20322 = vst [vmem:[#allocation96_spill] sm:$0xff] %v13772_v50  ;;  %v13776_v7 = vmax.f32 %v1746_v32, 0.0  ;;  %v13778_v47 = vmax.f32 %v1859_v14, 0.0  ;;  %v1748_v0 = vadd.f32 %v1747_v38, %v13690_v59  ;;  %v1861_v49 = vadd.f32 %v1860_v28, %v13694_v22 }
 0x15a   : > { %v1749_v37 = vpop.f32.mrf.mxu0  ;;  %v1862_v25 = vpop.f32.mrf.mxu1 }
 0x15b   : > { %20323 = vst [vmem:[#allocation97_spill] sm:$0xff] %v13776_v7  ;;  %20324 = vst [vmem:[#allocation98_spill] sm:$0xff] %v13778_v47  ;;  %v13782_v33 = vmax.f32 %v1748_v0, 0.0  ;;  %v13784_v17 = vmax.f32 %v1861_v49, 0.0  ;;  %v1750_v62 = vadd.f32 %v1749_v37, %v13704_v24  ;;  %v1863_v40 = vadd.f32 %v1862_v25, %v13708_v8 }
 0x15c   : > { %v1753_v16 = vpop.f32.mrf.mxu0  ;;  %v1866_v6 = vpop.f32.mrf.mxu1 }
 0x15d   : > { %20325 = vst [vmem:[#allocation99_spill] sm:$0xff] %v13782_v33  ;;  %20326 = vst [vmem:[#allocation100_spill] sm:$0xff] %v13784_v17  ;;  %v13788_v32 = vmax.f32 %v1750_v62, 0.0  ;;  %v13790_v14 = vmax.f32 %v1863_v40, 0.0  ;;  %v1754_v38 = vadd.f32 %v1753_v16, %v13690_v59  ;;  %v1867_v28 = vadd.f32 %v1866_v6, %v13694_v22 }
 0x15e   : > { %v1755_v15 = vpop.f32.mrf.mxu0  ;;  %v1868_v3 = vpop.f32.mrf.mxu1 }
 0x15f   : > { %20327 = vst [vmem:[#allocation101_spill] sm:$0xff] %v13788_v32  ;;  %20328 = vst [vmem:[#allocation102_spill] sm:$0xff] %v13790_v14  ;;  %v13794_v0 = vmax.f32 %v1754_v38, 0.0  ;;  %v13796_v49 = vmax.f32 %v1867_v28, 0.0  ;;  %v1756_v37 = vadd.f32 %v1755_v15, %v13704_v24  ;;  %v1869_v25 = vadd.f32 %v1868_v3, %v13708_v8 }
 0x160   : > { %v1757_v17 = vpop.f32.mrf.mxu0  ;;  %v1870_v33 = vpop.f32.mrf.mxu1 }
 0x161   : > { %20329 = vst [vmem:[#allocation103_spill] sm:$0xff] %v13794_v0  ;;  %20330 = vst [vmem:[#allocation104_spill] sm:$0xff] %v13796_v49  ;;  %v13800_v62 = vmax.f32 %v1756_v37, 0.0  ;;  %v13802_v40 = vmax.f32 %v1869_v25, 0.0  ;;  %v1758_v16 = vadd.f32 %v1757_v17, %v13690_v59  ;;  %v1871_v6 = vadd.f32 %v1870_v33, %v13694_v22 }
 0x162   : > { %v1759_v14 = vpop.f32.mrf.mxu0  ;;  %v1872_v32 = vpop.f32.mrf.mxu1 }
 0x163   : > { %20331 = vst [vmem:[#allocation105_spill] sm:$0xff] %v13800_v62  ;;  %20332 = vst [vmem:[#allocation106_spill] sm:$0xff] %v13802_v40  ;;  %v13806_v38 = vmax.f32 %v1758_v16, 0.0  ;;  %v13808_v28 = vmax.f32 %v1871_v6, 0.0  ;;  %v1760_v15 = vadd.f32 %v1759_v14, %v13704_v24  ;;  %v1873_v3 = vadd.f32 %v1872_v32, %v13708_v8 }
 0x164   : > { %v1763_v49 = vpop.f32.mrf.mxu0  ;;  %v1876_v0 = vpop.f32.mrf.mxu1 }
 0x165   : > { %20333 = vst [vmem:[#allocation107_spill] sm:$0xff] %v13806_v38  ;;  %20334 = vst [vmem:[#allocation108_spill] sm:$0xff] %v13808_v28  ;;  %v13812_v37 = vmax.f32 %v1760_v15, 0.0  ;;  %v13814_v25 = vmax.f32 %v1873_v3, 0.0  ;;  %v1764_v17 = vadd.f32 %v1763_v49, %v13690_v59  ;;  %v1877_v33 = vadd.f32 %v1876_v0, %v13694_v22 }
 0x166   : > { %v1765_v40 = vpop.f32.mrf.mxu0  ;;  %v1878_v62 = vpop.f32.mrf.mxu1 }
 0x167   : > { %20335 = vst [vmem:[#allocation109_spill] sm:$0xff] %v13812_v37  ;;  %20336 = vst [vmem:[#allocation110_spill] sm:$0xff] %v13814_v25  ;;  %v13818_v16 = vmax.f32 %v1764_v17, 0.0  ;;  %v13820_v6 = vmax.f32 %v1877_v33, 0.0  ;;  %v1766_v14 = vadd.f32 %v1765_v40, %v13704_v24  ;;  %v1879_v32 = vadd.f32 %v1878_v62, %v13708_v8 }
 0x168   : > { %v1767_v28 = vpop.f32.mrf.mxu0  ;;  %v1880_v38 = vpop.f32.mrf.mxu1 }
 0x169   : > { %20337 = vst [vmem:[#allocation111_spill] sm:$0xff] %v13818_v16  ;;  %20338 = vst [vmem:[#allocation112_spill] sm:$0xff] %v13820_v6  ;;  %v13824_v15 = vmax.f32 %v1766_v14, 0.0  ;;  %v13826_v3 = vmax.f32 %v1879_v32, 0.0  ;;  %v1768_v49 = vadd.f32 %v1767_v28, %v13690_v59  ;;  %v1881_v0 = vadd.f32 %v1880_v38, %v13694_v22 }
 0x16a   : > { %v1769_v25 = vpop.f32.mrf.mxu0  ;;  %v1882_v37 = vpop.f32.mrf.mxu1 }
 0x16b   : > { %20339 = vst [vmem:[#allocation113_spill] sm:$0xff] %v13824_v15  ;;  %20340 = vst [vmem:[#allocation114_spill] sm:$0xff] %v13826_v3  ;;  %v13830_v17 = vmax.f32 %v1768_v49, 0.0  ;;  %v13832_v33 = vmax.f32 %v1881_v0, 0.0  ;;  %v1770_v40 = vadd.f32 %v1769_v25, %v13704_v24  ;;  %v1883_v62 = vadd.f32 %v1882_v37, %v13708_v8 }
 0x16c   : > { %v1773_v6 = vpop.f32.mrf.mxu0  ;;  %v1886_v16 = vpop.f32.mrf.mxu1 }
 0x16d   : > { %20341 = vst [vmem:[#allocation115_spill] sm:$0xff] %v13830_v17  ;;  %20342 = vst [vmem:[#allocation116_spill] sm:$0xff] %v13832_v33  ;;  %v13836_v14 = vmax.f32 %v1770_v40, 0.0  ;;  %v13838_v32 = vmax.f32 %v1883_v62, 0.0  ;;  %v1774_v28 = vadd.f32 %v1773_v6, %v13690_v59  ;;  %v1887_v38 = vadd.f32 %v1886_v16, %v13694_v22 }
 0x16e   : > { %v1775_v3 = vpop.f32.mrf.mxu0  ;;  %v1888_v15 = vpop.f32.mrf.mxu1 }
 0x16f   : > { %20343 = vst [vmem:[#allocation117_spill] sm:$0xff] %v13836_v14  ;;  %20344 = vst [vmem:[#allocation118_spill] sm:$0xff] %v13838_v32  ;;  %v13842_v49 = vmax.f32 %v1774_v28, 0.0  ;;  %v13844_v0 = vmax.f32 %v1887_v38, 0.0  ;;  %v1776_v25 = vadd.f32 %v1775_v3, %v13704_v24  ;;  %v1889_v37 = vadd.f32 %v1888_v15, %v13708_v8 }
 0x170   : > { %v1777_v33 = vpop.f32.mrf.mxu0  ;;  %v1890_v17 = vpop.f32.mrf.mxu1 }
 0x171   : > { %20345 = vst [vmem:[#allocation119_spill] sm:$0xff] %v13842_v49  ;;  %20346 = vst [vmem:[#allocation120_spill] sm:$0xff] %v13844_v0  ;;  %v13848_v40 = vmax.f32 %v1776_v25, 0.0  ;;  %v13850_v62 = vmax.f32 %v1889_v37, 0.0  ;;  %v1778_v6 = vadd.f32 %v1777_v33, %v13690_v59  ;;  %v1891_v16 = vadd.f32 %v1890_v17, %v13694_v22 }
 0x172   : > { %v1779_v32 = vpop.f32.mrf.mxu0  ;;  %v1892_v14 = vpop.f32.mrf.mxu1 }
 0x173   : > { %20347 = vst [vmem:[#allocation121_spill] sm:$0xff] %v13848_v40  ;;  %20348 = vst [vmem:[#allocation122_spill] sm:$0xff] %v13850_v62  ;;  %v13854_v28 = vmax.f32 %v1778_v6, 0.0  ;;  %v13856_v38 = vmax.f32 %v1891_v16, 0.0  ;;  %v1780_v3 = vadd.f32 %v1779_v32, %v13704_v24  ;;  %v1893_v15 = vadd.f32 %v1892_v14, %v13708_v8 }
 0x174   : > { %v1783_v0 = vpop.f32.mrf.mxu0  ;;  %v1896_v49 = vpop.f32.mrf.mxu1 }
 0x175   : > { %20349 = vst [vmem:[#allocation123_spill] sm:$0xff] %v13854_v28  ;;  %20350 = vst [vmem:[#allocation124_spill] sm:$0xff] %v13856_v38  ;;  %v13860_v25 = vmax.f32 %v1780_v3, 0.0  ;;  %v13862_v37 = vmax.f32 %v1893_v15, 0.0  ;;  %v1784_v33 = vadd.f32 %v1783_v0, %v13690_v59  ;;  %v1897_v17 = vadd.f32 %v1896_v49, %v13694_v22 }
 0x176   : > { %v1785_v62 = vpop.f32.mrf.mxu0  ;;  %v1898_v40 = vpop.f32.mrf.mxu1 }
 0x177   : > { %20351 = vst [vmem:[#allocation125_spill] sm:$0xff] %v13860_v25  ;;  %20352 = vst [vmem:[#allocation126_spill] sm:$0xff] %v13862_v37  ;;  %v13866_v6 = vmax.f32 %v1784_v33, 0.0  ;;  %v13868_v16 = vmax.f32 %v1897_v17, 0.0  ;;  %v1786_v32 = vadd.f32 %v1785_v62, %v13704_v24  ;;  %v1899_v14 = vadd.f32 %v1898_v40, %v13708_v8 }
 0x178   : > { %v1787_v38 = vpop.f32.mrf.mxu0  ;;  %v1900_v28 = vpop.f32.mrf.mxu1 }
 0x179   : > { %20353 = vst [vmem:[#allocation127_spill] sm:$0xff] %v13866_v6  ;;  %20354 = vst [vmem:[#allocation128_spill] sm:$0xff] %v13868_v16  ;;  %v13872_v3 = vmax.f32 %v1786_v32, 0.0  ;;  %v13874_v15 = vmax.f32 %v1899_v14, 0.0  ;;  %v1788_v0 = vadd.f32 %v1787_v38, %v13690_v59  ;;  %v1901_v49 = vadd.f32 %v1900_v28, %v13694_v22 }
 0x17a   : > { %v1789_v37 = vpop.f32.mrf.mxu0  ;;  %v1902_v25 = vpop.f32.mrf.mxu1 }
 0x17b   : > { %20355 = vst [vmem:[#allocation129_spill] sm:$0xff] %v13872_v3  ;;  %20356 = vst [vmem:[#allocation130_spill] sm:$0xff] %v13874_v15  ;;  %v13878_v33 = vmax.f32 %v1788_v0, 0.0  ;;  %v13880_v17 = vmax.f32 %v1901_v49, 0.0  ;;  %v1790_v62 = vadd.f32 %v1789_v37, %v13704_v24  ;;  %v1903_v40 = vadd.f32 %v1902_v25, %v13708_v8  ;;  %v583_v0 = vld [vmem:[%s19685_s2 + $0x8] sm:$0xf] }
 0x17c   : > { %v1793_v16 = vpop.f32.mrf.mxu0  ;;  %v1906_v6 = vpop.f32.mrf.mxu1 }
 0x17d   : > { %20357 = vst [vmem:[#allocation131_spill] sm:$0xff] %v13878_v33  ;;  %20358 = vst [vmem:[#allocation132_spill] sm:$0xff] %v13880_v17  ;;  %v13884_v32 = vmax.f32 %v1790_v62, 0.0  ;;  %v13886_v14 = vmax.f32 %v1903_v40, 0.0  ;;  %v1794_v38 = vadd.f32 %v1793_v16, %v13690_v59  ;;  %v1907_v28 = vadd.f32 %v1906_v6, %v13694_v22 }
 0x17e   : > { %v1795_v49 = vpop.f32.mrf.mxu0  ;;  %v1908_v17 = vpop.f32.mrf.mxu1  ;;  %v13900_v16 = vrot.slane %v583_v0, %v13468_v58  ;;  %v13903_v6 = vrot.slane %v583_v0, %v13471_v63 }
 0x17f   : > { %20359 = vst [vmem:[#allocation133_spill] sm:$0xff] %v13884_v32  ;;  %20360 = vst [vmem:[#allocation134_spill] sm:$0xff] %v13886_v14  ;;  %v13893_v33 = vmax.f32 %v1794_v38, 0.0  ;;  %v13895_v37 = vmax.f32 %v1907_v28, 0.0  ;;  %v1796_v25 = vadd.f32 %v1795_v49, %v13704_v24  ;;  %v1909_v62 = vadd.f32 %v1908_v17, %v13708_v8 }
 0x180   : > { %v1797_v40 = vpop.f32.mrf.mxu0  ;;  %v1910_v14 = vpop.f32.mrf.mxu1  ;;  %v13912_v17 = vrot.slane %v583_v0, %v13479_v9 }
 0x181   : > { %20361 = vst [vmem:[#allocation135_spill] sm:$0xff] %v13893_v33  ;;  %20362 = vst [vmem:[#allocation136_spill] sm:$0xff] %v13895_v37  ;;  %v13905_v32 = vmax.f32 %v1796_v25, 0.0  ;;  %v13907_v15 = vmax.f32 %v1909_v62, 0.0  ;;  %v1798_v38 = vadd.f32 %v1797_v40, %v13690_v59  ;;  %v1911_v28 = vadd.f32 %v1910_v14, %v13694_v22 }
 0x182   : > { %v1799_v37 = vpop.f32.mrf.mxu0  ;;  %v1912_v49 = vpop.f32.mrf.mxu1  ;;  %v13915_v33 = vrot.slane %v583_v0, %v13482_v11 }
 0x183   : > { %20363 = vst [vmem:[#allocation137_spill] sm:$0xff] %v13905_v32  ;;  %20364 = vst [vmem:[#allocation138_spill] sm:$0xff] %v13907_v15  ;;  %v13917_v58 = vmax.f32 %v1798_v38, 0.0  ;;  %v13919_v63 = vmax.f32 %v1911_v28, 0.0  ;;  %v1800_v25 = vadd.f32 %v1799_v37, %v13704_v24  ;;  %v1913_v62 = vadd.f32 %v1912_v49, %v13708_v8 }
 0x184   : > { %v1949_v15 = vpop.f32.mrf.mxu0  ;;  %v2062_v59 = vpop.f32.mrf.mxu1 }
 0x185   : > { %20365 = vst [vmem:[#allocation139_spill] sm:$0xff] %v13917_v58  ;;  %20366 = vst [vmem:[#allocation140_spill] sm:$0xff] %v13919_v63  ;;  %v13923_v40 = vmax.f32 %v1800_v25, 0.0  ;;  %v13925_v22 = vmax.f32 %v1913_v62, 0.0  ;;  %v1950_v14 = vadd.f32 %v1949_v15, %v13900_v16  ;;  %v2063_v9 = vadd.f32 %v2062_v59, %v13903_v6 }
 0x186   : > { %v1951_v0 = vpop.f32.mrf.mxu0  ;;  %v2064_v11 = vpop.f32.mrf.mxu1 }
 0x187   : > { %20367 = vst [vmem:[#allocation141_spill] sm:$0xff] %v13923_v40  ;;  %20368 = vst [vmem:[#allocation142_spill] sm:$0xff] %v13925_v22  ;;  %v13929_v38 = vmax.f32 %v1950_v14, 0.0  ;;  %v13931_v28 = vmax.f32 %v2063_v9, 0.0  ;;  %v1952_v24 = vadd.f32 %v1951_v0, %v13912_v17  ;;  %v2065_v8 = vadd.f32 %v2064_v11, %v13915_v33 }
 0x188   : > { %v1953_v37 = vpop.f32.mrf.mxu0  ;;  %v2066_v49 = vpop.f32.mrf.mxu1 }
 0x189   : > { %20369 = vst [vmem:[#allocation143_spill] sm:$0xff] %v13929_v38  ;;  %20370 = vst [vmem:[#allocation144_spill] sm:$0xff] %v13931_v28  ;;  %v13935_v25 = vmax.f32 %v1952_v24, 0.0  ;;  %v13937_v62 = vmax.f32 %v2065_v8, 0.0  ;;  %v1954_v15 = vadd.f32 %v1953_v37, %v13900_v16  ;;  %v2067_v59 = vadd.f32 %v2066_v49, %v13903_v6 }
 0x18a   : > { %v1955_v22 = vpop.f32.mrf.mxu0  ;;  %v2068_v63 = vpop.f32.mrf.mxu1 }
 0x18b   : > { %20371 = vst [vmem:[#allocation145_spill] sm:$0xff] %v13935_v25  ;;  %20372 = vst [vmem:[#allocation146_spill] sm:$0xff] %v13937_v62  ;;  %v13941_v14 = vmax.f32 %v1954_v15, 0.0  ;;  %v13943_v9 = vmax.f32 %v2067_v59, 0.0  ;;  %v1956_v0 = vadd.f32 %v1955_v22, %v13912_v17  ;;  %v2069_v11 = vadd.f32 %v2068_v63, %v13915_v33 }
 0x18c   : > { %v1959_v28 = vpop.f32.mrf.mxu0  ;;  %v2072_v38 = vpop.f32.mrf.mxu1 }
 0x18d   : > { %20373 = vst [vmem:[#allocation147_spill] sm:$0xff] %v13941_v14  ;;  %20374 = vst [vmem:[#allocation148_spill] sm:$0xff] %v13943_v9  ;;  %v13947_v24 = vmax.f32 %v1956_v0, 0.0  ;;  %v13949_v8 = vmax.f32 %v2069_v11, 0.0  ;;  %v1960_v37 = vadd.f32 %v1959_v28, %v13900_v16  ;;  %v2073_v49 = vadd.f32 %v2072_v38, %v13903_v6 }
 0x18e   : > { %v1961_v62 = vpop.f32.mrf.mxu0  ;;  %v2074_v25 = vpop.f32.mrf.mxu1 }
 0x18f   : > { %20375 = vst [vmem:[#allocation149_spill] sm:$0xff] %v13947_v24  ;;  %20376 = vst [vmem:[#allocation150_spill] sm:$0xff] %v13949_v8  ;;  %v13953_v15 = vmax.f32 %v1960_v37, 0.0  ;;  %v13955_v59 = vmax.f32 %v2073_v49, 0.0  ;;  %v1962_v22 = vadd.f32 %v1961_v62, %v13912_v17  ;;  %v2075_v63 = vadd.f32 %v2074_v25, %v13915_v33 }
 0x190   : > { %v1963_v9 = vpop.f32.mrf.mxu0  ;;  %v2076_v14 = vpop.f32.mrf.mxu1 }
 0x191   : > { %20377 = vst [vmem:[#allocation151_spill] sm:$0xff] %v13953_v15  ;;  %20378 = vst [vmem:[#allocation152_spill] sm:$0xff] %v13955_v59  ;;  %v13959_v0 = vmax.f32 %v1962_v22, 0.0  ;;  %v13961_v11 = vmax.f32 %v2075_v63, 0.0  ;;  %v1964_v28 = vadd.f32 %v1963_v9, %v13900_v16  ;;  %v2077_v38 = vadd.f32 %v2076_v14, %v13903_v6 }
 0x192   : > { %v1965_v8 = vpop.f32.mrf.mxu0  ;;  %v2078_v24 = vpop.f32.mrf.mxu1 }
 0x193   : > { %20379 = vst [vmem:[#allocation153_spill] sm:$0xff] %v13959_v0  ;;  %20380 = vst [vmem:[#allocation154_spill] sm:$0xff] %v13961_v11  ;;  %v13965_v37 = vmax.f32 %v1964_v28, 0.0  ;;  %v13967_v49 = vmax.f32 %v2077_v38, 0.0  ;;  %v1966_v62 = vadd.f32 %v1965_v8, %v13912_v17  ;;  %v2079_v25 = vadd.f32 %v2078_v24, %v13915_v33 }
 0x194   : > { %v1969_v59 = vpop.f32.mrf.mxu0  ;;  %v2082_v15 = vpop.f32.mrf.mxu1 }
 0x195   : > { %20381 = vst [vmem:[#allocation155_spill] sm:$0xff] %v13965_v37  ;;  %20382 = vst [vmem:[#allocation156_spill] sm:$0xff] %v13967_v49  ;;  %v13971_v22 = vmax.f32 %v1966_v62, 0.0  ;;  %v13973_v63 = vmax.f32 %v2079_v25, 0.0  ;;  %v1970_v9 = vadd.f32 %v1969_v59, %v13900_v16  ;;  %v2083_v14 = vadd.f32 %v2082_v15, %v13903_v6 }
 0x196   : > { %v1971_v11 = vpop.f32.mrf.mxu0  ;;  %v2084_v0 = vpop.f32.mrf.mxu1 }
 0x197   : > { %20383 = vst [vmem:[#allocation157_spill] sm:$0xff] %v13971_v22  ;;  %20384 = vst [vmem:[#allocation158_spill] sm:$0xff] %v13973_v63  ;;  %v13977_v28 = vmax.f32 %v1970_v9, 0.0  ;;  %v13979_v38 = vmax.f32 %v2083_v14, 0.0  ;;  %v1972_v8 = vadd.f32 %v1971_v11, %v13912_v17  ;;  %v2085_v24 = vadd.f32 %v2084_v0, %v13915_v33 }
 0x198   : > { %v1973_v49 = vpop.f32.mrf.mxu0  ;;  %v2086_v37 = vpop.f32.mrf.mxu1 }
 0x199   : > { %20385 = vst [vmem:[#allocation159_spill] sm:$0xff] %v13977_v28  ;;  %20386 = vst [vmem:[#allocation160_spill] sm:$0xff] %v13979_v38  ;;  %v13983_v62 = vmax.f32 %v1972_v8, 0.0  ;;  %v13985_v25 = vmax.f32 %v2085_v24, 0.0  ;;  %v1974_v59 = vadd.f32 %v1973_v49, %v13900_v16  ;;  %v2087_v15 = vadd.f32 %v2086_v37, %v13903_v6 }
 0x19a   : > { %v1975_v63 = vpop.f32.mrf.mxu0  ;;  %v2088_v22 = vpop.f32.mrf.mxu1 }
 0x19b   : > { %20387 = vst [vmem:[#allocation161_spill] sm:$0xff] %v13983_v62  ;;  %20388 = vst [vmem:[#allocation162_spill] sm:$0xff] %v13985_v25  ;;  %v13989_v9 = vmax.f32 %v1974_v59, 0.0  ;;  %v13991_v14 = vmax.f32 %v2087_v15, 0.0  ;;  %v1976_v11 = vadd.f32 %v1975_v63, %v13912_v17  ;;  %v2089_v0 = vadd.f32 %v2088_v22, %v13915_v33 }
 0x19c   : > { %v1979_v38 = vpop.f32.mrf.mxu0  ;;  %v2092_v28 = vpop.f32.mrf.mxu1 }
 0x19d   : > { %20389 = vst [vmem:[#allocation163_spill] sm:$0xff] %v13989_v9  ;;  %20390 = vst [vmem:[#allocation164_spill] sm:$0xff] %v13991_v14  ;;  %v13995_v8 = vmax.f32 %v1976_v11, 0.0  ;;  %v13997_v24 = vmax.f32 %v2089_v0, 0.0  ;;  %v1980_v49 = vadd.f32 %v1979_v38, %v13900_v16  ;;  %v2093_v37 = vadd.f32 %v2092_v28, %v13903_v6 }
 0x19e   : > { %v1981_v25 = vpop.f32.mrf.mxu0  ;;  %v2094_v62 = vpop.f32.mrf.mxu1 }
 0x19f   : > { %20391 = vst [vmem:[#allocation165_spill] sm:$0xff] %v13995_v8  ;;  %20392 = vst [vmem:[#allocation166_spill] sm:$0xff] %v13997_v24  ;;  %v14001_v59 = vmax.f32 %v1980_v49, 0.0  ;;  %v14003_v15 = vmax.f32 %v2093_v37, 0.0  ;;  %v1982_v63 = vadd.f32 %v1981_v25, %v13912_v17  ;;  %v2095_v22 = vadd.f32 %v2094_v62, %v13915_v33 }
 0x1a0   : > { %v1983_v14 = vpop.f32.mrf.mxu0  ;;  %v2096_v9 = vpop.f32.mrf.mxu1 }
 0x1a1   : > { %20393 = vst [vmem:[#allocation167_spill] sm:$0xff] %v14001_v59  ;;  %20394 = vst [vmem:[#allocation168_spill] sm:$0xff] %v14003_v15  ;;  %v14007_v11 = vmax.f32 %v1982_v63, 0.0  ;;  %v14009_v0 = vmax.f32 %v2095_v22, 0.0  ;;  %v1984_v38 = vadd.f32 %v1983_v14, %v13900_v16  ;;  %v2097_v28 = vadd.f32 %v2096_v9, %v13903_v6 }
 0x1a2   : > { %v1985_v24 = vpop.f32.mrf.mxu0  ;;  %v2098_v8 = vpop.f32.mrf.mxu1 }
 0x1a3   : > { %20395 = vst [vmem:[#allocation169_spill] sm:$0xff] %v14007_v11  ;;  %20396 = vst [vmem:[#allocation170_spill] sm:$0xff] %v14009_v0  ;;  %v14013_v49 = vmax.f32 %v1984_v38, 0.0  ;;  %v14015_v37 = vmax.f32 %v2097_v28, 0.0  ;;  %v1986_v25 = vadd.f32 %v1985_v24, %v13912_v17  ;;  %v2099_v62 = vadd.f32 %v2098_v8, %v13915_v33 }
 0x1a4   : > { %v1989_v15 = vpop.f32.mrf.mxu0  ;;  %v2102_v59 = vpop.f32.mrf.mxu1 }
 0x1a5   : > { %20397 = vst [vmem:[#allocation171_spill] sm:$0xff] %v14013_v49  ;;  %20398 = vst [vmem:[#allocation172_spill] sm:$0xff] %v14015_v37  ;;  %v14019_v63 = vmax.f32 %v1986_v25, 0.0  ;;  %v14021_v22 = vmax.f32 %v2099_v62, 0.0  ;;  %v1990_v14 = vadd.f32 %v1989_v15, %v13900_v16  ;;  %v2103_v9 = vadd.f32 %v2102_v59, %v13903_v6 }
 0x1a6   : > { %v1991_v0 = vpop.f32.mrf.mxu0  ;;  %v2104_v11 = vpop.f32.mrf.mxu1 }
 0x1a7   : > { %20399 = vst [vmem:[#allocation173_spill] sm:$0xff] %v14019_v63  ;;  %20400 = vst [vmem:[#allocation174_spill] sm:$0xff] %v14021_v22  ;;  %v14025_v38 = vmax.f32 %v1990_v14, 0.0  ;;  %v14027_v28 = vmax.f32 %v2103_v9, 0.0  ;;  %v1992_v24 = vadd.f32 %v1991_v0, %v13912_v17  ;;  %v2105_v8 = vadd.f32 %v2104_v11, %v13915_v33 }
 0x1a8   : > { %v1993_v37 = vpop.f32.mrf.mxu0  ;;  %v2106_v49 = vpop.f32.mrf.mxu1 }
 0x1a9   : > { %20401 = vst [vmem:[#allocation175_spill] sm:$0xff] %v14025_v38  ;;  %20402 = vst [vmem:[#allocation176_spill] sm:$0xff] %v14027_v28  ;;  %v14031_v25 = vmax.f32 %v1992_v24, 0.0  ;;  %v14033_v62 = vmax.f32 %v2105_v8, 0.0  ;;  %v1994_v15 = vadd.f32 %v1993_v37, %v13900_v16  ;;  %v2107_v59 = vadd.f32 %v2106_v49, %v13903_v6 }
 0x1aa   : > { %v1995_v22 = vpop.f32.mrf.mxu0  ;;  %v2108_v63 = vpop.f32.mrf.mxu1 }
 0x1ab   : > { %20403 = vst [vmem:[#allocation177_spill] sm:$0xff] %v14031_v25  ;;  %20404 = vst [vmem:[#allocation178_spill] sm:$0xff] %v14033_v62  ;;  %v14037_v14 = vmax.f32 %v1994_v15, 0.0  ;;  %v14039_v9 = vmax.f32 %v2107_v59, 0.0  ;;  %v1996_v0 = vadd.f32 %v1995_v22, %v13912_v17  ;;  %v2109_v11 = vadd.f32 %v2108_v63, %v13915_v33 }
 0x1ac   : > { %v1999_v28 = vpop.f32.mrf.mxu0  ;;  %v2112_v38 = vpop.f32.mrf.mxu1 }
 0x1ad   : > { %20405 = vst [vmem:[#allocation179_spill] sm:$0xff] %v14037_v14  ;;  %20406 = vst [vmem:[#allocation180_spill] sm:$0xff] %v14039_v9  ;;  %v14043_v24 = vmax.f32 %v1996_v0, 0.0  ;;  %v14045_v8 = vmax.f32 %v2109_v11, 0.0  ;;  %v2000_v37 = vadd.f32 %v1999_v28, %v13900_v16  ;;  %v2113_v49 = vadd.f32 %v2112_v38, %v13903_v6 }
 0x1ae   : > { %v2001_v62 = vpop.f32.mrf.mxu0  ;;  %v2114_v25 = vpop.f32.mrf.mxu1 }
 0x1af   : > { %20407 = vst [vmem:[#allocation181_spill] sm:$0xff] %v14043_v24  ;;  %20408 = vst [vmem:[#allocation182_spill] sm:$0xff] %v14045_v8  ;;  %v14049_v15 = vmax.f32 %v2000_v37, 0.0  ;;  %v14051_v59 = vmax.f32 %v2113_v49, 0.0  ;;  %v2002_v22 = vadd.f32 %v2001_v62, %v13912_v17  ;;  %v2115_v63 = vadd.f32 %v2114_v25, %v13915_v33 }
 0x1b0   : > { %v2003_v9 = vpop.f32.mrf.mxu0  ;;  %v2116_v14 = vpop.f32.mrf.mxu1 }
 0x1b1   : > { %20409 = vst [vmem:[#allocation183_spill] sm:$0xff] %v14049_v15  ;;  %20410 = vst [vmem:[#allocation184_spill] sm:$0xff] %v14051_v59  ;;  %v14055_v0 = vmax.f32 %v2002_v22, 0.0  ;;  %v14057_v11 = vmax.f32 %v2115_v63, 0.0  ;;  %v2004_v28 = vadd.f32 %v2003_v9, %v13900_v16  ;;  %v2117_v38 = vadd.f32 %v2116_v14, %v13903_v6 }
 0x1b2   : > { %v2005_v8 = vpop.f32.mrf.mxu0  ;;  %v2118_v24 = vpop.f32.mrf.mxu1 }
 0x1b3   : > { %20411 = vst [vmem:[#allocation185_spill] sm:$0xff] %v14055_v0  ;;  %20412 = vst [vmem:[#allocation186_spill] sm:$0xff] %v14057_v11  ;;  %v14061_v37 = vmax.f32 %v2004_v28, 0.0  ;;  %v14063_v49 = vmax.f32 %v2117_v38, 0.0  ;;  %v2006_v62 = vadd.f32 %v2005_v8, %v13912_v17  ;;  %v2119_v25 = vadd.f32 %v2118_v24, %v13915_v33 }
 0x1b4   : > { %v2009_v59 = vpop.f32.mrf.mxu0  ;;  %v2122_v15 = vpop.f32.mrf.mxu1 }
 0x1b5   : > { %20413 = vst [vmem:[#allocation187_spill] sm:$0xff] %v14061_v37  ;;  %20414 = vst [vmem:[#allocation188_spill] sm:$0xff] %v14063_v49  ;;  %v14067_v22 = vmax.f32 %v2006_v62, 0.0  ;;  %v14069_v63 = vmax.f32 %v2119_v25, 0.0  ;;  %v2010_v9 = vadd.f32 %v2009_v59, %v13900_v16  ;;  %v2123_v14 = vadd.f32 %v2122_v15, %v13903_v6 }
 0x1b6   : > { %v2011_v11 = vpop.f32.mrf.mxu0  ;;  %v2124_v0 = vpop.f32.mrf.mxu1 }
 0x1b7   : > { %20415 = vst [vmem:[#allocation189_spill] sm:$0xff] %v14067_v22  ;;  %20416 = vst [vmem:[#allocation190_spill] sm:$0xff] %v14069_v63  ;;  %v14073_v28 = vmax.f32 %v2010_v9, 0.0  ;;  %v14075_v38 = vmax.f32 %v2123_v14, 0.0  ;;  %v2012_v8 = vadd.f32 %v2011_v11, %v13912_v17  ;;  %v2125_v24 = vadd.f32 %v2124_v0, %v13915_v33 }
 0x1b8   : > { %v2013_v49 = vpop.f32.mrf.mxu0  ;;  %v2126_v37 = vpop.f32.mrf.mxu1 }
 0x1b9   : > { %20417 = vst [vmem:[#allocation191_spill] sm:$0xff] %v14073_v28  ;;  %20418 = vst [vmem:[#allocation192_spill] sm:$0xff] %v14075_v38  ;;  %v14079_v62 = vmax.f32 %v2012_v8, 0.0  ;;  %v14081_v25 = vmax.f32 %v2125_v24, 0.0  ;;  %v2014_v59 = vadd.f32 %v2013_v49, %v13900_v16  ;;  %v2127_v15 = vadd.f32 %v2126_v37, %v13903_v6 }
 0x1ba   : > { %v2015_v63 = vpop.f32.mrf.mxu0  ;;  %v2128_v22 = vpop.f32.mrf.mxu1 }
 0x1bb   : > { %20419 = vst [vmem:[#allocation193_spill] sm:$0xff] %v14079_v62  ;;  %20420 = vst [vmem:[#allocation194_spill] sm:$0xff] %v14081_v25  ;;  %v14085_v9 = vmax.f32 %v2014_v59, 0.0  ;;  %v14087_v14 = vmax.f32 %v2127_v15, 0.0  ;;  %v2016_v11 = vadd.f32 %v2015_v63, %v13912_v17  ;;  %v2129_v0 = vadd.f32 %v2128_v22, %v13915_v33 }
 0x1bc   : > { %v2019_v38 = vpop.f32.mrf.mxu0  ;;  %v2132_v28 = vpop.f32.mrf.mxu1 }
 0x1bd   : > { %20421 = vst [vmem:[#allocation195_spill] sm:$0xff] %v14085_v9  ;;  %20422 = vst [vmem:[#allocation196_spill] sm:$0xff] %v14087_v14  ;;  %v14091_v8 = vmax.f32 %v2016_v11, 0.0  ;;  %v14093_v24 = vmax.f32 %v2129_v0, 0.0  ;;  %v2020_v49 = vadd.f32 %v2019_v38, %v13900_v16  ;;  %v2133_v37 = vadd.f32 %v2132_v28, %v13903_v6 }
 0x1be   : > { %v2021_v25 = vpop.f32.mrf.mxu0  ;;  %v2134_v62 = vpop.f32.mrf.mxu1 }
 0x1bf   : > { %20423 = vst [vmem:[#allocation197_spill] sm:$0xff] %v14091_v8  ;;  %20424 = vst [vmem:[#allocation198_spill] sm:$0xff] %v14093_v24  ;;  %v14097_v59 = vmax.f32 %v2020_v49, 0.0  ;;  %v14099_v15 = vmax.f32 %v2133_v37, 0.0  ;;  %v2022_v63 = vadd.f32 %v2021_v25, %v13912_v17  ;;  %v2135_v22 = vadd.f32 %v2134_v62, %v13915_v33 }
 0x1c0   : > { %v2023_v14 = vpop.f32.mrf.mxu0  ;;  %v2136_v9 = vpop.f32.mrf.mxu1 }
 0x1c1   : > { %20425 = vst [vmem:[#allocation199_spill] sm:$0xff] %v14097_v59  ;;  %20426 = vst [vmem:[#allocation200_spill] sm:$0xff] %v14099_v15  ;;  %v14103_v11 = vmax.f32 %v2022_v63, 0.0  ;;  %v14105_v0 = vmax.f32 %v2135_v22, 0.0  ;;  %v2024_v38 = vadd.f32 %v2023_v14, %v13900_v16  ;;  %v2137_v28 = vadd.f32 %v2136_v9, %v13903_v6 }
 0x1c2   : > { %v2025_v24 = vpop.f32.mrf.mxu0  ;;  %v2138_v8 = vpop.f32.mrf.mxu1 }
 0x1c3   : > { %20427 = vst [vmem:[#allocation201_spill] sm:$0xff] %v14103_v11  ;;  %20428 = vst [vmem:[#allocation202_spill] sm:$0xff] %v14105_v0  ;;  %v14109_v49 = vmax.f32 %v2024_v38, 0.0  ;;  %v14111_v37 = vmax.f32 %v2137_v28, 0.0  ;;  %v2026_v25 = vadd.f32 %v2025_v24, %v13912_v17  ;;  %v2139_v62 = vadd.f32 %v2138_v8, %v13915_v33  ;;  %2335 = sbr.rel (%p9857_p5) target bundleno = 694 (0x2b6), region = 72 }
 0x1c5   : > { %20429 = vst [vmem:[#allocation203_spill] sm:$0xff] %v14109_v49  ;;  %20430 = vst [vmem:[#allocation204_spill] sm:$0xff] %v14111_v37  ;;  %v14115_v15 = vmax.f32 %v2026_v25, 0.0  ;;  %v14117_v63 = vmax.f32 %v2139_v62, 0.0 }
 0x1c7   : > { %20431 = vst [vmem:[#allocation205_spill] sm:$0xff] %v14115_v15  ;;  %20432 = vst [vmem:[#allocation206_spill] sm:$0xff] %v14117_v63 }
 0x1c8   : > { %v2338_v16 = vadd.f32 %v13514_v4, %v13502_v52  ;;  %v2359_v6 = vadd.f32 %v13520_v12, %v13508_v60  ;;  %v2380_v9 = vadd.f32 %v13516_v5, %v13504_v54  ;;  %v2401_v17 = vadd.f32 %v13522_v13, %v13510_v61 }
 0x1c9   : > { %v2422_v33 = vadd.f32 %v13734_v42, %v13722_v31  ;;  %v2443_v14 = vadd.f32 %v13740_v29, %v13728_v51  ;;  %v2464_v8 = vadd.f32 %v13736_v53, %v13724_v39  ;;  %v2485_v24 = vadd.f32 %v13742_v30, %v13730_v19 }
 0x1ca   : > { %v2339_v22 = vadd.f32 %v2338_v16, %v13526_v18  ;;  %v2360_v38 = vadd.f32 %v2359_v6, %v13532_v26  ;;  %v2381_v28 = vadd.f32 %v2380_v9, %v13528_v21  ;;  %v2402_v25 = vadd.f32 %v2401_v17, %v13534_v27  ;;  %v20529_v27 = vld [vmem:[#allocation155_spill] sm:$0xff]  ;;  %v20530_v26 = vld [vmem:[#allocation157_spill] sm:$0xff] }
 0x1cb   : > { %v2423_v62 = vadd.f32 %v2422_v33, %v13746_v10  ;;  %v2444_v42 = vadd.f32 %v2443_v14, %v13752_v2  ;;  %v2465_v29 = vadd.f32 %v2464_v8, %v13748_v20  ;;  %v2486_v13 = vadd.f32 %v2485_v24, %v13754_v46 }
 0x1cc   : > { %v2340_v53 = vadd.f32 %v2339_v22, %v13538_v34  ;;  %v2361_v30 = vadd.f32 %v2360_v38, %v13544_v43  ;;  %v2382_v16 = vadd.f32 %v2381_v28, %v13540_v35  ;;  %v2403_v6 = vadd.f32 %v2402_v25, %v13546_v44  ;;  %v20528_v34 = vld [vmem:[#allocation154_spill] sm:$0xff] }
 0x1cd   : > { %v2424_v9 = vadd.f32 %v2423_v62, %v13758_v23  ;;  %v2445_v17 = vadd.f32 %v2444_v42, %v13764_v36  ;;  %v2466_v33 = vadd.f32 %v2465_v29, %v13760_v45  ;;  %v2487_v14 = vadd.f32 %v2486_v13, %v13766_v55  ;;  %v20433_v36 = vld [vmem:[#allocation31_spill] sm:$0xff]  ;;  %v20434_v45 = vld [vmem:[#allocation33_spill] sm:$0xff]  ;;  %v20435_v55 = vld [vmem:[#allocation32_spill] sm:$0xff] }
 0x1ce   : > { %v2341_v8 = vadd.f32 %v2340_v53, %v13550_v41  ;;  %v2362_v24 = vadd.f32 %v2361_v30, %v13556_v56  ;;  %v2383_v22 = vadd.f32 %v2382_v16, %v13552_v48  ;;  %v2404_v38 = vadd.f32 %v2403_v6, %v13558_v57  ;;  %v20436_v41 = vld [vmem:[#allocation34_spill] sm:$0xff]  ;;  %v20437_v56 = vld [vmem:[#allocation99_spill] sm:$0xff]  ;;  %v20438_v48 = vld [vmem:[#allocation101_spill] sm:$0xff] }
 0x1cf   : > { %v2425_v28 = vadd.f32 %v2424_v9, %v13770_v1  ;;  %v2446_v25 = vadd.f32 %v2445_v17, %v13776_v7  ;;  %v2467_v62 = vadd.f32 %v2466_v33, %v13772_v50  ;;  %v2488_v42 = vadd.f32 %v2487_v14, %v13778_v47  ;;  %v20439_v57 = vld [vmem:[#allocation100_spill] sm:$0xff]  ;;  %v20440_v1 = vld [vmem:[#allocation102_spill] sm:$0xff]  ;;  %v20441_v7 = vld [vmem:[#allocation35_spill] sm:$0xff] }
 0x1d0   : > { %v2342_v29 = vadd.f32 %v2341_v8, %v20433_v36  ;;  %v2363_v13 = vadd.f32 %v2362_v24, %v20434_v45  ;;  %v2384_v53 = vadd.f32 %v2383_v22, %v20435_v55  ;;  %v2405_v30 = vadd.f32 %v2404_v38, %v20436_v41  ;;  %v20442_v50 = vld [vmem:[#allocation37_spill] sm:$0xff]  ;;  %v20443_v47 = vld [vmem:[#allocation36_spill] sm:$0xff]  ;;  %v20444_v36 = vld [vmem:[#allocation38_spill] sm:$0xff] }
 0x1d1   : > { %v2426_v16 = vadd.f32 %v2425_v28, %v20437_v56  ;;  %v2447_v6 = vadd.f32 %v2446_v25, %v20438_v48  ;;  %v2468_v9 = vadd.f32 %v2467_v62, %v20439_v57  ;;  %v2489_v17 = vadd.f32 %v2488_v42, %v20440_v1  ;;  %v20445_v45 = vld [vmem:[#allocation103_spill] sm:$0xff]  ;;  %v20446_v55 = vld [vmem:[#allocation105_spill] sm:$0xff]  ;;  %v20447_v41 = vld [vmem:[#allocation104_spill] sm:$0xff] }
 0x1d2   : > { %v2343_v33 = vadd.f32 %v2342_v29, %v20441_v7  ;;  %v2364_v14 = vadd.f32 %v2363_v13, %v20442_v50  ;;  %v2385_v8 = vadd.f32 %v2384_v53, %v20443_v47  ;;  %v2406_v24 = vadd.f32 %v2405_v30, %v20444_v36  ;;  %v20448_v56 = vld [vmem:[#allocation106_spill] sm:$0xff]  ;;  %v20449_v48 = vld [vmem:[#allocation39_spill] sm:$0xff]  ;;  %v20450_v57 = vld [vmem:[#allocation41_spill] sm:$0xff] }
 0x1d3   : > { %v2427_v22 = vadd.f32 %v2426_v16, %v20445_v45  ;;  %v2448_v38 = vadd.f32 %v2447_v6, %v20446_v55  ;;  %v2469_v28 = vadd.f32 %v2468_v9, %v20447_v41  ;;  %v2490_v25 = vadd.f32 %v2489_v17, %v20448_v56  ;;  %v20451_v1 = vld [vmem:[#allocation40_spill] sm:$0xff]  ;;  %v20452_v7 = vld [vmem:[#allocation42_spill] sm:$0xff]  ;;  %v20453_v50 = vld [vmem:[#allocation107_spill] sm:$0xff] }
 0x1d4   : > { %v2344_v62 = vadd.f32 %v2343_v33, %v20449_v48  ;;  %v2365_v42 = vadd.f32 %v2364_v14, %v20450_v57  ;;  %v2386_v29 = vadd.f32 %v2385_v8, %v20451_v1  ;;  %v2407_v13 = vadd.f32 %v2406_v24, %v20452_v7  ;;  %v20454_v47 = vld [vmem:[#allocation109_spill] sm:$0xff]  ;;  %v20455_v36 = vld [vmem:[#allocation108_spill] sm:$0xff]  ;;  %v20456_v45 = vld [vmem:[#allocation110_spill] sm:$0xff] }
 0x1d5   : > { %v2428_v53 = vadd.f32 %v2427_v22, %v20453_v50  ;;  %v2449_v30 = vadd.f32 %v2448_v38, %v20454_v47  ;;  %v2470_v16 = vadd.f32 %v2469_v28, %v20455_v36  ;;  %v2491_v6 = vadd.f32 %v2490_v25, %v20456_v45  ;;  %v20457_v55 = vld [vmem:[#allocation43_spill] sm:$0xff]  ;;  %v20458_v41 = vld [vmem:[#allocation45_spill] sm:$0xff]  ;;  %v20459_v56 = vld [vmem:[#allocation44_spill] sm:$0xff] }
 0x1d6   : > { %v2345_v9 = vadd.f32 %v2344_v62, %v20457_v55  ;;  %v2366_v17 = vadd.f32 %v2365_v42, %v20458_v41  ;;  %v2387_v33 = vadd.f32 %v2386_v29, %v20459_v56  ;;  %v20460_v48 = vld [vmem:[#allocation46_spill] sm:$0xff]  ;;  %v20461_v57 = vld [vmem:[#allocation111_spill] sm:$0xff]  ;;  %v20462_v1 = vld [vmem:[#allocation113_spill] sm:$0xff] }
 0x1d7   : > { %v2408_v14 = vadd.f32 %v2407_v13, %v20460_v48  ;;  %v2429_v8 = vadd.f32 %v2428_v53, %v20461_v57  ;;  %v2450_v24 = vadd.f32 %v2449_v30, %v20462_v1  ;;  %v20463_v7 = vld [vmem:[#allocation112_spill] sm:$0xff]  ;;  %v20464_v50 = vld [vmem:[#allocation114_spill] sm:$0xff]  ;;  %v20465_v47 = vld [vmem:[#allocation47_spill] sm:$0xff] }
 0x1d8   : > { %v2471_v22 = vadd.f32 %v2470_v16, %v20463_v7  ;;  %v2492_v38 = vadd.f32 %v2491_v6, %v20464_v50  ;;  %v2346_v28 = vadd.f32 %v2345_v9, %v20465_v47  ;;  %v20466_v36 = vld [vmem:[#allocation49_spill] sm:$0xff]  ;;  %v20467_v45 = vld [vmem:[#allocation48_spill] sm:$0xff]  ;;  %v20468_v55 = vld [vmem:[#allocation50_spill] sm:$0xff] }
 0x1d9   : > { %v2367_v25 = vadd.f32 %v2366_v17, %v20466_v36  ;;  %v2388_v62 = vadd.f32 %v2387_v33, %v20467_v45  ;;  %v2409_v42 = vadd.f32 %v2408_v14, %v20468_v55  ;;  %v20469_v41 = vld [vmem:[#allocation115_spill] sm:$0xff]  ;;  %v20470_v56 = vld [vmem:[#allocation117_spill] sm:$0xff]  ;;  %v20471_v48 = vld [vmem:[#allocation116_spill] sm:$0xff] }
 0x1da   : > { %v2430_v29 = vadd.f32 %v2429_v8, %v20469_v41  ;;  %v2451_v13 = vadd.f32 %v2450_v24, %v20470_v56  ;;  %v2472_v53 = vadd.f32 %v2471_v22, %v20471_v48  ;;  %v20472_v57 = vld [vmem:[#allocation118_spill] sm:$0xff]  ;;  %v20473_v1 = vld [vmem:[#allocation51_spill] sm:$0xff]  ;;  %v20474_v7 = vld [vmem:[#allocation53_spill] sm:$0xff] }
 0x1db   : > { %v2493_v30 = vadd.f32 %v2492_v38, %v20472_v57  ;;  %v2347_v16 = vadd.f32 %v2346_v28, %v20473_v1  ;;  %v2368_v6 = vadd.f32 %v2367_v25, %v20474_v7  ;;  %v20475_v50 = vld [vmem:[#allocation52_spill] sm:$0xff]  ;;  %v20476_v47 = vld [vmem:[#allocation54_spill] sm:$0xff]  ;;  %v20477_v36 = vld [vmem:[#allocation119_spill] sm:$0xff] }
 0x1dc   : > { %v2389_v9 = vadd.f32 %v2388_v62, %v20475_v50  ;;  %v2410_v17 = vadd.f32 %v2409_v42, %v20476_v47  ;;  %v2431_v33 = vadd.f32 %v2430_v29, %v20477_v36  ;;  %v20478_v45 = vld [vmem:[#allocation121_spill] sm:$0xff]  ;;  %v20479_v55 = vld [vmem:[#allocation120_spill] sm:$0xff]  ;;  %v20480_v41 = vld [vmem:[#allocation122_spill] sm:$0xff] }
 0x1dd   : > { %v2452_v14 = vadd.f32 %v2451_v13, %v20478_v45  ;;  %v2473_v8 = vadd.f32 %v2472_v53, %v20479_v55  ;;  %v2494_v24 = vadd.f32 %v2493_v30, %v20480_v41  ;;  %v20481_v56 = vld [vmem:[#allocation55_spill] sm:$0xff]  ;;  %v20482_v48 = vld [vmem:[#allocation57_spill] sm:$0xff]  ;;  %v20483_v57 = vld [vmem:[#allocation56_spill] sm:$0xff] }
 0x1de   : > { %v2348_v22 = vadd.f32 %v2347_v16, %v20481_v56  ;;  %v2369_v38 = vadd.f32 %v2368_v6, %v20482_v48  ;;  %v2390_v28 = vadd.f32 %v2389_v9, %v20483_v57  ;;  %v20484_v1 = vld [vmem:[#allocation58_spill] sm:$0xff]  ;;  %v20485_v7 = vld [vmem:[#allocation123_spill] sm:$0xff]  ;;  %v20486_v50 = vld [vmem:[#allocation125_spill] sm:$0xff] }
 0x1df   : > { %v2411_v25 = vadd.f32 %v2410_v17, %v20484_v1  ;;  %v2432_v62 = vadd.f32 %v2431_v33, %v20485_v7  ;;  %v2453_v42 = vadd.f32 %v2452_v14, %v20486_v50  ;;  %v20487_v47 = vld [vmem:[#allocation124_spill] sm:$0xff]  ;;  %v20488_v36 = vld [vmem:[#allocation126_spill] sm:$0xff]  ;;  %v20489_v45 = vld [vmem:[#allocation59_spill] sm:$0xff] }
 0x1e0   : > { %v2474_v29 = vadd.f32 %v2473_v8, %v20487_v47  ;;  %v2495_v13 = vadd.f32 %v2494_v24, %v20488_v36  ;;  %v2349_v53 = vadd.f32 %v2348_v22, %v20489_v45  ;;  %v20490_v55 = vld [vmem:[#allocation61_spill] sm:$0xff]  ;;  %v20491_v41 = vld [vmem:[#allocation60_spill] sm:$0xff]  ;;  %v20492_v56 = vld [vmem:[#allocation62_spill] sm:$0xff] }
 0x1e1   : > { %v2370_v30 = vadd.f32 %v2369_v38, %v20490_v55  ;;  %v2391_v16 = vadd.f32 %v2390_v28, %v20491_v41  ;;  %v2412_v6 = vadd.f32 %v2411_v25, %v20492_v56  ;;  %v20493_v48 = vld [vmem:[#allocation127_spill] sm:$0xff]  ;;  %v2454_v17 = vadd.f32 %v2453_v42, %v13872_v3  ;;  %v20494_v1 = vld [vmem:[#allocation128_spill] sm:$0xff]  ;;  %v20495_v7 = vld [vmem:[#allocation130_spill] sm:$0xff] }
 0x1e2   : > { %v2433_v9 = vadd.f32 %v2432_v62, %v20493_v48  ;;  %v2475_v33 = vadd.f32 %v2474_v29, %v20494_v1  ;;  %v2496_v14 = vadd.f32 %v2495_v13, %v20495_v7  ;;  %v20496_v50 = vld [vmem:[#allocation63_spill] sm:$0xff]  ;;  %v20498_v36 = vld [vmem:[#allocation64_spill] sm:$0xff]  ;;  %v20501_v41 = vld [vmem:[#allocation133_spill] sm:$0xff] }
 0x1e3   : > { %v2350_v8 = vadd.f32 %v2349_v53, %v20496_v50  ;;  %v20497_v47 = vld [vmem:[#allocation67_spill] sm:$0xff]  ;;  %v2392_v22 = vadd.f32 %v2391_v16, %v20498_v36  ;;  %v20499_v45 = vld [vmem:[#allocation68_spill] sm:$0xff]  ;;  %v2455_v25 = vadd.f32 %v2454_v17, %v20501_v41  ;;  %v20503_v48 = vld [vmem:[#allocation134_spill] sm:$0xff] }
 0x1e4   : > { %v2371_v24 = vadd.f32 %v2370_v30, %v20497_v47  ;;  %v2413_v38 = vadd.f32 %v2412_v6, %v20499_v45  ;;  %v20500_v55 = vld [vmem:[#allocation131_spill] sm:$0xff]  ;;  %v20502_v56 = vld [vmem:[#allocation132_spill] sm:$0xff]  ;;  %v2497_v42 = vadd.f32 %v2496_v14, %v20503_v48  ;;  %v20505_v1 = vld [vmem:[#allocation73_spill] sm:$0xff] }
 0x1e5   : > { %v2434_v28 = vadd.f32 %v2433_v9, %v20500_v55  ;;  %v2476_v62 = vadd.f32 %v2475_v33, %v20502_v56  ;;  %v20504_v3 = vld [vmem:[#allocation71_spill] sm:$0xff]  ;;  %v20506_v7 = vld [vmem:[#allocation72_spill] sm:$0xff]  ;;  %v20507_v50 = vld [vmem:[#allocation74_spill] sm:$0xff]  ;;  %v2456_v6 = vadd.f32 %v2455_v25, %v13905_v32 }
 0x1e6   : > { %v2351_v29 = vadd.f32 %v2350_v8, %v20504_v3  ;;  %v2372_v13 = vadd.f32 %v2371_v24, %v20505_v1  ;;  %v2393_v53 = vadd.f32 %v2392_v22, %v20506_v7  ;;  %v2414_v30 = vadd.f32 %v2413_v38, %v20507_v50  ;;  %v20508_v47 = vld [vmem:[#allocation135_spill] sm:$0xff]  ;;  %v20509_v45 = vld [vmem:[#allocation136_spill] sm:$0xff]  ;;  %v20510_v55 = vld [vmem:[#allocation138_spill] sm:$0xff] }
 0x1e7   : > { %v2435_v16 = vadd.f32 %v2434_v28, %v20508_v47  ;;  %v2477_v9 = vadd.f32 %v2476_v62, %v20509_v45  ;;  %v2498_v17 = vadd.f32 %v2497_v42, %v20510_v55  ;;  %v20511_v41 = vld [vmem:[#allocation75_spill] sm:$0xff]  ;;  %v20512_v56 = vld [vmem:[#allocation77_spill] sm:$0xff]  ;;  %v20513_v48 = vld [vmem:[#allocation76_spill] sm:$0xff]  ;;  %v2457_v38 = vadd.f32 %v2456_v6, %v13923_v40 }
 0x1e8   : > { %v2352_v33 = vadd.f32 %v2351_v29, %v20511_v41  ;;  %v2373_v14 = vadd.f32 %v2372_v13, %v20512_v56  ;;  %v2394_v8 = vadd.f32 %v2393_v53, %v20513_v48  ;;  %v20514_v3 = vld [vmem:[#allocation78_spill] sm:$0xff]  ;;  %v20515_v50 = vld [vmem:[#allocation140_spill] sm:$0xff] }
 0x1e9   : > { %v2415_v24 = vadd.f32 %v2414_v30, %v20514_v3  ;;  %v2436_v22 = vadd.f32 %v2435_v16, %v13917_v58  ;;  %v2478_v28 = vadd.f32 %v2477_v9, %v20515_v50  ;;  %v20516_v47 = vld [vmem:[#allocation142_spill] sm:$0xff]  ;;  %v2458_v29 = vrot.slane %v2457_v38, 4 }
 0x1ea   : > { %v2499_v25 = vadd.f32 %v2498_v17, %v20516_v47  ;;  %v2353_v32 = vrot.slane %v2352_v33, 4  ;;  %v2374_v62 = vrot.slane %v2373_v14, 4  ;;  %v2395_v45 = vrot.slane %v2394_v8, 4 }
 0x1eb   : > { %v2416_v42 = vrot.slane %v2415_v24, 4  ;;  %v2437_v55 = vrot.slane %v2436_v22, 4  ;;  %v2479_v41 = vrot.slane %v2478_v28, 4  ;;  %v2459_v16 = vadd.f32 %v2458_v29, %v2457_v38  ;;  %v20518_v29 = vld [vmem:[#allocation147_spill] sm:$0xff] }
 0x1ec   : > { %v2500_v13 = vrot.slane %v2499_v25, 4  ;;  %v2354_v56 = vadd.f32 %v2353_v32, %v2352_v33  ;;  %v2375_v53 = vadd.f32 %v2374_v62, %v2373_v14  ;;  %v2396_v48 = vadd.f32 %v2395_v45, %v2394_v8 }
 0x1ed   : > { %v2417_v30 = vadd.f32 %v2416_v42, %v2415_v24  ;;  %v2438_v3 = vadd.f32 %v2437_v55, %v2436_v22  ;;  %v2480_v58 = vadd.f32 %v2479_v41, %v2478_v28  ;;  %v2460_v7 = vrot.slane %v2459_v16, 2  ;;  %v20517_v42 = vld [vmem:[#allocation143_spill] sm:$0xff] }
 0x1ee   : > { %v2501_v6 = vadd.f32 %v2500_v13, %v2499_v25  ;;  %v2355_v40 = vrot.slane %v2354_v56, 2  ;;  %v2376_v9 = vrot.slane %v2375_v53, 2  ;;  %v2397_v50 = vrot.slane %v2396_v48, 2 }
 0x1ef   : > { %v2418_v17 = vrot.slane %v2417_v30, 2  ;;  %v2439_v47 = vrot.slane %v2438_v3, 2  ;;  %v2481_v1 = vrot.slane %v2480_v58, 2  ;;  %v2461_v33 = vadd.f32 %v2460_v7, %v2459_v16 }
 0x1f0   : > { %v2502_v36 = vrot.slane %v2501_v6, 2  ;;  %v2356_v57 = vadd.f32 %v2355_v40, %v2354_v56  ;;  %v2377_v23 = vadd.f32 %v2376_v9, %v2375_v53  ;;  %v2398_v44 = vadd.f32 %v2397_v50, %v2396_v48  ;;  %v20519_v56 = vld [vmem:[#allocation145_spill] sm:$0xff]  ;;  %v20521_v50 = vld [vmem:[#allocation144_spill] sm:$0xff] }
 0x1f1   : > { %v2419_v35 = vadd.f32 %v2418_v17, %v2417_v30  ;;  %v2440_v32 = vadd.f32 %v2439_v47, %v2438_v3  ;;  %v2482_v45 = vadd.f32 %v2481_v1, %v2480_v58  ;;  %v2462_v28 = vrot.slane %v2461_v33, 1  ;;  %v20520_v40 = vld [vmem:[#allocation149_spill] sm:$0xff]  ;;  %v20522_v47 = vld [vmem:[#allocation148_spill] sm:$0xff]  ;;  %v20523_v58 = vld [vmem:[#allocation146_spill] sm:$0xff] }
 0x1f2   : > { %v2503_v14 = vadd.f32 %v2502_v36, %v2501_v6  ;;  %v2357_v55 = vrot.slane %v2356_v57, 1  ;;  %v2378_v8 = vrot.slane %v2377_v23, 1  ;;  %v2399_v41 = vrot.slane %v2398_v44, 1  ;;  %v20524_v36 = vld [vmem:[#allocation150_spill] sm:$0xff]  ;;  %v20526_v9 = vld [vmem:[#allocation153_spill] sm:$0xff] }
 0x1f3   : > { %v2420_v24 = vrot.slane %v2419_v35, 1  ;;  %v2441_v22 = vrot.slane %v2440_v32, 1  ;;  %v2483_v25 = vrot.slane %v2482_v45, 1  ;;  %v2506_v13 = vadd.f32 %v20518_v29, %v20517_v42 }
 0x1f4   : > { %v2358_v38 = vadd.f32 %v2357_v55, %v2356_v57  ;;  %v2504_v62 = vrot.slane %v2503_v14, 1  ;;  %v2527_v48 = vadd.f32 %v20520_v40, %v20519_v56  ;;  %v2548_v7 = vadd.f32 %v20522_v47, %v20521_v50  ;;  %v20525_v57 = vld [vmem:[#allocation151_spill] sm:$0xff]  ;;  %v20527_v55 = vld [vmem:[#allocation152_spill] sm:$0xff] }
 0x1f5   : > { %v2569_v1 = vadd.f32 %v20524_v36, %v20523_v58  ;;  %v2379_v3 = vadd.f32 %v2378_v8, %v2377_v23  ;;  %v2400_v53 = vadd.f32 %v2399_v41, %v2398_v44  ;;  %v2421_v30 = vadd.f32 %v2420_v24, %v2419_v35  ;;  %v20531_v36 = vld [vmem:[#allocation156_spill] sm:$0xff]  ;;  %v20532_v44 = vld [vmem:[#allocation158_spill] sm:$0xff]  ;;  %v20533_v24 = vld [vmem:[#allocation159_spill] sm:$0xff] }
 0x1f6   : > { %v2442_v16 = vadd.f32 %v2441_v22, %v2440_v32  ;;  %v2507_v6 = vadd.f32 %v2506_v13, %v20525_v57  ;;  %v2528_v17 = vadd.f32 %v2527_v48, %v20526_v9  ;;  %v2549_v43 = vadd.f32 %v2548_v7, %v20527_v55  ;;  %v20534_v13 = vld [vmem:[#allocation161_spill] sm:$0xff]  ;;  %v20535_v7 = vld [vmem:[#allocation160_spill] sm:$0xff] }
 0x1f7   : > { %v2570_v46 = vadd.f32 %v2569_v1, %v20528_v34  ;;  %v2463_v20 = vadd.f32 %v2462_v28, %v2461_v33  ;;  %v2484_v2 = vadd.f32 %v2483_v25, %v2482_v45  ;;  %v2505_v10 = vadd.f32 %v2504_v62, %v2503_v14  ;;  %v20536_v33 = vld [vmem:[#allocation162_spill] sm:$0xff] }
 0x1f8   : > { %v2508_v21 = vadd.f32 %v2507_v6, %v20529_v27  ;;  %v2529_v18 = vadd.f32 %v2528_v17, %v20530_v26  ;;  %v2550_v23 = vadd.f32 %v2549_v43, %v20531_v36  ;;  %v2602_v32 = vcombine.low %v2358_v38, %v2379_v3  ;;  %v20537_v6 = vld [vmem:[#allocation163_spill] sm:$0xff]  ;;  %v20538_v43 = vld [vmem:[#allocation165_spill] sm:$0xff]  ;;  %v20540_v3 = vld [vmem:[#allocation166_spill] sm:$0xff] }
 0x1f9   : > { %v2571_v35 = vadd.f32 %v2570_v46, %v20532_v44  ;;  %v12723_v8 = vmov 1966171168   ;;  %v2603_v14 = vcombine.low %v2400_v53, %v2421_v30  ;;  %v2604_v28 = vcombine.low %v2442_v16, %v2463_v20  ;;  %v20539_v46 = vld [vmem:[#allocation164_spill] sm:$0xff]  ;;  %v20541_v44 = vld [vmem:[#allocation6_spill] sm:$0xff] }
 0x1fa   : > { %v2607_v41 = vunpack.c.l.s4 %v12723_v8  ;;  %v2509_v22 = vadd.f32 %v2508_v21, %v20533_v24  ;;  %v2530_v48 = vadd.f32 %v2529_v18, %v20534_v13  ;;  %v2551_v1 = vadd.f32 %v2550_v23, %v20535_v7  ;;  %v20543_v18 = vld [vmem:[#allocation167_spill] sm:$0xff]  ;;  %v20544_v23 = vld [vmem:[#allocation169_spill] sm:$0xff]  ;;  %v20546_v20 = vld [vmem:[#allocation170_spill] sm:$0xff] }
 0x1fb   : > { %v2572_v45 = vadd.f32 %v2571_v35, %v20536_v33  ;;  %v2605_v25 = vcombine.low %v2484_v2, %v2505_v10  ;;  %v20545_v35 = vld [vmem:[#allocation168_spill] sm:$0xff] }
 0x1fc   : > { %v2608_v62 = vunpack.c.0.s8 %v2607_v41  ;;  %v2510_v17 = vadd.f32 %v2509_v22, %v20537_v6  ;;  %v2531_v36 = vadd.f32 %v2530_v48, %v20538_v43  ;;  %v2552_v38 = vadd.f32 %v2551_v1, %v20539_v46  ;;  %v20547_v22 = vld [vmem:[#allocation171_spill] sm:$0xff]  ;;  %v20564_v46 = vld [vmem:[#allocation189_spill] sm:$0xff] }
 0x1fd   : > { %v2573_v8 = vadd.f32 %v2572_v45, %v20540_v3  ;;  %v20549_v45 = vld [vmem:[#allocation172_spill] sm:$0xff]  ;;  %v20554_v3 = vld [vmem:[#allocation178_spill] sm:$0xff] }
 0x1fe   : > { %v14273_v21 = vsub.s32 %v2608_v62, %v20541_v44  ;;  %v2511_v13 = vadd.f32 %v2510_v17, %v20543_v18  ;;  %v2532_v7 = vadd.f32 %v2531_v36, %v20544_v23  ;;  %v2553_v53 = vadd.f32 %v2552_v38, %v20545_v35  ;;  %v20548_v44 = vld [vmem:[#allocation173_spill] sm:$0xff]  ;;  %v20550_v17 = vld [vmem:[#allocation174_spill] sm:$0xff]  ;;  %v20551_v35 = vld [vmem:[#allocation175_spill] sm:$0xff] }
 0x1ff   : > { %v2574_v10 = vadd.f32 %v2573_v8, %v20546_v20  ;;  %v20552_v20 = vld [vmem:[#allocation177_spill] sm:$0xff]  ;;  %v20553_v18 = vld [vmem:[#allocation176_spill] sm:$0xff] }
 0x200   : > { %20542 = vst [vmem:[#allocation207_spill] sm:$0xff] %v14273_v21  ;;  %v2612_v2 = vrot.slane %v2602_v32, %v14273_v21  ;;  %v2619_v30 = vrot.slane %v2603_v14, %v14273_v21  ;;  %v2626_v16 = vrot.slane %v2604_v28, %v14273_v21  ;;  %v2633_v41 = vrot.slane %v2605_v25, %v14273_v21 }
 0x201   : > { %v2512_v48 = vadd.f32 %v2511_v13, %v20547_v22  ;;  %v2533_v1 = vadd.f32 %v2532_v7, %v20548_v44  ;;  %v2554_v62 = vadd.f32 %v2553_v53, %v20549_v45  ;;  %v2575_v36 = vadd.f32 %v2574_v10, %v20550_v17  ;;  %v2336_v22 = vld [vmem:[#allocation2] sm:$0xff]  ;;  %v20556_v53 = vld [vmem:[#allocation181_spill] sm:$0xff]  ;;  %v20557_v10 = vld [vmem:[#allocation180_spill] sm:$0xff] }
 0x202   : > { %v2634_v23 = vcombine.low %v2612_v2, %v2619_v30  ;;  %v2635_v38 = vcombine.low %v2626_v16, %v2633_v41  ;;  %v20555_v7 = vld [vmem:[#allocation179_spill] sm:$0xff]  ;;  %v20558_v30 = vld [vmem:[#allocation182_spill] sm:$0xff] }
 0x203   : > { %v2513_v8 = vadd.f32 %v2512_v48, %v20551_v35  ;;  %v2534_v32 = vadd.f32 %v2533_v1, %v20552_v20  ;;  %v2555_v14 = vadd.f32 %v2554_v62, %v20553_v18  ;;  %v2576_v28 = vadd.f32 %v2575_v36, %v20554_v3  ;;  %v20559_v48 = vld [vmem:[#allocation183_spill] sm:$0xff]  ;;  %v20560_v20 = vld [vmem:[#allocation185_spill] sm:$0xff]  ;;  %v20561_v18 = vld [vmem:[#allocation184_spill] sm:$0xff] }
 0x204   : > { %v2642_v25 = vrot.slane %v2634_v23, %v14273_v21  ;;  %v2649_v13 = vrot.slane %v2635_v38, %v14273_v21  ;;  %v20562_v3 = vld [vmem:[#allocation186_spill] sm:$0xff]  ;;  %v20563_v38 = vld [vmem:[#allocation187_spill] sm:$0xff] }
 0x205   : > { %v2514_v44 = vadd.f32 %v2513_v8, %v20555_v7  ;;  %v2535_v45 = vadd.f32 %v2534_v32, %v20556_v53  ;;  %v2556_v2 = vadd.f32 %v2555_v14, %v20557_v10  ;;  %v2577_v16 = vadd.f32 %v2576_v28, %v20558_v30  ;;  %v20565_v7 = vld [vmem:[#allocation188_spill] sm:$0xff]  ;;  %v20566_v53 = vld [vmem:[#allocation190_spill] sm:$0xff]  ;;  %v20567_v28 = vld [vmem:[#allocation191_spill] sm:$0xff] }
 0x206   : > { %v2650_v41 = vcombine.low %v2642_v25, %v2649_v13  ;;  %v20568_v13 = vld [vmem:[#allocation193_spill] sm:$0xff] }
 0x207   : > { %v2515_v1 = vadd.f32 %v2514_v44, %v20559_v48  ;;  %v2536_v62 = vadd.f32 %v2535_v45, %v20560_v20  ;;  %v2557_v36 = vadd.f32 %v2556_v2, %v20561_v18  ;;  %v2578_v23 = vadd.f32 %v2577_v16, %v20562_v3  ;;  %v20569_v48 = vld [vmem:[#allocation192_spill] sm:$0xff]  ;;  %v20570_v20 = vld [vmem:[#allocation194_spill] sm:$0xff]  ;;  %v20571_v18 = vld [vmem:[#allocation195_spill] sm:$0xff] }
 0x208   : > { %v2677_v35 = vadd.f32 %v2650_v41, %v2336_v22  ;;  %v20572_v22 = vld [vmem:[#allocation197_spill] sm:$0xff]  ;;  %v20620_v3 = vld [vmem:[#allocation27_spill] sm:$0xff] }
 0x209   : > { %v2516_v17 = vadd.f32 %v2515_v1, %v20563_v38  ;;  %v2537_v8 = vadd.f32 %v2536_v62, %v20564_v46  ;;  %v2558_v32 = vadd.f32 %v2557_v36, %v20565_v7  ;;  %v2579_v14 = vadd.f32 %v2578_v23, %v20566_v53  ;;  %v20573_v1 = vld [vmem:[#allocation196_spill] sm:$0xff]  ;;  %v20574_v62 = vld [vmem:[#allocation198_spill] sm:$0xff] }
 0x20a   : > { %2679 = vst [vmem:[#allocation2] sm:$0xff] %v2677_v35  ;;  %v20575_v23 = vld [vmem:[#allocation200_spill] sm:$0xff]  ;;  %v20613_v53 = vld [vmem:[#allocation94_spill] sm:$0xff]  ;;  %v14523_v30 = vmul.f32 %v20620_v3, %v20620_v3 }
 0x20b   : > { %v2517_v25 = vadd.f32 %v2516_v17, %v20567_v28  ;;  %v2538_v44 = vadd.f32 %v2537_v8, %v20568_v13  ;;  %v2559_v45 = vadd.f32 %v2558_v32, %v20569_v48  ;;  %v2580_v2 = vadd.f32 %v2579_v14, %v20570_v20  ;;  %v20597_v20 = vld [vmem:[#allocation22_spill] sm:$0xff]  ;;  %v20611_v13 = vld [vmem:[#allocation93_spill] sm:$0xff]  ;;  %v20612_v28 = vld [vmem:[#allocation92_spill] sm:$0xff] }
 0x20c   : > { %v14319_v32 = vmul.f32 %v13502_v52, %v13502_v52  ;;  %v14351_v52 = vmul.f32 %v13730_v19, %v13730_v19  ;;  %v14367_v19 = vmul.f32 %v20523_v58, %v20523_v58  ;;  %v2337_v7 = vld [vmem:[#allocation2 + $0x8] sm:$0xf] }
 0x20d   : > { %v2518_v16 = vadd.f32 %v2517_v25, %v20571_v18  ;;  %v2539_v41 = vadd.f32 %v2538_v44, %v20572_v22  ;;  %v2560_v38 = vadd.f32 %v2559_v45, %v20573_v1  ;;  %v2581_v46 = vadd.f32 %v2580_v2, %v20574_v62  ;;  %v20595_v22 = vld [vmem:[#allocation21_spill] sm:$0xff]  ;;  %v20596_v18 = vld [vmem:[#allocation20_spill] sm:$0xff] }
 0x20e   : > { %v14327_v2 = vmul.f32 %v13508_v60, %v13508_v60  ;;  %20579 = vst [vmem:[#allocation211_spill] sm:$0xff] %v14367_v19  ;;  %v20591_v1 = vlaneseq  ;;  %v20648_v19 = vld [vmem:[#allocation35_spill] sm:$0xff] }
 0x20f   : > { %v2519_v36 = vadd.f32 %v2518_v16, %v14097_v59  ;;  %v2540_v35 = vadd.f32 %v2539_v41, %v14103_v11  ;;  %v2561_v17 = vadd.f32 %v2560_v38, %v20575_v23  ;;  %v2582_v8 = vadd.f32 %v2581_v46, %v14105_v0  ;;  %v20582_v0 = vld [vmem:[#allocation85_spill] sm:$0xff]  ;;  %v20583_v23 = vld [vmem:[#allocation84_spill] sm:$0xff]  ;;  %v20584_v11 = vld [vmem:[#allocation86_spill] sm:$0xff] }
 0x210   : > { %v14331_v38 = vmul.f32 %v13504_v54, %v13504_v54  ;;  %v14335_v46 = vmul.f32 %v13510_v61, %v13510_v61  ;;  %v14339_v16 = vmul.f32 %v13722_v31, %v13722_v31  ;;  %v14347_v54 = vmul.f32 %v13724_v39, %v13724_v39 }
 0x211   : > { %v2520_v14 = vadd.f32 %v2519_v36, %v14109_v49  ;;  %v2541_v25 = vadd.f32 %v2540_v35, %v14115_v15  ;;  %v2562_v44 = vadd.f32 %v2561_v17, %v14111_v37  ;;  %v2583_v45 = vadd.f32 %v2582_v8, %v14117_v63 }
 0x212   : > { %v14343_v8 = vmul.f32 %v13728_v51, %v13728_v51  ;;  %v14355_v31 = vmul.f32 %v20517_v42, %v20517_v42  ;;  %v14359_v51 = vmul.f32 %v20519_v56, %v20519_v56  ;;  %v14363_v39 = vmul.f32 %v20521_v50, %v20521_v50 }
 0x213   : > { %v2521_v41 = vrot.slane %v2520_v14, 4  ;;  %v2542_v36 = vrot.slane %v2541_v25, 4  ;;  %v2563_v35 = vrot.slane %v2562_v44, 4  ;;  %v2584_v17 = vrot.slane %v2583_v45, 4 }
 0x214   : > { %20576 = vst [vmem:[#allocation208_spill] sm:$0xff] %v14355_v31  ;;  %20577 = vst [vmem:[#allocation209_spill] sm:$0xff] %v14359_v51  ;;  %v14371_v42 = vmul.f32 %v13514_v4, %v13514_v4  ;;  %v14375_v56 = vmul.f32 %v13520_v12, %v13520_v12  ;;  %v14379_v50 = vmul.f32 %v13516_v5, %v13516_v5  ;;  %vm14422_vm2 = vcmp.lt.s32.totalorder %v20591_v1, 512  ;;  %v20659_v51 = vld [vmem:[#allocation167_spill] sm:$0xff]  ;;  %v20663_v31 = vld [vmem:[#allocation168_spill] sm:$0xff] }
 0x215   : > { %v2522_v61 = vadd.f32 %v2521_v41, %v2520_v14  ;;  %v2543_v60 = vadd.f32 %v2542_v36, %v2541_v25  ;;  %v2564_v63 = vadd.f32 %v2563_v35, %v2562_v44  ;;  %v2585_v37 = vadd.f32 %v2584_v17, %v2583_v45  ;;  %20578 = vst [vmem:[#allocation210_spill] sm:$0xff] %v14363_v39  ;;  %v20580_v41 = vld [vmem:[#allocation18_spill] sm:$0xff]  ;;  %v20581_v36 = vld [vmem:[#allocation83_spill] sm:$0xff]  ;;  %v20655_v39 = vld [vmem:[#allocation104_spill] sm:$0xff] }
 0x216   : > { %v14383_v58 = vmul.f32 %v20580_v41, %v20580_v41  ;;  %v14387_v35 = vmul.f32 %v20581_v36, %v20581_v36  ;;  %v14391_v12 = vmul.f32 %v20582_v0, %v20582_v0  ;;  %v14395_v5 = vmul.f32 %v20583_v23, %v20583_v23 }
 0x217   : > { %v2523_v14 = vrot.slane %v2522_v61, 2  ;;  %v2544_v25 = vrot.slane %v2543_v60, 2  ;;  %v2565_v44 = vrot.slane %v2564_v63, 2  ;;  %v2586_v45 = vrot.slane %v2585_v37, 2 }
 0x218   : > { %v14399_v41 = vmul.f32 %v20584_v11, %v20584_v11  ;;  %v14403_v36 = vmul.f32 %v20518_v29, %v20518_v29  ;;  %v14407_v0 = vmul.f32 %v20520_v40, %v20520_v40  ;;  %v14411_v23 = vmul.f32 %v20522_v47, %v20522_v47 }
 0x219   : > { %v2524_v17 = vadd.f32 %v2523_v14, %v2522_v61  ;;  %v2545_v4 = vadd.f32 %v2544_v25, %v2543_v60  ;;  %v2566_v15 = vadd.f32 %v2565_v44, %v2564_v63  ;;  %v2587_v49 = vadd.f32 %v2586_v45, %v2585_v37  ;;  %v20588_v14 = vld [vmem:[#allocation150_spill] sm:$0xff]  ;;  %v20590_v25 = vld [vmem:[#allocation19_spill] sm:$0xff] }
 0x21a   : > { %20585 = vst [vmem:[#allocation212_spill] sm:$0xff] %v14403_v36  ;;  %20586 = vst [vmem:[#allocation213_spill] sm:$0xff] %v14407_v0  ;;  %v14415_v11 = vmul.f32 %v20588_v14, %v20588_v14  ;;  %v14419_v29 = vmul.f32 %v20590_v25, %v20590_v25  ;;  %v20592_v40 = vmov 0  ;;  %v14428_v47 = vmul.f32 %v20595_v22, %v20595_v22  ;;  %v20600_v22 = vld [vmem:[#allocation88_spill] sm:$0xff]  ;;  %v20657_v0 = vld [vmem:[#allocation106_spill] sm:$0xff] }
 0x21b   : > { %v2525_v61 = vrot.slane %v2524_v17, 1  ;;  %v2546_v60 = vrot.slane %v2545_v4, 1  ;;  %v2567_v63 = vrot.slane %v2566_v15, 1  ;;  %v2588_v37 = vrot.slane %v2587_v49, 1  ;;  %20587 = vst [vmem:[#allocation214_spill] sm:$0xff] %v14411_v23  ;;  %v20649_v23 = vld [vmem:[#allocation37_spill] sm:$0xff] }
 0x21c   : > { %20589 = vst [vmem:[#allocation215_spill] sm:$0xff] %v14415_v11  ;;  %v20593_v40 = vsel %vm14422_vm2, 4294967295, %v20592_v40  ;;  %v14432_v14 = vmul.f32 %v20596_v18, %v20596_v18  ;;  %v14436_v25 = vmul.f32 %v20597_v20, %v20597_v20  ;;  %v20601_v18 = vld [vmem:[#allocation90_spill] sm:$0xff]  ;;  %v14456_v20 = vmul.f32 %v20525_v57, %v20525_v57  ;;  %v20661_v36 = vld [vmem:[#allocation169_spill] sm:$0xff] }
 0x21d   : > { %v2526_v44 = vadd.f32 %v2525_v61, %v2524_v17  ;;  %v2547_v45 = vadd.f32 %v2546_v60, %v2545_v4  ;;  %v2568_v59 = vadd.f32 %v2567_v63, %v2566_v15  ;;  %v2589_v62 = vadd.f32 %v2588_v37, %v2587_v49  ;;  %20594 = vst [vmem:[#allocation216_spill] sm:$0xff] %v20593_v40  ;;  %v20598_v4 = vld [vmem:[#allocation87_spill] sm:$0xff]  ;;  %v20599_v17 = vld [vmem:[#allocation89_spill] sm:$0xff]  ;;  %v20646_v11 = vld [vmem:[#allocation166_spill] sm:$0xff] }
 0x21e   : > { %v14440_v15 = vmul.f32 %v20598_v4, %v20598_v4  ;;  %v14444_v61 = vmul.f32 %v20599_v17, %v20599_v17  ;;  %v14448_v60 = vmul.f32 %v20600_v22, %v20600_v22  ;;  %v14452_v63 = vmul.f32 %v20601_v18, %v20601_v18  ;;  %20602 = vst [vmem:[#allocation217_spill] sm:$0xff] %v14456_v20  ;;  %v20606_v4 = vld [vmem:[#allocation23_spill] sm:$0xff]  ;;  %v20607_v17 = vld [vmem:[#allocation25_spill] sm:$0xff]  ;;  %v20608_v22 = vld [vmem:[#allocation24_spill] sm:$0xff] }
 0x21f   : > { %v2651_v49 = vcombine.low %v2526_v44, %v2547_v45  ;;  %v2652_v1 = vcombine.low %v2568_v59, %v2589_v62  ;;  %v14460_v37 = vmul.f32 %v20526_v9, %v20526_v9  ;;  %v14464_v59 = vmul.f32 %v20527_v55, %v20527_v55  ;;  %v20609_v18 = vld [vmem:[#allocation26_spill] sm:$0xff]  ;;  %v20644_v20 = vld [vmem:[#allocation164_spill] sm:$0xff] }
 0x220   : > { %v14470_v45 = vmul.f32 %v20528_v34, %v20528_v34  ;;  %v14474_v57 = vmul.f32 %v20606_v4, %v20606_v4  ;;  %v14478_v9 = vmul.f32 %v20607_v17, %v20607_v17  ;;  %v14482_v55 = vmul.f32 %v20608_v22, %v20608_v22 }
 0x221   : > { %20603 = vst [vmem:[#allocation218_spill] sm:$0xff] %v14460_v37  ;;  %20604 = vst [vmem:[#allocation219_spill] sm:$0xff] %v14464_v59  ;;  %v2659_v62 = vrot.slane %v2651_v49, %v14273_v21  ;;  %v2666_v44 = vrot.slane %v2652_v1, %v14273_v21  ;;  %v14486_v49 = vmul.f32 %v20609_v18, %v20609_v18  ;;  %v20610_v1 = vld [vmem:[#allocation91_spill] sm:$0xff]  ;;  %v20629_v59 = vld [vmem:[#allocation161_spill] sm:$0xff] }
 0x222   : > { %20605 = vst [vmem:[#allocation220_spill] sm:$0xff] %v14470_v45  ;;  %v14490_v34 = vmul.f32 %v20610_v1, %v20610_v1  ;;  %v14494_v4 = vmul.f32 %v20611_v13, %v20611_v13  ;;  %v14498_v17 = vmul.f32 %v20612_v28, %v20612_v28  ;;  %v14502_v22 = vmul.f32 %v20613_v53, %v20613_v53  ;;  %v20618_v1 = vld [vmem:[#allocation158_spill] sm:$0xff]  ;;  %v20631_v37 = vld [vmem:[#allocation160_spill] sm:$0xff] }
 0x223   : > { %v2667_v48 = vcombine.low %v2659_v62, %v2666_v44  ;;  %v14506_v18 = vmul.f32 %v20529_v27, %v20529_v27  ;;  %v14510_v62 = vmul.f32 %v20530_v26, %v20530_v26  ;;  %v20616_v44 = vld [vmem:[#allocation156_spill] sm:$0xff]  ;;  %v14518_v28 = vmul.f32 %v20618_v1, %v20618_v1  ;;  %v20621_v27 = vld [vmem:[#allocation29_spill] sm:$0xff]  ;;  %v20624_v1 = vld [vmem:[#allocation95_spill] sm:$0xff] }
 0x224   : > { %v14514_v13 = vmul.f32 %v20616_v44, %v20616_v44  ;;  %v14527_v10 = vmul.f32 %v20621_v27, %v20621_v27  ;;  %v20622_v26 = vld [vmem:[#allocation28_spill] sm:$0xff]  ;;  %v20623_v44 = vld [vmem:[#allocation30_spill] sm:$0xff] }
 0x225   : > { %20614 = vst [vmem:[#allocation221_spill] sm:$0xff] %v14506_v18  ;;  %20615 = vst [vmem:[#allocation222_spill] sm:$0xff] %v14510_v62  ;;  %v2674_v53 = vrot.slane %v2667_v48, %v14273_v21  ;;  %v14531_v62 = vmul.f32 %v20622_v26, %v20622_v26  ;;  %v20625_v48 = vld [vmem:[#allocation97_spill] sm:$0xff]  ;;  %v20626_v18 = vld [vmem:[#allocation96_spill] sm:$0xff] }
 0x226   : > { %20617 = vst [vmem:[#allocation223_spill] sm:$0xff] %v14514_v13  ;;  %20619 = vst [vmem:[#allocation224_spill] sm:$0xff] %v14518_v28  ;;  %v14535_v13 = vmul.f32 %v20623_v44, %v20623_v44  ;;  %v14539_v28 = vmul.f32 %v20624_v1, %v20624_v1  ;;  %v14543_v3 = vmul.f32 %v20625_v48, %v20625_v48  ;;  %v20627_v45 = vld [vmem:[#allocation98_spill] sm:$0xff] }
 0x227   : > { %v14547_v27 = vmul.f32 %v20626_v18, %v20626_v18  ;;  %v2678_v21 = vadd.f32 %v2674_v53, %v2337_v7  ;;  %v14551_v26 = vmul.f32 %v20627_v45, %v20627_v45  ;;  %v14555_v44 = vmul.f32 %v20533_v24, %v20533_v24  ;;  %v20634_v7 = vld [vmem:[#allocation31_spill] sm:$0xff]  ;;  %v20635_v53 = vld [vmem:[#allocation33_spill] sm:$0xff] }
 0x228   : > { %v14559_v1 = vmul.f32 %v20629_v59, %v20629_v59  ;;  %v14563_v48 = vmul.f32 %v20631_v37, %v20631_v37  ;;  %v14567_v18 = vmul.f32 %v20536_v33, %v20536_v33  ;;  %v14571_v45 = vmul.f32 %v20634_v7, %v20634_v7  ;;  %v20636_v59 = vld [vmem:[#allocation32_spill] sm:$0xff]  ;;  %v20637_v37 = vld [vmem:[#allocation34_spill] sm:$0xff]  ;;  %v20638_v33 = vld [vmem:[#allocation99_spill] sm:$0xff] }
 0x229   : > { %20628 = vst [vmem:[#allocation225_spill] sm:$0xff] %v14555_v44  ;;  %v14575_v24 = vmul.f32 %v20635_v53, %v20635_v53  ;;  %2684 = vst.msk [vmem:[#allocation2 + $0x8] sm:$0xf] %vm14422_vm2, %v2678_v21  ;;  %v20639_v7 = vld [vmem:[#allocation101_spill] sm:$0xff]  ;;  %v20640_v53 = vld [vmem:[#allocation100_spill] sm:$0xff] }
 0x22a   : > { %20630 = vst [vmem:[#allocation226_spill] sm:$0xff] %v14559_v1  ;;  %20632 = vst [vmem:[#allocation227_spill] sm:$0xff] %v14563_v48  ;;  %v14581_v1 = vmul.f32 %v20636_v59, %v20636_v59  ;;  %v14585_v48 = vmul.f32 %v20637_v37, %v20637_v37  ;;  %v14593_v44 = vmul.f32 %v20639_v7, %v20639_v7  ;;  %v20641_v21 = vld [vmem:[#allocation102_spill] sm:$0xff] }
 0x22b   : > { %20633 = vst [vmem:[#allocation228_spill] sm:$0xff] %v14567_v18  ;;  %v14589_v18 = vmul.f32 %v20638_v33, %v20638_v33  ;;  %v14597_v40 = vmul.f32 %v20640_v53, %v20640_v53  ;;  %v14601_v59 = vmul.f32 %v20641_v21, %v20641_v21  ;;  %v14605_v37 = vmul.f32 %v20537_v6, %v20537_v6 }
 0x22c   : > { %v14609_v33 = vmul.f32 %v20538_v43, %v20538_v43  ;;  %v14613_v7 = vmul.f32 %v20644_v20, %v20644_v20  ;;  %v14617_v53 = vmul.f32 %v20646_v11, %v20646_v11  ;;  %v14621_v21 = vmul.f32 %v20648_v19, %v20648_v19 }
 0x22d   : > { %20642 = vst [vmem:[#allocation229_spill] sm:$0xff] %v14605_v37  ;;  %v14625_v6 = vmul.f32 %v20649_v23, %v20649_v23  ;;  %v20650_v37 = vld [vmem:[#allocation36_spill] sm:$0xff]  ;;  %v14645_v23 = vmul.f32 %v20655_v39, %v20655_v39 }
 0x22e   : > { %20643 = vst [vmem:[#allocation230_spill] sm:$0xff] %v14609_v33  ;;  %20645 = vst [vmem:[#allocation231_spill] sm:$0xff] %v14613_v7  ;;  %v14629_v43 = vmul.f32 %v20650_v37, %v20650_v37  ;;  %v20651_v33 = vld [vmem:[#allocation38_spill] sm:$0xff]  ;;  %v20652_v7 = vld [vmem:[#allocation103_spill] sm:$0xff]  ;;  %v14649_v37 = vmul.f32 %v20657_v0, %v20657_v0 }
 0x22f   : > { %20647 = vst [vmem:[#allocation232_spill] sm:$0xff] %v14617_v53  ;;  %v14633_v20 = vmul.f32 %v20651_v33, %v20651_v33  ;;  %v14637_v11 = vmul.f32 %v20652_v7, %v20652_v7  ;;  %v20653_v53 = vld [vmem:[#allocation105_spill] sm:$0xff]  ;;  %20656 = vst [vmem:[#allocation234_spill] sm:$0xff] %v14645_v23  ;;  %v14653_v33 = vmul.f32 %v20659_v51, %v20659_v51  ;;  %v20667_v23 = vld [vmem:[#allocation39_spill] sm:$0xff] }
 0x230   : > { %v14641_v19 = vmul.f32 %v20653_v53, %v20653_v53  ;;  %20658 = vst [vmem:[#allocation235_spill] sm:$0xff] %v14649_v37  ;;  %v14657_v7 = vmul.f32 %v20661_v36, %v20661_v36  ;;  %v14661_v53 = vmul.f32 %v20663_v31, %v20663_v31  ;;  %v14669_v0 = vmul.f32 %v20667_v23, %v20667_v23  ;;  %v20669_v37 = vld [vmem:[#allocation41_spill] sm:$0xff] }
 0x231   : > { %20660 = vst [vmem:[#allocation236_spill] sm:$0xff] %v14653_v33  ;;  %v14673_v51 = vmul.f32 %v20669_v37, %v20669_v37  ;;  %v20671_v33 = vld [vmem:[#allocation40_spill] sm:$0xff] }
 0x232   : > { %20654 = vst [vmem:[#allocation233_spill] sm:$0xff] %v14641_v19  ;;  %20662 = vst [vmem:[#allocation237_spill] sm:$0xff] %v14657_v7  ;;  %v20665_v19 = vld [vmem:[#allocation170_spill] sm:$0xff]  ;;  %v14677_v36 = vmul.f32 %v20671_v33, %v20671_v33 }
 0x233   : > { %20664 = vst [vmem:[#allocation238_spill] sm:$0xff] %v14661_v53  ;;  %v14665_v39 = vmul.f32 %v20665_v19, %v20665_v19  ;;  %20668 = vst [vmem:[#allocation240_spill] sm:$0xff] %v14669_v0  ;;  %v20673_v7 = vld [vmem:[#allocation42_spill] sm:$0xff]  ;;  %v20675_v53 = vld [vmem:[#allocation107_spill] sm:$0xff] }
 0x234   : > { %20670 = vst [vmem:[#allocation241_spill] sm:$0xff] %v14673_v51  ;;  %20672 = vst [vmem:[#allocation242_spill] sm:$0xff] %v14677_v36  ;;  %v14681_v31 = vmul.f32 %v20673_v7, %v20673_v7  ;;  %v14685_v19 = vmul.f32 %v20675_v53, %v20675_v53  ;;  %v20679_v0 = vld [vmem:[#allocation108_spill] sm:$0xff]  ;;  %v20681_v51 = vld [vmem:[#allocation110_spill] sm:$0xff] }
 0x235   : > { %20666 = vst [vmem:[#allocation239_spill] sm:$0xff] %v14665_v39  ;;  %v20677_v39 = vld [vmem:[#allocation109_spill] sm:$0xff]  ;;  %v14693_v37 = vmul.f32 %v20679_v0, %v20679_v0  ;;  %v14697_v33 = vmul.f32 %v20681_v51, %v20681_v51  ;;  %v20683_v36 = vld [vmem:[#allocation43_spill] sm:$0xff] }
 0x236   : > { %20674 = vst [vmem:[#allocation243_spill] sm:$0xff] %v14681_v31  ;;  %20676 = vst [vmem:[#allocation244_spill] sm:$0xff] %v14685_v19  ;;  %v14689_v23 = vmul.f32 %v20677_v39, %v20677_v39  ;;  %v14701_v7 = vmul.f32 %v20683_v36, %v20683_v36  ;;  %v20685_v31 = vld [vmem:[#allocation45_spill] sm:$0xff]  ;;  %v20687_v19 = vld [vmem:[#allocation44_spill] sm:$0xff] }
 0x237   : > { %20680 = vst [vmem:[#allocation246_spill] sm:$0xff] %v14693_v37  ;;  %20682 = vst [vmem:[#allocation247_spill] sm:$0xff] %v14697_v33  ;;  %v14705_v53 = vmul.f32 %v20685_v31, %v20685_v31  ;;  %v14709_v39 = vmul.f32 %v20687_v19, %v20687_v19  ;;  %v20691_v37 = vld [vmem:[#allocation111_spill] sm:$0xff]  ;;  %v20693_v33 = vld [vmem:[#allocation113_spill] sm:$0xff] }
 0x238   : > { %20678 = vst [vmem:[#allocation245_spill] sm:$0xff] %v14689_v23  ;;  %20684 = vst [vmem:[#allocation248_spill] sm:$0xff] %v14701_v7  ;;  %v20689_v23 = vld [vmem:[#allocation46_spill] sm:$0xff]  ;;  %v14717_v51 = vmul.f32 %v20691_v37, %v20691_v37  ;;  %v14721_v36 = vmul.f32 %v20693_v33, %v20693_v33  ;;  %v20695_v7 = vld [vmem:[#allocation112_spill] sm:$0xff] }
 0x239   : > { %20686 = vst [vmem:[#allocation249_spill] sm:$0xff] %v14705_v53  ;;  %20688 = vst [vmem:[#allocation250_spill] sm:$0xff] %v14709_v39  ;;  %v14713_v0 = vmul.f32 %v20689_v23, %v20689_v23  ;;  %v14725_v31 = vmul.f32 %v20695_v7, %v20695_v7  ;;  %v20697_v53 = vld [vmem:[#allocation114_spill] sm:$0xff]  ;;  %v20699_v39 = vld [vmem:[#allocation47_spill] sm:$0xff] }
 0x23a   : > { %20692 = vst [vmem:[#allocation252_spill] sm:$0xff] %v14717_v51  ;;  %20694 = vst [vmem:[#allocation253_spill] sm:$0xff] %v14721_v36  ;;  %v14729_v19 = vmul.f32 %v20697_v53, %v20697_v53  ;;  %v14733_v23 = vmul.f32 %v20699_v39, %v20699_v39  ;;  %v20703_v51 = vld [vmem:[#allocation48_spill] sm:$0xff]  ;;  %v20705_v36 = vld [vmem:[#allocation50_spill] sm:$0xff] }
 0x23b   : > { %20690 = vst [vmem:[#allocation251_spill] sm:$0xff] %v14713_v0  ;;  %20696 = vst [vmem:[#allocation254_spill] sm:$0xff] %v14725_v31  ;;  %v20701_v0 = vld [vmem:[#allocation49_spill] sm:$0xff]  ;;  %v14741_v33 = vmul.f32 %v20703_v51, %v20703_v51  ;;  %v14745_v7 = vmul.f32 %v20705_v36, %v20705_v36  ;;  %v20707_v31 = vld [vmem:[#allocation115_spill] sm:$0xff] }
 0x23c   : > { %20698 = vst [vmem:[#allocation255_spill] sm:$0xff] %v14729_v19  ;;  %20700 = vst [vmem:[#allocation256_spill] sm:$0xff] %v14733_v23  ;;  %v14737_v37 = vmul.f32 %v20701_v0, %v20701_v0  ;;  %v14749_v53 = vmul.f32 %v20707_v31, %v20707_v31  ;;  %v20709_v19 = vld [vmem:[#allocation117_spill] sm:$0xff]  ;;  %v20711_v23 = vld [vmem:[#allocation116_spill] sm:$0xff] }
 0x23d   : > { %20704 = vst [vmem:[#allocation258_spill] sm:$0xff] %v14741_v33  ;;  %20706 = vst [vmem:[#allocation259_spill] sm:$0xff] %v14745_v7  ;;  %v14753_v39 = vmul.f32 %v20709_v19, %v20709_v19  ;;  %v14757_v0 = vmul.f32 %v20711_v23, %v20711_v23  ;;  %v20715_v33 = vld [vmem:[#allocation51_spill] sm:$0xff]  ;;  %v20717_v7 = vld [vmem:[#allocation53_spill] sm:$0xff] }
 0x23e   : > { %20702 = vst [vmem:[#allocation257_spill] sm:$0xff] %v14737_v37  ;;  %20708 = vst [vmem:[#allocation260_spill] sm:$0xff] %v14749_v53  ;;  %v20713_v37 = vld [vmem:[#allocation118_spill] sm:$0xff]  ;;  %v14765_v36 = vmul.f32 %v20715_v33, %v20715_v33  ;;  %v14769_v31 = vmul.f32 %v20717_v7, %v20717_v7  ;;  %v20719_v53 = vld [vmem:[#allocation52_spill] sm:$0xff] }
 0x23f   : > { %20710 = vst [vmem:[#allocation261_spill] sm:$0xff] %v14753_v39  ;;  %20712 = vst [vmem:[#allocation262_spill] sm:$0xff] %v14757_v0  ;;  %v14761_v51 = vmul.f32 %v20713_v37, %v20713_v37  ;;  %v14773_v19 = vmul.f32 %v20719_v53, %v20719_v53  ;;  %v20721_v39 = vld [vmem:[#allocation54_spill] sm:$0xff]  ;;  %v20723_v0 = vld [vmem:[#allocation119_spill] sm:$0xff] }
 0x240   : > { %20716 = vst [vmem:[#allocation264_spill] sm:$0xff] %v14765_v36  ;;  %20718 = vst [vmem:[#allocation265_spill] sm:$0xff] %v14769_v31  ;;  %v14777_v23 = vmul.f32 %v20721_v39, %v20721_v39  ;;  %v14781_v37 = vmul.f32 %v20723_v0, %v20723_v0  ;;  %v20727_v36 = vld [vmem:[#allocation120_spill] sm:$0xff]  ;;  %v20729_v31 = vld [vmem:[#allocation122_spill] sm:$0xff] }
 0x241   : > { %20714 = vst [vmem:[#allocation263_spill] sm:$0xff] %v14761_v51  ;;  %20720 = vst [vmem:[#allocation266_spill] sm:$0xff] %v14773_v19  ;;  %v20725_v51 = vld [vmem:[#allocation121_spill] sm:$0xff]  ;;  %v14789_v7 = vmul.f32 %v20727_v36, %v20727_v36  ;;  %v14793_v53 = vmul.f32 %v20729_v31, %v20729_v31  ;;  %v20731_v19 = vld [vmem:[#allocation55_spill] sm:$0xff] }
 0x242   : > { %20722 = vst [vmem:[#allocation267_spill] sm:$0xff] %v14777_v23  ;;  %20724 = vst [vmem:[#allocation268_spill] sm:$0xff] %v14781_v37  ;;  %v14785_v33 = vmul.f32 %v20725_v51, %v20725_v51  ;;  %v14797_v39 = vmul.f32 %v20731_v19, %v20731_v19  ;;  %v20733_v23 = vld [vmem:[#allocation57_spill] sm:$0xff]  ;;  %v20735_v37 = vld [vmem:[#allocation56_spill] sm:$0xff] }
 0x243   : > { %20728 = vst [vmem:[#allocation270_spill] sm:$0xff] %v14789_v7  ;;  %20730 = vst [vmem:[#allocation271_spill] sm:$0xff] %v14793_v53  ;;  %v14801_v0 = vmul.f32 %v20733_v23, %v20733_v23  ;;  %v14805_v51 = vmul.f32 %v20735_v37, %v20735_v37  ;;  %v20739_v7 = vld [vmem:[#allocation123_spill] sm:$0xff]  ;;  %v20741_v53 = vld [vmem:[#allocation125_spill] sm:$0xff] }
 0x244   : > { %20726 = vst [vmem:[#allocation269_spill] sm:$0xff] %v14785_v33  ;;  %20732 = vst [vmem:[#allocation272_spill] sm:$0xff] %v14797_v39  ;;  %v20737_v33 = vld [vmem:[#allocation58_spill] sm:$0xff]  ;;  %v14813_v31 = vmul.f32 %v20739_v7, %v20739_v7  ;;  %v14817_v19 = vmul.f32 %v20741_v53, %v20741_v53  ;;  %v20743_v39 = vld [vmem:[#allocation124_spill] sm:$0xff] }
 0x245   : > { %20734 = vst [vmem:[#allocation273_spill] sm:$0xff] %v14801_v0  ;;  %20736 = vst [vmem:[#allocation274_spill] sm:$0xff] %v14805_v51  ;;  %v14809_v36 = vmul.f32 %v20737_v33, %v20737_v33  ;;  %v14821_v23 = vmul.f32 %v20743_v39, %v20743_v39  ;;  %v20745_v0 = vld [vmem:[#allocation126_spill] sm:$0xff]  ;;  %v20747_v51 = vld [vmem:[#allocation59_spill] sm:$0xff] }
 0x246   : > { %20740 = vst [vmem:[#allocation276_spill] sm:$0xff] %v14813_v31  ;;  %20742 = vst [vmem:[#allocation277_spill] sm:$0xff] %v14817_v19  ;;  %v14825_v37 = vmul.f32 %v20745_v0, %v20745_v0  ;;  %v14829_v33 = vmul.f32 %v20747_v51, %v20747_v51  ;;  %v20751_v31 = vld [vmem:[#allocation60_spill] sm:$0xff]  ;;  %v20753_v19 = vld [vmem:[#allocation62_spill] sm:$0xff] }
 0x247   : > { %20738 = vst [vmem:[#allocation275_spill] sm:$0xff] %v14809_v36  ;;  %20744 = vst [vmem:[#allocation278_spill] sm:$0xff] %v14821_v23  ;;  %v20749_v36 = vld [vmem:[#allocation61_spill] sm:$0xff]  ;;  %v14837_v53 = vmul.f32 %v20751_v31, %v20751_v31  ;;  %v14841_v39 = vmul.f32 %v20753_v19, %v20753_v19  ;;  %v20755_v23 = vld [vmem:[#allocation127_spill] sm:$0xff] }
 0x248   : > { %20746 = vst [vmem:[#allocation279_spill] sm:$0xff] %v14825_v37  ;;  %20748 = vst [vmem:[#allocation280_spill] sm:$0xff] %v14829_v33  ;;  %v14833_v7 = vmul.f32 %v20749_v36, %v20749_v36  ;;  %v14845_v0 = vmul.f32 %v20755_v23, %v20755_v23  ;;  %v20757_v37 = vld [vmem:[#allocation129_spill] sm:$0xff]  ;;  %v20759_v33 = vld [vmem:[#allocation128_spill] sm:$0xff] }
 0x249   : > { %20752 = vst [vmem:[#allocation282_spill] sm:$0xff] %v14837_v53  ;;  %20754 = vst [vmem:[#allocation283_spill] sm:$0xff] %v14841_v39  ;;  %v14849_v51 = vmul.f32 %v20757_v37, %v20757_v37  ;;  %v14853_v36 = vmul.f32 %v20759_v33, %v20759_v33  ;;  %v20763_v53 = vld [vmem:[#allocation63_spill] sm:$0xff] }
 0x24a   : > { %20750 = vst [vmem:[#allocation281_spill] sm:$0xff] %v14833_v7  ;;  %20756 = vst [vmem:[#allocation284_spill] sm:$0xff] %v14845_v0  ;;  %v20761_v7 = vld [vmem:[#allocation130_spill] sm:$0xff]  ;;  %v14861_v19 = vmul.f32 %v20763_v53, %v20763_v53  ;;  %v20765_v39 = vld [vmem:[#allocation67_spill] sm:$0xff] }
 0x24b   : > { %20758 = vst [vmem:[#allocation285_spill] sm:$0xff] %v14849_v51  ;;  %20760 = vst [vmem:[#allocation286_spill] sm:$0xff] %v14853_v36  ;;  %v14857_v31 = vmul.f32 %v20761_v7, %v20761_v7  ;;  %v14865_v23 = vmul.f32 %v20765_v39, %v20765_v39  ;;  %v20767_v0 = vld [vmem:[#allocation64_spill] sm:$0xff]  ;;  %v20771_v36 = vld [vmem:[#allocation131_spill] sm:$0xff] }
 0x24c   : > { %20764 = vst [vmem:[#allocation288_spill] sm:$0xff] %v14861_v19  ;;  %v14869_v37 = vmul.f32 %v20767_v0, %v20767_v0  ;;  %v20769_v51 = vld [vmem:[#allocation68_spill] sm:$0xff]  ;;  %v14877_v7 = vmul.f32 %v20771_v36, %v20771_v36 }
 0x24d   : > { %20762 = vst [vmem:[#allocation287_spill] sm:$0xff] %v14857_v31  ;;  %20766 = vst [vmem:[#allocation289_spill] sm:$0xff] %v14865_v23  ;;  %v14873_v33 = vmul.f32 %v20769_v51, %v20769_v51  ;;  %v20773_v31 = vld [vmem:[#allocation133_spill] sm:$0xff]  ;;  %v20775_v19 = vld [vmem:[#allocation132_spill] sm:$0xff] }
 0x24e   : > { %20768 = vst [vmem:[#allocation290_spill] sm:$0xff] %v14869_v37  ;;  %20772 = vst [vmem:[#allocation292_spill] sm:$0xff] %v14877_v7  ;;  %v14881_v53 = vmul.f32 %v20773_v31, %v20773_v31  ;;  %v14885_v39 = vmul.f32 %v20775_v19, %v20775_v19  ;;  %v20777_v23 = vld [vmem:[#allocation134_spill] sm:$0xff]  ;;  %v20779_v37 = vld [vmem:[#allocation71_spill] sm:$0xff] }
 0x24f   : > { %20770 = vst [vmem:[#allocation291_spill] sm:$0xff] %v14873_v33  ;;  %v14889_v0 = vmul.f32 %v20777_v23, %v20777_v23  ;;  %v14893_v51 = vmul.f32 %v20779_v37, %v20779_v37  ;;  %v20781_v33 = vld [vmem:[#allocation73_spill] sm:$0xff]  ;;  %v20783_v7 = vld [vmem:[#allocation72_spill] sm:$0xff] }
 0x250   : > { %20774 = vst [vmem:[#allocation293_spill] sm:$0xff] %v14881_v53  ;;  %20776 = vst [vmem:[#allocation294_spill] sm:$0xff] %v14885_v39  ;;  %v14897_v36 = vmul.f32 %v20781_v33, %v20781_v33  ;;  %v14901_v31 = vmul.f32 %v20783_v7, %v20783_v7  ;;  %v20785_v53 = vld [vmem:[#allocation74_spill] sm:$0xff]  ;;  %v20787_v39 = vld [vmem:[#allocation135_spill] sm:$0xff] }
 0x251   : > { %20778 = vst [vmem:[#allocation295_spill] sm:$0xff] %v14889_v0  ;;  %20780 = vst [vmem:[#allocation296_spill] sm:$0xff] %v14893_v51  ;;  %v14905_v19 = vmul.f32 %v20785_v53, %v20785_v53  ;;  %v14909_v23 = vmul.f32 %v20787_v39, %v20787_v39  ;;  %v20789_v0 = vld [vmem:[#allocation137_spill] sm:$0xff]  ;;  %v20791_v51 = vld [vmem:[#allocation136_spill] sm:$0xff] }
 0x252   : > { %20782 = vst [vmem:[#allocation297_spill] sm:$0xff] %v14897_v36  ;;  %20784 = vst [vmem:[#allocation298_spill] sm:$0xff] %v14901_v31  ;;  %v14913_v37 = vmul.f32 %v20789_v0, %v20789_v0  ;;  %v14917_v33 = vmul.f32 %v20791_v51, %v20791_v51  ;;  %v20793_v36 = vld [vmem:[#allocation138_spill] sm:$0xff]  ;;  %v20795_v31 = vld [vmem:[#allocation75_spill] sm:$0xff] }
 0x253   : > { %20786 = vst [vmem:[#allocation299_spill] sm:$0xff] %v14905_v19  ;;  %20788 = vst [vmem:[#allocation300_spill] sm:$0xff] %v14909_v23  ;;  %v14921_v7 = vmul.f32 %v20793_v36, %v20793_v36  ;;  %v14925_v53 = vmul.f32 %v20795_v31, %v20795_v31  ;;  %v20797_v19 = vld [vmem:[#allocation77_spill] sm:$0xff]  ;;  %v20799_v23 = vld [vmem:[#allocation76_spill] sm:$0xff] }
 0x254   : > { %20790 = vst [vmem:[#allocation301_spill] sm:$0xff] %v14913_v37  ;;  %20792 = vst [vmem:[#allocation302_spill] sm:$0xff] %v14917_v33  ;;  %v14929_v39 = vmul.f32 %v20797_v19, %v20797_v19  ;;  %v14933_v0 = vmul.f32 %v20799_v23, %v20799_v23  ;;  %v20800_v37 = vld [vmem:[#allocation78_spill] sm:$0xff]  ;;  %v20802_v33 = vld [vmem:[#allocation139_spill] sm:$0xff] }
 0x255   : > { %20794 = vst [vmem:[#allocation303_spill] sm:$0xff] %v14921_v7  ;;  %20796 = vst [vmem:[#allocation304_spill] sm:$0xff] %v14925_v53  ;;  %v14937_v51 = vmul.f32 %v20800_v37, %v20800_v37  ;;  %v14941_v36 = vmul.f32 %v20802_v33, %v20802_v33  ;;  %v20803_v7 = vld [vmem:[#allocation141_spill] sm:$0xff]  ;;  %v20804_v53 = vld [vmem:[#allocation140_spill] sm:$0xff]  ;;  %v2879_v37 = vadd.f32 %v14371_v42, %v14319_v32 }
 0x256   : > { %20798 = vst [vmem:[#allocation305_spill] sm:$0xff] %v14929_v39  ;;  %v14945_v31 = vmul.f32 %v20803_v7, %v20803_v7  ;;  %v14949_v19 = vmul.f32 %v20804_v53, %v20804_v53  ;;  %v20806_v39 = vld [vmem:[#allocation142_spill] sm:$0xff]  ;;  %v2921_v33 = vadd.f32 %v14379_v50, %v14331_v38  ;;  %v2942_v7 = vadd.f32 %v14383_v58, %v14335_v46 }
 0x257   : > { %20801 = vst [vmem:[#allocation306_spill] sm:$0xff] %v14937_v51  ;;  %v14953_v23 = vmul.f32 %v20806_v39, %v20806_v39  ;;  %v2900_v51 = vadd.f32 %v14375_v56, %v14327_v2  ;;  %v2963_v53 = vadd.f32 %v14387_v35, %v14339_v16  ;;  %v2880_v39 = vadd.f32 %v2879_v37, %v14419_v29  ;;  %v20817_v37 = vld [vmem:[#allocation248_spill] sm:$0xff] }
 0x258   : > { %20805 = vst [vmem:[#allocation307_spill] sm:$0xff] %v14949_v19  ;;  %v2984_v19 = vadd.f32 %v14391_v12, %v14343_v8  ;;  %v3005_v32 = vadd.f32 %v14395_v5, %v14347_v54  ;;  %v3026_v2 = vadd.f32 %v14399_v41, %v14351_v52  ;;  %v2922_v38 = vadd.f32 %v2921_v33, %v14432_v14  ;;  %v20818_v33 = vld [vmem:[#allocation249_spill] sm:$0xff] }
 0x259   : > { %20807 = vst [vmem:[#allocation308_spill] sm:$0xff] %v14953_v23  ;;  %v2901_v23 = vadd.f32 %v2900_v51, %v14428_v47  ;;  %v2943_v46 = vadd.f32 %v2942_v7, %v14436_v25  ;;  %v2964_v42 = vadd.f32 %v2963_v53, %v14440_v15  ;;  %v2881_v12 = vadd.f32 %v2880_v39, %v14474_v57  ;;  %v20814_v51 = vld [vmem:[#allocation243_spill] sm:$0xff]  ;;  %v20819_v53 = vld [vmem:[#allocation246_spill] sm:$0xff] }
 0x25a   : > { %v2985_v16 = vadd.f32 %v2984_v19, %v14444_v61  ;;  %v3006_v56 = vadd.f32 %v3005_v32, %v14448_v60  ;;  %v3027_v50 = vadd.f32 %v3026_v2, %v14452_v63  ;;  %v2923_v54 = vadd.f32 %v2922_v38, %v14482_v55  ;;  %v20815_v19 = vld [vmem:[#allocation244_spill] sm:$0xff]  ;;  %v20820_v32 = vld [vmem:[#allocation247_spill] sm:$0xff]  ;;  %v20821_v38 = vld [vmem:[#allocation250_spill] sm:$0xff] }
 0x25b   : > { %v2902_v8 = vadd.f32 %v2901_v23, %v14478_v9  ;;  %v2944_v52 = vadd.f32 %v2943_v46, %v14486_v49  ;;  %v2965_v5 = vadd.f32 %v2964_v42, %v14490_v34  ;;  %v2882_v35 = vadd.f32 %v2881_v12, %v14523_v30  ;;  %v20816_v23 = vld [vmem:[#allocation245_spill] sm:$0xff]  ;;  %v20822_v42 = vld [vmem:[#allocation251_spill] sm:$0xff]  ;;  %v20823_v12 = vld [vmem:[#allocation252_spill] sm:$0xff] }
 0x25c   : > { %v2986_v58 = vadd.f32 %v2985_v16, %v14494_v4  ;;  %v3007_v29 = vadd.f32 %v3006_v56, %v14498_v17  ;;  %v3028_v47 = vadd.f32 %v3027_v50, %v14502_v22  ;;  %v2924_v14 = vadd.f32 %v2923_v54, %v14531_v62  ;;  %v20824_v56 = vld [vmem:[#allocation253_spill] sm:$0xff]  ;;  %v20825_v54 = vld [vmem:[#allocation256_spill] sm:$0xff] }
 0x25d   : > { %v2903_v41 = vadd.f32 %v2902_v8, %v14527_v10  ;;  %v2945_v25 = vadd.f32 %v2944_v52, %v14535_v13  ;;  %v2966_v15 = vadd.f32 %v2965_v5, %v14539_v28  ;;  %v2883_v60 = vadd.f32 %v2882_v35, %v14571_v45  ;;  %v20826_v5 = vld [vmem:[#allocation257_spill] sm:$0xff]  ;;  %v20827_v35 = vld [vmem:[#allocation254_spill] sm:$0xff] }
 0x25e   : > { %v2987_v61 = vadd.f32 %v2986_v58, %v14543_v3  ;;  %v3008_v30 = vadd.f32 %v3007_v29, %v14547_v27  ;;  %v3029_v10 = vadd.f32 %v3028_v47, %v14551_v26  ;;  %v2925_v57 = vadd.f32 %v2924_v14, %v14581_v1  ;;  %v20808_v3 = vld [vmem:[#allocation233_spill] sm:$0xff]  ;;  %v20809_v26 = vld [vmem:[#allocation240_spill] sm:$0xff]  ;;  %v20828_v29 = vld [vmem:[#allocation255_spill] sm:$0xff] }
 0x25f   : > { %v2904_v63 = vadd.f32 %v2903_v41, %v14575_v24  ;;  %v2946_v9 = vadd.f32 %v2945_v25, %v14585_v48  ;;  %v2967_v55 = vadd.f32 %v2966_v15, %v14589_v18  ;;  %v2884_v34 = vadd.f32 %v2883_v60, %v14621_v21  ;;  %v20810_v48 = vld [vmem:[#allocation241_spill] sm:$0xff]  ;;  %v20811_v18 = vld [vmem:[#allocation234_spill] sm:$0xff]  ;;  %v20812_v24 = vld [vmem:[#allocation235_spill] sm:$0xff] }
 0x260   : > { %v2988_v49 = vadd.f32 %v2987_v61, %v14593_v44  ;;  %v3009_v17 = vadd.f32 %v3008_v30, %v14597_v40  ;;  %v3030_v22 = vadd.f32 %v3029_v10, %v14601_v59  ;;  %v2926_v62 = vadd.f32 %v2925_v57, %v14629_v43  ;;  %v20829_v14 = vld [vmem:[#allocation258_spill] sm:$0xff]  ;;  %v20830_v15 = vld [vmem:[#allocation259_spill] sm:$0xff]  ;;  %v20831_v60 = vld [vmem:[#allocation260_spill] sm:$0xff] }
 0x261   : > { %v2905_v4 = vadd.f32 %v2904_v63, %v14625_v6  ;;  %v2947_v13 = vadd.f32 %v2946_v9, %v14633_v20  ;;  %v2968_v28 = vadd.f32 %v2967_v55, %v14637_v11  ;;  %v2885_v1 = vadd.f32 %v2884_v34, %v20809_v26  ;;  %v20813_v6 = vld [vmem:[#allocation242_spill] sm:$0xff]  ;;  %v20832_v30 = vld [vmem:[#allocation261_spill] sm:$0xff]  ;;  %v20833_v57 = vld [vmem:[#allocation264_spill] sm:$0xff] }
 0x262   : > { %v2989_v27 = vadd.f32 %v2988_v49, %v20808_v3  ;;  %v3010_v45 = vadd.f32 %v3009_v17, %v20811_v18  ;;  %v3031_v21 = vadd.f32 %v3030_v22, %v20812_v24  ;;  %v2927_v40 = vadd.f32 %v2926_v62, %v20813_v6  ;;  %v20834_v55 = vld [vmem:[#allocation265_spill] sm:$0xff]  ;;  %v20835_v34 = vld [vmem:[#allocation262_spill] sm:$0xff]  ;;  %v20836_v17 = vld [vmem:[#allocation263_spill] sm:$0xff] }
 0x263   : > { %v2906_v44 = vadd.f32 %v2905_v4, %v20810_v48  ;;  %v2948_v59 = vadd.f32 %v2947_v13, %v20814_v51  ;;  %v2969_v43 = vadd.f32 %v2968_v28, %v20815_v19  ;;  %v2886_v11 = vadd.f32 %v2885_v1, %v20817_v37  ;;  %v20837_v62 = vld [vmem:[#allocation266_spill] sm:$0xff]  ;;  %v20838_v28 = vld [vmem:[#allocation267_spill] sm:$0xff]  ;;  %v20840_v1 = vld [vmem:[#allocation269_spill] sm:$0xff] }
 0x264   : > { %v2990_v20 = vadd.f32 %v2989_v27, %v20816_v23  ;;  %v3011_v39 = vadd.f32 %v3010_v45, %v20819_v53  ;;  %v3032_v2 = vadd.f32 %v3031_v21, %v20820_v32  ;;  %v2928_v46 = vadd.f32 %v2927_v40, %v20821_v38  ;;  %v20839_v27 = vld [vmem:[#allocation268_spill] sm:$0xff]  ;;  %v20842_v45 = vld [vmem:[#allocation273_spill] sm:$0xff]  ;;  %v20843_v21 = vld [vmem:[#allocation270_spill] sm:$0xff] }
 0x265   : > { %v2907_v7 = vadd.f32 %v2906_v44, %v20818_v33  ;;  %v2949_v16 = vadd.f32 %v2948_v59, %v20822_v42  ;;  %v2970_v8 = vadd.f32 %v2969_v43, %v20823_v12  ;;  %v2887_v52 = vadd.f32 %v2886_v11, %v20825_v54  ;;  %v20841_v44 = vld [vmem:[#allocation272_spill] sm:$0xff]  ;;  %v20844_v40 = vld [vmem:[#allocation271_spill] sm:$0xff]  ;;  %v20845_v59 = vld [vmem:[#allocation274_spill] sm:$0xff] }
 0x266   : > { %v2991_v50 = vadd.f32 %v2990_v20, %v20824_v56  ;;  %v3012_v41 = vadd.f32 %v3011_v39, %v20827_v35  ;;  %v3033_v47 = vadd.f32 %v3032_v2, %v20828_v29  ;;  %v2929_v25 = vadd.f32 %v2928_v46, %v20829_v14  ;;  %v20846_v43 = vld [vmem:[#allocation275_spill] sm:$0xff]  ;;  %v20847_v20 = vld [vmem:[#allocation276_spill] sm:$0xff]  ;;  %v20848_v11 = vld [vmem:[#allocation277_spill] sm:$0xff] }
 0x267   : > { %v2908_v58 = vadd.f32 %v2907_v7, %v20826_v5  ;;  %v2950_v61 = vadd.f32 %v2949_v16, %v20830_v15  ;;  %v2971_v63 = vadd.f32 %v2970_v8, %v20831_v60  ;;  %v2888_v9 = vadd.f32 %v2887_v52, %v20833_v57  ;;  %v20849_v7 = vld [vmem:[#allocation280_spill] sm:$0xff]  ;;  %v20850_v39 = vld [vmem:[#allocation281_spill] sm:$0xff]  ;;  %v20851_v2 = vld [vmem:[#allocation278_spill] sm:$0xff] }
 0x268   : > { %v2992_v10 = vadd.f32 %v2991_v50, %v20832_v30  ;;  %v3013_v4 = vadd.f32 %v3012_v41, %v20835_v34  ;;  %v3034_v22 = vadd.f32 %v3033_v47, %v20836_v17  ;;  %v2930_v13 = vadd.f32 %v2929_v25, %v20837_v62  ;;  %v20852_v46 = vld [vmem:[#allocation279_spill] sm:$0xff]  ;;  %v20853_v16 = vld [vmem:[#allocation282_spill] sm:$0xff]  ;;  %v20855_v50 = vld [vmem:[#allocation284_spill] sm:$0xff] }
 0x269   : > { %v2909_v49 = vadd.f32 %v2908_v58, %v20834_v55  ;;  %v2951_v3 = vadd.f32 %v2950_v61, %v20838_v28  ;;  %v2972_v26 = vadd.f32 %v2971_v63, %v20839_v27  ;;  %v2889_v18 = vadd.f32 %v2888_v9, %v20841_v44  ;;  %v20854_v8 = vld [vmem:[#allocation283_spill] sm:$0xff]  ;;  %v20856_v52 = vld [vmem:[#allocation285_spill] sm:$0xff]  ;;  %v20857_v58 = vld [vmem:[#allocation288_spill] sm:$0xff] }
 0x26a   : > { %v2993_v48 = vadd.f32 %v2992_v10, %v20840_v1  ;;  %v3014_v6 = vadd.f32 %v3013_v4, %v20843_v21  ;;  %v3035_v51 = vadd.f32 %v3034_v22, %v20844_v40  ;;  %v2931_v19 = vadd.f32 %v2930_v13, %v20845_v59  ;;  %v20858_v41 = vld [vmem:[#allocation289_spill] sm:$0xff]  ;;  %v20859_v47 = vld [vmem:[#allocation286_spill] sm:$0xff]  ;;  %v20860_v25 = vld [vmem:[#allocation287_spill] sm:$0xff] }
 0x26b   : > { %v2910_v24 = vadd.f32 %v2909_v49, %v20842_v45  ;;  %v2952_v23 = vadd.f32 %v2951_v3, %v20846_v43  ;;  %v2973_v37 = vadd.f32 %v2972_v26, %v20847_v20  ;;  %v2890_v53 = vadd.f32 %v2889_v18, %v20849_v7  ;;  %v20861_v61 = vld [vmem:[#allocation290_spill] sm:$0xff]  ;;  %v20862_v63 = vld [vmem:[#allocation291_spill] sm:$0xff]  ;;  %v20863_v10 = vld [vmem:[#allocation292_spill] sm:$0xff] }
 0x26c   : > { %v2994_v33 = vadd.f32 %v2993_v48, %v20848_v11  ;;  %v3015_v38 = vadd.f32 %v3014_v6, %v20851_v2  ;;  %v3036_v42 = vadd.f32 %v3035_v51, %v20852_v46  ;;  %v2932_v12 = vadd.f32 %v2931_v19, %v20853_v16  ;;  %v20864_v9 = vld [vmem:[#allocation293_spill] sm:$0xff]  ;;  %v20865_v49 = vld [vmem:[#allocation296_spill] sm:$0xff]  ;;  %v20867_v22 = vld [vmem:[#allocation294_spill] sm:$0xff] }
 0x26d   : > { %v2911_v32 = vadd.f32 %v2910_v24, %v20850_v39  ;;  %v2953_v56 = vadd.f32 %v2952_v23, %v20854_v8  ;;  %v2974_v54 = vadd.f32 %v2973_v37, %v20855_v50  ;;  %v2891_v35 = vadd.f32 %v2890_v53, %v20857_v58  ;;  %v20866_v4 = vld [vmem:[#allocation297_spill] sm:$0xff]  ;;  %v20868_v13 = vld [vmem:[#allocation295_spill] sm:$0xff]  ;;  %v20869_v3 = vld [vmem:[#allocation298_spill] sm:$0xff] }
 0x26e   : > { %v2995_v5 = vadd.f32 %v2994_v33, %v20856_v52  ;;  %v3016_v14 = vadd.f32 %v3015_v38, %v20859_v47  ;;  %v3037_v15 = vadd.f32 %v3036_v42, %v20860_v25  ;;  %v2933_v60 = vadd.f32 %v2932_v12, %v20861_v61  ;;  %v20870_v26 = vld [vmem:[#allocation299_spill] sm:$0xff]  ;;  %v20871_v48 = vld [vmem:[#allocation300_spill] sm:$0xff]  ;;  %v20872_v18 = vld [vmem:[#allocation301_spill] sm:$0xff] }
 0x26f   : > { %v2912_v29 = vadd.f32 %v2911_v32, %v20858_v41  ;;  %v2954_v30 = vadd.f32 %v2953_v56, %v20862_v63  ;;  %v2975_v57 = vadd.f32 %v2974_v54, %v20863_v10  ;;  %v2892_v34 = vadd.f32 %v2891_v35, %v20865_v49  ;;  %v20873_v24 = vld [vmem:[#allocation304_spill] sm:$0xff]  ;;  %v20874_v6 = vld [vmem:[#allocation305_spill] sm:$0xff]  ;;  %v20875_v51 = vld [vmem:[#allocation302_spill] sm:$0xff] }
 0x270   : > { %v2996_v55 = vadd.f32 %v2995_v5, %v20864_v9  ;;  %v3017_v62 = vadd.f32 %v3016_v14, %v20867_v22  ;;  %v3038_v28 = vadd.f32 %v3037_v15, %v20868_v13  ;;  %v2934_v27 = vadd.f32 %v2933_v60, %v20869_v3  ;;  %v20876_v19 = vld [vmem:[#allocation303_spill] sm:$0xff]  ;;  %v20877_v20 = vld [vmem:[#allocation306_spill] sm:$0xff]  ;;  %v20879_v2 = vld [vmem:[#allocation308_spill] sm:$0xff] }
 0x271   : > { %v2913_v17 = vadd.f32 %v2912_v29, %v20866_v4  ;;  %v2955_v1 = vadd.f32 %v2954_v30, %v20870_v26  ;;  %v2976_v44 = vadd.f32 %v2975_v57, %v20871_v48  ;;  %v2893_v21 = vadd.f32 %v2892_v34, %v20873_v24  ;;  %v20878_v39 = vld [vmem:[#allocation307_spill] sm:$0xff] }
 0x272   : > { %v2997_v45 = vadd.f32 %v2996_v55, %v20872_v18  ;;  %v3018_v59 = vadd.f32 %v3017_v62, %v20875_v51  ;;  %v3039_v43 = vadd.f32 %v3038_v28, %v20876_v19  ;;  %v2935_v23 = vadd.f32 %v2934_v27, %v14933_v0  ;;  %v20882_v51 = vld [vmem:[#allocation209_spill] sm:$0xff] }
 0x273   : > { %v2914_v40 = vadd.f32 %v2913_v17, %v20874_v6  ;;  %v2956_v37 = vadd.f32 %v2955_v1, %v20877_v20  ;;  %v2977_v11 = vadd.f32 %v2976_v44, %v14941_v36  ;;  %v2894_v7 = vrot.slane %v2893_v21, 4  ;;  %v20881_v6 = vld [vmem:[#allocation212_spill] sm:$0xff] }
 0x274   : > { %v2998_v33 = vadd.f32 %v2997_v45, %v14945_v31  ;;  %v3019_v32 = vadd.f32 %v3018_v59, %v20878_v39  ;;  %v3040_v38 = vadd.f32 %v3039_v43, %v20879_v2  ;;  %v2936_v46 = vrot.slane %v2935_v23, 4  ;;  %v20883_v59 = vld [vmem:[#allocation213_spill] sm:$0xff]  ;;  %v20884_v43 = vld [vmem:[#allocation210_spill] sm:$0xff] }
 0x275   : > { %v2915_v53 = vrot.slane %v2914_v40, 4  ;;  %v2957_v42 = vrot.slane %v2956_v37, 4  ;;  %v2978_v16 = vrot.slane %v2977_v11, 4  ;;  %v2895_v8 = vadd.f32 %v2894_v7, %v2893_v21  ;;  %v20880_v21 = vld [vmem:[#allocation208_spill] sm:$0xff]  ;;  %v20888_v39 = vld [vmem:[#allocation217_spill] sm:$0xff]  ;;  %v20889_v2 = vld [vmem:[#allocation218_spill] sm:$0xff] }
 0x276   : > { %v2999_v12 = vrot.slane %v2998_v33, 4  ;;  %v3020_v50 = vrot.slane %v3019_v32, 4  ;;  %v3041_v0 = vrot.slane %v3040_v38, 4  ;;  %v2937_v54 = vadd.f32 %v2936_v46, %v2935_v23  ;;  %v20885_v23 = vld [vmem:[#allocation214_spill] sm:$0xff] }
 0x277   : > { %v2916_v56 = vadd.f32 %v2915_v53, %v2914_v40  ;;  %v2958_v52 = vadd.f32 %v2957_v42, %v2956_v37  ;;  %v2979_v5 = vadd.f32 %v2978_v16, %v2977_v11  ;;  %v2896_v58 = vrot.slane %v2895_v8, 2  ;;  %v20886_v37 = vld [vmem:[#allocation211_spill] sm:$0xff] }
 0x278   : > { %v3000_v36 = vadd.f32 %v2999_v12, %v2998_v33  ;;  %v3021_v35 = vadd.f32 %v3020_v50, %v3019_v32  ;;  %v3042_v41 = vadd.f32 %v3041_v0, %v3040_v38  ;;  %v2938_v29 = vrot.slane %v2937_v54, 2  ;;  %v20887_v11 = vld [vmem:[#allocation215_spill] sm:$0xff] }
 0x279   : > { %v2917_v31 = vrot.slane %v2916_v56, 2  ;;  %v2959_v47 = vrot.slane %v2958_v52, 2  ;;  %v2980_v14 = vrot.slane %v2979_v5, 2  ;;  %v2897_v15 = vadd.f32 %v2896_v58, %v2895_v8  ;;  %v20890_v16 = vld [vmem:[#allocation219_spill] sm:$0xff]  ;;  %v20891_v8 = vld [vmem:[#allocation220_spill] sm:$0xff] }
 0x27a   : > { %v3001_v25 = vrot.slane %v3000_v36, 2  ;;  %v3022_v60 = vrot.slane %v3021_v35, 2  ;;  %v3043_v63 = vrot.slane %v3042_v41, 2  ;;  %v2939_v30 = vadd.f32 %v2938_v29, %v2937_v54  ;;  %v20892_v50 = vld [vmem:[#allocation207_spill] sm:$0xff] }
 0x27b   : > { %v2918_v61 = vadd.f32 %v2917_v31, %v2916_v56  ;;  %v2960_v10 = vadd.f32 %v2959_v47, %v2958_v52  ;;  %v2981_v57 = vadd.f32 %v2980_v14, %v2979_v5  ;;  %v2898_v55 = vrot.slane %v2897_v15, 1  ;;  %v20893_v52 = vld [vmem:[#allocation221_spill] sm:$0xff]  ;;  %v20896_v47 = vld [vmem:[#allocation223_spill] sm:$0xff] }
 0x27c   : > { %v3002_v9 = vadd.f32 %v3001_v25, %v3000_v36  ;;  %v3023_v34 = vadd.f32 %v3022_v60, %v3021_v35  ;;  %v3044_v4 = vadd.f32 %v3043_v63, %v3042_v41  ;;  %v2940_v17 = vrot.slane %v2939_v30, 1  ;;  %v20894_v36 = vld [vmem:[#allocation222_spill] sm:$0xff]  ;;  %v20895_v41 = vld [vmem:[#allocation171_spill] sm:$0xff]  ;;  %v20897_v25 = vld [vmem:[#allocation224_spill] sm:$0xff] }
 0x27d   : > { %v2919_v49 = vrot.slane %v2918_v61, 1  ;;  %v2961_v22 = vrot.slane %v2960_v10, 1  ;;  %v2982_v62 = vrot.slane %v2981_v57, 1  ;;  %v2899_v28 = vadd.f32 %v2898_v55, %v2897_v15  ;;  %v20898_v60 = vld [vmem:[#allocation173_spill] sm:$0xff] }
 0x27e   : > { %v3003_v13 = vrot.slane %v3002_v9, 1  ;;  %v3024_v27 = vrot.slane %v3023_v34, 1  ;;  %v3045_v26 = vrot.slane %v3044_v4, 1  ;;  %v2941_v1 = vadd.f32 %v2940_v17, %v2939_v30  ;;  %v20899_v30 = vld [vmem:[#allocation225_spill] sm:$0xff] }
 0x27f   : > { %v2920_v3 = vadd.f32 %v2919_v49, %v2918_v61  ;;  %v2962_v48 = vadd.f32 %v2961_v22, %v2960_v10  ;;  %v2983_v44 = vadd.f32 %v2982_v62, %v2981_v57  ;;  %v3047_v40 = vadd.f32 %v20881_v6, %v20880_v21  ;;  %v20900_v57 = vld [vmem:[#allocation226_spill] sm:$0xff]  ;;  %v20901_v49 = vld [vmem:[#allocation172_spill] sm:$0xff]  ;;  %v20908_v21 = vld [vmem:[#allocation177_spill] sm:$0xff] }
 0x280   : > { %v3004_v18 = vadd.f32 %v3003_v13, %v3002_v9  ;;  %v3025_v45 = vadd.f32 %v3024_v27, %v3023_v34  ;;  %v3046_v24 = vadd.f32 %v3045_v26, %v3044_v4  ;;  %v3068_v19 = vadd.f32 %v20883_v59, %v20882_v51  ;;  %v20902_v4 = vld [vmem:[#allocation227_spill] sm:$0xff]  ;;  %v20903_v22 = vld [vmem:[#allocation228_spill] sm:$0xff]  ;;  %v20905_v27 = vld [vmem:[#allocation229_spill] sm:$0xff] }
 0x281   : > { %v3089_v20 = vadd.f32 %v20885_v23, %v20884_v43  ;;  %v3110_v33 = vadd.f32 %v20887_v11, %v20886_v37  ;;  %v3143_v7 = vcombine.low %v2899_v28, %v2920_v3  ;;  %v3144_v53 = vcombine.low %v2941_v1, %v2962_v48  ;;  %v20904_v28 = vld [vmem:[#allocation174_spill] sm:$0xff]  ;;  %v20910_v59 = vld [vmem:[#allocation232_spill] sm:$0xff]  ;;  %v20913_v11 = vld [vmem:[#allocation237_spill] sm:$0xff] }
 0x282   : > { %v3048_v32 = vadd.f32 %v3047_v40, %v20888_v39  ;;  %v3069_v38 = vadd.f32 %v3068_v19, %v20889_v2  ;;  %v3145_v46 = vcombine.low %v2983_v44, %v3004_v18  ;;  %v3146_v42 = vcombine.low %v3025_v45, %v3046_v24  ;;  %v20906_v1 = vld [vmem:[#allocation230_spill] sm:$0xff]  ;;  %v2685_v18 = vld [vmem:[#allocation3] sm:$0xff]  ;;  %v20907_v45 = vld [vmem:[#allocation175_spill] sm:$0xff] }
 0x283   : > { %v3090_v12 = vadd.f32 %v3089_v20, %v20890_v16  ;;  %v3111_v56 = vadd.f32 %v3110_v33, %v20891_v8  ;;  %v3153_v0 = vrot.slane %v3143_v7, %v20892_v50  ;;  %v3160_v54 = vrot.slane %v3144_v53, %v20892_v50  ;;  %v20909_v40 = vld [vmem:[#allocation231_spill] sm:$0xff]  ;;  %v20911_v43 = vld [vmem:[#allocation176_spill] sm:$0xff]  ;;  %v20914_v53 = vld [vmem:[#allocation178_spill] sm:$0xff] }
 0x284   : > { %v3049_v5 = vadd.f32 %v3048_v32, %v20893_v52  ;;  %v3070_v58 = vadd.f32 %v3069_v38, %v20894_v36  ;;  %v3167_v31 = vrot.slane %v3145_v46, %v20892_v50  ;;  %v3174_v35 = vrot.slane %v3146_v42, %v20892_v50  ;;  %v20912_v20 = vld [vmem:[#allocation236_spill] sm:$0xff]  ;;  %v20915_v32 = vld [vmem:[#allocation179_spill] sm:$0xff]  ;;  %v20916_v38 = vld [vmem:[#allocation238_spill] sm:$0xff] }
 0x285   : > { %v2779_v29 = vmul.f32 %v20895_v41, %v20895_v41  ;;  %v3091_v14 = vadd.f32 %v3090_v12, %v20896_v47  ;;  %v3112_v15 = vadd.f32 %v3111_v56, %v20897_v25  ;;  %v3175_v61 = vcombine.low %v3153_v0, %v3160_v54  ;;  %v20917_v42 = vld [vmem:[#allocation239_spill] sm:$0xff]  ;;  %v20918_v12 = vld [vmem:[#allocation181_spill] sm:$0xff]  ;;  %v20919_v52 = vld [vmem:[#allocation180_spill] sm:$0xff] }
 0x286   : > { %v2780_v63 = vmul.f32 %v20898_v60, %v20898_v60  ;;  %v3050_v10 = vadd.f32 %v3049_v5, %v20899_v30  ;;  %v3071_v9 = vadd.f32 %v3070_v58, %v20900_v57  ;;  %v3176_v55 = vcombine.low %v3167_v31, %v3174_v35  ;;  %v20920_v36 = vld [vmem:[#allocation182_spill] sm:$0xff]  ;;  %v20921_v41 = vld [vmem:[#allocation183_spill] sm:$0xff] }
 0x287   : > { %v2781_v34 = vmul.f32 %v20901_v49, %v20901_v49  ;;  %v3092_v17 = vadd.f32 %v3091_v14, %v20902_v4  ;;  %v3113_v62 = vadd.f32 %v3112_v15, %v20903_v22  ;;  %v3183_v13 = vrot.slane %v3175_v61, %v20892_v50  ;;  %v20922_v14 = vld [vmem:[#allocation185_spill] sm:$0xff]  ;;  %v20927_v22 = vld [vmem:[#allocation188_spill] sm:$0xff] }
 0x288   : > { %v2782_v3 = vmul.f32 %v20904_v28, %v20904_v28  ;;  %v3051_v26 = vadd.f32 %v3050_v10, %v20905_v27  ;;  %v3072_v48 = vadd.f32 %v3071_v9, %v20906_v1  ;;  %v3190_v44 = vrot.slane %v3176_v55, %v20892_v50  ;;  %v20925_v9 = vld [vmem:[#allocation187_spill] sm:$0xff]  ;;  %v20926_v49 = vld [vmem:[#allocation189_spill] sm:$0xff] }
 0x289   : > { %v2791_v24 = vmul.f32 %v20907_v45, %v20907_v45  ;;  %v2792_v6 = vmul.f32 %v20908_v21, %v20908_v21  ;;  %v3093_v51 = vadd.f32 %v3092_v17, %v20909_v40  ;;  %v3114_v19 = vadd.f32 %v3113_v62, %v20910_v59 }
 0x28a   : > { %v2793_v23 = vmul.f32 %v20911_v43, %v20911_v43  ;;  %v3052_v37 = vadd.f32 %v3051_v26, %v20912_v20  ;;  %v3073_v33 = vadd.f32 %v3072_v48, %v20913_v11  ;;  %v3191_v7 = vcombine.low %v3183_v13, %v3190_v44  ;;  %v20928_v13 = vld [vmem:[#allocation190_spill] sm:$0xff]  ;;  %v20929_v26 = vld [vmem:[#allocation191_spill] sm:$0xff]  ;;  %v20930_v48 = vld [vmem:[#allocation193_spill] sm:$0xff] }
 0x28b   : > { %v2794_v39 = vmul.f32 %v20914_v53, %v20914_v53  ;;  %v2803_v2 = vmul.f32 %v20915_v32, %v20915_v32  ;;  %v3094_v46 = vadd.f32 %v3093_v51, %v20916_v38  ;;  %v3115_v16 = vadd.f32 %v3114_v19, %v20917_v42  ;;  %v20933_v19 = vld [vmem:[#allocation195_spill] sm:$0xff]  ;;  %v20936_v53 = vld [vmem:[#allocation198_spill] sm:$0xff]  ;;  %v20938_v42 = vld [vmem:[#allocation201_spill] sm:$0xff] }
 0x28c   : > { %v2804_v8 = vmul.f32 %v20918_v12, %v20918_v12  ;;  %v3053_v56 = vadd.f32 %v3052_v37, %v2779_v29  ;;  %v3074_v0 = vadd.f32 %v3073_v33, %v2780_v63  ;;  %v3218_v54 = vadd.f32 %v3191_v7, %v2685_v18  ;;  %v20923_v29 = vld [vmem:[#allocation184_spill] sm:$0xff]  ;;  %v20924_v63 = vld [vmem:[#allocation186_spill] sm:$0xff]  ;;  %v20937_v38 = vld [vmem:[#allocation199_spill] sm:$0xff] }
 0x28d   : > { %v2805_v5 = vmul.f32 %v20919_v52, %v20919_v52  ;;  %v2806_v58 = vmul.f32 %v20920_v36, %v20920_v36  ;;  %v3095_v31 = vadd.f32 %v3094_v46, %v2781_v34  ;;  %v3116_v35 = vadd.f32 %v3115_v16, %v2782_v3  ;;  %v20935_v33 = vld [vmem:[#allocation196_spill] sm:$0xff] }
 0x28e   : > { %v2815_v47 = vmul.f32 %v20921_v41, %v20921_v41  ;;  %v2816_v25 = vmul.f32 %v20922_v14, %v20922_v14  ;;  %v3054_v15 = vadd.f32 %v3053_v56, %v2791_v24  ;;  %v3075_v61 = vadd.f32 %v3074_v0, %v2792_v6  ;;  %3220 = vst [vmem:[#allocation3] sm:$0xff] %v3218_v54  ;;  %v20931_v24 = vld [vmem:[#allocation192_spill] sm:$0xff]  ;;  %v20932_v6 = vld [vmem:[#allocation194_spill] sm:$0xff] }
 0x28f   : > { %v2817_v60 = vmul.f32 %v20923_v29, %v20923_v29  ;;  %v2818_v30 = vmul.f32 %v20924_v63, %v20924_v63  ;;  %v3096_v10 = vadd.f32 %v3095_v31, %v2793_v23  ;;  %v3117_v57 = vadd.f32 %v3116_v35, %v2794_v39  ;;  %v20934_v23 = vld [vmem:[#allocation197_spill] sm:$0xff]  ;;  %v20939_v56 = vld [vmem:[#allocation200_spill] sm:$0xff]  ;;  %v20940_v54 = vld [vmem:[#allocation202_spill] sm:$0xff] }
 0x290   : > { %v2827_v55 = vmul.f32 %v20925_v9, %v20925_v9  ;;  %v2828_v34 = vmul.f32 %v20926_v49, %v20926_v49  ;;  %v3055_v4 = vadd.f32 %v3054_v15, %v2803_v2  ;;  %v3076_v17 = vadd.f32 %v3075_v61, %v2804_v8  ;;  %v20942_v35 = vld [vmem:[#allocation205_spill] sm:$0xff]  ;;  %v20944_v61 = vld [vmem:[#allocation206_spill] sm:$0xff] }
 0x291   : > { %v2829_v62 = vmul.f32 %v20927_v22, %v20927_v22  ;;  %v2830_v28 = vmul.f32 %v20928_v13, %v20928_v13  ;;  %v3097_v3 = vadd.f32 %v3096_v10, %v2805_v5  ;;  %v3118_v27 = vadd.f32 %v3117_v57, %v2806_v58  ;;  %v20941_v58 = vld [vmem:[#allocation203_spill] sm:$0xff] }
 0x292   : > { %v2839_v1 = vmul.f32 %v20929_v26, %v20929_v26  ;;  %v2840_v44 = vmul.f32 %v20930_v48, %v20930_v48  ;;  %v3056_v18 = vadd.f32 %v3055_v4, %v2815_v47  ;;  %v3077_v45 = vadd.f32 %v3076_v17, %v2816_v25  ;;  %v20943_v25 = vld [vmem:[#allocation204_spill] sm:$0xff] }
 0x293   : > { %v2841_v21 = vmul.f32 %v20931_v24, %v20931_v24  ;;  %v2842_v40 = vmul.f32 %v20932_v6, %v20932_v6  ;;  %v3098_v51 = vadd.f32 %v3097_v3, %v2817_v60  ;;  %v3119_v59 = vadd.f32 %v3118_v27, %v2818_v30 }
 0x294   : > { %v2851_v43 = vmul.f32 %v20933_v19, %v20933_v19  ;;  %v2852_v20 = vmul.f32 %v20934_v23, %v20934_v23  ;;  %v3057_v37 = vadd.f32 %v3056_v18, %v2827_v55  ;;  %v3078_v11 = vadd.f32 %v3077_v45, %v2828_v34 }
 0x295   : > { %v2853_v7 = vmul.f32 %v20935_v33, %v20935_v33  ;;  %v2854_v39 = vmul.f32 %v20936_v53, %v20936_v53  ;;  %v3099_v32 = vadd.f32 %v3098_v51, %v2829_v62  ;;  %v3120_v2 = vadd.f32 %v3119_v59, %v2830_v28 }
 0x296   : > { %v2863_v46 = vmul.f32 %v20937_v38, %v20937_v38  ;;  %v2864_v16 = vmul.f32 %v20938_v42, %v20938_v42  ;;  %v3058_v12 = vadd.f32 %v3057_v37, %v2839_v1  ;;  %v3079_v8 = vadd.f32 %v3078_v11, %v2840_v44 }
 0x297   : > { %v2865_v0 = vmul.f32 %v20939_v56, %v20939_v56  ;;  %v2866_v52 = vmul.f32 %v20940_v54, %v20940_v54  ;;  %v3100_v5 = vadd.f32 %v3099_v32, %v2841_v21  ;;  %v3121_v36 = vadd.f32 %v3120_v2, %v2842_v40  ;;  %v2686_v32 = vld [vmem:[#allocation3 + $0x8] sm:$0xf] }
 0x298   : > { %v2875_v31 = vmul.f32 %v20941_v58, %v20941_v58  ;;  %v2876_v41 = vmul.f32 %v20942_v35, %v20942_v35  ;;  %v3059_v47 = vadd.f32 %v3058_v12, %v2851_v43  ;;  %v3080_v14 = vadd.f32 %v3079_v8, %v2852_v20 }
 0x299   : > { %v2877_v15 = vmul.f32 %v20943_v25, %v20943_v25  ;;  %v2878_v29 = vmul.f32 %v20944_v61, %v20944_v61  ;;  %v3101_v60 = vadd.f32 %v3100_v5, %v2853_v7  ;;  %v3122_v63 = vadd.f32 %v3121_v36, %v2854_v39 }
 0x29a   : > { %v3060_v30 = vadd.f32 %v3059_v47, %v2863_v46  ;;  %v3081_v10 = vadd.f32 %v3080_v14, %v2864_v16 }
 0x29b   : > { %v3102_v57 = vadd.f32 %v3101_v60, %v2865_v0  ;;  %v3123_v9 = vadd.f32 %v3122_v63, %v2866_v52 }
 0x29c   : > { %v3061_v55 = vadd.f32 %v3060_v30, %v2875_v31  ;;  %v3082_v49 = vadd.f32 %v3081_v10, %v2876_v41 }
 0x29d   : > { %v3103_v34 = vadd.f32 %v3102_v57, %v2877_v15  ;;  %v3124_v4 = vadd.f32 %v3123_v9, %v2878_v29 }
 0x29e   : > { %v3062_v17 = vrot.slane %v3061_v55, 4  ;;  %v3083_v22 = vrot.slane %v3082_v49, 4 }
 0x29f   : > { %v3104_v62 = vrot.slane %v3103_v34, 4  ;;  %v3125_v13 = vrot.slane %v3124_v4, 4 }
 0x2a0   : > { %v3063_v28 = vadd.f32 %v3062_v17, %v3061_v55  ;;  %v3084_v3 = vadd.f32 %v3083_v22, %v3082_v49 }
 0x2a1   : > { %v3105_v27 = vadd.f32 %v3104_v62, %v3103_v34  ;;  %v3126_v26 = vadd.f32 %v3125_v13, %v3124_v4 }
 0x2a2   : > { %v3064_v1 = vrot.slane %v3063_v28, 2  ;;  %v3085_v48 = vrot.slane %v3084_v3, 2 }
 0x2a3   : > { %v3106_v44 = vrot.slane %v3105_v27, 2  ;;  %v3127_v18 = vrot.slane %v3126_v26, 2 }
 0x2a4   : > { %v3065_v45 = vadd.f32 %v3064_v1, %v3063_v28  ;;  %v3086_v24 = vadd.f32 %v3085_v48, %v3084_v3 }
 0x2a5   : > { %v3107_v21 = vadd.f32 %v3106_v44, %v3105_v27  ;;  %v3128_v6 = vadd.f32 %v3127_v18, %v3126_v26 }
 0x2a6   : > { %v3066_v40 = vrot.slane %v3065_v45, 1  ;;  %v3087_v51 = vrot.slane %v3086_v24, 1 }
 0x2a7   : > { %v3108_v59 = vrot.slane %v3107_v21, 1  ;;  %v3129_v19 = vrot.slane %v3128_v6, 1 }
 0x2a8   : > { %v3067_v43 = vadd.f32 %v3066_v40, %v3065_v45  ;;  %v3088_v23 = vadd.f32 %v3087_v51, %v3086_v24 }
 0x2a9   : > { %v3109_v20 = vadd.f32 %v3108_v59, %v3107_v21  ;;  %v3130_v37 = vadd.f32 %v3129_v19, %v3128_v6 }
 0x2aa   : > { %v3192_v11 = vcombine.low %v3067_v43, %v3088_v23 }
 0x2ab   : > { %v3193_v33 = vcombine.low %v3109_v20, %v3130_v37 }
 0x2ac   : > { %v3200_v7 = vrot.slane %v3192_v11, %v20892_v50 }
 0x2ad   : > { %v3207_v53 = vrot.slane %v3193_v33, %v20892_v50 }
 0x2af   : > { %v3208_v39 = vcombine.low %v3200_v7, %v3207_v53 }
 0x2b1   : > { %v3215_v2 = vrot.slane %v3208_v39, %v20892_v50 }
 0x2b3   : > { %v3219_v38 = vadd.f32 %v3215_v2, %v2686_v32 }
 0x2b5   : > { %3221 = vst.msk [vmem:[#allocation3 + $0x8] sm:$0xf] %vm14422_vm2, %v3219_v38 }
 0x2b6 PF: > { %p3222_p6 = scmp.eq.s32.totalorder %s12712_s17, 1 }
 0x2b8   : > { %3226 = sbr.rel (!%p3222_p6) target bundleno = 1868 (0x74c), region = 76 }
 0x2bd   : > { %v15198_v42 = vld [vmem:[%s19686_s3 + $0xf8] sm:$0xff]  ;;  %v15220_v8 = vld [vmem:[%s19686_s3 + $0xf0] sm:$0xff]  ;;  %v15242_v52 = vld [vmem:[%s19686_s3 + $0xe8] sm:$0xff]  ;;  %vm12725_vm3 = vmmov 0   ;;  %vm5378_vm4 = vcmask 261120   ;;  %vm7765_vm5 = vcmask 519168  }
 0x2be   : > { %v15203_v16 = vld [vmem:[%s19686_s3 + $0x1f8] sm:$0xff]  ;;  %10845 = vmatprep.subr.mxu0 %v15198_v42  ;;  %v15225_v56 = vld [vmem:[%s19686_s3 + $0x1f0] sm:$0xff]  ;;  %v15249_v5 = vld [vmem:[%s19686_s3 + $0x1e8] sm:$0xff]  ;;  %vm5453_vm6 = vcmask 516096  }
 0x2bf   : > { %v15208_v50 = vld [vmem:[%s19686_s3 + $0x78] sm:$0xff]  ;;  %10880 = vmatprep.subr.mxu1 %v15203_v16  ;;  %v15232_v0 = vld [vmem:[%s19686_s3 + $0x70] sm:$0xff]  ;;  %v15254_v36 = vld [vmem:[%s19686_s3 + $0x68] sm:$0xff] }
 0x2c0   : > { %v15215_v12 = vld [vmem:[%s19686_s3 + $0x178] sm:$0xff]  ;;  %10846 = vmatpush3.msra.mxu0 %v15208_v50  ;;  %v15237_v54 = vld [vmem:[%s19686_s3 + $0x170] sm:$0xff]  ;;  %v15259_v58 = vld [vmem:[%s19686_s3 + $0x168] sm:$0xff] }
 0x2c1   : > { %10881 = vmatpush3.msra.mxu1 %v15215_v12  ;;  %10847 = vmatprep.subr.mxu0 %v15220_v8  ;;  %v15266_v31 = vld [vmem:[%s19686_s3 + $0xe0] sm:$0xff]  ;;  %v15290_v14 = vld [vmem:[%s19686_s3 + $0xd8] sm:$0xff]  ;;  %v15314_v29 = vld [vmem:[%s19686_s3 + $0xd0] sm:$0xff] }
 0x2c2   : > { %10882 = vmatprep.subr.mxu1 %v15225_v56  ;;  %10848 = vmatpush3.msra.mxu0 %v15232_v0  ;;  %v15271_v35 = vld [vmem:[%s19686_s3 + $0x1e0] sm:$0xff]  ;;  %v15295_v25 = vld [vmem:[%s19686_s3 + $0x1d8] sm:$0xff]  ;;  %v15319_v60 = vld [vmem:[%s19686_s3 + $0x1d0] sm:$0xff] }
 0x2c3   : > { %10883 = vmatpush3.msra.mxu1 %v15237_v54  ;;  %10849 = vmatprep.subr.mxu0 %v15242_v52  ;;  %v15278_v41 = vld [vmem:[%s19686_s3 + $0x60] sm:$0xff]  ;;  %v15302_v15 = vld [vmem:[%s19686_s3 + $0x58] sm:$0xff]  ;;  %v15326_v63 = vld [vmem:[%s19686_s3 + $0x50] sm:$0xff] }
 0x2c4   : > { %10884 = vmatprep.subr.mxu1 %v15249_v5  ;;  %v15283_v47 = vld [vmem:[%s19686_s3 + $0x160] sm:$0xff]  ;;  %10850 = vmatpush3.msra.mxu0 %v15254_v36  ;;  %v15307_v61 = vld [vmem:[%s19686_s3 + $0x158] sm:$0xff]  ;;  %v15331_v30 = vld [vmem:[%s19686_s3 + $0x150] sm:$0xff] }
 0x2c5   : > { %10885 = vmatpush3.msra.mxu1 %v15259_v58  ;;  %10851 = vmatprep.subr.mxu0 %v15266_v31  ;;  %v15338_v10 = vld [vmem:[%s19686_s3 + $0xc8] sm:$0xff]  ;;  %v15362_v49 = vld [vmem:[%s19686_s3 + $0xc0] sm:$0xff]  ;;  %v15386_v22 = vld [vmem:[%s19686_s3 + $0xb8] sm:$0xff] }
 0x2c6   : > { %10886 = vmatprep.subr.mxu1 %v15271_v35  ;;  %10852 = vmatpush3.msra.mxu0 %v15278_v41  ;;  %v15343_v57 = vld [vmem:[%s19686_s3 + $0x1c8] sm:$0xff]  ;;  %v15367_v34 = vld [vmem:[%s19686_s3 + $0x1c0] sm:$0xff]  ;;  %v15391_v62 = vld [vmem:[%s19686_s3 + $0x1b8] sm:$0xff] }
 0x2c7   : > { %10887 = vmatpush3.msra.mxu1 %v15283_v47  ;;  %10853 = vmatprep.subr.mxu0 %v15290_v14  ;;  %v15350_v9 = vld [vmem:[%s19686_s3 + $0x48] sm:$0xff]  ;;  %v15374_v4 = vld [vmem:[%s19686_s3 + $0x40] sm:$0xff]  ;;  %v15398_v13 = vld [vmem:[%s19686_s3 + $0x38] sm:$0xff] }
 0x2c8   : > { %10888 = vmatprep.subr.mxu1 %v15295_v25  ;;  %10854 = vmatpush3.msra.mxu0 %v15302_v15  ;;  %v15355_v55 = vld [vmem:[%s19686_s3 + $0x148] sm:$0xff]  ;;  %v15379_v17 = vld [vmem:[%s19686_s3 + $0x140] sm:$0xff]  ;;  %v15403_v28 = vld [vmem:[%s19686_s3 + $0x138] sm:$0xff] }
 0x2c9   : > { %10889 = vmatpush3.msra.mxu1 %v15307_v61  ;;  %10855 = vmatprep.subr.mxu0 %v15314_v29  ;;  %v15410_v3 = vld [vmem:[%s19686_s3 + $0xb0] sm:$0xff]  ;;  %v15434_v48 = vld [vmem:[%s19686_s3 + $0xa8] sm:$0xff]  ;;  %v15458_v24 = vld [vmem:[%s19686_s3 + $0xa0] sm:$0xff] }
 0x2ca   : > { %10890 = vmatprep.subr.mxu1 %v15319_v60  ;;  %10856 = vmatpush3.msra.mxu0 %v15326_v63  ;;  %v15415_v27 = vld [vmem:[%s19686_s3 + $0x1b0] sm:$0xff]  ;;  %v15439_v44 = vld [vmem:[%s19686_s3 + $0x1a8] sm:$0xff]  ;;  %v15463_v21 = vld [vmem:[%s19686_s3 + $0x1a0] sm:$0xff] }
 0x2cb   : > { %10891 = vmatpush3.msra.mxu1 %v15331_v30  ;;  %10857 = vmatprep.subr.mxu0 %v15338_v10  ;;  %v15422_v26 = vld [vmem:[%s19686_s3 + $0x30] sm:$0xff]  ;;  %v15446_v18 = vld [vmem:[%s19686_s3 + $0x28] sm:$0xff]  ;;  %v15470_v6 = vld [vmem:[%s19686_s3 + $0x20] sm:$0xff] }
 0x2cc   : > { %10892 = vmatprep.subr.mxu1 %v15343_v57  ;;  %10858 = vmatpush3.msra.mxu0 %v15350_v9  ;;  %v15427_v1 = vld [vmem:[%s19686_s3 + $0x130] sm:$0xff]  ;;  %v15451_v45 = vld [vmem:[%s19686_s3 + $0x128] sm:$0xff]  ;;  %v15475_v40 = vld [vmem:[%s19686_s3 + $0x120] sm:$0xff] }
 0x2cd   : > { %10893 = vmatpush3.msra.mxu1 %v15355_v55  ;;  %10859 = vmatprep.subr.mxu0 %v15362_v49  ;;  %20946 = vst [vmem:[#allocation309_spill] sm:$0xff] %v15475_v40  ;;  %v15482_v51 = vld [vmem:[%s19686_s3 + $0x98] sm:$0xff]  ;;  %v15506_v23 = vld [vmem:[%s19686_s3 + $0x90] sm:$0xff]  ;;  %v15525_v33 = vld [vmem:[#allocation2] sm:$0xff] }
 0x2ce   : > { %10894 = vmatprep.subr.mxu1 %v15367_v34  ;;  %10860 = vmatpush3.msra.mxu0 %v15374_v4  ;;  %20947 = vst [vmem:[#allocation310_spill] sm:$0xff] %v15482_v51  ;;  %v15487_v59 = vld [vmem:[%s19686_s3 + $0x198] sm:$0xff]  ;;  %20951 = vst [vmem:[#allocation314_spill] sm:$0xff] %v15506_v23  ;;  %v15511_v20 = vld [vmem:[%s19686_s3 + $0x190] sm:$0xff] }
 0x2cf   : > { %10895 = vmatpush3.msra.mxu1 %v15379_v17  ;;  %10861 = vmatprep.subr.mxu0 %v15386_v22  ;;  %20948 = vst [vmem:[#allocation311_spill] sm:$0xff] %v15487_v59  ;;  %v15494_v19 = vld [vmem:[%s19686_s3 + $0x18] sm:$0xff]  ;;  %20952 = vst [vmem:[#allocation315_spill] sm:$0xff] %v15511_v20  ;;  %v15518_v37 = vld [vmem:[%s19686_s3 + $0x10] sm:$0xff] }
 0x2d0   : > { %10896 = vmatprep.subr.mxu1 %v15391_v62  ;;  %10862 = vmatpush3.msra.mxu0 %v15398_v13  ;;  %20949 = vst [vmem:[#allocation312_spill] sm:$0xff] %v15494_v19  ;;  %v15499_v43 = vld [vmem:[%s19686_s3 + $0x118] sm:$0xff]  ;;  %20953 = vst [vmem:[#allocation316_spill] sm:$0xff] %v15518_v37  ;;  %v15523_v11 = vld [vmem:[%s19686_s3 + $0x110] sm:$0xff] }
 0x2d1   : > { %10897 = vmatpush3.msra.mxu1 %v15403_v28  ;;  %10863 = vmatprep.subr.mxu0 %v15410_v3  ;;  %20950 = vst [vmem:[#allocation313_spill] sm:$0xff] %v15499_v43  ;;  %20954 = vst [vmem:[#allocation317_spill] sm:$0xff] %v15523_v11  ;;  %v15532_v7 = vld [vmem:[%s19686_s3 + $0x88] sm:$0xff]  ;;  %v15556_v2 = vld [vmem:[%s19686_s3 + $0x80] sm:$0xff] }
 0x2d2   : > { %10898 = vmatprep.subr.mxu1 %v15415_v27  ;;  %10864 = vmatpush3.msra.mxu0 %v15422_v26  ;;  %20955 = vst [vmem:[#allocation318_spill] sm:$0xff] %v15532_v7  ;;  %v15537_v53 = vld [vmem:[%s19686_s3 + $0x188] sm:$0xff]  ;;  %20959 = vst [vmem:[#allocation322_spill] sm:$0xff] %v15556_v2  ;;  %v15561_v38 = vld [vmem:[%s19686_s3 + $0x180] sm:$0xff] }
 0x2d3   : > { %10899 = vmatpush3.msra.mxu1 %v15427_v1  ;;  %10865 = vmatprep.subr.mxu0 %v15434_v48  ;;  %20956 = vst [vmem:[#allocation319_spill] sm:$0xff] %v15537_v53  ;;  %v15544_v39 = vld [vmem:[%s19686_s3 + $0x8] sm:$0xff]  ;;  %20960 = vst [vmem:[#allocation323_spill] sm:$0xff] %v15561_v38  ;;  %v20961_v46 = vld [vmem:[#allocation9_spill] sm:$0xff] }
 0x2d4   : > { %10900 = vmatprep.subr.mxu1 %v15439_v44  ;;  %10866 = vmatpush3.msra.mxu0 %v15446_v18  ;;  %20957 = vst [vmem:[#allocation320_spill] sm:$0xff] %v15544_v39  ;;  %v15549_v32 = vld [vmem:[%s19686_s3 + $0x108] sm:$0xff] }
 0x2d5   : > { %10901 = vmatpush3.msra.mxu1 %v15451_v45  ;;  %10867 = vmatprep.subr.mxu0 %v15458_v24  ;;  %20958 = vst [vmem:[#allocation321_spill] sm:$0xff] %v15549_v32 }
 0x2d6   : > { %10902 = vmatprep.subr.mxu1 %v15463_v21  ;;  %10868 = vmatpush3.msra.mxu0 %v15470_v6 }
 0x2d7   : > { %10903 = vmatpush3.msra.mxu1 %v15475_v40  ;;  %10869 = vmatprep.subr.mxu0 %v15482_v51  ;;  %v15988_v40 = vld [vmem:[%s19686_s3 + $0x5f8] sm:$0xff] }
 0x2d8   : > { %10904 = vmatprep.subr.mxu1 %v15487_v59  ;;  %10870 = vmatpush3.msra.mxu0 %v15494_v19  ;;  %v20966_v19 = vld [vmem:[#allocation8_spill] sm:$0xff]  ;;  %21035 = vst [vmem:[#allocation390_spill] sm:$0xff] %v15988_v40 }
 0x2d9   : > { %10905 = vmatpush3.msra.mxu1 %v15499_v43  ;;  %10871 = vmatprep.subr.mxu0 %v15506_v23  ;;  %v15579_v43 = vld [vmem:[%s19686_s3 + $0x100] sm:$0xff]  ;;  %v3434_v59 = vrot.slane %v15525_v33, %v20966_v19 }
 0x2da   : > { %10906 = vmatprep.subr.mxu1 %v15511_v20  ;;  %10872 = vmatpush3.msra.mxu0 %v15518_v37  ;;  %v3430_v20 = vrot.slane %v15525_v33, %v20961_v46  ;;  %v20963_v37 = vld [vmem:[#allocation10_spill] sm:$0xff]  ;;  %20964 = vst [vmem:[#allocation325_spill] sm:$0xff] %v15579_v43 }
 0x2db   : > { %10907 = vmatpush3.msra.mxu1 %v15523_v11  ;;  %10873 = vmatprep.subr.mxu0 %v15532_v7  ;;  %v15570_v11 = vld [vmem:[%s19686_s3] sm:$0xff]  ;;  %v3438_v23 = vrot.slane %v15525_v33, %v20963_v37 }
 0x2dc   : > { %10908 = vmatprep.subr.mxu1 %v15537_v53  ;;  %20962 = vst [vmem:[#allocation324_spill] sm:$0xff] %v15570_v11  ;;  %10874 = vmatpush3.msra.mxu0 %v15544_v39  ;;  %v20965_v7 = vld [vmem:[#allocation7_spill] sm:$0xff]  ;;  %v15596_v39 = vld [vmem:[%s19686_s3 + $0x3f8] sm:$0xff] }
 0x2dd   : > { %10909 = vmatpush3.msra.mxu1 %v15549_v32  ;;  %v3426_v53 = vrot.slane %v15525_v33, %v20965_v7  ;;  %10875 = vmatprep.subr.mxu0 %v15556_v2  ;;  %v15591_v32 = vld [vmem:[%s19686_s3 + $0x2f8] sm:$0xff]  ;;  %20968 = vst [vmem:[#allocation327_spill] sm:$0xff] %v15596_v39 }
 0x2de   : > { %10910 = vmatprep.subr.mxu1 %v15561_v38  ;;  %10876 = vmatpush3.msra.mxu0 %v15570_v11  ;;  %20967 = vst [vmem:[#allocation326_spill] sm:$0xff] %v15591_v32  ;;  %v15602_v38 = vld [vmem:[%s19686_s3 + $0x278] sm:$0xff]  ;;  %v15612_v11 = vld [vmem:[%s19686_s3 + $0x2f0] sm:$0xff] }
 0x2df   : > { %3547 = vmatprep.mubr.f32.mxu0 %v3430_v20  ;;  %10911 = vmatpush3.msra.mxu1 %v15579_v43  ;;  %20969 = vst [vmem:[#allocation328_spill] sm:$0xff] %v15602_v38  ;;  %v15607_v20 = vld [vmem:[%s19686_s3 + $0x378] sm:$0xff]  ;;  %20971 = vst [vmem:[#allocation330_spill] sm:$0xff] %v15612_v11  ;;  %v15624_v43 = vld [vmem:[%s19686_s3 + $0x270] sm:$0xff] }
 0x2e0   : > { %3617 = vmatprep.mubr.f32.mxu1 %v3438_v23  ;;  %20970 = vst [vmem:[#allocation329_spill] sm:$0xff] %v15607_v20  ;;  %3548 = vmatmul.mubr.f32.vlgmr.msra.gmra.mxu0 %v3426_v53  ;;  %v15617_v23 = vld [vmem:[%s19686_s3 + $0x3f0] sm:$0xff]  ;;  %20973 = vst [vmem:[#allocation332_spill] sm:$0xff] %v15624_v43  ;;  %v15636_v53 = vld [vmem:[%s19686_s3 + $0x2e8] sm:$0xff] }
 0x2e1   : > { %3618 = vmatmul.mubr.f32.vlgmr.msra.gmra.mxu1 %v3434_v59  ;;  %20972 = vst [vmem:[#allocation331_spill] sm:$0xff] %v15617_v23  ;;  %10915 = vmatprep.subr.mxu0 %v15591_v32  ;;  %v15629_v59 = vld [vmem:[%s19686_s3 + $0x370] sm:$0xff]  ;;  %20975 = vst [vmem:[#allocation334_spill] sm:$0xff] %v15636_v53 }
 0x2e2   : > { %10950 = vmatprep.subr.mxu1 %v15596_v39  ;;  %20974 = vst [vmem:[#allocation333_spill] sm:$0xff] %v15629_v59  ;;  %10916 = vmatpush3.msra.mxu0 %v15602_v38  ;;  %v15641_v39 = vld [vmem:[%s19686_s3 + $0x3e8] sm:$0xff]  ;;  %v21028_v32 = vld [vmem:[#allocation69_spill] sm:$0xff] }
 0x2e3   : > { %10951 = vmatpush3.msra.mxu1 %v15607_v20  ;;  %20976 = vst [vmem:[#allocation335_spill] sm:$0xff] %v15641_v39  ;;  %10917 = vmatprep.subr.mxu0 %v15612_v11  ;;  %v15648_v38 = vld [vmem:[%s19686_s3 + $0x268] sm:$0xff]  ;;  %v15660_v11 = vld [vmem:[%s19686_s3 + $0x2e0] sm:$0xff]  ;;  %v3446_v2 = vrot.slane %v15525_v33, %v21028_v32 }
 0x2e4   : > { %10952 = vmatprep.subr.mxu1 %v15617_v23  ;;  %20977 = vst [vmem:[#allocation336_spill] sm:$0xff] %v15648_v38  ;;  %v15653_v20 = vld [vmem:[%s19686_s3 + $0x368] sm:$0xff]  ;;  %10918 = vmatpush3.msra.mxu0 %v15624_v43  ;;  %20979 = vst [vmem:[#allocation338_spill] sm:$0xff] %v15660_v11  ;;  %v15665_v23 = vld [vmem:[%s19686_s3 + $0x3e0] sm:$0xff] }
 0x2e5   : > { %20978 = vst [vmem:[#allocation337_spill] sm:$0xff] %v15653_v20  ;;  %10953 = vmatpush3.msra.mxu1 %v15629_v59  ;;  %20980 = vst [vmem:[#allocation339_spill] sm:$0xff] %v15665_v23  ;;  %10919 = vmatprep.subr.mxu0 %v15636_v53  ;;  %v15672_v43 = vld [vmem:[%s19686_s3 + $0x260] sm:$0xff]  ;;  %v15684_v53 = vld [vmem:[%s19686_s3 + $0x2d8] sm:$0xff] }
 0x2e6   : > { %10954 = vmatprep.subr.mxu1 %v15641_v39  ;;  %20981 = vst [vmem:[#allocation340_spill] sm:$0xff] %v15672_v43  ;;  %v15677_v59 = vld [vmem:[%s19686_s3 + $0x360] sm:$0xff]  ;;  %10920 = vmatpush3.msra.mxu0 %v15648_v38  ;;  %20983 = vst [vmem:[#allocation342_spill] sm:$0xff] %v15684_v53  ;;  %v15689_v39 = vld [vmem:[%s19686_s3 + $0x3d8] sm:$0xff] }
 0x2e7   : > { %20982 = vst [vmem:[#allocation341_spill] sm:$0xff] %v15677_v59  ;;  %10955 = vmatpush3.msra.mxu1 %v15653_v20  ;;  %20984 = vst [vmem:[#allocation343_spill] sm:$0xff] %v15689_v39  ;;  %10921 = vmatprep.subr.mxu0 %v15660_v11  ;;  %v15696_v38 = vld [vmem:[%s19686_s3 + $0x258] sm:$0xff]  ;;  %v15708_v11 = vld [vmem:[%s19686_s3 + $0x2d0] sm:$0xff] }
 0x2e8   : > { %10956 = vmatprep.subr.mxu1 %v15665_v23  ;;  %20985 = vst [vmem:[#allocation344_spill] sm:$0xff] %v15696_v38  ;;  %v15701_v20 = vld [vmem:[%s19686_s3 + $0x358] sm:$0xff]  ;;  %10922 = vmatpush3.msra.mxu0 %v15672_v43  ;;  %20987 = vst [vmem:[#allocation346_spill] sm:$0xff] %v15708_v11  ;;  %v15713_v23 = vld [vmem:[%s19686_s3 + $0x3d0] sm:$0xff] }
 0x2e9   : > { %20986 = vst [vmem:[#allocation345_spill] sm:$0xff] %v15701_v20  ;;  %10957 = vmatpush3.msra.mxu1 %v15677_v59  ;;  %20988 = vst [vmem:[#allocation347_spill] sm:$0xff] %v15713_v23  ;;  %10923 = vmatprep.subr.mxu0 %v15684_v53  ;;  %v15720_v43 = vld [vmem:[%s19686_s3 + $0x250] sm:$0xff]  ;;  %v15732_v53 = vld [vmem:[%s19686_s3 + $0x2c8] sm:$0xff] }
 0x2ea   : > { %10958 = vmatprep.subr.mxu1 %v15689_v39  ;;  %20989 = vst [vmem:[#allocation348_spill] sm:$0xff] %v15720_v43  ;;  %v15725_v59 = vld [vmem:[%s19686_s3 + $0x350] sm:$0xff]  ;;  %10924 = vmatpush3.msra.mxu0 %v15696_v38  ;;  %20991 = vst [vmem:[#allocation350_spill] sm:$0xff] %v15732_v53  ;;  %v15737_v39 = vld [vmem:[%s19686_s3 + $0x3c8] sm:$0xff] }
 0x2eb   : > { %20990 = vst [vmem:[#allocation349_spill] sm:$0xff] %v15725_v59  ;;  %10959 = vmatpush3.msra.mxu1 %v15701_v20  ;;  %20992 = vst [vmem:[#allocation351_spill] sm:$0xff] %v15737_v39  ;;  %10925 = vmatprep.subr.mxu0 %v15708_v11  ;;  %v15744_v38 = vld [vmem:[%s19686_s3 + $0x248] sm:$0xff]  ;;  %v15756_v11 = vld [vmem:[%s19686_s3 + $0x2c0] sm:$0xff] }
 0x2ec   : > { %10960 = vmatprep.subr.mxu1 %v15713_v23  ;;  %20993 = vst [vmem:[#allocation352_spill] sm:$0xff] %v15744_v38  ;;  %v15749_v20 = vld [vmem:[%s19686_s3 + $0x348] sm:$0xff]  ;;  %10926 = vmatpush3.msra.mxu0 %v15720_v43  ;;  %20995 = vst [vmem:[#allocation354_spill] sm:$0xff] %v15756_v11  ;;  %v15761_v23 = vld [vmem:[%s19686_s3 + $0x3c0] sm:$0xff] }
 0x2ed   : > { %20994 = vst [vmem:[#allocation353_spill] sm:$0xff] %v15749_v20  ;;  %10961 = vmatpush3.msra.mxu1 %v15725_v59  ;;  %20996 = vst [vmem:[#allocation355_spill] sm:$0xff] %v15761_v23  ;;  %10927 = vmatprep.subr.mxu0 %v15732_v53  ;;  %v15768_v43 = vld [vmem:[%s19686_s3 + $0x240] sm:$0xff]  ;;  %v15780_v53 = vld [vmem:[%s19686_s3 + $0x2b8] sm:$0xff] }
 0x2ee   : > { %10962 = vmatprep.subr.mxu1 %v15737_v39  ;;  %20997 = vst [vmem:[#allocation356_spill] sm:$0xff] %v15768_v43  ;;  %v15773_v59 = vld [vmem:[%s19686_s3 + $0x340] sm:$0xff]  ;;  %10928 = vmatpush3.msra.mxu0 %v15744_v38  ;;  %20999 = vst [vmem:[#allocation358_spill] sm:$0xff] %v15780_v53  ;;  %v15785_v39 = vld [vmem:[%s19686_s3 + $0x3b8] sm:$0xff] }
 0x2ef   : > { %20998 = vst [vmem:[#allocation357_spill] sm:$0xff] %v15773_v59  ;;  %10963 = vmatpush3.msra.mxu1 %v15749_v20  ;;  %21000 = vst [vmem:[#allocation359_spill] sm:$0xff] %v15785_v39  ;;  %10929 = vmatprep.subr.mxu0 %v15756_v11  ;;  %v15792_v38 = vld [vmem:[%s19686_s3 + $0x238] sm:$0xff]  ;;  %v15804_v11 = vld [vmem:[%s19686_s3 + $0x2b0] sm:$0xff] }
 0x2f0   : > { %10964 = vmatprep.subr.mxu1 %v15761_v23  ;;  %21001 = vst [vmem:[#allocation360_spill] sm:$0xff] %v15792_v38  ;;  %v15797_v20 = vld [vmem:[%s19686_s3 + $0x338] sm:$0xff]  ;;  %10930 = vmatpush3.msra.mxu0 %v15768_v43  ;;  %21003 = vst [vmem:[#allocation362_spill] sm:$0xff] %v15804_v11  ;;  %v15809_v23 = vld [vmem:[%s19686_s3 + $0x3b0] sm:$0xff] }
 0x2f1   : > { %21002 = vst [vmem:[#allocation361_spill] sm:$0xff] %v15797_v20  ;;  %10965 = vmatpush3.msra.mxu1 %v15773_v59  ;;  %21004 = vst [vmem:[#allocation363_spill] sm:$0xff] %v15809_v23  ;;  %10931 = vmatprep.subr.mxu0 %v15780_v53  ;;  %v15816_v43 = vld [vmem:[%s19686_s3 + $0x230] sm:$0xff]  ;;  %v15828_v53 = vld [vmem:[%s19686_s3 + $0x2a8] sm:$0xff] }
 0x2f2   : > { %10966 = vmatprep.subr.mxu1 %v15785_v39  ;;  %21005 = vst [vmem:[#allocation364_spill] sm:$0xff] %v15816_v43  ;;  %v15821_v59 = vld [vmem:[%s19686_s3 + $0x330] sm:$0xff]  ;;  %10932 = vmatpush3.msra.mxu0 %v15792_v38  ;;  %21007 = vst [vmem:[#allocation366_spill] sm:$0xff] %v15828_v53  ;;  %v15833_v39 = vld [vmem:[%s19686_s3 + $0x3a8] sm:$0xff] }
 0x2f3   : > { %21006 = vst [vmem:[#allocation365_spill] sm:$0xff] %v15821_v59  ;;  %10967 = vmatpush3.msra.mxu1 %v15797_v20  ;;  %21008 = vst [vmem:[#allocation367_spill] sm:$0xff] %v15833_v39  ;;  %10933 = vmatprep.subr.mxu0 %v15804_v11  ;;  %v15840_v38 = vld [vmem:[%s19686_s3 + $0x228] sm:$0xff]  ;;  %v15852_v11 = vld [vmem:[%s19686_s3 + $0x2a0] sm:$0xff] }
 0x2f4   : > { %10968 = vmatprep.subr.mxu1 %v15809_v23  ;;  %21009 = vst [vmem:[#allocation368_spill] sm:$0xff] %v15840_v38  ;;  %v15845_v20 = vld [vmem:[%s19686_s3 + $0x328] sm:$0xff]  ;;  %10934 = vmatpush3.msra.mxu0 %v15816_v43  ;;  %21011 = vst [vmem:[#allocation370_spill] sm:$0xff] %v15852_v11  ;;  %v15857_v23 = vld [vmem:[%s19686_s3 + $0x3a0] sm:$0xff] }
 0x2f5   : > { %21010 = vst [vmem:[#allocation369_spill] sm:$0xff] %v15845_v20  ;;  %10969 = vmatpush3.msra.mxu1 %v15821_v59  ;;  %21012 = vst [vmem:[#allocation371_spill] sm:$0xff] %v15857_v23  ;;  %10935 = vmatprep.subr.mxu0 %v15828_v53  ;;  %v15864_v43 = vld [vmem:[%s19686_s3 + $0x220] sm:$0xff]  ;;  %v15876_v53 = vld [vmem:[%s19686_s3 + $0x298] sm:$0xff] }
 0x2f6   : > { %10970 = vmatprep.subr.mxu1 %v15833_v39  ;;  %21013 = vst [vmem:[#allocation372_spill] sm:$0xff] %v15864_v43  ;;  %v15869_v59 = vld [vmem:[%s19686_s3 + $0x320] sm:$0xff]  ;;  %10936 = vmatpush3.msra.mxu0 %v15840_v38  ;;  %21015 = vst [vmem:[#allocation374_spill] sm:$0xff] %v15876_v53  ;;  %v15881_v39 = vld [vmem:[%s19686_s3 + $0x398] sm:$0xff] }
 0x2f7   : > { %21014 = vst [vmem:[#allocation373_spill] sm:$0xff] %v15869_v59  ;;  %10971 = vmatpush3.msra.mxu1 %v15845_v20  ;;  %21016 = vst [vmem:[#allocation375_spill] sm:$0xff] %v15881_v39  ;;  %10937 = vmatprep.subr.mxu0 %v15852_v11  ;;  %v15888_v38 = vld [vmem:[%s19686_s3 + $0x218] sm:$0xff]  ;;  %v15900_v11 = vld [vmem:[%s19686_s3 + $0x290] sm:$0xff] }
 0x2f8   : > { %10972 = vmatprep.subr.mxu1 %v15857_v23  ;;  %21017 = vst [vmem:[#allocation376_spill] sm:$0xff] %v15888_v38  ;;  %v15893_v20 = vld [vmem:[%s19686_s3 + $0x318] sm:$0xff]  ;;  %10938 = vmatpush3.msra.mxu0 %v15864_v43  ;;  %21019 = vst [vmem:[#allocation378_spill] sm:$0xff] %v15900_v11  ;;  %v15905_v23 = vld [vmem:[%s19686_s3 + $0x390] sm:$0xff] }
 0x2f9   : > { %21018 = vst [vmem:[#allocation377_spill] sm:$0xff] %v15893_v20  ;;  %10973 = vmatpush3.msra.mxu1 %v15869_v59  ;;  %21020 = vst [vmem:[#allocation379_spill] sm:$0xff] %v15905_v23  ;;  %10939 = vmatprep.subr.mxu0 %v15876_v53  ;;  %v15912_v43 = vld [vmem:[%s19686_s3 + $0x210] sm:$0xff]  ;;  %v15924_v53 = vld [vmem:[%s19686_s3 + $0x288] sm:$0xff] }
 0x2fa   : > { %10974 = vmatprep.subr.mxu1 %v15881_v39  ;;  %21021 = vst [vmem:[#allocation380_spill] sm:$0xff] %v15912_v43  ;;  %v15917_v59 = vld [vmem:[%s19686_s3 + $0x310] sm:$0xff]  ;;  %10940 = vmatpush3.msra.mxu0 %v15888_v38  ;;  %21023 = vst [vmem:[#allocation382_spill] sm:$0xff] %v15924_v53  ;;  %v15929_v39 = vld [vmem:[%s19686_s3 + $0x388] sm:$0xff] }
 0x2fb   : > { %21022 = vst [vmem:[#allocation381_spill] sm:$0xff] %v15917_v59  ;;  %10975 = vmatpush3.msra.mxu1 %v15893_v20  ;;  %21024 = vst [vmem:[#allocation383_spill] sm:$0xff] %v15929_v39  ;;  %10941 = vmatprep.subr.mxu0 %v15900_v11  ;;  %v15936_v38 = vld [vmem:[%s19686_s3 + $0x208] sm:$0xff]  ;;  %v15948_v11 = vld [vmem:[%s19686_s3 + $0x280] sm:$0xff] }
 0x2fc   : > { %10976 = vmatprep.subr.mxu1 %v15905_v23  ;;  %21025 = vst [vmem:[#allocation384_spill] sm:$0xff] %v15936_v38  ;;  %v15941_v20 = vld [vmem:[%s19686_s3 + $0x308] sm:$0xff]  ;;  %10942 = vmatpush3.msra.mxu0 %v15912_v43  ;;  %v15953_v23 = vld [vmem:[%s19686_s3 + $0x380] sm:$0xff]  ;;  %v21030_v43 = vld [vmem:[#allocation65_spill] sm:$0xff] }
 0x2fd   : > { %21026 = vst [vmem:[#allocation385_spill] sm:$0xff] %v15941_v20  ;;  %10977 = vmatpush3.msra.mxu1 %v15917_v59  ;;  %21027 = vst [vmem:[#allocation386_spill] sm:$0xff] %v15953_v23  ;;  %10943 = vmatprep.subr.mxu0 %v15924_v53  ;;  %v15962_v59 = vld [vmem:[%s19686_s3 + $0x200] sm:$0xff]  ;;  %v3442_v51 = vrot.slane %v15525_v33, %v21030_v43  ;;  %v15980_v43 = vld [vmem:[%s19686_s3 + $0x4f8] sm:$0xff] }
 0x2fe   : > { %10978 = vmatprep.subr.mxu1 %v15929_v39  ;;  %21029 = vst [vmem:[#allocation387_spill] sm:$0xff] %v15962_v59  ;;  %10944 = vmatpush3.msra.mxu0 %v15936_v38  ;;  %v15971_v32 = vld [vmem:[%s19686_s3 + $0x300] sm:$0xff]  ;;  %21033 = vst [vmem:[#allocation389_spill] sm:$0xff] %v15980_v43 }
 0x2ff   : > { %10979 = vmatpush3.msra.mxu1 %v15941_v20  ;;  %21031 = vst [vmem:[#allocation388_spill] sm:$0xff] %v15971_v32  ;;  %v21032_v53 = vld [vmem:[#allocation70_spill] sm:$0xff]  ;;  %10945 = vmatprep.subr.mxu0 %v15948_v11 }
 0x300   : > { %v3454_v39 = vrot.slane %v15525_v33, %v21032_v53  ;;  %10980 = vmatprep.subr.mxu1 %v15953_v23  ;;  %v21034_v38 = vld [vmem:[#allocation66_spill] sm:$0xff]  ;;  %10946 = vmatpush3.msra.mxu0 %v15962_v59 }
 0x301   : > { %v3450_v20 = vrot.slane %v15525_v33, %v21034_v38  ;;  %3687 = vmatprep.mubr.f32.mxu0 %v3446_v2  ;;  %10981 = vmatpush3.msra.mxu1 %v15971_v32  ;;  %v15994_v23 = vld [vmem:[%s19686_s3 + $0x478] sm:$0xff]  ;;  %v16005_v2 = vld [vmem:[%s19686_s3 + $0x4f0] sm:$0xff]  ;;  %v16361_v38 = vld [vmem:[%s19686_s3 + $0x500] sm:$0xff] }
 0x302   : > { %3688 = vmatmul.mubr.f32.vlgmr.msra.gmra.mxu0 %v3442_v51  ;;  %21036 = vst [vmem:[#allocation391_spill] sm:$0xff] %v15994_v23  ;;  %v15999_v33 = vld [vmem:[%s19686_s3 + $0x578] sm:$0xff]  ;;  %3757 = vmatprep.mubr.f32.mxu1 %v3454_v39  ;;  %21038 = vst [vmem:[#allocation393_spill] sm:$0xff] %v16005_v2  ;;  %v16010_v51 = vld [vmem:[%s19686_s3 + $0x5f0] sm:$0xff] }
 0x303   : > { %21037 = vst [vmem:[#allocation392_spill] sm:$0xff] %v15999_v33  ;;  %10985 = vmatprep.subr.mxu0 %v15980_v43  ;;  %21039 = vst [vmem:[#allocation394_spill] sm:$0xff] %v16010_v51  ;;  %11020 = vmatprep.subr.mxu1 %v15988_v40  ;;  %v16016_v32 = vld [vmem:[%s19686_s3 + $0x470] sm:$0xff]  ;;  %v16028_v43 = vld [vmem:[%s19686_s3 + $0x4e8] sm:$0xff] }
 0x304   : > { %3758 = vmatmul.mubr.f32.vlgmr.msra.gmra.mxu1 %v3450_v20  ;;  %21040 = vst [vmem:[#allocation395_spill] sm:$0xff] %v16016_v32  ;;  %v16021_v39 = vld [vmem:[%s19686_s3 + $0x570] sm:$0xff]  ;;  %10986 = vmatpush3.msra.mxu0 %v15994_v23  ;;  %21042 = vst [vmem:[#allocation397_spill] sm:$0xff] %v16028_v43  ;;  %v16033_v20 = vld [vmem:[%s19686_s3 + $0x5e8] sm:$0xff] }
 0x305   : > { %21041 = vst [vmem:[#allocation396_spill] sm:$0xff] %v16021_v39  ;;  %11021 = vmatpush3.msra.mxu1 %v15999_v33  ;;  %21043 = vst [vmem:[#allocation398_spill] sm:$0xff] %v16033_v20  ;;  %10987 = vmatprep.subr.mxu0 %v16005_v2  ;;  %v16040_v23 = vld [vmem:[%s19686_s3 + $0x468] sm:$0xff]  ;;  %v16052_v2 = vld [vmem:[%s19686_s3 + $0x4e0] sm:$0xff] }
 0x306   : > { %11022 = vmatprep.subr.mxu1 %v16010_v51  ;;  %21044 = vst [vmem:[#allocation399_spill] sm:$0xff] %v16040_v23  ;;  %v16045_v33 = vld [vmem:[%s19686_s3 + $0x568] sm:$0xff]  ;;  %10988 = vmatpush3.msra.mxu0 %v16016_v32  ;;  %21046 = vst [vmem:[#allocation401_spill] sm:$0xff] %v16052_v2  ;;  %v16057_v51 = vld [vmem:[%s19686_s3 + $0x5e0] sm:$0xff] }
 0x307   : > { %21045 = vst [vmem:[#allocation400_spill] sm:$0xff] %v16045_v33  ;;  %11023 = vmatpush3.msra.mxu1 %v16021_v39  ;;  %21047 = vst [vmem:[#allocation402_spill] sm:$0xff] %v16057_v51  ;;  %10989 = vmatprep.subr.mxu0 %v16028_v43  ;;  %v16064_v32 = vld [vmem:[%s19686_s3 + $0x460] sm:$0xff]  ;;  %v16076_v43 = vld [vmem:[%s19686_s3 + $0x4d8] sm:$0xff] }
 0x308   : > { %11024 = vmatprep.subr.mxu1 %v16033_v20  ;;  %21048 = vst [vmem:[#allocation403_spill] sm:$0xff] %v16064_v32  ;;  %v16069_v39 = vld [vmem:[%s19686_s3 + $0x560] sm:$0xff]  ;;  %10990 = vmatpush3.msra.mxu0 %v16040_v23  ;;  %21050 = vst [vmem:[#allocation405_spill] sm:$0xff] %v16076_v43  ;;  %v16081_v20 = vld [vmem:[%s19686_s3 + $0x5d8] sm:$0xff] }
 0x309   : > { %21049 = vst [vmem:[#allocation404_spill] sm:$0xff] %v16069_v39  ;;  %11025 = vmatpush3.msra.mxu1 %v16045_v33  ;;  %21051 = vst [vmem:[#allocation406_spill] sm:$0xff] %v16081_v20  ;;  %10991 = vmatprep.subr.mxu0 %v16052_v2  ;;  %v16088_v23 = vld [vmem:[%s19686_s3 + $0x458] sm:$0xff]  ;;  %v16100_v2 = vld [vmem:[%s19686_s3 + $0x4d0] sm:$0xff] }
 0x30a   : > { %11026 = vmatprep.subr.mxu1 %v16057_v51  ;;  %21052 = vst [vmem:[#allocation407_spill] sm:$0xff] %v16088_v23  ;;  %v16093_v33 = vld [vmem:[%s19686_s3 + $0x558] sm:$0xff]  ;;  %10992 = vmatpush3.msra.mxu0 %v16064_v32  ;;  %21054 = vst [vmem:[#allocation409_spill] sm:$0xff] %v16100_v2  ;;  %v16105_v51 = vld [vmem:[%s19686_s3 + $0x5d0] sm:$0xff] }
 0x30b   : > { %21053 = vst [vmem:[#allocation408_spill] sm:$0xff] %v16093_v33  ;;  %11027 = vmatpush3.msra.mxu1 %v16069_v39  ;;  %21055 = vst [vmem:[#allocation410_spill] sm:$0xff] %v16105_v51  ;;  %10993 = vmatprep.subr.mxu0 %v16076_v43  ;;  %v16112_v32 = vld [vmem:[%s19686_s3 + $0x450] sm:$0xff]  ;;  %v16124_v43 = vld [vmem:[%s19686_s3 + $0x4c8] sm:$0xff] }
 0x30c   : > { %11028 = vmatprep.subr.mxu1 %v16081_v20  ;;  %21056 = vst [vmem:[#allocation411_spill] sm:$0xff] %v16112_v32  ;;  %v16117_v39 = vld [vmem:[%s19686_s3 + $0x550] sm:$0xff]  ;;  %10994 = vmatpush3.msra.mxu0 %v16088_v23  ;;  %21058 = vst [vmem:[#allocation413_spill] sm:$0xff] %v16124_v43  ;;  %v16129_v20 = vld [vmem:[%s19686_s3 + $0x5c8] sm:$0xff] }
 0x30d   : > { %21057 = vst [vmem:[#allocation412_spill] sm:$0xff] %v16117_v39  ;;  %11029 = vmatpush3.msra.mxu1 %v16093_v33  ;;  %21059 = vst [vmem:[#allocation414_spill] sm:$0xff] %v16129_v20  ;;  %10995 = vmatprep.subr.mxu0 %v16100_v2  ;;  %v16136_v23 = vld [vmem:[%s19686_s3 + $0x448] sm:$0xff]  ;;  %v16148_v2 = vld [vmem:[%s19686_s3 + $0x4c0] sm:$0xff] }
 0x30e   : > { %11030 = vmatprep.subr.mxu1 %v16105_v51  ;;  %21060 = vst [vmem:[#allocation415_spill] sm:$0xff] %v16136_v23  ;;  %v16141_v33 = vld [vmem:[%s19686_s3 + $0x548] sm:$0xff]  ;;  %10996 = vmatpush3.msra.mxu0 %v16112_v32  ;;  %21062 = vst [vmem:[#allocation417_spill] sm:$0xff] %v16148_v2  ;;  %v16153_v51 = vld [vmem:[%s19686_s3 + $0x5c0] sm:$0xff] }
 0x30f   : > { %21061 = vst [vmem:[#allocation416_spill] sm:$0xff] %v16141_v33  ;;  %11031 = vmatpush3.msra.mxu1 %v16117_v39  ;;  %21063 = vst [vmem:[#allocation418_spill] sm:$0xff] %v16153_v51  ;;  %10997 = vmatprep.subr.mxu0 %v16124_v43  ;;  %v16160_v32 = vld [vmem:[%s19686_s3 + $0x440] sm:$0xff]  ;;  %v16172_v43 = vld [vmem:[%s19686_s3 + $0x4b8] sm:$0xff] }
 0x310   : > { %11032 = vmatprep.subr.mxu1 %v16129_v20  ;;  %21064 = vst [vmem:[#allocation419_spill] sm:$0xff] %v16160_v32  ;;  %v16165_v39 = vld [vmem:[%s19686_s3 + $0x540] sm:$0xff]  ;;  %10998 = vmatpush3.msra.mxu0 %v16136_v23  ;;  %21066 = vst [vmem:[#allocation421_spill] sm:$0xff] %v16172_v43  ;;  %v16177_v20 = vld [vmem:[%s19686_s3 + $0x5b8] sm:$0xff] }
 0x311   : > { %21065 = vst [vmem:[#allocation420_spill] sm:$0xff] %v16165_v39  ;;  %11033 = vmatpush3.msra.mxu1 %v16141_v33  ;;  %21067 = vst [vmem:[#allocation422_spill] sm:$0xff] %v16177_v20  ;;  %10999 = vmatprep.subr.mxu0 %v16148_v2  ;;  %v16184_v23 = vld [vmem:[%s19686_s3 + $0x438] sm:$0xff]  ;;  %v16196_v2 = vld [vmem:[%s19686_s3 + $0x4b0] sm:$0xff] }
 0x312   : > { %11034 = vmatprep.subr.mxu1 %v16153_v51  ;;  %21068 = vst [vmem:[#allocation423_spill] sm:$0xff] %v16184_v23  ;;  %v16189_v33 = vld [vmem:[%s19686_s3 + $0x538] sm:$0xff]  ;;  %11000 = vmatpush3.msra.mxu0 %v16160_v32  ;;  %21070 = vst [vmem:[#allocation425_spill] sm:$0xff] %v16196_v2  ;;  %v16201_v51 = vld [vmem:[%s19686_s3 + $0x5b0] sm:$0xff] }
 0x313   : > { %21069 = vst [vmem:[#allocation424_spill] sm:$0xff] %v16189_v33  ;;  %11035 = vmatpush3.msra.mxu1 %v16165_v39  ;;  %21071 = vst [vmem:[#allocation426_spill] sm:$0xff] %v16201_v51  ;;  %11001 = vmatprep.subr.mxu0 %v16172_v43  ;;  %v16208_v32 = vld [vmem:[%s19686_s3 + $0x430] sm:$0xff]  ;;  %v16220_v43 = vld [vmem:[%s19686_s3 + $0x4a8] sm:$0xff] }
 0x314   : > { %11036 = vmatprep.subr.mxu1 %v16177_v20  ;;  %21072 = vst [vmem:[#allocation427_spill] sm:$0xff] %v16208_v32  ;;  %v16213_v39 = vld [vmem:[%s19686_s3 + $0x530] sm:$0xff]  ;;  %11002 = vmatpush3.msra.mxu0 %v16184_v23  ;;  %21074 = vst [vmem:[#allocation429_spill] sm:$0xff] %v16220_v43  ;;  %v16225_v20 = vld [vmem:[%s19686_s3 + $0x5a8] sm:$0xff] }
 0x315   : > { %21073 = vst [vmem:[#allocation428_spill] sm:$0xff] %v16213_v39  ;;  %11037 = vmatpush3.msra.mxu1 %v16189_v33  ;;  %21075 = vst [vmem:[#allocation430_spill] sm:$0xff] %v16225_v20  ;;  %11003 = vmatprep.subr.mxu0 %v16196_v2  ;;  %v16232_v23 = vld [vmem:[%s19686_s3 + $0x428] sm:$0xff]  ;;  %v16244_v2 = vld [vmem:[%s19686_s3 + $0x4a0] sm:$0xff] }
 0x316   : > { %11038 = vmatprep.subr.mxu1 %v16201_v51  ;;  %21076 = vst [vmem:[#allocation431_spill] sm:$0xff] %v16232_v23  ;;  %v16237_v33 = vld [vmem:[%s19686_s3 + $0x528] sm:$0xff]  ;;  %11004 = vmatpush3.msra.mxu0 %v16208_v32  ;;  %21078 = vst [vmem:[#allocation433_spill] sm:$0xff] %v16244_v2  ;;  %v16249_v51 = vld [vmem:[%s19686_s3 + $0x5a0] sm:$0xff] }
 0x317   : > { %21077 = vst [vmem:[#allocation432_spill] sm:$0xff] %v16237_v33  ;;  %11039 = vmatpush3.msra.mxu1 %v16213_v39  ;;  %21079 = vst [vmem:[#allocation434_spill] sm:$0xff] %v16249_v51  ;;  %11005 = vmatprep.subr.mxu0 %v16220_v43  ;;  %v16256_v32 = vld [vmem:[%s19686_s3 + $0x420] sm:$0xff]  ;;  %v16268_v43 = vld [vmem:[%s19686_s3 + $0x498] sm:$0xff] }
 0x318   : > { %11040 = vmatprep.subr.mxu1 %v16225_v20  ;;  %21080 = vst [vmem:[#allocation435_spill] sm:$0xff] %v16256_v32  ;;  %v16261_v39 = vld [vmem:[%s19686_s3 + $0x520] sm:$0xff]  ;;  %11006 = vmatpush3.msra.mxu0 %v16232_v23  ;;  %21082 = vst [vmem:[#allocation437_spill] sm:$0xff] %v16268_v43  ;;  %v16273_v20 = vld [vmem:[%s19686_s3 + $0x598] sm:$0xff] }
 0x319   : > { %21081 = vst [vmem:[#allocation436_spill] sm:$0xff] %v16261_v39  ;;  %11041 = vmatpush3.msra.mxu1 %v16237_v33  ;;  %21083 = vst [vmem:[#allocation438_spill] sm:$0xff] %v16273_v20  ;;  %11007 = vmatprep.subr.mxu0 %v16244_v2  ;;  %v16280_v23 = vld [vmem:[%s19686_s3 + $0x418] sm:$0xff]  ;;  %v16292_v2 = vld [vmem:[%s19686_s3 + $0x490] sm:$0xff] }
 0x31a   : > { %11042 = vmatprep.subr.mxu1 %v16249_v51  ;;  %21084 = vst [vmem:[#allocation439_spill] sm:$0xff] %v16280_v23  ;;  %v16285_v33 = vld [vmem:[%s19686_s3 + $0x518] sm:$0xff]  ;;  %11008 = vmatpush3.msra.mxu0 %v16256_v32  ;;  %21086 = vst [vmem:[#allocation441_spill] sm:$0xff] %v16292_v2  ;;  %v16297_v51 = vld [vmem:[%s19686_s3 + $0x590] sm:$0xff] }
 0x31b   : > { %21085 = vst [vmem:[#allocation440_spill] sm:$0xff] %v16285_v33  ;;  %11043 = vmatpush3.msra.mxu1 %v16261_v39  ;;  %21087 = vst [vmem:[#allocation442_spill] sm:$0xff] %v16297_v51  ;;  %11009 = vmatprep.subr.mxu0 %v16268_v43  ;;  %v16304_v32 = vld [vmem:[%s19686_s3 + $0x410] sm:$0xff]  ;;  %v3228_v40 = vld [vmem:[#allocation2 + $0x8] sm:$0xf] }
 0x31c   : > { %11044 = vmatprep.subr.mxu1 %v16273_v20  ;;  %21088 = vst [vmem:[#allocation443_spill] sm:$0xff] %v16304_v32  ;;  %v16309_v39 = vld [vmem:[%s19686_s3 + $0x510] sm:$0xff]  ;;  %11010 = vmatpush3.msra.mxu0 %v16280_v23  ;;  %v16316_v43 = vld [vmem:[%s19686_s3 + $0x488] sm:$0xff]  ;;  %v3462_v59 = vrot.slane %v3228_v40, %v20961_v46  ;;  %21095 = vst [vmem:[#allocation450_spill] sm:$0xff] %v16361_v38 }
 0x31d   : > { %21089 = vst [vmem:[#allocation444_spill] sm:$0xff] %v16309_v39  ;;  %11045 = vmatpush3.msra.mxu1 %v16285_v33  ;;  %21090 = vst [vmem:[#allocation445_spill] sm:$0xff] %v16316_v43  ;;  %v16321_v20 = vld [vmem:[%s19686_s3 + $0x588] sm:$0xff]  ;;  %11011 = vmatprep.subr.mxu0 %v16292_v2  ;;  %v16340_v2 = vld [vmem:[%s19686_s3 + $0x480] sm:$0xff] }
 0x31e   : > { %21091 = vst [vmem:[#allocation446_spill] sm:$0xff] %v16321_v20  ;;  %11046 = vmatprep.subr.mxu1 %v16297_v51  ;;  %v16328_v23 = vld [vmem:[%s19686_s3 + $0x408] sm:$0xff]  ;;  %11012 = vmatpush3.msra.mxu0 %v16304_v32  ;;  %v16345_v51 = vld [vmem:[%s19686_s3 + $0x580] sm:$0xff]  ;;  %v3458_v32 = vrot.slane %v3228_v40, %v20965_v7 }
 0x31f   : > { %21092 = vst [vmem:[#allocation447_spill] sm:$0xff] %v16328_v23  ;;  %v16333_v33 = vld [vmem:[%s19686_s3 + $0x508] sm:$0xff]  ;;  %11047 = vmatpush3.msra.mxu1 %v16309_v39  ;;  %21093 = vst [vmem:[#allocation448_spill] sm:$0xff] %v16345_v51  ;;  %11013 = vmatprep.subr.mxu0 %v16316_v43  ;;  %v16353_v39 = vld [vmem:[%s19686_s3 + $0x400] sm:$0xff]  ;;  %v3470_v43 = vrot.slane %v3228_v40, %v20963_v37 }
 0x320   : > { %11048 = vmatprep.subr.mxu1 %v16321_v20  ;;  %21094 = vst [vmem:[#allocation449_spill] sm:$0xff] %v16353_v39  ;;  %11014 = vmatpush3.msra.mxu0 %v16328_v23  ;;  %v3466_v20 = vrot.slane %v3228_v40, %v20966_v19  ;;  %v21138_v40 = vld [vmem:[#allocation351_spill] sm:$0xff] }
 0x321   : > { %11049 = vmatpush3.msra.mxu1 %v16333_v33  ;;  %11015 = vmatprep.subr.mxu0 %v16340_v2 }
 0x322   : > { %11050 = vmatprep.subr.mxu1 %v16345_v51  ;;  %11016 = vmatpush3.msra.mxu0 %v16353_v39 }
 0x323   : > { %3827 = vmatprep.mubr.f32.mxu0 %v3462_v59  ;;  %11051 = vmatpush3.msra.mxu1 %v16361_v38  ;;  %v21141_v59 = vld [vmem:[#allocation354_spill] sm:$0xff] }
 0x324   : > { %3828 = vmatmul.mubr.f32.vlgmr.msra.gmra.mxu0 %v3458_v32  ;;  %3897 = vmatprep.mubr.f32.mxu1 %v3470_v43  ;;  %v21139_v43 = vld [vmem:[#allocation352_spill] sm:$0xff]  ;;  %v21140_v32 = vld [vmem:[#allocation353_spill] sm:$0xff] }
 0x325   : > { %11055 = vmatprep.subr.mxu0 %v15198_v42  ;;  %11090 = vmatprep.subr.mxu1 %v15203_v16  ;;  %v21096_v42 = vld [vmem:[#allocation309_spill] sm:$0xff]  ;;  %v21097_v16 = vld [vmem:[#allocation310_spill] sm:$0xff] }
 0x326   : > { %3898 = vmatmul.mubr.f32.vlgmr.msra.gmra.mxu1 %v3466_v20  ;;  %11056 = vmatpush3.msra.mxu0 %v15208_v50  ;;  %v21098_v50 = vld [vmem:[#allocation311_spill] sm:$0xff] }
 0x327   : > { %11091 = vmatpush3.msra.mxu1 %v15215_v12  ;;  %11057 = vmatprep.subr.mxu0 %v15220_v8  ;;  %v16419_v12 = vld [vmem:[#allocation3] sm:$0xff]  ;;  %v21099_v8 = vld [vmem:[#allocation312_spill] sm:$0xff] }
 0x328   : > { %11092 = vmatprep.subr.mxu1 %v15225_v56  ;;  %11058 = vmatpush3.msra.mxu0 %v15232_v0  ;;  %v21100_v56 = vld [vmem:[#allocation313_spill] sm:$0xff]  ;;  %v21101_v0 = vld [vmem:[#allocation314_spill] sm:$0xff]  ;;  %v21142_v20 = vld [vmem:[#allocation355_spill] sm:$0xff] }
 0x329   : > { %11093 = vmatpush3.msra.mxu1 %v15237_v54  ;;  %11059 = vmatprep.subr.mxu0 %v15242_v52  ;;  %v21102_v54 = vld [vmem:[#allocation315_spill] sm:$0xff]  ;;  %v21103_v52 = vld [vmem:[#allocation316_spill] sm:$0xff] }
 0x32a   : > { %11094 = vmatprep.subr.mxu1 %v15249_v5  ;;  %11060 = vmatpush3.msra.mxu0 %v15254_v36  ;;  %v21104_v5 = vld [vmem:[#allocation317_spill] sm:$0xff]  ;;  %v3914_v36 = vrot.slane %v16419_v12, %v20961_v46 }
 0x32b   : > { %11095 = vmatpush3.msra.mxu1 %v15259_v58  ;;  %11061 = vmatprep.subr.mxu0 %v15266_v31  ;;  %v21105_v58 = vld [vmem:[#allocation318_spill] sm:$0xff]  ;;  %v21106_v31 = vld [vmem:[#allocation319_spill] sm:$0xff] }
 0x32c   : > { %11096 = vmatprep.subr.mxu1 %v15271_v35  ;;  %11062 = vmatpush3.msra.mxu0 %v15278_v41  ;;  %v3922_v35 = vrot.slane %v16419_v12, %v20963_v37  ;;  %v21107_v41 = vld [vmem:[#allocation320_spill] sm:$0xff] }
 0x32d   : > { %11097 = vmatpush3.msra.mxu1 %v15283_v47  ;;  %11063 = vmatprep.subr.mxu0 %v15290_v14  ;;  %v21108_v47 = vld [vmem:[#allocation321_spill] sm:$0xff]  ;;  %v3910_v14 = vrot.slane %v16419_v12, %v20965_v7 }
 0x32e   : > { %11098 = vmatprep.subr.mxu1 %v15295_v25  ;;  %11064 = vmatpush3.msra.mxu0 %v15302_v15  ;;  %v3918_v25 = vrot.slane %v16419_v12, %v20966_v19  ;;  %v21109_v15 = vld [vmem:[#allocation322_spill] sm:$0xff] }
 0x32f   : > { %11099 = vmatpush3.msra.mxu1 %v15307_v61  ;;  %11065 = vmatprep.subr.mxu0 %v15314_v29  ;;  %v21110_v61 = vld [vmem:[#allocation323_spill] sm:$0xff]  ;;  %v21111_v29 = vld [vmem:[#allocation324_spill] sm:$0xff] }
 0x330   : > { %11100 = vmatprep.subr.mxu1 %v15319_v60  ;;  %11066 = vmatpush3.msra.mxu0 %v15326_v63  ;;  %v21112_v60 = vld [vmem:[#allocation325_spill] sm:$0xff]  ;;  %v21113_v63 = vld [vmem:[#allocation326_spill] sm:$0xff] }
 0x331   : > { %11101 = vmatpush3.msra.mxu1 %v15331_v30  ;;  %11067 = vmatprep.subr.mxu0 %v15338_v10  ;;  %v21114_v30 = vld [vmem:[#allocation327_spill] sm:$0xff]  ;;  %v21115_v10 = vld [vmem:[#allocation328_spill] sm:$0xff] }
 0x332   : > { %11102 = vmatprep.subr.mxu1 %v15343_v57  ;;  %11068 = vmatpush3.msra.mxu0 %v15350_v9  ;;  %v21116_v57 = vld [vmem:[#allocation329_spill] sm:$0xff]  ;;  %v21117_v9 = vld [vmem:[#allocation330_spill] sm:$0xff] }
 0x333   : > { %11103 = vmatpush3.msra.mxu1 %v15355_v55  ;;  %11069 = vmatprep.subr.mxu0 %v15362_v49  ;;  %v21118_v55 = vld [vmem:[#allocation331_spill] sm:$0xff]  ;;  %v21119_v49 = vld [vmem:[#allocation332_spill] sm:$0xff] }
 0x334   : > { %11104 = vmatprep.subr.mxu1 %v15367_v34  ;;  %11070 = vmatpush3.msra.mxu0 %v15374_v4  ;;  %v21120_v34 = vld [vmem:[#allocation333_spill] sm:$0xff]  ;;  %v21121_v4 = vld [vmem:[#allocation334_spill] sm:$0xff] }
 0x335   : > { %11105 = vmatpush3.msra.mxu1 %v15379_v17  ;;  %11071 = vmatprep.subr.mxu0 %v15386_v22  ;;  %v21122_v17 = vld [vmem:[#allocation335_spill] sm:$0xff]  ;;  %v21123_v22 = vld [vmem:[#allocation336_spill] sm:$0xff] }
 0x336   : > { %11106 = vmatprep.subr.mxu1 %v15391_v62  ;;  %11072 = vmatpush3.msra.mxu0 %v15398_v13  ;;  %v21124_v62 = vld [vmem:[#allocation337_spill] sm:$0xff]  ;;  %v21125_v13 = vld [vmem:[#allocation338_spill] sm:$0xff] }
 0x337   : > { %11107 = vmatpush3.msra.mxu1 %v15403_v28  ;;  %11073 = vmatprep.subr.mxu0 %v15410_v3  ;;  %v21126_v28 = vld [vmem:[#allocation339_spill] sm:$0xff]  ;;  %v21127_v3 = vld [vmem:[#allocation340_spill] sm:$0xff] }
 0x338   : > { %11108 = vmatprep.subr.mxu1 %v15415_v27  ;;  %11074 = vmatpush3.msra.mxu0 %v15422_v26  ;;  %v21128_v27 = vld [vmem:[#allocation341_spill] sm:$0xff]  ;;  %v21129_v26 = vld [vmem:[#allocation342_spill] sm:$0xff] }
 0x339   : > { %11109 = vmatpush3.msra.mxu1 %v15427_v1  ;;  %11075 = vmatprep.subr.mxu0 %v15434_v48  ;;  %v21130_v1 = vld [vmem:[#allocation343_spill] sm:$0xff]  ;;  %v21131_v48 = vld [vmem:[#allocation344_spill] sm:$0xff] }
 0x33a   : > { %11110 = vmatprep.subr.mxu1 %v15439_v44  ;;  %11076 = vmatpush3.msra.mxu0 %v15446_v18  ;;  %v21132_v44 = vld [vmem:[#allocation345_spill] sm:$0xff]  ;;  %v21133_v18 = vld [vmem:[#allocation346_spill] sm:$0xff] }
 0x33b   : > { %11111 = vmatpush3.msra.mxu1 %v15451_v45  ;;  %11077 = vmatprep.subr.mxu0 %v15458_v24  ;;  %v21134_v45 = vld [vmem:[#allocation347_spill] sm:$0xff]  ;;  %v21135_v24 = vld [vmem:[#allocation348_spill] sm:$0xff] }
 0x33c   : > { %11112 = vmatprep.subr.mxu1 %v15463_v21  ;;  %11078 = vmatpush3.msra.mxu0 %v15470_v6  ;;  %v21136_v21 = vld [vmem:[#allocation349_spill] sm:$0xff]  ;;  %v21137_v6 = vld [vmem:[#allocation350_spill] sm:$0xff] }
 0x33d   : > { %11113 = vmatpush3.msra.mxu1 %v21096_v42  ;;  %11079 = vmatprep.subr.mxu0 %v21097_v16  ;;  %v21143_v42 = vld [vmem:[#allocation356_spill] sm:$0xff]  ;;  %v21144_v16 = vld [vmem:[#allocation357_spill] sm:$0xff] }
 0x33e   : > { %11114 = vmatprep.subr.mxu1 %v21098_v50  ;;  %11080 = vmatpush3.msra.mxu0 %v21099_v8  ;;  %v21145_v50 = vld [vmem:[#allocation358_spill] sm:$0xff]  ;;  %v21146_v8 = vld [vmem:[#allocation359_spill] sm:$0xff] }
 0x33f   : > { %11115 = vmatpush3.msra.mxu1 %v21100_v56  ;;  %11081 = vmatprep.subr.mxu0 %v21101_v0  ;;  %v21147_v56 = vld [vmem:[#allocation360_spill] sm:$0xff]  ;;  %v21148_v0 = vld [vmem:[#allocation361_spill] sm:$0xff] }
 0x340   : > { %11116 = vmatprep.subr.mxu1 %v21102_v54  ;;  %11082 = vmatpush3.msra.mxu0 %v21103_v52  ;;  %v21149_v54 = vld [vmem:[#allocation362_spill] sm:$0xff]  ;;  %v21150_v52 = vld [vmem:[#allocation363_spill] sm:$0xff] }
 0x341   : > { %11117 = vmatpush3.msra.mxu1 %v21104_v5  ;;  %11083 = vmatprep.subr.mxu0 %v21105_v58  ;;  %v21151_v5 = vld [vmem:[#allocation364_spill] sm:$0xff]  ;;  %v21153_v58 = vld [vmem:[#allocation366_spill] sm:$0xff] }
 0x342   : > { %11118 = vmatprep.subr.mxu1 %v21106_v31  ;;  %11084 = vmatpush3.msra.mxu0 %v21107_v41  ;;  %v21154_v31 = vld [vmem:[#allocation367_spill] sm:$0xff]  ;;  %v21156_v41 = vld [vmem:[#allocation369_spill] sm:$0xff] }
 0x343   : > { %11119 = vmatpush3.msra.mxu1 %v21108_v47  ;;  %11085 = vmatprep.subr.mxu0 %v21109_v15  ;;  %v21157_v47 = vld [vmem:[#allocation370_spill] sm:$0xff]  ;;  %v21160_v15 = vld [vmem:[#allocation373_spill] sm:$0xff] }
 0x344   : > { %11120 = vmatprep.subr.mxu1 %v21110_v61  ;;  %11086 = vmatpush3.msra.mxu0 %v21111_v29  ;;  %v21161_v61 = vld [vmem:[#allocation374_spill] sm:$0xff]  ;;  %v21162_v29 = vld [vmem:[#allocation375_spill] sm:$0xff] }
 0x345   : > { %4031 = vmatprep.mubr.f32.mxu0 %v3914_v36  ;;  %11121 = vmatpush3.msra.mxu1 %v21112_v60  ;;  %v21152_v36 = vld [vmem:[#allocation365_spill] sm:$0xff]  ;;  %v21163_v60 = vld [vmem:[#allocation376_spill] sm:$0xff] }
 0x346   : > { %4101 = vmatprep.mubr.f32.mxu1 %v3922_v35  ;;  %4032 = vmatmul.mubr.f32.vlgmr.msra.gmra.mxu0 %v3910_v14  ;;  %v21155_v35 = vld [vmem:[#allocation368_spill] sm:$0xff]  ;;  %v21158_v14 = vld [vmem:[#allocation371_spill] sm:$0xff] }
 0x347   : > { %4102 = vmatmul.mubr.f32.vlgmr.msra.gmra.mxu1 %v3918_v25  ;;  %11125 = vmatprep.subr.mxu0 %v21113_v63  ;;  %v21159_v25 = vld [vmem:[#allocation372_spill] sm:$0xff]  ;;  %v21164_v63 = vld [vmem:[#allocation377_spill] sm:$0xff] }
 0x348   : > { %11160 = vmatprep.subr.mxu1 %v21114_v30  ;;  %11126 = vmatpush3.msra.mxu0 %v21115_v10  ;;  %v21165_v30 = vld [vmem:[#allocation378_spill] sm:$0xff]  ;;  %v21166_v10 = vld [vmem:[#allocation379_spill] sm:$0xff] }
 0x349   : > { %11161 = vmatpush3.msra.mxu1 %v21116_v57  ;;  %11127 = vmatprep.subr.mxu0 %v21117_v9  ;;  %v21167_v57 = vld [vmem:[#allocation380_spill] sm:$0xff]  ;;  %v21168_v9 = vld [vmem:[#allocation381_spill] sm:$0xff] }
 0x34a   : > { %11162 = vmatprep.subr.mxu1 %v21118_v55  ;;  %11128 = vmatpush3.msra.mxu0 %v21119_v49  ;;  %v21169_v55 = vld [vmem:[#allocation69_spill] sm:$0xff] }
 0x34b   : > { %11163 = vmatpush3.msra.mxu1 %v21120_v34  ;;  %11129 = vmatprep.subr.mxu0 %v21121_v4  ;;  %v3930_v49 = vrot.slane %v16419_v12, %v21169_v55  ;;  %v21170_v34 = vld [vmem:[#allocation382_spill] sm:$0xff]  ;;  %v21171_v4 = vld [vmem:[#allocation383_spill] sm:$0xff] }
 0x34c   : > { %11164 = vmatprep.subr.mxu1 %v21122_v17  ;;  %11130 = vmatpush3.msra.mxu0 %v21123_v22  ;;  %v21172_v17 = vld [vmem:[#allocation65_spill] sm:$0xff] }
 0x34d   : > { %11165 = vmatpush3.msra.mxu1 %v21124_v62  ;;  %11131 = vmatprep.subr.mxu0 %v21125_v13  ;;  %v3926_v22 = vrot.slane %v16419_v12, %v21172_v17  ;;  %v21173_v62 = vld [vmem:[#allocation384_spill] sm:$0xff]  ;;  %v21174_v13 = vld [vmem:[#allocation385_spill] sm:$0xff] }
 0x34e   : > { %11166 = vmatprep.subr.mxu1 %v21126_v28  ;;  %11132 = vmatpush3.msra.mxu0 %v21127_v3  ;;  %v3938_v28 = vrot.slane %v16419_v12, %v21032_v53  ;;  %v21175_v3 = vld [vmem:[#allocation386_spill] sm:$0xff] }
 0x34f   : > { %11167 = vmatpush3.msra.mxu1 %v21128_v27  ;;  %11133 = vmatprep.subr.mxu0 %v21129_v26  ;;  %v21176_v27 = vld [vmem:[#allocation66_spill] sm:$0xff] }
 0x350   : > { %11168 = vmatprep.subr.mxu1 %v21130_v1  ;;  %11134 = vmatpush3.msra.mxu0 %v21131_v48  ;;  %v3934_v26 = vrot.slane %v16419_v12, %v21176_v27  ;;  %v21177_v1 = vld [vmem:[#allocation387_spill] sm:$0xff]  ;;  %v21178_v48 = vld [vmem:[#allocation388_spill] sm:$0xff] }
 0x351   : > { %11169 = vmatpush3.msra.mxu1 %v21132_v44  ;;  %11135 = vmatprep.subr.mxu0 %v21133_v18  ;;  %v21179_v44 = vld [vmem:[#allocation389_spill] sm:$0xff]  ;;  %v21180_v18 = vld [vmem:[#allocation390_spill] sm:$0xff]  ;;  %v21185_v12 = vld [vmem:[#allocation395_spill] sm:$0xff] }
 0x352   : > { %11170 = vmatprep.subr.mxu1 %v21134_v45  ;;  %11136 = vmatpush3.msra.mxu0 %v21135_v24  ;;  %v21181_v45 = vld [vmem:[#allocation391_spill] sm:$0xff]  ;;  %v21183_v24 = vld [vmem:[#allocation393_spill] sm:$0xff] }
 0x353   : > { %11171 = vmatpush3.msra.mxu1 %v21136_v21  ;;  %11137 = vmatprep.subr.mxu0 %v21137_v6  ;;  %v21184_v21 = vld [vmem:[#allocation394_spill] sm:$0xff]  ;;  %v21186_v6 = vld [vmem:[#allocation396_spill] sm:$0xff] }
 0x354   : > { %11172 = vmatprep.subr.mxu1 %v21138_v40  ;;  %11138 = vmatpush3.msra.mxu0 %v21139_v43  ;;  %v21187_v40 = vld [vmem:[#allocation397_spill] sm:$0xff]  ;;  %v21188_v43 = vld [vmem:[#allocation398_spill] sm:$0xff] }
 0x355   : > { %11173 = vmatpush3.msra.mxu1 %v21140_v32  ;;  %11139 = vmatprep.subr.mxu0 %v21141_v59  ;;  %v21189_v32 = vld [vmem:[#allocation399_spill] sm:$0xff]  ;;  %v21190_v59 = vld [vmem:[#allocation400_spill] sm:$0xff] }
 0x356   : > { %11174 = vmatprep.subr.mxu1 %v21142_v20  ;;  %11140 = vmatpush3.msra.mxu0 %v21143_v42  ;;  %v21191_v20 = vld [vmem:[#allocation401_spill] sm:$0xff]  ;;  %v21192_v42 = vld [vmem:[#allocation402_spill] sm:$0xff] }
 0x357   : > { %11175 = vmatpush3.msra.mxu1 %v21144_v16  ;;  %11141 = vmatprep.subr.mxu0 %v21145_v50  ;;  %v21193_v16 = vld [vmem:[#allocation403_spill] sm:$0xff]  ;;  %v21194_v50 = vld [vmem:[#allocation404_spill] sm:$0xff] }
 0x358   : > { %11176 = vmatprep.subr.mxu1 %v21146_v8  ;;  %11142 = vmatpush3.msra.mxu0 %v21147_v56  ;;  %v21195_v8 = vld [vmem:[#allocation405_spill] sm:$0xff]  ;;  %v21196_v56 = vld [vmem:[#allocation406_spill] sm:$0xff] }
 0x359   : > { %11177 = vmatpush3.msra.mxu1 %v21148_v0  ;;  %11143 = vmatprep.subr.mxu0 %v21149_v54  ;;  %v21197_v0 = vld [vmem:[#allocation407_spill] sm:$0xff]  ;;  %v21198_v54 = vld [vmem:[#allocation408_spill] sm:$0xff] }
 0x35a   : > { %11178 = vmatprep.subr.mxu1 %v21150_v52  ;;  %11144 = vmatpush3.msra.mxu0 %v21151_v5  ;;  %v21199_v52 = vld [vmem:[#allocation409_spill] sm:$0xff]  ;;  %v21200_v5 = vld [vmem:[#allocation410_spill] sm:$0xff] }
 0x35b   : > { %11179 = vmatpush3.msra.mxu1 %v21152_v36  ;;  %11145 = vmatprep.subr.mxu0 %v21153_v58  ;;  %v21201_v36 = vld [vmem:[#allocation411_spill] sm:$0xff]  ;;  %v21202_v58 = vld [vmem:[#allocation412_spill] sm:$0xff] }
 0x35c   : > { %11180 = vmatprep.subr.mxu1 %v21154_v31  ;;  %11146 = vmatpush3.msra.mxu0 %v21155_v35  ;;  %v21203_v31 = vld [vmem:[#allocation413_spill] sm:$0xff]  ;;  %v21204_v35 = vld [vmem:[#allocation414_spill] sm:$0xff] }
 0x35d   : > { %11181 = vmatpush3.msra.mxu1 %v21156_v41  ;;  %11147 = vmatprep.subr.mxu0 %v21157_v47  ;;  %v21205_v41 = vld [vmem:[#allocation415_spill] sm:$0xff]  ;;  %v21206_v47 = vld [vmem:[#allocation416_spill] sm:$0xff] }
 0x35e   : > { %11182 = vmatprep.subr.mxu1 %v21158_v14  ;;  %11148 = vmatpush3.msra.mxu0 %v21159_v25  ;;  %v21207_v14 = vld [vmem:[#allocation417_spill] sm:$0xff]  ;;  %v21208_v25 = vld [vmem:[#allocation418_spill] sm:$0xff] }
 0x35f   : > { %11183 = vmatpush3.msra.mxu1 %v21160_v15  ;;  %11149 = vmatprep.subr.mxu0 %v21161_v61  ;;  %v21209_v15 = vld [vmem:[#allocation419_spill] sm:$0xff]  ;;  %v21210_v61 = vld [vmem:[#allocation420_spill] sm:$0xff] }
 0x360   : > { %11184 = vmatprep.subr.mxu1 %v21162_v29  ;;  %11150 = vmatpush3.msra.mxu0 %v21163_v60  ;;  %v21211_v29 = vld [vmem:[#allocation421_spill] sm:$0xff]  ;;  %v21212_v60 = vld [vmem:[#allocation422_spill] sm:$0xff] }
 0x361   : > { %11185 = vmatpush3.msra.mxu1 %v21164_v63  ;;  %11151 = vmatprep.subr.mxu0 %v21165_v30  ;;  %v21213_v63 = vld [vmem:[#allocation423_spill] sm:$0xff]  ;;  %v21214_v30 = vld [vmem:[#allocation424_spill] sm:$0xff] }
 0x362   : > { %11186 = vmatprep.subr.mxu1 %v21166_v10  ;;  %11152 = vmatpush3.msra.mxu0 %v21167_v57  ;;  %v21215_v10 = vld [vmem:[#allocation425_spill] sm:$0xff]  ;;  %v21216_v57 = vld [vmem:[#allocation426_spill] sm:$0xff] }
 0x363   : > { %11187 = vmatpush3.msra.mxu1 %v21168_v9  ;;  %11153 = vmatprep.subr.mxu0 %v21170_v34  ;;  %v21217_v9 = vld [vmem:[#allocation427_spill] sm:$0xff]  ;;  %v21219_v34 = vld [vmem:[#allocation429_spill] sm:$0xff] }
 0x364   : > { %11188 = vmatprep.subr.mxu1 %v21171_v4  ;;  %11154 = vmatpush3.msra.mxu0 %v21173_v62  ;;  %v21220_v4 = vld [vmem:[#allocation430_spill] sm:$0xff]  ;;  %v21222_v62 = vld [vmem:[#allocation432_spill] sm:$0xff] }
 0x365   : > { %11189 = vmatpush3.msra.mxu1 %v21174_v13  ;;  %11155 = vmatprep.subr.mxu0 %v15948_v11  ;;  %v21182_v11 = vld [vmem:[#allocation392_spill] sm:$0xff]  ;;  %v21223_v13 = vld [vmem:[#allocation433_spill] sm:$0xff] }
 0x366   : > { %11190 = vmatprep.subr.mxu1 %v21175_v3  ;;  %11156 = vmatpush3.msra.mxu0 %v21177_v1  ;;  %v21225_v3 = vld [vmem:[#allocation435_spill] sm:$0xff] }
 0x367   : > { %4171 = vmatprep.mubr.f32.mxu0 %v3930_v49  ;;  %11191 = vmatpush3.msra.mxu1 %v21178_v48  ;;  %v21218_v49 = vld [vmem:[#allocation428_spill] sm:$0xff] }
 0x368   : > { %4172 = vmatmul.mubr.f32.vlgmr.msra.gmra.mxu0 %v3926_v22  ;;  %4241 = vmatprep.mubr.f32.mxu1 %v3938_v28  ;;  %v21221_v22 = vld [vmem:[#allocation431_spill] sm:$0xff]  ;;  %v21224_v28 = vld [vmem:[#allocation434_spill] sm:$0xff] }
 0x369   : > { %11195 = vmatprep.subr.mxu0 %v21179_v44  ;;  %11230 = vmatprep.subr.mxu1 %v21180_v18 }
 0x36a   : > { %4242 = vmatmul.mubr.f32.vlgmr.msra.gmra.mxu1 %v3934_v26  ;;  %11196 = vmatpush3.msra.mxu0 %v21181_v45  ;;  %v21226_v26 = vld [vmem:[#allocation436_spill] sm:$0xff] }
 0x36b   : > { %11231 = vmatpush3.msra.mxu1 %v21182_v11  ;;  %11197 = vmatprep.subr.mxu0 %v21183_v24 }
 0x36c   : > { %11232 = vmatprep.subr.mxu1 %v21184_v21  ;;  %11198 = vmatpush3.msra.mxu0 %v21185_v12 }
 0x36d   : > { %11233 = vmatpush3.msra.mxu1 %v21186_v6  ;;  %11199 = vmatprep.subr.mxu0 %v21187_v40 }
 0x36e   : > { %11234 = vmatprep.subr.mxu1 %v21188_v43  ;;  %11200 = vmatpush3.msra.mxu0 %v21189_v32 }
 0x36f   : > { %11235 = vmatpush3.msra.mxu1 %v21190_v59  ;;  %11201 = vmatprep.subr.mxu0 %v21191_v20 }
 0x370   : > { %11236 = vmatprep.subr.mxu1 %v21192_v42  ;;  %11202 = vmatpush3.msra.mxu0 %v21193_v16 }
 0x371   : > { %11237 = vmatpush3.msra.mxu1 %v21194_v50  ;;  %11203 = vmatprep.subr.mxu0 %v21195_v8 }
 0x372   : > { %11238 = vmatprep.subr.mxu1 %v21196_v56  ;;  %11204 = vmatpush3.msra.mxu0 %v21197_v0 }
 0x373   : > { %11239 = vmatpush3.msra.mxu1 %v21198_v54  ;;  %11205 = vmatprep.subr.mxu0 %v21199_v52 }
 0x374   : > { %11240 = vmatprep.subr.mxu1 %v21200_v5  ;;  %11206 = vmatpush3.msra.mxu0 %v21201_v36 }
 0x375   : > { %11241 = vmatpush3.msra.mxu1 %v21202_v58  ;;  %11207 = vmatprep.subr.mxu0 %v21203_v31 }
 0x376   : > { %11242 = vmatprep.subr.mxu1 %v21204_v35  ;;  %11208 = vmatpush3.msra.mxu0 %v21205_v41 }
 0x377   : > { %11243 = vmatpush3.msra.mxu1 %v21206_v47  ;;  %11209 = vmatprep.subr.mxu0 %v21207_v14 }
 0x378   : > { %11244 = vmatprep.subr.mxu1 %v21208_v25  ;;  %11210 = vmatpush3.msra.mxu0 %v21209_v15 }
 0x379   : > { %11245 = vmatpush3.msra.mxu1 %v21210_v61  ;;  %11211 = vmatprep.subr.mxu0 %v21211_v29 }
 0x37a   : > { %11246 = vmatprep.subr.mxu1 %v21212_v60  ;;  %11212 = vmatpush3.msra.mxu0 %v21213_v63 }
 0x37b   : > { %11247 = vmatpush3.msra.mxu1 %v21214_v30  ;;  %11213 = vmatprep.subr.mxu0 %v21215_v10 }
 0x37c   : > { %11248 = vmatprep.subr.mxu1 %v21216_v57  ;;  %11214 = vmatpush3.msra.mxu0 %v21217_v9  ;;  %v21227_v57 = vld [vmem:[#allocation437_spill] sm:$0xff]  ;;  %v21228_v9 = vld [vmem:[#allocation438_spill] sm:$0xff] }
 0x37d   : > { %11249 = vmatpush3.msra.mxu1 %v21218_v49  ;;  %11215 = vmatprep.subr.mxu0 %v21219_v34  ;;  %v3904_v49 = vld [vmem:[#allocation3 + $0x8] sm:$0xf] }
 0x37e   : > { %11250 = vmatprep.subr.mxu1 %v21220_v4  ;;  %11216 = vmatpush3.msra.mxu0 %v21221_v22  ;;  %v21229_v34 = vld [vmem:[#allocation439_spill] sm:$0xff]  ;;  %v21230_v4 = vld [vmem:[#allocation440_spill] sm:$0xff]  ;;  %v21231_v22 = vld [vmem:[#allocation441_spill] sm:$0xff] }
 0x37f   : > { %11251 = vmatpush3.msra.mxu1 %v21222_v62  ;;  %11217 = vmatprep.subr.mxu0 %v21223_v13  ;;  %v21232_v62 = vld [vmem:[#allocation442_spill] sm:$0xff]  ;;  %v21233_v13 = vld [vmem:[#allocation443_spill] sm:$0xff] }
 0x380   : > { %11252 = vmatprep.subr.mxu1 %v21224_v28  ;;  %11218 = vmatpush3.msra.mxu0 %v21225_v3  ;;  %v21234_v28 = vld [vmem:[#allocation444_spill] sm:$0xff]  ;;  %v3946_v3 = vrot.slane %v3904_v49, %v20961_v46 }
 0x381   : > { %11253 = vmatpush3.msra.mxu1 %v21226_v26  ;;  %11219 = vmatprep.subr.mxu0 %v21227_v57  ;;  %v21235_v26 = vld [vmem:[#allocation445_spill] sm:$0xff]  ;;  %v21236_v57 = vld [vmem:[#allocation446_spill] sm:$0xff] }
 0x382   : > { %11254 = vmatprep.subr.mxu1 %v21228_v9  ;;  %11220 = vmatpush3.msra.mxu0 %v21229_v34  ;;  %v3942_v9 = vrot.slane %v3904_v49, %v20965_v7 }
 0x383   : > { %11255 = vmatpush3.msra.mxu1 %v21230_v4  ;;  %11221 = vmatprep.subr.mxu0 %v21231_v22  ;;  %v3954_v22 = vrot.slane %v3904_v49, %v20963_v37 }
 0x384   : > { %11256 = vmatprep.subr.mxu1 %v21232_v62  ;;  %11222 = vmatpush3.msra.mxu0 %v21233_v13 }
 0x385   : > { %11257 = vmatpush3.msra.mxu1 %v21234_v28  ;;  %11223 = vmatprep.subr.mxu0 %v21235_v26  ;;  %v3950_v28 = vrot.slane %v3904_v49, %v20966_v19  ;;  %v16604_v49 = vld [vmem:[%s19686_s3 + $0x178] sm:$0xff] }
 0x386   : > { %11258 = vmatprep.subr.mxu1 %v21236_v57  ;;  %11224 = vmatpush3.msra.mxu0 %v16328_v23  ;;  %v16586_v23 = vld [vmem:[%s19686_s3 + $0xf8] sm:$0xff]  ;;  %21240 = vst [vmem:[#allocation312_spill] sm:$0xff] %v16604_v49 }
 0x387   : > { %11259 = vmatpush3.msra.mxu1 %v16333_v33  ;;  %11225 = vmatprep.subr.mxu0 %v16340_v2  ;;  %21237 = vst [vmem:[#allocation309_spill] sm:$0xff] %v16586_v23 }
 0x388   : > { %11260 = vmatprep.subr.mxu1 %v16345_v51  ;;  %11226 = vmatpush3.msra.mxu0 %v16353_v39  ;;  %v16592_v51 = vld [vmem:[%s19686_s3 + $0x1f8] sm:$0xff]  ;;  %v16977_v39 = vld [vmem:[%s19686_s3 + $0x100] sm:$0xff] }
 0x389   : > { %4311 = vmatprep.mubr.f32.mxu0 %v3946_v3  ;;  %11261 = vmatpush3.msra.mxu1 %v16361_v38  ;;  %21238 = vst [vmem:[#allocation310_spill] sm:$0xff] %v16592_v51  ;;  %v16622_v3 = vld [vmem:[%s19686_s3 + $0x70] sm:$0xff]  ;;  %v16959_v38 = vld [vmem:[%s19686_s3 + $0x80] sm:$0xff] }
 0x38a   : > { %4312 = vmatmul.mubr.f32.vlgmr.msra.gmra.mxu0 %v3942_v9  ;;  %4381 = vmatprep.mubr.f32.mxu1 %v3954_v22  ;;  %v16598_v9 = vld [vmem:[%s19686_s3 + $0x78] sm:$0xff]  ;;  %v16610_v22 = vld [vmem:[%s19686_s3 + $0xf0] sm:$0xff]  ;;  %21243 = vst [vmem:[#allocation315_spill] sm:$0xff] %v16622_v3 }
 0x38b   : > { %11265 = vmatprep.subr.mxu0 %v16586_v23  ;;  %11300 = vmatprep.subr.mxu1 %v16592_v51  ;;  %21239 = vst [vmem:[#allocation311_spill] sm:$0xff] %v16598_v9  ;;  %21241 = vst [vmem:[#allocation313_spill] sm:$0xff] %v16610_v22  ;;  %v16943_v51 = vld [vmem:[%s19686_s3 + $0x8] sm:$0xff] }
 0x38c   : > { %4382 = vmatmul.mubr.f32.vlgmr.msra.gmra.mxu1 %v3950_v28  ;;  %11266 = vmatpush3.msra.mxu0 %v16598_v9  ;;  %v16616_v28 = vld [vmem:[%s19686_s3 + $0x1f0] sm:$0xff]  ;;  %v16859_v9 = vld [vmem:[%s19686_s3 + $0x1a0] sm:$0xff]  ;;  %21295 = vst [vmem:[#allocation367_spill] sm:$0xff] %v16943_v51 }
 0x38d   : > { %11301 = vmatpush3.msra.mxu1 %v16604_v49  ;;  %11267 = vmatprep.subr.mxu0 %v16610_v22  ;;  %21242 = vst [vmem:[#allocation314_spill] sm:$0xff] %v16616_v28  ;;  %v16628_v49 = vld [vmem:[%s19686_s3 + $0x170] sm:$0xff]  ;;  %v16634_v22 = vld [vmem:[%s19686_s3 + $0xe8] sm:$0xff]  ;;  %21282 = vst [vmem:[#allocation354_spill] sm:$0xff] %v16859_v9 }
 0x38e   : > { %11302 = vmatprep.subr.mxu1 %v16616_v28  ;;  %11268 = vmatpush3.msra.mxu0 %v16622_v3  ;;  %21244 = vst [vmem:[#allocation316_spill] sm:$0xff] %v16628_v49  ;;  %21245 = vst [vmem:[#allocation317_spill] sm:$0xff] %v16634_v22  ;;  %v16640_v28 = vld [vmem:[%s19686_s3 + $0x1e8] sm:$0xff] }
 0x38f   : > { %11303 = vmatpush3.msra.mxu1 %v16628_v49  ;;  %11269 = vmatprep.subr.mxu0 %v16634_v22  ;;  %21246 = vst [vmem:[#allocation318_spill] sm:$0xff] %v16640_v28  ;;  %v16646_v3 = vld [vmem:[%s19686_s3 + $0x68] sm:$0xff]  ;;  %v16658_v22 = vld [vmem:[%s19686_s3 + $0xe0] sm:$0xff] }
 0x390   : > { %11304 = vmatprep.subr.mxu1 %v16640_v28  ;;  %21247 = vst [vmem:[#allocation319_spill] sm:$0xff] %v16646_v3  ;;  %11270 = vmatpush3.msra.mxu0 %v16646_v3  ;;  %v16652_v49 = vld [vmem:[%s19686_s3 + $0x168] sm:$0xff]  ;;  %21249 = vst [vmem:[#allocation321_spill] sm:$0xff] %v16658_v22  ;;  %v16664_v28 = vld [vmem:[%s19686_s3 + $0x1e0] sm:$0xff] }
 0x391   : > { %21248 = vst [vmem:[#allocation320_spill] sm:$0xff] %v16652_v49  ;;  %11305 = vmatpush3.msra.mxu1 %v16652_v49  ;;  %11271 = vmatprep.subr.mxu0 %v16658_v22  ;;  %21250 = vst [vmem:[#allocation322_spill] sm:$0xff] %v16664_v28  ;;  %v16670_v3 = vld [vmem:[%s19686_s3 + $0x60] sm:$0xff]  ;;  %v16682_v22 = vld [vmem:[%s19686_s3 + $0xd8] sm:$0xff] }
 0x392   : > { %11306 = vmatprep.subr.mxu1 %v16664_v28  ;;  %21251 = vst [vmem:[#allocation323_spill] sm:$0xff] %v16670_v3  ;;  %11272 = vmatpush3.msra.mxu0 %v16670_v3  ;;  %v16676_v49 = vld [vmem:[%s19686_s3 + $0x160] sm:$0xff]  ;;  %21253 = vst [vmem:[#allocation325_spill] sm:$0xff] %v16682_v22  ;;  %v16688_v28 = vld [vmem:[%s19686_s3 + $0x1d8] sm:$0xff] }
 0x393   : > { %21252 = vst [vmem:[#allocation324_spill] sm:$0xff] %v16676_v49  ;;  %11307 = vmatpush3.msra.mxu1 %v16676_v49  ;;  %11273 = vmatprep.subr.mxu0 %v16682_v22  ;;  %21254 = vst [vmem:[#allocation326_spill] sm:$0xff] %v16688_v28  ;;  %v16694_v3 = vld [vmem:[%s19686_s3 + $0x58] sm:$0xff]  ;;  %v16706_v22 = vld [vmem:[%s19686_s3 + $0xd0] sm:$0xff] }
 0x394   : > { %11308 = vmatprep.subr.mxu1 %v16688_v28  ;;  %21255 = vst [vmem:[#allocation327_spill] sm:$0xff] %v16694_v3  ;;  %11274 = vmatpush3.msra.mxu0 %v16694_v3  ;;  %v16700_v49 = vld [vmem:[%s19686_s3 + $0x158] sm:$0xff]  ;;  %21257 = vst [vmem:[#allocation329_spill] sm:$0xff] %v16706_v22  ;;  %v16712_v28 = vld [vmem:[%s19686_s3 + $0x1d0] sm:$0xff] }
 0x395   : > { %21256 = vst [vmem:[#allocation328_spill] sm:$0xff] %v16700_v49  ;;  %11309 = vmatpush3.msra.mxu1 %v16700_v49  ;;  %11275 = vmatprep.subr.mxu0 %v16706_v22  ;;  %21258 = vst [vmem:[#allocation330_spill] sm:$0xff] %v16712_v28  ;;  %v16718_v3 = vld [vmem:[%s19686_s3 + $0x50] sm:$0xff]  ;;  %v16730_v22 = vld [vmem:[%s19686_s3 + $0xc8] sm:$0xff] }
 0x396   : > { %11310 = vmatprep.subr.mxu1 %v16712_v28  ;;  %21259 = vst [vmem:[#allocation331_spill] sm:$0xff] %v16718_v3  ;;  %11276 = vmatpush3.msra.mxu0 %v16718_v3  ;;  %v16724_v49 = vld [vmem:[%s19686_s3 + $0x150] sm:$0xff]  ;;  %21261 = vst [vmem:[#allocation333_spill] sm:$0xff] %v16730_v22  ;;  %v16736_v28 = vld [vmem:[%s19686_s3 + $0x1c8] sm:$0xff] }
 0x397   : > { %21260 = vst [vmem:[#allocation332_spill] sm:$0xff] %v16724_v49  ;;  %11311 = vmatpush3.msra.mxu1 %v16724_v49  ;;  %11277 = vmatprep.subr.mxu0 %v16730_v22  ;;  %21262 = vst [vmem:[#allocation334_spill] sm:$0xff] %v16736_v28  ;;  %v16742_v3 = vld [vmem:[%s19686_s3 + $0x48] sm:$0xff]  ;;  %v16754_v22 = vld [vmem:[%s19686_s3 + $0xc0] sm:$0xff] }
 0x398   : > { %11312 = vmatprep.subr.mxu1 %v16736_v28  ;;  %21263 = vst [vmem:[#allocation335_spill] sm:$0xff] %v16742_v3  ;;  %11278 = vmatpush3.msra.mxu0 %v16742_v3  ;;  %v16748_v49 = vld [vmem:[%s19686_s3 + $0x148] sm:$0xff]  ;;  %21265 = vst [vmem:[#allocation337_spill] sm:$0xff] %v16754_v22  ;;  %v16760_v28 = vld [vmem:[%s19686_s3 + $0x1c0] sm:$0xff] }
 0x399   : > { %21264 = vst [vmem:[#allocation336_spill] sm:$0xff] %v16748_v49  ;;  %11313 = vmatpush3.msra.mxu1 %v16748_v49  ;;  %11279 = vmatprep.subr.mxu0 %v16754_v22  ;;  %21266 = vst [vmem:[#allocation338_spill] sm:$0xff] %v16760_v28  ;;  %v16766_v3 = vld [vmem:[%s19686_s3 + $0x40] sm:$0xff]  ;;  %v16778_v22 = vld [vmem:[%s19686_s3 + $0xb8] sm:$0xff] }
 0x39a   : > { %11314 = vmatprep.subr.mxu1 %v16760_v28  ;;  %21267 = vst [vmem:[#allocation339_spill] sm:$0xff] %v16766_v3  ;;  %11280 = vmatpush3.msra.mxu0 %v16766_v3  ;;  %v16772_v49 = vld [vmem:[%s19686_s3 + $0x140] sm:$0xff]  ;;  %21269 = vst [vmem:[#allocation341_spill] sm:$0xff] %v16778_v22  ;;  %v16784_v28 = vld [vmem:[%s19686_s3 + $0x1b8] sm:$0xff] }
 0x39b   : > { %21268 = vst [vmem:[#allocation340_spill] sm:$0xff] %v16772_v49  ;;  %11315 = vmatpush3.msra.mxu1 %v16772_v49  ;;  %11281 = vmatprep.subr.mxu0 %v16778_v22  ;;  %21270 = vst [vmem:[#allocation342_spill] sm:$0xff] %v16784_v28  ;;  %v16790_v3 = vld [vmem:[%s19686_s3 + $0x38] sm:$0xff]  ;;  %v16802_v22 = vld [vmem:[%s19686_s3 + $0xb0] sm:$0xff] }
 0x39c   : > { %11316 = vmatprep.subr.mxu1 %v16784_v28  ;;  %21271 = vst [vmem:[#allocation343_spill] sm:$0xff] %v16790_v3  ;;  %11282 = vmatpush3.msra.mxu0 %v16790_v3  ;;  %v16796_v49 = vld [vmem:[%s19686_s3 + $0x138] sm:$0xff]  ;;  %21273 = vst [vmem:[#allocation345_spill] sm:$0xff] %v16802_v22  ;;  %v16808_v28 = vld [vmem:[%s19686_s3 + $0x1b0] sm:$0xff] }
 0x39d   : > { %21272 = vst [vmem:[#allocation344_spill] sm:$0xff] %v16796_v49  ;;  %11317 = vmatpush3.msra.mxu1 %v16796_v49  ;;  %11283 = vmatprep.subr.mxu0 %v16802_v22  ;;  %21274 = vst [vmem:[#allocation346_spill] sm:$0xff] %v16808_v28  ;;  %v16814_v3 = vld [vmem:[%s19686_s3 + $0x30] sm:$0xff]  ;;  %v16826_v22 = vld [vmem:[%s19686_s3 + $0xa8] sm:$0xff] }
 0x39e   : > { %11318 = vmatprep.subr.mxu1 %v16808_v28  ;;  %21275 = vst [vmem:[#allocation347_spill] sm:$0xff] %v16814_v3  ;;  %11284 = vmatpush3.msra.mxu0 %v16814_v3  ;;  %v16820_v49 = vld [vmem:[%s19686_s3 + $0x130] sm:$0xff]  ;;  %21277 = vst [vmem:[#allocation349_spill] sm:$0xff] %v16826_v22  ;;  %v16832_v28 = vld [vmem:[%s19686_s3 + $0x1a8] sm:$0xff] }
 0x39f   : > { %21276 = vst [vmem:[#allocation348_spill] sm:$0xff] %v16820_v49  ;;  %11319 = vmatpush3.msra.mxu1 %v16820_v49  ;;  %11285 = vmatprep.subr.mxu0 %v16826_v22  ;;  %21278 = vst [vmem:[#allocation350_spill] sm:$0xff] %v16832_v28  ;;  %v4387_v3 = vld [vmem:[%s19685_s2] sm:$0xff]  ;;  %v16841_v49 = vld [vmem:[%s19686_s3 + $0x28] sm:$0xff] }
 0x3a0   : > { %11320 = vmatprep.subr.mxu1 %v16832_v28  ;;  %21279 = vst [vmem:[#allocation351_spill] sm:$0xff] %v16841_v49  ;;  %11286 = vmatpush3.msra.mxu0 %v16841_v49  ;;  %v16847_v22 = vld [vmem:[%s19686_s3 + $0x128] sm:$0xff]  ;;  %v16853_v28 = vld [vmem:[%s19686_s3 + $0xa0] sm:$0xff] }
 0x3a1   : > { %21280 = vst [vmem:[#allocation352_spill] sm:$0xff] %v16847_v22  ;;  %11321 = vmatpush3.msra.mxu1 %v16847_v22  ;;  %21281 = vst [vmem:[#allocation353_spill] sm:$0xff] %v16853_v28  ;;  %11287 = vmatprep.subr.mxu0 %v16853_v28  ;;  %v16865_v49 = vld [vmem:[%s19686_s3 + $0x20] sm:$0xff]  ;;  %v16874_v28 = vmax.f32 %v4387_v3, 0.0  ;;  %v16897_v3 = vld [vmem:[%s19686_s3 + $0x118] sm:$0xff] }
 0x3a2   : > { %11322 = vmatprep.subr.mxu1 %v16859_v9  ;;  %21283 = vst [vmem:[#allocation355_spill] sm:$0xff] %v16865_v49  ;;  %11288 = vmatpush3.msra.mxu0 %v16865_v49  ;;  %v16871_v22 = vld [vmem:[%s19686_s3 + $0x120] sm:$0xff]  ;;  %v16879_v9 = vld [vmem:[%s19686_s3 + $0x98] sm:$0xff]  ;;  %21288 = vst [vmem:[#allocation360_spill] sm:$0xff] %v16897_v3 }
 0x3a3   : > { %21284 = vst [vmem:[#allocation356_spill] sm:$0xff] %v16871_v22  ;;  %11323 = vmatpush3.msra.mxu1 %v16871_v22  ;;  %21285 = vst [vmem:[#allocation357_spill] sm:$0xff] %v16879_v9  ;;  %11289 = vmatprep.subr.mxu0 %v16879_v9  ;;  %v16885_v49 = vld [vmem:[%s19686_s3 + $0x198] sm:$0xff]  ;;  %v16903_v9 = vld [vmem:[%s19686_s3 + $0x90] sm:$0xff]  ;;  %v4404_v23 = vrot.slane %v16874_v28, %v20966_v19 }
 0x3a4   : > { %21286 = vst [vmem:[#allocation358_spill] sm:$0xff] %v16885_v49  ;;  %11324 = vmatprep.subr.mxu1 %v16885_v49  ;;  %v16891_v22 = vld [vmem:[%s19686_s3 + $0x18] sm:$0xff]  ;;  %21289 = vst [vmem:[#allocation361_spill] sm:$0xff] %v16903_v9  ;;  %v16909_v49 = vld [vmem:[%s19686_s3 + $0x190] sm:$0xff] }
 0x3a5   : > { %21287 = vst [vmem:[#allocation359_spill] sm:$0xff] %v16891_v22  ;;  %11290 = vmatpush3.msra.mxu0 %v16891_v22  ;;  %11325 = vmatpush3.msra.mxu1 %v16897_v3  ;;  %21290 = vst [vmem:[#allocation362_spill] sm:$0xff] %v16909_v49  ;;  %v16915_v22 = vld [vmem:[%s19686_s3 + $0x10] sm:$0xff] }
 0x3a6   : > { %11291 = vmatprep.subr.mxu0 %v16903_v9  ;;  %11326 = vmatprep.subr.mxu1 %v16909_v49  ;;  %21291 = vst [vmem:[#allocation363_spill] sm:$0xff] %v16915_v22  ;;  %v16921_v3 = vld [vmem:[%s19686_s3 + $0x110] sm:$0xff]  ;;  %v4400_v9 = vrot.slane %v16874_v28, %v20961_v46  ;;  %v16929_v49 = vld [vmem:[%s19686_s3 + $0x88] sm:$0xff] }
 0x3a7   : > { %11292 = vmatpush3.msra.mxu0 %v16915_v22  ;;  %21292 = vst [vmem:[#allocation364_spill] sm:$0xff] %v16921_v3  ;;  %11327 = vmatpush3.msra.mxu1 %v16921_v3  ;;  %21293 = vst [vmem:[#allocation365_spill] sm:$0xff] %v16929_v49  ;;  %v16935_v22 = vld [vmem:[%s19686_s3 + $0x188] sm:$0xff]  ;;  %v4408_v3 = vrot.slane %v16874_v28, %v20963_v37 }
 0x3a8   : > { %11293 = vmatprep.subr.mxu0 %v16929_v49  ;;  %21294 = vst [vmem:[#allocation366_spill] sm:$0xff] %v16935_v22  ;;  %11328 = vmatprep.subr.mxu1 %v16935_v22  ;;  %v16949_v49 = vld [vmem:[%s19686_s3 + $0x108] sm:$0xff]  ;;  %v4396_v22 = vrot.slane %v16874_v28, %v20965_v7 }
 0x3a9   : > { %11294 = vmatpush3.msra.mxu0 %v16943_v51  ;;  %21296 = vst [vmem:[#allocation368_spill] sm:$0xff] %v16949_v49  ;;  %11329 = vmatpush3.msra.mxu1 %v16949_v49  ;;  %v16965_v51 = vld [vmem:[%s19686_s3 + $0x180] sm:$0xff] }
 0x3aa   : > { %11295 = vmatprep.subr.mxu0 %v16959_v38  ;;  %21297 = vst [vmem:[#allocation369_spill] sm:$0xff] %v16965_v51  ;;  %11330 = vmatprep.subr.mxu1 %v16965_v51  ;;  %v16971_v49 = vld [vmem:[%s19686_s3] sm:$0xff]  ;;  %v16983_v51 = vld [vmem:[%s19686_s3 + $0x2f8] sm:$0xff] }
 0x3ab   : > { %11296 = vmatpush3.msra.mxu0 %v16971_v49  ;;  %4517 = vmatprep.mubr.f32.mxu0 %v4400_v9  ;;  %v16989_v9 = vld [vmem:[%s19686_s3 + $0x3f8] sm:$0xff] }
 0x3ac   : > { %11331 = vmatpush3.msra.mxu1 %v16977_v39  ;;  %4587 = vmatprep.mubr.f32.mxu1 %v4408_v3  ;;  %21298 = vst [vmem:[#allocation370_spill] sm:$0xff] %v16989_v9  ;;  %v16995_v3 = vld [vmem:[%s19686_s3 + $0x278] sm:$0xff] }
 0x3ad   : > { %4518 = vmatmul.mubr.f32.vlgmr.msra.gmra.mxu0 %v4396_v22  ;;  %4588 = vmatmul.mubr.f32.vlgmr.msra.gmra.mxu1 %v4404_v23  ;;  %21299 = vst [vmem:[#allocation371_spill] sm:$0xff] %v16995_v3  ;;  %v17001_v23 = vld [vmem:[%s19686_s3 + $0x378] sm:$0xff]  ;;  %v17007_v22 = vld [vmem:[%s19686_s3 + $0x2f0] sm:$0xff] }
 0x3ae   : > { %11335 = vmatprep.subr.mxu0 %v16983_v51  ;;  %11370 = vmatprep.subr.mxu1 %v16989_v9  ;;  %21300 = vst [vmem:[#allocation372_spill] sm:$0xff] %v17001_v23  ;;  %21301 = vst [vmem:[#allocation373_spill] sm:$0xff] %v17007_v22  ;;  %v17013_v9 = vld [vmem:[%s19686_s3 + $0x3f0] sm:$0xff] }
 0x3af   : > { %11336 = vmatpush3.msra.mxu0 %v16995_v3  ;;  %11371 = vmatpush3.msra.mxu1 %v17001_v23  ;;  %21302 = vst [vmem:[#allocation374_spill] sm:$0xff] %v17013_v9  ;;  %v17019_v3 = vld [vmem:[%s19686_s3 + $0x270] sm:$0xff] }
 0x3b0   : > { %11337 = vmatprep.subr.mxu0 %v17007_v22  ;;  %11372 = vmatprep.subr.mxu1 %v17013_v9  ;;  %21303 = vst [vmem:[#allocation375_spill] sm:$0xff] %v17019_v3  ;;  %v17025_v23 = vld [vmem:[%s19686_s3 + $0x370] sm:$0xff]  ;;  %v17031_v22 = vld [vmem:[%s19686_s3 + $0x2e8] sm:$0xff] }
 0x3b1   : > { %11338 = vmatpush3.msra.mxu0 %v17019_v3  ;;  %21304 = vst [vmem:[#allocation376_spill] sm:$0xff] %v17025_v23  ;;  %11373 = vmatpush3.msra.mxu1 %v17025_v23  ;;  %21305 = vst [vmem:[#allocation377_spill] sm:$0xff] %v17031_v22  ;;  %v17037_v9 = vld [vmem:[%s19686_s3 + $0x3e8] sm:$0xff] }
 0x3b2   : > { %11339 = vmatprep.subr.mxu0 %v17031_v22  ;;  %21306 = vst [vmem:[#allocation378_spill] sm:$0xff] %v17037_v9  ;;  %11374 = vmatprep.subr.mxu1 %v17037_v9  ;;  %v17043_v3 = vld [vmem:[%s19686_s3 + $0x268] sm:$0xff]  ;;  %v17055_v22 = vld [vmem:[%s19686_s3 + $0x2e0] sm:$0xff] }
 0x3b3   : > { %21307 = vst [vmem:[#allocation379_spill] sm:$0xff] %v17043_v3  ;;  %11340 = vmatpush3.msra.mxu0 %v17043_v3  ;;  %v17049_v23 = vld [vmem:[%s19686_s3 + $0x368] sm:$0xff]  ;;  %21309 = vst [vmem:[#allocation381_spill] sm:$0xff] %v17055_v22  ;;  %v17061_v9 = vld [vmem:[%s19686_s3 + $0x3e0] sm:$0xff] }
 0x3b4   : > { %21308 = vst [vmem:[#allocation380_spill] sm:$0xff] %v17049_v23  ;;  %11375 = vmatpush3.msra.mxu1 %v17049_v23  ;;  %11341 = vmatprep.subr.mxu0 %v17055_v22  ;;  %21310 = vst [vmem:[#allocation382_spill] sm:$0xff] %v17061_v9  ;;  %v17067_v3 = vld [vmem:[%s19686_s3 + $0x260] sm:$0xff]  ;;  %v17079_v22 = vld [vmem:[%s19686_s3 + $0x2d8] sm:$0xff] }
 0x3b5   : > { %11376 = vmatprep.subr.mxu1 %v17061_v9  ;;  %21311 = vst [vmem:[#allocation383_spill] sm:$0xff] %v17067_v3  ;;  %11342 = vmatpush3.msra.mxu0 %v17067_v3  ;;  %v17073_v23 = vld [vmem:[%s19686_s3 + $0x360] sm:$0xff]  ;;  %21313 = vst [vmem:[#allocation385_spill] sm:$0xff] %v17079_v22  ;;  %v17085_v9 = vld [vmem:[%s19686_s3 + $0x3d8] sm:$0xff] }
 0x3b6   : > { %21312 = vst [vmem:[#allocation384_spill] sm:$0xff] %v17073_v23  ;;  %11377 = vmatpush3.msra.mxu1 %v17073_v23  ;;  %11343 = vmatprep.subr.mxu0 %v17079_v22  ;;  %21314 = vst [vmem:[#allocation386_spill] sm:$0xff] %v17085_v9  ;;  %v17091_v3 = vld [vmem:[%s19686_s3 + $0x258] sm:$0xff]  ;;  %v17103_v22 = vld [vmem:[%s19686_s3 + $0x2d0] sm:$0xff] }
 0x3b7   : > { %11378 = vmatprep.subr.mxu1 %v17085_v9  ;;  %21315 = vst [vmem:[#allocation387_spill] sm:$0xff] %v17091_v3  ;;  %11344 = vmatpush3.msra.mxu0 %v17091_v3  ;;  %v17097_v23 = vld [vmem:[%s19686_s3 + $0x358] sm:$0xff]  ;;  %21317 = vst [vmem:[#allocation389_spill] sm:$0xff] %v17103_v22  ;;  %v17109_v9 = vld [vmem:[%s19686_s3 + $0x3d0] sm:$0xff] }
 0x3b8   : > { %21316 = vst [vmem:[#allocation388_spill] sm:$0xff] %v17097_v23  ;;  %11379 = vmatpush3.msra.mxu1 %v17097_v23  ;;  %11345 = vmatprep.subr.mxu0 %v17103_v22  ;;  %21318 = vst [vmem:[#allocation390_spill] sm:$0xff] %v17109_v9  ;;  %v17115_v3 = vld [vmem:[%s19686_s3 + $0x250] sm:$0xff]  ;;  %v17127_v22 = vld [vmem:[%s19686_s3 + $0x2c8] sm:$0xff] }
 0x3b9   : > { %11380 = vmatprep.subr.mxu1 %v17109_v9  ;;  %21319 = vst [vmem:[#allocation391_spill] sm:$0xff] %v17115_v3  ;;  %11346 = vmatpush3.msra.mxu0 %v17115_v3  ;;  %v17121_v23 = vld [vmem:[%s19686_s3 + $0x350] sm:$0xff]  ;;  %21321 = vst [vmem:[#allocation393_spill] sm:$0xff] %v17127_v22  ;;  %v17133_v9 = vld [vmem:[%s19686_s3 + $0x3c8] sm:$0xff] }
 0x3ba   : > { %21320 = vst [vmem:[#allocation392_spill] sm:$0xff] %v17121_v23  ;;  %11381 = vmatpush3.msra.mxu1 %v17121_v23  ;;  %11347 = vmatprep.subr.mxu0 %v17127_v22  ;;  %21322 = vst [vmem:[#allocation394_spill] sm:$0xff] %v17133_v9  ;;  %v17139_v3 = vld [vmem:[%s19686_s3 + $0x248] sm:$0xff]  ;;  %v17151_v22 = vld [vmem:[%s19686_s3 + $0x2c0] sm:$0xff] }
 0x3bb   : > { %11382 = vmatprep.subr.mxu1 %v17133_v9  ;;  %21323 = vst [vmem:[#allocation395_spill] sm:$0xff] %v17139_v3  ;;  %11348 = vmatpush3.msra.mxu0 %v17139_v3  ;;  %v17145_v23 = vld [vmem:[%s19686_s3 + $0x348] sm:$0xff]  ;;  %21325 = vst [vmem:[#allocation397_spill] sm:$0xff] %v17151_v22  ;;  %v17157_v9 = vld [vmem:[%s19686_s3 + $0x3c0] sm:$0xff] }
 0x3bc   : > { %21324 = vst [vmem:[#allocation396_spill] sm:$0xff] %v17145_v23  ;;  %11383 = vmatpush3.msra.mxu1 %v17145_v23  ;;  %11349 = vmatprep.subr.mxu0 %v17151_v22  ;;  %21326 = vst [vmem:[#allocation398_spill] sm:$0xff] %v17157_v9  ;;  %v17163_v3 = vld [vmem:[%s19686_s3 + $0x240] sm:$0xff]  ;;  %v17175_v22 = vld [vmem:[%s19686_s3 + $0x2b8] sm:$0xff] }
 0x3bd   : > { %11384 = vmatprep.subr.mxu1 %v17157_v9  ;;  %21327 = vst [vmem:[#allocation399_spill] sm:$0xff] %v17163_v3  ;;  %11350 = vmatpush3.msra.mxu0 %v17163_v3  ;;  %v17169_v23 = vld [vmem:[%s19686_s3 + $0x340] sm:$0xff]  ;;  %21329 = vst [vmem:[#allocation401_spill] sm:$0xff] %v17175_v22  ;;  %v17181_v9 = vld [vmem:[%s19686_s3 + $0x3b8] sm:$0xff] }
 0x3be   : > { %21328 = vst [vmem:[#allocation400_spill] sm:$0xff] %v17169_v23  ;;  %11385 = vmatpush3.msra.mxu1 %v17169_v23  ;;  %11351 = vmatprep.subr.mxu0 %v17175_v22  ;;  %21330 = vst [vmem:[#allocation402_spill] sm:$0xff] %v17181_v9  ;;  %v17187_v3 = vld [vmem:[%s19686_s3 + $0x238] sm:$0xff]  ;;  %v17199_v22 = vld [vmem:[%s19686_s3 + $0x2b0] sm:$0xff] }
 0x3bf   : > { %11386 = vmatprep.subr.mxu1 %v17181_v9  ;;  %21331 = vst [vmem:[#allocation403_spill] sm:$0xff] %v17187_v3  ;;  %11352 = vmatpush3.msra.mxu0 %v17187_v3  ;;  %v17193_v23 = vld [vmem:[%s19686_s3 + $0x338] sm:$0xff]  ;;  %21333 = vst [vmem:[#allocation405_spill] sm:$0xff] %v17199_v22  ;;  %v17205_v9 = vld [vmem:[%s19686_s3 + $0x3b0] sm:$0xff] }
 0x3c0   : > { %21332 = vst [vmem:[#allocation404_spill] sm:$0xff] %v17193_v23  ;;  %11387 = vmatpush3.msra.mxu1 %v17193_v23  ;;  %11353 = vmatprep.subr.mxu0 %v17199_v22  ;;  %21334 = vst [vmem:[#allocation406_spill] sm:$0xff] %v17205_v9  ;;  %v17211_v3 = vld [vmem:[%s19686_s3 + $0x230] sm:$0xff]  ;;  %v17223_v22 = vld [vmem:[%s19686_s3 + $0x2a8] sm:$0xff] }
 0x3c1   : > { %11388 = vmatprep.subr.mxu1 %v17205_v9  ;;  %21335 = vst [vmem:[#allocation407_spill] sm:$0xff] %v17211_v3  ;;  %11354 = vmatpush3.msra.mxu0 %v17211_v3  ;;  %v17217_v23 = vld [vmem:[%s19686_s3 + $0x330] sm:$0xff]  ;;  %21337 = vst [vmem:[#allocation409_spill] sm:$0xff] %v17223_v22  ;;  %v17229_v9 = vld [vmem:[%s19686_s3 + $0x3a8] sm:$0xff] }
 0x3c2   : > { %21336 = vst [vmem:[#allocation408_spill] sm:$0xff] %v17217_v23  ;;  %11389 = vmatpush3.msra.mxu1 %v17217_v23  ;;  %11355 = vmatprep.subr.mxu0 %v17223_v22  ;;  %21338 = vst [vmem:[#allocation410_spill] sm:$0xff] %v17229_v9  ;;  %v17235_v3 = vld [vmem:[%s19686_s3 + $0x228] sm:$0xff]  ;;  %v17247_v22 = vld [vmem:[%s19686_s3 + $0x2a0] sm:$0xff] }
 0x3c3   : > { %11390 = vmatprep.subr.mxu1 %v17229_v9  ;;  %21339 = vst [vmem:[#allocation411_spill] sm:$0xff] %v17235_v3  ;;  %11356 = vmatpush3.msra.mxu0 %v17235_v3  ;;  %v17241_v23 = vld [vmem:[%s19686_s3 + $0x328] sm:$0xff]  ;;  %21341 = vst [vmem:[#allocation413_spill] sm:$0xff] %v17247_v22  ;;  %v17253_v9 = vld [vmem:[%s19686_s3 + $0x3a0] sm:$0xff] }
 0x3c4   : > { %21340 = vst [vmem:[#allocation412_spill] sm:$0xff] %v17241_v23  ;;  %11391 = vmatpush3.msra.mxu1 %v17241_v23  ;;  %11357 = vmatprep.subr.mxu0 %v17247_v22  ;;  %21342 = vst [vmem:[#allocation414_spill] sm:$0xff] %v17253_v9  ;;  %v17259_v3 = vld [vmem:[%s19686_s3 + $0x220] sm:$0xff]  ;;  %v17271_v22 = vld [vmem:[%s19686_s3 + $0x298] sm:$0xff] }
 0x3c5   : > { %11392 = vmatprep.subr.mxu1 %v17253_v9  ;;  %21343 = vst [vmem:[#allocation415_spill] sm:$0xff] %v17259_v3  ;;  %11358 = vmatpush3.msra.mxu0 %v17259_v3  ;;  %v17265_v23 = vld [vmem:[%s19686_s3 + $0x320] sm:$0xff]  ;;  %21345 = vst [vmem:[#allocation417_spill] sm:$0xff] %v17271_v22  ;;  %v17277_v9 = vld [vmem:[%s19686_s3 + $0x398] sm:$0xff] }
 0x3c6   : > { %21344 = vst [vmem:[#allocation416_spill] sm:$0xff] %v17265_v23  ;;  %11393 = vmatpush3.msra.mxu1 %v17265_v23  ;;  %11359 = vmatprep.subr.mxu0 %v17271_v22  ;;  %21346 = vst [vmem:[#allocation418_spill] sm:$0xff] %v17277_v9  ;;  %v17283_v3 = vld [vmem:[%s19686_s3 + $0x218] sm:$0xff]  ;;  %v17295_v22 = vld [vmem:[%s19686_s3 + $0x290] sm:$0xff] }
 0x3c7   : > { %11394 = vmatprep.subr.mxu1 %v17277_v9  ;;  %21347 = vst [vmem:[#allocation419_spill] sm:$0xff] %v17283_v3  ;;  %11360 = vmatpush3.msra.mxu0 %v17283_v3  ;;  %v17289_v23 = vld [vmem:[%s19686_s3 + $0x318] sm:$0xff]  ;;  %21349 = vst [vmem:[#allocation421_spill] sm:$0xff] %v17295_v22  ;;  %v17301_v9 = vld [vmem:[%s19686_s3 + $0x390] sm:$0xff] }
 0x3c8   : > { %21348 = vst [vmem:[#allocation420_spill] sm:$0xff] %v17289_v23  ;;  %11395 = vmatpush3.msra.mxu1 %v17289_v23  ;;  %11361 = vmatprep.subr.mxu0 %v17295_v22  ;;  %21350 = vst [vmem:[#allocation422_spill] sm:$0xff] %v17301_v9  ;;  %v17307_v3 = vld [vmem:[%s19686_s3 + $0x210] sm:$0xff]  ;;  %v4416_v22 = vrot.slane %v16874_v28, %v21169_v55  ;;  %v17335_v55 = vld [vmem:[%s19686_s3 + $0x208] sm:$0xff] }
 0x3c9   : > { %11396 = vmatprep.subr.mxu1 %v17301_v9  ;;  %21351 = vst [vmem:[#allocation423_spill] sm:$0xff] %v17307_v3  ;;  %11362 = vmatpush3.msra.mxu0 %v17307_v3  ;;  %v17313_v23 = vld [vmem:[%s19686_s3 + $0x310] sm:$0xff]  ;;  %v17321_v9 = vld [vmem:[%s19686_s3 + $0x288] sm:$0xff]  ;;  %21355 = vst [vmem:[#allocation440_spill] sm:$0xff] %v17335_v55 }
 0x3ca   : > { %21352 = vst [vmem:[#allocation424_spill] sm:$0xff] %v17313_v23  ;;  %11397 = vmatpush3.msra.mxu1 %v17313_v23  ;;  %21353 = vst [vmem:[#allocation425_spill] sm:$0xff] %v17321_v9  ;;  %11363 = vmatprep.subr.mxu0 %v17321_v9  ;;  %v17327_v3 = vld [vmem:[%s19686_s3 + $0x388] sm:$0xff]  ;;  %v4412_v23 = vrot.slane %v16874_v28, %v21172_v17  ;;  %v17349_v17 = vld [vmem:[%s19686_s3 + $0x280] sm:$0xff] }
 0x3cb   : > { %21354 = vst [vmem:[#allocation439_spill] sm:$0xff] %v17327_v3  ;;  %11398 = vmatprep.subr.mxu1 %v17327_v3  ;;  %11364 = vmatpush3.msra.mxu0 %v17335_v55  ;;  %v17341_v9 = vld [vmem:[%s19686_s3 + $0x308] sm:$0xff]  ;;  %v4424_v3 = vrot.slane %v16874_v28, %v21032_v53  ;;  %v17355_v55 = vld [vmem:[%s19686_s3 + $0x380] sm:$0xff] }
 0x3cc   : > { %21356 = vst [vmem:[#allocation442_spill] sm:$0xff] %v17341_v9  ;;  %11399 = vmatpush3.msra.mxu1 %v17341_v9  ;;  %11365 = vmatprep.subr.mxu0 %v17349_v17  ;;  %v4420_v9 = vrot.slane %v16874_v28, %v21176_v27 }
 0x3cd   : > { %11400 = vmatprep.subr.mxu1 %v17355_v55  ;;  %11366 = vmatpush3.msra.mxu0 %v21177_v1  ;;  %v21357_v1 = vld [vmem:[#allocation426_spill] sm:$0xff] }
 0x3ce   : > { %4657 = vmatprep.mubr.f32.mxu0 %v4416_v22  ;;  %11401 = vmatpush3.msra.mxu1 %v21178_v48  ;;  %v21358_v48 = vld [vmem:[#allocation427_spill] sm:$0xff]  ;;  %v21401_v22 = vld [vmem:[#allocation334_spill] sm:$0xff] }
 0x3cf   : > { %4658 = vmatmul.mubr.f32.vlgmr.msra.gmra.mxu0 %v4412_v23  ;;  %4727 = vmatprep.mubr.f32.mxu1 %v4424_v3  ;;  %v21399_v3 = vld [vmem:[#allocation332_spill] sm:$0xff]  ;;  %v21400_v23 = vld [vmem:[#allocation333_spill] sm:$0xff] }
 0x3d0   : > { %11405 = vmatprep.subr.mxu0 %v21179_v44  ;;  %11440 = vmatprep.subr.mxu1 %v21180_v18  ;;  %v21359_v44 = vld [vmem:[#allocation428_spill] sm:$0xff]  ;;  %v21360_v18 = vld [vmem:[#allocation429_spill] sm:$0xff] }
 0x3d1   : > { %4728 = vmatmul.mubr.f32.vlgmr.msra.gmra.mxu1 %v4420_v9  ;;  %11406 = vmatpush3.msra.mxu0 %v21181_v45  ;;  %v21361_v45 = vld [vmem:[#allocation430_spill] sm:$0xff]  ;;  %v21398_v9 = vld [vmem:[#allocation331_spill] sm:$0xff] }
 0x3d2   : > { %11441 = vmatpush3.msra.mxu1 %v21182_v11  ;;  %11407 = vmatprep.subr.mxu0 %v21183_v24  ;;  %v4388_v11 = vld [vmem:[%s19685_s2 + $0x8] sm:$0xf]  ;;  %v21362_v24 = vld [vmem:[#allocation431_spill] sm:$0xff] }
 0x3d3   : > { %11442 = vmatprep.subr.mxu1 %v21184_v21  ;;  %11408 = vmatpush3.msra.mxu0 %v21185_v12  ;;  %v21363_v21 = vld [vmem:[#allocation432_spill] sm:$0xff]  ;;  %v21364_v12 = vld [vmem:[#allocation433_spill] sm:$0xff] }
 0x3d4   : > { %11443 = vmatpush3.msra.mxu1 %v21186_v6  ;;  %11409 = vmatprep.subr.mxu0 %v21187_v40  ;;  %v21365_v6 = vld [vmem:[#allocation434_spill] sm:$0xff]  ;;  %v21366_v40 = vld [vmem:[#allocation435_spill] sm:$0xff] }
 0x3d5   : > { %11444 = vmatprep.subr.mxu1 %v21188_v43  ;;  %11410 = vmatpush3.msra.mxu0 %v21189_v32  ;;  %v21367_v43 = vld [vmem:[#allocation436_spill] sm:$0xff]  ;;  %v17413_v32 = vmax.f32 %v4388_v11, 0.0 }
 0x3d6   : > { %11445 = vmatpush3.msra.mxu1 %v21190_v59  ;;  %11411 = vmatprep.subr.mxu0 %v21191_v20  ;;  %v21368_v59 = vld [vmem:[#allocation437_spill] sm:$0xff]  ;;  %v21369_v20 = vld [vmem:[#allocation438_spill] sm:$0xff]  ;;  %v21407_v11 = vld [vmem:[#allocation340_spill] sm:$0xff] }
 0x3d7   : > { %11446 = vmatprep.subr.mxu1 %v21192_v42  ;;  %11412 = vmatpush3.msra.mxu0 %v21193_v16  ;;  %v21370_v42 = vld [vmem:[#allocation441_spill] sm:$0xff]  ;;  %v21371_v16 = vld [vmem:[#allocation444_spill] sm:$0xff] }
 0x3d8   : > { %11447 = vmatpush3.msra.mxu1 %v21194_v50  ;;  %11413 = vmatprep.subr.mxu0 %v21195_v8  ;;  %v4432_v50 = vrot.slane %v17413_v32, %v20961_v46  ;;  %v4428_v8 = vrot.slane %v17413_v32, %v20965_v7 }
 0x3d9   : > { %11448 = vmatprep.subr.mxu1 %v21196_v56  ;;  %11414 = vmatpush3.msra.mxu0 %v21197_v0  ;;  %v21372_v56 = vld [vmem:[#allocation447_spill] sm:$0xff]  ;;  %v4440_v0 = vrot.slane %v17413_v32, %v20963_v37 }
 0x3da   : > { %11449 = vmatpush3.msra.mxu1 %v21198_v54  ;;  %11415 = vmatprep.subr.mxu0 %v21199_v52  ;;  %v21373_v54 = vld [vmem:[#allocation448_spill] sm:$0xff]  ;;  %v4436_v52 = vrot.slane %v17413_v32, %v20966_v19 }
 0x3db   : > { %11450 = vmatprep.subr.mxu1 %v21200_v5  ;;  %11416 = vmatpush3.msra.mxu0 %v21201_v36  ;;  %v21374_v5 = vld [vmem:[#allocation449_spill] sm:$0xff]  ;;  %v21375_v36 = vld [vmem:[#allocation450_spill] sm:$0xff] }
 0x3dc   : > { %11451 = vmatpush3.msra.mxu1 %v21202_v58  ;;  %11417 = vmatprep.subr.mxu0 %v21203_v31  ;;  %v21376_v58 = vld [vmem:[#allocation309_spill] sm:$0xff]  ;;  %v21378_v31 = vld [vmem:[#allocation311_spill] sm:$0xff] }
 0x3dd   : > { %11452 = vmatprep.subr.mxu1 %v21204_v35  ;;  %11418 = vmatpush3.msra.mxu0 %v21205_v41  ;;  %v21380_v35 = vld [vmem:[#allocation313_spill] sm:$0xff]  ;;  %v21381_v41 = vld [vmem:[#allocation314_spill] sm:$0xff] }
 0x3de   : > { %11453 = vmatpush3.msra.mxu1 %v21206_v47  ;;  %11419 = vmatprep.subr.mxu0 %v21207_v14  ;;  %v21382_v47 = vld [vmem:[#allocation315_spill] sm:$0xff]  ;;  %v21383_v14 = vld [vmem:[#allocation316_spill] sm:$0xff] }
 0x3df   : > { %11454 = vmatprep.subr.mxu1 %v21208_v25  ;;  %11420 = vmatpush3.msra.mxu0 %v21209_v15  ;;  %v21384_v25 = vld [vmem:[#allocation317_spill] sm:$0xff]  ;;  %v21385_v15 = vld [vmem:[#allocation318_spill] sm:$0xff] }
 0x3e0   : > { %11455 = vmatpush3.msra.mxu1 %v21210_v61  ;;  %11421 = vmatprep.subr.mxu0 %v21211_v29  ;;  %v21386_v61 = vld [vmem:[#allocation319_spill] sm:$0xff]  ;;  %v21387_v29 = vld [vmem:[#allocation320_spill] sm:$0xff] }
 0x3e1   : > { %11456 = vmatprep.subr.mxu1 %v21212_v60  ;;  %11422 = vmatpush3.msra.mxu0 %v21213_v63  ;;  %v21388_v60 = vld [vmem:[#allocation321_spill] sm:$0xff]  ;;  %v21389_v63 = vld [vmem:[#allocation322_spill] sm:$0xff] }
 0x3e2   : > { %11457 = vmatpush3.msra.mxu1 %v21214_v30  ;;  %11423 = vmatprep.subr.mxu0 %v21215_v10  ;;  %v21390_v30 = vld [vmem:[#allocation323_spill] sm:$0xff]  ;;  %v21391_v10 = vld [vmem:[#allocation324_spill] sm:$0xff] }
 0x3e3   : > { %11458 = vmatprep.subr.mxu1 %v21357_v1  ;;  %11424 = vmatpush3.msra.mxu0 %v21358_v48  ;;  %v21402_v1 = vld [vmem:[#allocation335_spill] sm:$0xff]  ;;  %v21403_v48 = vld [vmem:[#allocation336_spill] sm:$0xff] }
 0x3e4   : > { %11459 = vmatpush3.msra.mxu1 %v21359_v44  ;;  %11425 = vmatprep.subr.mxu0 %v21360_v18  ;;  %v21404_v44 = vld [vmem:[#allocation337_spill] sm:$0xff]  ;;  %v21405_v18 = vld [vmem:[#allocation338_spill] sm:$0xff] }
 0x3e5   : > { %11460 = vmatprep.subr.mxu1 %v21361_v45  ;;  %11426 = vmatpush3.msra.mxu0 %v21362_v24  ;;  %v21406_v45 = vld [vmem:[#allocation339_spill] sm:$0xff]  ;;  %v21408_v24 = vld [vmem:[#allocation341_spill] sm:$0xff] }
 0x3e6   : > { %11461 = vmatpush3.msra.mxu1 %v21363_v21  ;;  %11427 = vmatprep.subr.mxu0 %v21364_v12  ;;  %v21409_v21 = vld [vmem:[#allocation342_spill] sm:$0xff]  ;;  %v21410_v12 = vld [vmem:[#allocation343_spill] sm:$0xff] }
 0x3e7   : > { %11462 = vmatprep.subr.mxu1 %v21365_v6  ;;  %11428 = vmatpush3.msra.mxu0 %v21366_v40  ;;  %v21411_v6 = vld [vmem:[#allocation344_spill] sm:$0xff]  ;;  %v21412_v40 = vld [vmem:[#allocation345_spill] sm:$0xff] }
 0x3e8   : > { %11463 = vmatpush3.msra.mxu1 %v21367_v43  ;;  %11429 = vmatprep.subr.mxu0 %v21368_v59  ;;  %v21413_v43 = vld [vmem:[#allocation346_spill] sm:$0xff]  ;;  %v21414_v59 = vld [vmem:[#allocation347_spill] sm:$0xff] }
 0x3e9   : > { %11464 = vmatprep.subr.mxu1 %v21369_v20  ;;  %11430 = vmatpush3.msra.mxu0 %v21229_v34  ;;  %v21393_v34 = vld [vmem:[#allocation326_spill] sm:$0xff]  ;;  %v21415_v20 = vld [vmem:[#allocation348_spill] sm:$0xff] }
 0x3ea   : > { %11465 = vmatpush3.msra.mxu1 %v21230_v4  ;;  %11431 = vmatprep.subr.mxu0 %v21370_v42  ;;  %v21394_v4 = vld [vmem:[#allocation327_spill] sm:$0xff]  ;;  %v21416_v42 = vld [vmem:[#allocation349_spill] sm:$0xff] }
 0x3eb   : > { %11466 = vmatprep.subr.mxu1 %v21232_v62  ;;  %11432 = vmatpush3.msra.mxu0 %v21233_v13  ;;  %v21395_v62 = vld [vmem:[#allocation328_spill] sm:$0xff]  ;;  %v21396_v13 = vld [vmem:[#allocation329_spill] sm:$0xff] }
 0x3ec   : > { %11467 = vmatpush3.msra.mxu1 %v21371_v16  ;;  %11433 = vmatprep.subr.mxu0 %v21235_v26  ;;  %v21397_v26 = vld [vmem:[#allocation330_spill] sm:$0xff] }
 0x3ed   : > { %11468 = vmatprep.subr.mxu1 %v21236_v57  ;;  %11434 = vmatpush3.msra.mxu0 %v21372_v56  ;;  %v21392_v57 = vld [vmem:[#allocation325_spill] sm:$0xff]  ;;  %v21417_v16 = vld [vmem:[#allocation350_spill] sm:$0xff] }
 0x3ee   : > { %11469 = vmatpush3.msra.mxu1 %v16333_v33  ;;  %11435 = vmatprep.subr.mxu0 %v16340_v2  ;;  %v21377_v33 = vld [vmem:[#allocation310_spill] sm:$0xff]  ;;  %v21379_v2 = vld [vmem:[#allocation312_spill] sm:$0xff]  ;;  %v21420_v56 = vld [vmem:[#allocation353_spill] sm:$0xff] }
 0x3ef   : > { %11470 = vmatprep.subr.mxu1 %v21373_v54  ;;  %11436 = vmatpush3.msra.mxu0 %v21374_v5  ;;  %v21422_v54 = vld [vmem:[#allocation355_spill] sm:$0xff]  ;;  %v17489_v5 = vmul.f32 %v16874_v28, %v16874_v28 }
 0x3f0   : > { %4797 = vmatprep.mubr.f32.mxu0 %v4432_v50  ;;  %11471 = vmatpush3.msra.mxu1 %v21375_v36  ;;  %v21418_v50 = vld [vmem:[#allocation351_spill] sm:$0xff]  ;;  %v21424_v36 = vld [vmem:[#allocation357_spill] sm:$0xff] }
 0x3f1   : > { %4798 = vmatmul.mubr.f32.vlgmr.msra.gmra.mxu0 %v4428_v8  ;;  %4867 = vmatprep.mubr.f32.mxu1 %v4440_v0  ;;  %v21419_v8 = vld [vmem:[#allocation352_spill] sm:$0xff]  ;;  %v21421_v0 = vld [vmem:[#allocation354_spill] sm:$0xff]  ;;  %v4886_v28 = vrot.slane %v17489_v5, %v20961_v46 }
 0x3f2   : > { %11475 = vmatprep.subr.mxu0 %v21376_v58  ;;  %11510 = vmatprep.subr.mxu1 %v21377_v33  ;;  %v21425_v58 = vld [vmem:[#allocation358_spill] sm:$0xff]  ;;  %v21426_v33 = vld [vmem:[#allocation359_spill] sm:$0xff] }
 0x3f3   : > { %4868 = vmatmul.mubr.f32.vlgmr.msra.gmra.mxu1 %v4436_v52  ;;  %11476 = vmatpush3.msra.mxu0 %v21378_v31  ;;  %v21423_v52 = vld [vmem:[#allocation356_spill] sm:$0xff] }
 0x3f4   : > { %11511 = vmatpush3.msra.mxu1 %v21379_v2  ;;  %11477 = vmatprep.subr.mxu0 %v21380_v35  ;;  %v21427_v31 = vld [vmem:[#allocation360_spill] sm:$0xff]  ;;  %v21428_v2 = vld [vmem:[#allocation361_spill] sm:$0xff]  ;;  %v21429_v35 = vld [vmem:[#allocation362_spill] sm:$0xff] }
 0x3f5   : > { %11512 = vmatprep.subr.mxu1 %v21381_v41  ;;  %11478 = vmatpush3.msra.mxu0 %v21382_v47  ;;  %v21430_v41 = vld [vmem:[#allocation363_spill] sm:$0xff]  ;;  %v21431_v47 = vld [vmem:[#allocation364_spill] sm:$0xff] }
 0x3f6   : > { %11513 = vmatpush3.msra.mxu1 %v21383_v14  ;;  %11479 = vmatprep.subr.mxu0 %v21384_v25  ;;  %v21432_v14 = vld [vmem:[#allocation365_spill] sm:$0xff]  ;;  %v21433_v25 = vld [vmem:[#allocation366_spill] sm:$0xff] }
 0x3f7   : > { %11514 = vmatprep.subr.mxu1 %v21385_v15  ;;  %11480 = vmatpush3.msra.mxu0 %v21386_v61  ;;  %v4894_v15 = vrot.slane %v17489_v5, %v20963_v37  ;;  %v21434_v61 = vld [vmem:[#allocation367_spill] sm:$0xff] }
 0x3f8   : > { %11515 = vmatpush3.msra.mxu1 %v21387_v29  ;;  %11481 = vmatprep.subr.mxu0 %v21388_v60  ;;  %v21435_v29 = vld [vmem:[#allocation368_spill] sm:$0xff]  ;;  %v4882_v60 = vrot.slane %v17489_v5, %v20965_v7 }
 0x3f9   : > { %11516 = vmatprep.subr.mxu1 %v21389_v63  ;;  %11482 = vmatpush3.msra.mxu0 %v21390_v30  ;;  %v4890_v63 = vrot.slane %v17489_v5, %v20966_v19  ;;  %v21436_v30 = vld [vmem:[#allocation369_spill] sm:$0xff] }
 0x3fa   : > { %11517 = vmatpush3.msra.mxu1 %v21391_v10  ;;  %11483 = vmatprep.subr.mxu0 %v21392_v57  ;;  %v21437_v10 = vld [vmem:[#allocation370_spill] sm:$0xff]  ;;  %v21438_v57 = vld [vmem:[#allocation371_spill] sm:$0xff] }
 0x3fb   : > { %11518 = vmatprep.subr.mxu1 %v21393_v34  ;;  %11484 = vmatpush3.msra.mxu0 %v21394_v4  ;;  %v21439_v34 = vld [vmem:[#allocation372_spill] sm:$0xff]  ;;  %v21440_v4 = vld [vmem:[#allocation373_spill] sm:$0xff] }
 0x3fc   : > { %11519 = vmatpush3.msra.mxu1 %v21395_v62  ;;  %11485 = vmatprep.subr.mxu0 %v21396_v13  ;;  %v21442_v62 = vld [vmem:[#allocation375_spill] sm:$0xff]  ;;  %v21445_v13 = vld [vmem:[#allocation378_spill] sm:$0xff] }
 0x3fd   : > { %11520 = vmatprep.subr.mxu1 %v21397_v26  ;;  %11486 = vmatpush3.msra.mxu0 %v21398_v9  ;;  %v21446_v26 = vld [vmem:[#allocation379_spill] sm:$0xff]  ;;  %v21448_v9 = vld [vmem:[#allocation381_spill] sm:$0xff] }
 0x3fe   : > { %11521 = vmatpush3.msra.mxu1 %v21399_v3  ;;  %11487 = vmatprep.subr.mxu0 %v21400_v23  ;;  %v21449_v3 = vld [vmem:[#allocation382_spill] sm:$0xff]  ;;  %v21450_v23 = vld [vmem:[#allocation383_spill] sm:$0xff] }
 0x3ff   : > { %11522 = vmatprep.subr.mxu1 %v21401_v22  ;;  %11488 = vmatpush3.msra.mxu0 %v21402_v1  ;;  %v21451_v22 = vld [vmem:[#allocation384_spill] sm:$0xff]  ;;  %v21452_v1 = vld [vmem:[#allocation385_spill] sm:$0xff] }
 0x400   : > { %11523 = vmatpush3.msra.mxu1 %v21403_v48  ;;  %11489 = vmatprep.subr.mxu0 %v21404_v44  ;;  %v21453_v48 = vld [vmem:[#allocation386_spill] sm:$0xff]  ;;  %v21454_v44 = vld [vmem:[#allocation387_spill] sm:$0xff] }
 0x401   : > { %11524 = vmatprep.subr.mxu1 %v21405_v18  ;;  %11490 = vmatpush3.msra.mxu0 %v21406_v45  ;;  %v21455_v18 = vld [vmem:[#allocation388_spill] sm:$0xff]  ;;  %v21456_v45 = vld [vmem:[#allocation389_spill] sm:$0xff] }
 0x402   : > { %11525 = vmatpush3.msra.mxu1 %v21407_v11  ;;  %11491 = vmatprep.subr.mxu0 %v21408_v24  ;;  %v21457_v11 = vld [vmem:[#allocation390_spill] sm:$0xff]  ;;  %v21458_v24 = vld [vmem:[#allocation391_spill] sm:$0xff] }
 0x403   : > { %11526 = vmatprep.subr.mxu1 %v21409_v21  ;;  %11492 = vmatpush3.msra.mxu0 %v21410_v12  ;;  %v21459_v21 = vld [vmem:[#allocation392_spill] sm:$0xff]  ;;  %v21460_v12 = vld [vmem:[#allocation393_spill] sm:$0xff] }
 0x404   : > { %11527 = vmatpush3.msra.mxu1 %v21411_v6  ;;  %11493 = vmatprep.subr.mxu0 %v21412_v40  ;;  %v21461_v6 = vld [vmem:[#allocation394_spill] sm:$0xff]  ;;  %v21462_v40 = vld [vmem:[#allocation395_spill] sm:$0xff] }
 0x405   : > { %11528 = vmatprep.subr.mxu1 %v21413_v43  ;;  %11494 = vmatpush3.msra.mxu0 %v21414_v59  ;;  %v21463_v43 = vld [vmem:[#allocation396_spill] sm:$0xff]  ;;  %v21464_v59 = vld [vmem:[#allocation397_spill] sm:$0xff] }
 0x406   : > { %11529 = vmatpush3.msra.mxu1 %v21415_v20  ;;  %11495 = vmatprep.subr.mxu0 %v21416_v42  ;;  %v21465_v20 = vld [vmem:[#allocation398_spill] sm:$0xff]  ;;  %v21466_v42 = vld [vmem:[#allocation399_spill] sm:$0xff] }
 0x407   : > { %11530 = vmatprep.subr.mxu1 %v21417_v16  ;;  %11496 = vmatpush3.msra.mxu0 %v21418_v50  ;;  %v21467_v16 = vld [vmem:[#allocation400_spill] sm:$0xff]  ;;  %v21468_v50 = vld [vmem:[#allocation401_spill] sm:$0xff] }
 0x408   : > { %11531 = vmatpush3.msra.mxu1 %v21419_v8  ;;  %11497 = vmatprep.subr.mxu0 %v21420_v56  ;;  %v21469_v8 = vld [vmem:[#allocation402_spill] sm:$0xff]  ;;  %v21470_v56 = vld [vmem:[#allocation403_spill] sm:$0xff] }
 0x409   : > { %11532 = vmatprep.subr.mxu1 %v21421_v0  ;;  %11498 = vmatpush3.msra.mxu0 %v21422_v54  ;;  %v21471_v0 = vld [vmem:[#allocation404_spill] sm:$0xff]  ;;  %v21472_v54 = vld [vmem:[#allocation405_spill] sm:$0xff] }
 0x40a   : > { %11533 = vmatpush3.msra.mxu1 %v21423_v52  ;;  %11499 = vmatprep.subr.mxu0 %v21424_v36  ;;  %v21473_v52 = vld [vmem:[#allocation406_spill] sm:$0xff]  ;;  %v21474_v36 = vld [vmem:[#allocation407_spill] sm:$0xff] }
 0x40b   : > { %11534 = vmatprep.subr.mxu1 %v21425_v58  ;;  %11500 = vmatpush3.msra.mxu0 %v21426_v33  ;;  %v21475_v58 = vld [vmem:[#allocation408_spill] sm:$0xff]  ;;  %v21476_v33 = vld [vmem:[#allocation409_spill] sm:$0xff] }
 0x40c   : > { %11535 = vmatpush3.msra.mxu1 %v21427_v31  ;;  %11501 = vmatprep.subr.mxu0 %v21428_v2  ;;  %v21477_v31 = vld [vmem:[#allocation410_spill] sm:$0xff]  ;;  %v21478_v2 = vld [vmem:[#allocation411_spill] sm:$0xff] }
 0x40d   : > { %11536 = vmatprep.subr.mxu1 %v21429_v35  ;;  %11502 = vmatpush3.msra.mxu0 %v21430_v41  ;;  %v21479_v35 = vld [vmem:[#allocation412_spill] sm:$0xff]  ;;  %v21480_v41 = vld [vmem:[#allocation413_spill] sm:$0xff] }
 0x40e   : > { %11537 = vmatpush3.msra.mxu1 %v21431_v47  ;;  %11503 = vmatprep.subr.mxu0 %v21432_v14  ;;  %v21481_v47 = vld [vmem:[#allocation414_spill] sm:$0xff]  ;;  %v21483_v14 = vld [vmem:[#allocation416_spill] sm:$0xff] }
 0x40f   : > { %11538 = vmatprep.subr.mxu1 %v21433_v25  ;;  %11504 = vmatpush3.msra.mxu0 %v21434_v61  ;;  %v21484_v25 = vld [vmem:[#allocation417_spill] sm:$0xff]  ;;  %v21486_v61 = vld [vmem:[#allocation419_spill] sm:$0xff] }
 0x410   : > { %11539 = vmatpush3.msra.mxu1 %v21435_v29  ;;  %11505 = vmatprep.subr.mxu0 %v16959_v38  ;;  %v21441_v38 = vld [vmem:[#allocation374_spill] sm:$0xff]  ;;  %v21487_v29 = vld [vmem:[#allocation420_spill] sm:$0xff] }
 0x411   : > { %11540 = vmatprep.subr.mxu1 %v21436_v30  ;;  %11506 = vmatpush3.msra.mxu0 %v16971_v49  ;;  %v21443_v49 = vld [vmem:[#allocation376_spill] sm:$0xff]  ;;  %v21490_v30 = vld [vmem:[#allocation423_spill] sm:$0xff] }
 0x412   : > { %5003 = vmatprep.mubr.f32.mxu0 %v4886_v28  ;;  %11541 = vmatpush3.msra.mxu1 %v16977_v39  ;;  %v21444_v39 = vld [vmem:[#allocation377_spill] sm:$0xff]  ;;  %v21482_v28 = vld [vmem:[#allocation415_spill] sm:$0xff] }
 0x413   : > { %5073 = vmatprep.mubr.f32.mxu1 %v4894_v15  ;;  %5004 = vmatmul.mubr.f32.vlgmr.msra.gmra.mxu0 %v4882_v60  ;;  %v21485_v15 = vld [vmem:[#allocation418_spill] sm:$0xff]  ;;  %v21488_v60 = vld [vmem:[#allocation421_spill] sm:$0xff] }
 0x414   : > { %5074 = vmatmul.mubr.f32.vlgmr.msra.gmra.mxu1 %v4890_v63  ;;  %11545 = vmatprep.subr.mxu0 %v16983_v51  ;;  %v21447_v51 = vld [vmem:[#allocation380_spill] sm:$0xff]  ;;  %v21489_v63 = vld [vmem:[#allocation422_spill] sm:$0xff] }
 0x415   : > { %11580 = vmatprep.subr.mxu1 %v21437_v10  ;;  %11546 = vmatpush3.msra.mxu0 %v21438_v57  ;;  %v21491_v10 = vld [vmem:[#allocation424_spill] sm:$0xff]  ;;  %v21492_v57 = vld [vmem:[#allocation69_spill] sm:$0xff] }
 0x416   : > { %11581 = vmatpush3.msra.mxu1 %v21439_v34  ;;  %11547 = vmatprep.subr.mxu0 %v21440_v4  ;;  %v4902_v34 = vrot.slane %v17489_v5, %v21492_v57  ;;  %v21493_v4 = vld [vmem:[#allocation425_spill] sm:$0xff] }
 0x417   : > { %11582 = vmatprep.subr.mxu1 %v21441_v38  ;;  %11548 = vmatpush3.msra.mxu0 %v21442_v62  ;;  %v21494_v38 = vld [vmem:[#allocation439_spill] sm:$0xff]  ;;  %v12584_v57 = vld [vmem:[%s19686_s3 + $0x520] sm:$0xff] }
 0x418   : > { %11583 = vmatpush3.msra.mxu1 %v21443_v49  ;;  %11549 = vmatprep.subr.mxu0 %v21444_v39  ;;  %v21495_v62 = vld [vmem:[#allocation65_spill] sm:$0xff]  ;;  %v21496_v39 = vld [vmem:[#allocation440_spill] sm:$0xff] }
 0x419   : > { %11584 = vmatprep.subr.mxu1 %v21445_v13  ;;  %11550 = vmatpush3.msra.mxu0 %v21446_v26  ;;  %v4898_v49 = vrot.slane %v17489_v5, %v21495_v62  ;;  %v21497_v13 = vld [vmem:[#allocation442_spill] sm:$0xff]  ;;  %v4910_v26 = vrot.slane %v17489_v5, %v21032_v53  ;;  %v12537_v53 = vld [vmem:[%s19686_s3 + $0x4f8] sm:$0xff] }
 0x41a   : > { %11585 = vmatpush3.msra.mxu1 %v21447_v51  ;;  %11551 = vmatprep.subr.mxu0 %v21448_v9  ;;  %v4906_v51 = vrot.slane %v17489_v5, %v21176_v27  ;;  %v12535_v9 = vld [vmem:[%s19686_s3 + $0x200] sm:$0xff]  ;;  %v12540_v27 = vld [vmem:[%s19686_s3 + $0x578] sm:$0xff]  ;;  %v12541_v5 = vld [vmem:[%s19686_s3 + $0x4f0] sm:$0xff] }
 0x41b   : > { %11586 = vmatprep.subr.mxu1 %v21449_v3  ;;  %11552 = vmatpush3.msra.mxu0 %v21450_v23  ;;  %v12536_v3 = vld [vmem:[%s19686_s3 + $0x300] sm:$0xff]  ;;  %v12542_v23 = vld [vmem:[%s19686_s3 + $0x5f0] sm:$0xff]  ;;  %v12587_v62 = vld [vmem:[%s19686_s3 + $0x418] sm:$0xff] }
 0x41c   : > { %11587 = vmatpush3.msra.mxu1 %v21451_v22  ;;  %11553 = vmatprep.subr.mxu0 %v21452_v1  ;;  %v12543_v22 = vld [vmem:[%s19686_s3 + $0x470] sm:$0xff] }
 0x41d   : > { %11588 = vmatprep.subr.mxu1 %v21453_v48  ;;  %11554 = vmatpush3.msra.mxu0 %v21454_v44  ;;  %v12544_v1 = vld [vmem:[%s19686_s3 + $0x570] sm:$0xff]  ;;  %v12545_v48 = vld [vmem:[%s19686_s3 + $0x4e8] sm:$0xff] }
 0x41e   : > { %11589 = vmatpush3.msra.mxu1 %v21455_v18  ;;  %11555 = vmatprep.subr.mxu0 %v21456_v45  ;;  %v12546_v44 = vld [vmem:[%s19686_s3 + $0x5e8] sm:$0xff] }
 0x41f   : > { %11590 = vmatprep.subr.mxu1 %v21457_v11  ;;  %11556 = vmatpush3.msra.mxu0 %v21458_v24  ;;  %v12547_v18 = vld [vmem:[%s19686_s3 + $0x468] sm:$0xff]  ;;  %v12549_v11 = vld [vmem:[%s19686_s3 + $0x4e0] sm:$0xff] }
 0x420   : > { %11591 = vmatpush3.msra.mxu1 %v21459_v21  ;;  %11557 = vmatprep.subr.mxu0 %v21460_v12  ;;  %v12548_v45 = vld [vmem:[%s19686_s3 + $0x568] sm:$0xff]  ;;  %v12550_v24 = vld [vmem:[%s19686_s3 + $0x5e0] sm:$0xff] }
 0x421   : > { %11592 = vmatprep.subr.mxu1 %v21461_v6  ;;  %11558 = vmatpush3.msra.mxu0 %v21462_v40  ;;  %v12551_v21 = vld [vmem:[%s19686_s3 + $0x460] sm:$0xff]  ;;  %v12553_v6 = vld [vmem:[%s19686_s3 + $0x4d8] sm:$0xff] }
 0x422   : > { %11593 = vmatpush3.msra.mxu1 %v21463_v43  ;;  %11559 = vmatprep.subr.mxu0 %v21464_v59  ;;  %v12552_v12 = vld [vmem:[%s19686_s3 + $0x560] sm:$0xff]  ;;  %v12554_v40 = vld [vmem:[%s19686_s3 + $0x5d8] sm:$0xff] }
 0x423   : > { %11594 = vmatprep.subr.mxu1 %v21465_v20  ;;  %11560 = vmatpush3.msra.mxu0 %v21466_v42  ;;  %v12555_v43 = vld [vmem:[%s19686_s3 + $0x458] sm:$0xff]  ;;  %v12557_v20 = vld [vmem:[%s19686_s3 + $0x4d0] sm:$0xff] }
 0x424   : > { %11595 = vmatpush3.msra.mxu1 %v21467_v16  ;;  %11561 = vmatprep.subr.mxu0 %v21468_v50  ;;  %v12556_v59 = vld [vmem:[%s19686_s3 + $0x558] sm:$0xff]  ;;  %v12558_v42 = vld [vmem:[%s19686_s3 + $0x5d0] sm:$0xff] }
 0x425   : > { %11596 = vmatprep.subr.mxu1 %v21469_v8  ;;  %11562 = vmatpush3.msra.mxu0 %v21470_v56  ;;  %v12559_v16 = vld [vmem:[%s19686_s3 + $0x450] sm:$0xff]  ;;  %v12561_v8 = vld [vmem:[%s19686_s3 + $0x4c8] sm:$0xff] }
 0x426   : > { %11597 = vmatpush3.msra.mxu1 %v21471_v0  ;;  %11563 = vmatprep.subr.mxu0 %v21472_v54  ;;  %v12560_v50 = vld [vmem:[%s19686_s3 + $0x550] sm:$0xff]  ;;  %v12562_v56 = vld [vmem:[%s19686_s3 + $0x5c8] sm:$0xff] }
 0x427   : > { %11598 = vmatprep.subr.mxu1 %v21473_v52  ;;  %11564 = vmatpush3.msra.mxu0 %v21474_v36  ;;  %v12563_v0 = vld [vmem:[%s19686_s3 + $0x448] sm:$0xff]  ;;  %v12565_v52 = vld [vmem:[%s19686_s3 + $0x4c0] sm:$0xff] }
 0x428   : > { %11599 = vmatpush3.msra.mxu1 %v21475_v58  ;;  %11565 = vmatprep.subr.mxu0 %v21476_v33  ;;  %v12564_v54 = vld [vmem:[%s19686_s3 + $0x548] sm:$0xff]  ;;  %v12566_v36 = vld [vmem:[%s19686_s3 + $0x5c0] sm:$0xff] }
 0x429   : > { %11600 = vmatprep.subr.mxu1 %v21477_v31  ;;  %11566 = vmatpush3.msra.mxu0 %v21478_v2  ;;  %v12567_v58 = vld [vmem:[%s19686_s3 + $0x440] sm:$0xff]  ;;  %v12569_v31 = vld [vmem:[%s19686_s3 + $0x4b8] sm:$0xff] }
 0x42a   : > { %11601 = vmatpush3.msra.mxu1 %v21479_v35  ;;  %11567 = vmatprep.subr.mxu0 %v21480_v41  ;;  %v12568_v33 = vld [vmem:[%s19686_s3 + $0x540] sm:$0xff]  ;;  %v12570_v2 = vld [vmem:[%s19686_s3 + $0x5b8] sm:$0xff] }
 0x42b   : > { %11602 = vmatprep.subr.mxu1 %v21481_v47  ;;  %11568 = vmatpush3.msra.mxu0 %v21482_v28  ;;  %v12571_v35 = vld [vmem:[%s19686_s3 + $0x438] sm:$0xff]  ;;  %v12573_v47 = vld [vmem:[%s19686_s3 + $0x4b0] sm:$0xff] }
 0x42c   : > { %11603 = vmatpush3.msra.mxu1 %v21483_v14  ;;  %11569 = vmatprep.subr.mxu0 %v21484_v25  ;;  %v12572_v41 = vld [vmem:[%s19686_s3 + $0x538] sm:$0xff]  ;;  %v12574_v28 = vld [vmem:[%s19686_s3 + $0x5b0] sm:$0xff] }
 0x42d   : > { %11604 = vmatprep.subr.mxu1 %v21485_v15  ;;  %11570 = vmatpush3.msra.mxu0 %v21486_v61  ;;  %v12575_v14 = vld [vmem:[%s19686_s3 + $0x430] sm:$0xff]  ;;  %v12577_v15 = vld [vmem:[%s19686_s3 + $0x4a8] sm:$0xff] }
 0x42e   : > { %11605 = vmatpush3.msra.mxu1 %v21487_v29  ;;  %11571 = vmatprep.subr.mxu0 %v21488_v60  ;;  %v12576_v25 = vld [vmem:[%s19686_s3 + $0x530] sm:$0xff]  ;;  %v12578_v61 = vld [vmem:[%s19686_s3 + $0x5a8] sm:$0xff] }
 0x42f   : > { %11606 = vmatprep.subr.mxu1 %v21489_v63  ;;  %11572 = vmatpush3.msra.mxu0 %v21490_v30  ;;  %v12579_v29 = vld [vmem:[%s19686_s3 + $0x428] sm:$0xff]  ;;  %v12581_v63 = vld [vmem:[%s19686_s3 + $0x4a0] sm:$0xff] }
 0x430   : > { %11607 = vmatpush3.msra.mxu1 %v21491_v10  ;;  %11573 = vmatprep.subr.mxu0 %v21493_v4  ;;  %v12580_v60 = vld [vmem:[%s19686_s3 + $0x528] sm:$0xff]  ;;  %v12582_v30 = vld [vmem:[%s19686_s3 + $0x5a0] sm:$0xff]  ;;  %v12585_v4 = vld [vmem:[%s19686_s3 + $0x498] sm:$0xff] }
 0x431   : > { %11608 = vmatprep.subr.mxu1 %v21494_v38  ;;  %11574 = vmatpush3.msra.mxu0 %v21496_v39  ;;  %v12583_v10 = vld [vmem:[%s19686_s3 + $0x420] sm:$0xff]  ;;  %v12586_v38 = vld [vmem:[%s19686_s3 + $0x598] sm:$0xff]  ;;  %v12590_v39 = vld [vmem:[%s19686_s3 + $0x590] sm:$0xff] }
 0x432   : > { %11609 = vmatpush3.msra.mxu1 %v21497_v13  ;;  %11575 = vmatprep.subr.mxu0 %v17349_v17  ;;  %v12539_v17 = vld [vmem:[%s19686_s3 + $0x478] sm:$0xff]  ;;  %v12591_v13 = vld [vmem:[%s19686_s3 + $0x410] sm:$0xff] }
 0x433   : > { %11610 = vmatprep.subr.mxu1 %v17355_v55  ;;  %11576 = vmatpush3.msra.mxu0 %v12535_v9  ;;  %v12538_v55 = vld [vmem:[%s19686_s3 + $0x5f8] sm:$0xff]  ;;  %v12593_v9 = vld [vmem:[%s19686_s3 + $0x488] sm:$0xff] }
 0x434   : > { %5143 = vmatprep.mubr.f32.mxu0 %v4902_v34  ;;  %11611 = vmatpush3.msra.mxu1 %v12536_v3  ;;  %v4876_v34 = vmul.f32 %v17413_v32, %v17413_v32  ;;  %v12589_v32 = vld [vmem:[%s19686_s3 + $0x490] sm:$0xff]  ;;  %v12594_v3 = vld [vmem:[%s19686_s3 + $0x588] sm:$0xff] }
 0x435   : > { %5144 = vmatmul.mubr.f32.vlgmr.msra.gmra.mxu0 %v4898_v49  ;;  %5213 = vmatprep.mubr.f32.mxu1 %v4910_v26  ;;  %v12588_v49 = vld [vmem:[%s19686_s3 + $0x518] sm:$0xff]  ;;  %v12592_v26 = vld [vmem:[%s19686_s3 + $0x510] sm:$0xff] }
 0x436   : > { %11615 = vmatprep.subr.mxu0 %v12537_v53  ;;  %11650 = vmatprep.subr.mxu1 %v12538_v55  ;;  %v4926_v53 = vrot.slane %v4876_v34, %v20963_v37  ;;  %v12595_v55 = vld [vmem:[%s19686_s3 + $0x408] sm:$0xff]  ;;  %v12598_v37 = vld [vmem:[%s19686_s3 + $0x580] sm:$0xff] }
 0x437   : > { %5214 = vmatmul.mubr.f32.vlgmr.msra.gmra.mxu1 %v4906_v51  ;;  %11616 = vmatpush3.msra.mxu0 %v12539_v17  ;;  %v4918_v51 = vrot.slane %v4876_v34, %v20961_v46  ;;  %v12596_v46 = vld [vmem:[%s19686_s3 + $0x508] sm:$0xff]  ;;  %v4914_v17 = vrot.slane %v4876_v34, %v20965_v7 }
 0x438   : > { %11651 = vmatpush3.msra.mxu1 %v12540_v27  ;;  %11617 = vmatprep.subr.mxu0 %v12541_v5  ;;  %v4922_v27 = vrot.slane %v4876_v34, %v20966_v19  ;;  %v12597_v5 = vld [vmem:[%s19686_s3 + $0x480] sm:$0xff] }
 0x439   : > { %11652 = vmatprep.subr.mxu1 %v12542_v23  ;;  %11618 = vmatpush3.msra.mxu0 %v12543_v22  ;;  %v12599_v23 = vld [vmem:[%s19686_s3 + $0x400] sm:$0xff]  ;;  %v5377_v22 = vld [vmem:[%s19691_s8 + $0x18] sm:$0xff] }
 0x43a   : > { %11653 = vmatpush3.msra.mxu1 %v12544_v1  ;;  %11619 = vmatprep.subr.mxu0 %v12545_v48  ;;  %v12600_v19 = vld [vmem:[%s19686_s3 + $0x500] sm:$0xff]  ;;  %v12724_v1 = vmov 0.0   ;;  %v5376_v48 = vld [vmem:[%s19691_s8 + $0x10] sm:$0xff] }
 0x43b   : > { %11654 = vmatprep.subr.mxu1 %v12546_v44  ;;  %11620 = vmatpush3.msra.mxu0 %v12547_v18  ;;  %v5375_v44 = vld [vmem:[%s19691_s8 + $0x8] sm:$0xff]  ;;  %v5374_v18 = vld [vmem:[%s19691_s8] sm:$0xff] }
 0x43c   : > { %11655 = vmatpush3.msra.mxu1 %v12548_v45  ;;  %11621 = vmatprep.subr.mxu0 %v12549_v11  ;;  %v10877_v45 = vpop.f32.mrf.mxu0  ;;  %v10912_v11 = vpop.f32.mrf.mxu1 }
 0x43d   : > { %11656 = vmatprep.subr.mxu1 %v12550_v24  ;;  %11622 = vmatpush3.msra.mxu0 %v12551_v21 }
 0x43e   : > { %11657 = vmatpush3.msra.mxu1 %v12552_v12  ;;  %11623 = vmatprep.subr.mxu0 %v12553_v6  ;;  %v10878_v24 = vpop.f32.mrf.mxu0  ;;  %v10913_v12 = vpop.f32.mrf.mxu1 }
 0x43f   : > { %11658 = vmatprep.subr.mxu1 %v12554_v40  ;;  %11624 = vmatpush3.msra.mxu0 %v12555_v43 }
 0x440   : > { %11659 = vmatpush3.msra.mxu1 %v12556_v59  ;;  %11625 = vmatprep.subr.mxu0 %v12557_v20  ;;  %v10947_v21 = vpop.f32.mrf.mxu0  ;;  %v10982_v6 = vpop.f32.mrf.mxu1 }
 0x441   : > { %11660 = vmatprep.subr.mxu1 %v12558_v42  ;;  %11626 = vmatpush3.msra.mxu0 %v12559_v16 }
 0x442   : > { %11661 = vmatpush3.msra.mxu1 %v12560_v50  ;;  %11627 = vmatprep.subr.mxu0 %v12561_v8  ;;  %v10948_v40 = vpop.f32.mrf.mxu0  ;;  %v10983_v59 = vpop.f32.mrf.mxu1 }
 0x443   : > { %11662 = vmatprep.subr.mxu1 %v12562_v56  ;;  %11628 = vmatpush3.msra.mxu0 %v12563_v0 }
 0x444   : > { %11663 = vmatpush3.msra.mxu1 %v12564_v54  ;;  %11629 = vmatprep.subr.mxu0 %v12565_v52  ;;  %v11017_v43 = vpop.f32.mrf.mxu0  ;;  %v17801_v20 = vpop.f32.mrf.mxu1 }
 0x445   : > { %11664 = vmatprep.subr.mxu1 %v12566_v36  ;;  %11630 = vmatpush3.msra.mxu0 %v12567_v58 }
 0x446   : > { %11665 = vmatpush3.msra.mxu1 %v12568_v33  ;;  %11631 = vmatprep.subr.mxu0 %v12569_v31  ;;  %v11018_v42 = vpop.f32.mrf.mxu0  ;;  %v11053_v50 = vpop.f32.mrf.mxu1 }
 0x447   : > { %11666 = vmatprep.subr.mxu1 %v12570_v2  ;;  %11632 = vmatpush3.msra.mxu0 %v12571_v35 }
 0x448   : > { %11667 = vmatpush3.msra.mxu1 %v12572_v41  ;;  %11633 = vmatprep.subr.mxu0 %v12573_v47  ;;  %v11087_v16 = vpop.f32.mrf.mxu0  ;;  %v11122_v8 = vpop.f32.mrf.mxu1 }
 0x449   : > { %11668 = vmatprep.subr.mxu1 %v12574_v28  ;;  %11634 = vmatpush3.msra.mxu0 %v12575_v14 }
 0x44a   : > { %11669 = vmatpush3.msra.mxu1 %v12576_v25  ;;  %11635 = vmatprep.subr.mxu0 %v12577_v15  ;;  %v11088_v56 = vpop.f32.mrf.mxu0  ;;  %v11123_v54 = vpop.f32.mrf.mxu1 }
 0x44b   : > { %11670 = vmatprep.subr.mxu1 %v12578_v61  ;;  %11636 = vmatpush3.msra.mxu0 %v12579_v29 }
 0x44c   : > { %11671 = vmatpush3.msra.mxu1 %v12580_v60  ;;  %11637 = vmatprep.subr.mxu0 %v12581_v63  ;;  %v11157_v0 = vpop.f32.mrf.mxu0  ;;  %v11192_v52 = vpop.f32.mrf.mxu1 }
 0x44d   : > { %11672 = vmatprep.subr.mxu1 %v12582_v30  ;;  %11638 = vmatpush3.msra.mxu0 %v12583_v10 }
 0x44e   : > { %11673 = vmatpush3.msra.mxu1 %v12584_v57  ;;  %11639 = vmatprep.subr.mxu0 %v12585_v4  ;;  %v11158_v36 = vpop.f32.mrf.mxu0  ;;  %v11193_v33 = vpop.f32.mrf.mxu1 }
 0x44f   : > { %11674 = vmatprep.subr.mxu1 %v12586_v38  ;;  %11640 = vmatpush3.msra.mxu0 %v12587_v62 }
 0x450   : > { %11675 = vmatpush3.msra.mxu1 %v12588_v49  ;;  %11641 = vmatprep.subr.mxu0 %v12589_v32  ;;  %v11227_v58 = vpop.f32.mrf.mxu0  ;;  %v17803_v31 = vpop.f32.mrf.mxu1  ;;  %v10879_v49 = vadd.f32 %v10878_v24, %v10877_v45  ;;  %v10914_v32 = vadd.f32 %v10913_v12, %v10912_v11  ;;  %v11159_v45 = vadd.f32 %v11158_v36, %v11157_v0 }
 0x451   : > { %11676 = vmatprep.subr.mxu1 %v12590_v39  ;;  %11642 = vmatpush3.msra.mxu0 %v12591_v13  ;;  %v11019_v11 = vadd.f32 %v11018_v42, %v11017_v43 }
 0x452   : > { %11677 = vmatpush3.msra.mxu1 %v12592_v26  ;;  %11643 = vmatprep.subr.mxu0 %v12593_v9  ;;  %v11228_v2 = vpop.f32.mrf.mxu0  ;;  %v17805_v41 = vpop.f32.mrf.mxu1  ;;  %v10949_v9 = vadd.f32 %v10948_v40, %v10947_v21 }
 0x453   : > { %11678 = vmatprep.subr.mxu1 %v12594_v3  ;;  %11644 = vmatpush3.msra.mxu0 %v12595_v55  ;;  %v3620_v55 = vadd.f32 %v10914_v32, %v10879_v49  ;;  %v5366_v49 = vld [vmem:[%s19687_s4] sm:$0x1] }
 0x454   : > { %11679 = vmatpush3.msra.mxu1 %v12596_v46  ;;  %11645 = vmatprep.subr.mxu0 %v12597_v5  ;;  %v10984_v5 = vadd.f32 %v10983_v59, %v10982_v6  ;;  %v11054_v6 = vadd.f32 %v11053_v50, %v17801_v20 }
 0x455   : > { %11680 = vmatprep.subr.mxu1 %v12598_v37  ;;  %11646 = vmatpush3.msra.mxu0 %v12599_v23  ;;  %v11089_v37 = vadd.f32 %v11088_v56, %v11087_v16  ;;  %v11124_v23 = vadd.f32 %v11123_v54, %v11122_v8  ;;  %v11229_v8 = vadd.f32 %v11228_v2, %v11227_v58 }
 0x456   : > { %5283 = vmatprep.mubr.f32.mxu0 %v4918_v51  ;;  %11681 = vmatpush3.msra.mxu1 %v12600_v19 }
 0x457   : > { %5353 = vmatprep.mubr.f32.mxu1 %v4926_v53  ;;  %5284 = vmatmul.mubr.f32.vlgmr.msra.gmra.mxu0 %v4914_v17  ;;  %v4104_v12 = vadd.f32 %v11124_v23, %v11089_v37  ;;  %v5460_v37 = vld [vmem:[%s19686_s3 + $0x28] sm:$0xff]  ;;  %v5459_v23 = vld [vmem:[%s19686_s3 + $0x20] sm:$0xff] }
 0x458   : > { %5354 = vmatmul.mubr.f32.vlgmr.msra.gmra.mxu1 %v4922_v27  ;;  %12092 = vmatprep.subr.mxu0 %v12724_v1  ;;  %v3690_v27 = vadd.f32 %v10949_v9, %v3620_v55  ;;  %v5458_v9 = vld [vmem:[%s19686_s3 + $0x18] sm:$0xff] }
 0x459   : > { %12100 = vmatprep.mubr.msk.f32.mxu0 %vm12725_vm3, %v12724_v1  ;;  %12093 = vmatpush3.msra.mxu0 %v5377_v22 }
 0x45a   : > { %12094 = vmatprep.subr.mxu0 %v12724_v1  ;;  %v3760_v40 = vadd.f32 %v10984_v5, %v3690_v27 }
 0x45b   : > { %12095 = vmatpush3.msra.mxu0 %v5376_v48 }
 0x45c   : > { %12096 = vmatprep.subr.mxu0 %v12724_v1 }
 0x45d   : > { %12097 = vmatpush3.msra.mxu0 %v5375_v44 }
 0x45e   : > { %12098 = vmatprep.subr.mxu0 %v12724_v1 }
 0x45f   : > { %12099 = vmatpush3.msra.mxu0 %v5374_v18 }
 0x46d   : > { %v11297_v35 = vpop.f32.mrf.mxu0  ;;  %v11332_v47 = vpop.f32.mrf.mxu1 }
 0x46f   : > { %v11298_v28 = vpop.f32.mrf.mxu0  ;;  %v11333_v25 = vpop.f32.mrf.mxu1 }
 0x470   : > { %v11299_v10 = vadd.f32 %v11298_v28, %v11297_v35  ;;  %v11334_v57 = vadd.f32 %v11333_v25, %v11332_v47  ;;  %v4174_v28 = vadd.f32 %v11159_v45, %v4104_v12  ;;  %v3830_v25 = vadd.f32 %v11019_v11, %v3760_v40  ;;  %v5463_v40 = vld [vmem:[%s19686_s3 + $0x40] sm:$0xff] }
 0x472   : > { %v4590_v62 = vadd.f32 %v11334_v57, %v11299_v10  ;;  %v3900_v42 = vadd.f32 %v11054_v6, %v3830_v25  ;;  %v5466_v25 = vld [vmem:[%s19686_s3 + $0x58] sm:$0xff]  ;;  %v5465_v6 = vld [vmem:[%s19686_s3 + $0x50] sm:$0xff] }
 0x48f   : > { %v11367_v14 = vpop.f32.mrf.mxu0 }
 0x491   : > { %v11402_v15 = vpop.f32.mrf.mxu1  ;;  %v11368_v61 = vpop.f32.mrf.mxu0 }
 0x492   : > { %v11369_v4 = vadd.f32 %v11368_v61, %v11367_v14  ;;  %v11194_v14 = vadd.f32 %v11193_v33, %v11192_v52 }
 0x493   : > { %v11403_v60 = vpop.f32.mrf.mxu1 }
 0x494   : > { %v4660_v26 = vadd.f32 %v11369_v4, %v4590_v62  ;;  %v11404_v51 = vadd.f32 %v11403_v60, %v11402_v15  ;;  %v4244_v61 = vadd.f32 %v11194_v14, %v4174_v28 }
 0x496   : > { %v4730_v17 = vadd.f32 %v11404_v51, %v4660_v26  ;;  %v4314_v60 = vadd.f32 %v11229_v8, %v4244_v61 }
 0x4b1   : > { %v11437_v29 = vpop.f32.mrf.mxu0 }
 0x4b3   : > { %v11472_v63 = vpop.f32.mrf.mxu1  ;;  %v11438_v30 = vpop.f32.mrf.mxu0 }
 0x4b4   : > { %v11439_v53 = vadd.f32 %v11438_v30, %v11437_v29 }
 0x4b5   : > { %v11473_v38 = vpop.f32.mrf.mxu1 }
 0x4b6   : > { %v4800_v1 = vadd.f32 %v11439_v53, %v4730_v17  ;;  %v11474_v48 = vadd.f32 %v11473_v38, %v11472_v63  ;;  %v11264_v63 = vadd.f32 %v17805_v41, %v17803_v31  ;;  %v5370_v41 = vld [vmem:[%s19688_s5] sm:$0x1] }
 0x4b8   : > { %v4870_v35 = vadd.f32 %v11474_v48, %v4800_v1  ;;  %v4384_v50 = vadd.f32 %v11264_v63, %v4314_v60 }
 0x4ba   : > { %v4873_v15 = vmul.f32 96.0, %v4870_v35 }
 0x4bc   : > { %v4874_v52 = vsub.f32 %v3900_v42, %v4873_v15  ;;  %v5467_v15 = vld [vmem:[%s19686_s3 + $0x60] sm:$0xff] }
 0x4be   : > { %v5361_v10 = vmul.f32 0.0006510417, %v4874_v52 }
 0x4c0   : > { %v5363_v57 = vmul.f32 %v5361_v10, %v5361_v10 }
 0x4d3   : > { %v11507_v34 = vpop.f32.mrf.mxu0 }
 0x4d4   : > { %v11542_v39 = vpop.f32.mrf.mxu1 }
 0x4d5   : > { %v11508_v13 = vpop.f32.mrf.mxu0 }
 0x4d6   : > { %v11543_v46 = vpop.f32.mrf.mxu1  ;;  %v11509_v44 = vadd.f32 %v11508_v13, %v11507_v34  ;;  %v5455_v13 = vld [vmem:[%s19686_s3] sm:$0xff] }
 0x4d7   : > { %v11544_v18 = vadd.f32 %v11543_v46, %v11542_v39  ;;  %v5457_v39 = vld [vmem:[%s19686_s3 + $0x10] sm:$0xff] }
 0x4d9   : > { %v5076_v47 = vadd.f32 %v11544_v18, %v11509_v44  ;;  %v5462_v44 = vld [vmem:[%s19686_s3 + $0x38] sm:$0xff]  ;;  %v5461_v18 = vld [vmem:[%s19686_s3 + $0x30] sm:$0xff] }
 0x4f5   : > { %v11577_v3 = vpop.f32.mrf.mxu0 }
 0x4f7   : > { %v11612_v19 = vpop.f32.mrf.mxu1  ;;  %v11578_v22 = vpop.f32.mrf.mxu0 }
 0x4f8   : > { %v11579_v24 = vadd.f32 %v11578_v22, %v11577_v3  ;;  %v5456_v3 = vld [vmem:[%s19686_s3 + $0x8] sm:$0xff] }
 0x4f9   : > { %v11613_v21 = vpop.f32.mrf.mxu1 }
 0x4fa   : > { %v5146_v59 = vadd.f32 %v11579_v24, %v5076_v47  ;;  %v11614_v16 = vadd.f32 %v11613_v21, %v11612_v19  ;;  %v5464_v21 = vld [vmem:[%s19686_s3 + $0x48] sm:$0xff] }
 0x4fc   : > { %v5216_v36 = vadd.f32 %v11614_v16, %v5146_v59 }
 0x517   : > { %v11647_v56 = vpop.f32.mrf.mxu0 }
 0x518   : > { %v11682_v54 = vpop.f32.mrf.mxu1 }
 0x519   : > { %v11648_v0 = vpop.f32.mrf.mxu0 }
 0x51a   : > { %v11683_v43 = vpop.f32.mrf.mxu1  ;;  %v11649_v29 = vadd.f32 %v11648_v0, %v11647_v56 }
 0x51b   : > { %v11684_v30 = vadd.f32 %v11683_v43, %v11682_v54  ;;  %v5468_v54 = vld [vmem:[%s19686_s3 + $0x68] sm:$0xff] }
 0x51c   : > { %v5286_v33 = vadd.f32 %v11649_v29, %v5216_v36  ;;  %v5470_v36 = vld [vmem:[%s19686_s3 + $0x78] sm:$0xff]  ;;  %v5469_v29 = vld [vmem:[%s19686_s3 + $0x70] sm:$0xff] }
 0x51e   : > { %v5356_v20 = vadd.f32 %v11684_v30, %v5286_v33  ;;  %v5472_v30 = vld [vmem:[%s19686_s3 + $0x88] sm:$0xff] }
 0x520   : > { %v5359_v58 = vmul.f32 96.0, %v5356_v20  ;;  %v5471_v20 = vld [vmem:[%s19686_s3 + $0x80] sm:$0xff] }
 0x522   : > { %v5360_v2 = vsub.f32 %v4384_v50, %v5359_v58 }
 0x524   : > { %v5362_v34 = vmul.f32 0.0006510417, %v5360_v2 }
 0x526   : > { %v5364_v4 = vsub.f32 %v5362_v34, %v5363_v57  ;;  %v5474_v57 = vld [vmem:[%s19686_s3 + $0x98] sm:$0xff]  ;;  %v5473_v34 = vld [vmem:[%s19686_s3 + $0x90] sm:$0xff] }
 0x528   : > { %v5365_v38 = vmax.f32 %v5364_v4, 0.0 }
 0x52a   : > { %v5367_v62 = vadd.f32 1e-05, %v5365_v38 }
 0x52c   : > { %12407 = vrsqrt.f32 %v5367_v62 }
 0x539   : > { %v12408_v32 = vpop.eup %12407 }
 0x53a   : > { %v5369_v31 = vmul.f32 %v12408_v32, %v5366_v49  ;;  %v5476_v32 = vld [vmem:[%s19686_s3 + $0xa8] sm:$0xff] }
 0x53c   : > { %v5371_v26 = vmul.f32 %v5369_v31, %v5361_v10  ;;  %v17823_v51 = vrot.slane %v5369_v31, %v20965_v7  ;;  %v5475_v31 = vld [vmem:[%s19686_s3 + $0xa0] sm:$0xff] }
 0x53e   : > { %v5372_v53 = vsub.f32 %v5370_v41, %v5371_v26  ;;  %v5655_v55 = vmul.f32 %v17823_v51, %v5457_v39  ;;  %v5653_v46 = vmul.f32 %v17823_v51, %v5455_v13  ;;  %v5656_v27 = vmul.f32 %v17823_v51, %v5458_v9  ;;  %v5478_v9 = vld [vmem:[%s19686_s3 + $0xb8] sm:$0xff] }
 0x53f   : > { %v5654_v5 = vmul.f32 %v17823_v51, %v5456_v3  ;;  %v5658_v1 = vmul.f32 %v17823_v51, %v5460_v37  ;;  %v5657_v48 = vmul.f32 %v17823_v51, %v5459_v23  ;;  %v5660_v24 = vmul.f32 %v17823_v51, %v5462_v44  ;;  %v5477_v3 = vld [vmem:[%s19686_s3 + $0xb0] sm:$0xff] }
 0x540   : > { %12101 = vmatmul.mubr.msk.f32.vlgmr.msra.gmra.mxu0 %vm5378_vm4, %v5372_v53  ;;  %v5851_v17 = vsel %vm5378_vm4, %v5655_v55, 0.0  ;;  %v5845_v7 = vsel %vm5378_vm4, %v5653_v46, 0.0  ;;  %v5854_v19 = vsel %vm5378_vm4, %v5656_v27, 0.0  ;;  %v5659_v12 = vmul.f32 %v17823_v51, %v5461_v18  ;;  %v5479_v27 = vld [vmem:[%s19686_s3 + $0xc0] sm:$0xff] }
 0x541   : > { %5852 = vadd.xlane.f32.xlu1 %v5851_v17  ;;  %5846 = vadd.xlane.f32.xlu0 %v5845_v7  ;;  %v5848_v22 = vsel %vm5378_vm4, %v5654_v5, 0.0  ;;  %v5860_v45 = vsel %vm5378_vm4, %v5658_v1, 0.0  ;;  %v5857_v11 = vsel %vm5378_vm4, %v5657_v48, 0.0  ;;  %v5866_v35 = vsel %vm5378_vm4, %v5660_v24, 0.0  ;;  %v5480_v7 = vld [vmem:[%s19686_s3 + $0xc8] sm:$0xff]  ;;  %v5481_v1 = vld [vmem:[%s19686_s3 + $0xd0] sm:$0xff] }
 0x542   : > { %v5863_v47 = vsel %vm5378_vm4, %v5659_v12, 0.0  ;;  %v5662_v28 = vmul.f32 %v17823_v51, %v5464_v21  ;;  %v5661_v14 = vmul.f32 %v17823_v51, %v5463_v40  ;;  %v5664_v8 = vmul.f32 %v17823_v51, %v5466_v25  ;;  %v5483_v24 = vld [vmem:[%s19686_s3 + $0xe0] sm:$0xff] }
 0x543   : > { %v5663_v56 = vmul.f32 %v17823_v51, %v5465_v6  ;;  %v5666_v43 = vmul.f32 %v17823_v51, %v5468_v54  ;;  %v5665_v42 = vmul.f32 %v17823_v51, %v5467_v15  ;;  %v5668_v52 = vmul.f32 %v17823_v51, %v5470_v36 }
 0x544   : > { %v5872_v59 = vsel %vm5378_vm4, %v5662_v28, 0.0  ;;  %v5869_v16 = vsel %vm5378_vm4, %v5661_v14, 0.0  ;;  %v5878_v61 = vsel %vm5378_vm4, %v5664_v8, 0.0  ;;  %v5667_v33 = vmul.f32 %v17823_v51, %v5469_v29  ;;  %v5485_v28 = vld [vmem:[%s19686_s3 + $0xf0] sm:$0xff]  ;;  %v5487_v8 = vld [vmem:[%s19686_s3 + $0x100] sm:$0xff] }
 0x545   : > { %5855 = vadd.xlane.f32.xlu1 %v5854_v19  ;;  %5849 = vadd.xlane.f32.xlu0 %v5848_v22  ;;  %v5875_v0 = vsel %vm5378_vm4, %v5663_v56, 0.0  ;;  %v5884_v60 = vsel %vm5378_vm4, %v5666_v43, 0.0  ;;  %v5881_v63 = vsel %vm5378_vm4, %v5665_v42, 0.0  ;;  %v5890_v50 = vsel %vm5378_vm4, %v5668_v52, 0.0  ;;  %v5482_v22 = vld [vmem:[%s19686_s3 + $0xd8] sm:$0xff]  ;;  %v5489_v43 = vld [vmem:[%s19686_s3 + $0x110] sm:$0xff] }
 0x546   : > { %v5887_v10 = vsel %vm5378_vm4, %v5667_v33, 0.0  ;;  %v5670_v58 = vmul.f32 %v17823_v51, %v5472_v30  ;;  %v5669_v2 = vmul.f32 %v17823_v51, %v5471_v20  ;;  %v5672_v62 = vmul.f32 %v17823_v51, %v5474_v57  ;;  %v5491_v52 = vld [vmem:[%s19686_s3 + $0x120] sm:$0xff] }
 0x547   : > { %v5671_v49 = vmul.f32 %v17823_v51, %v5473_v34  ;;  %v5674_v13 = vmul.f32 %v17823_v51, %v5476_v32  ;;  %v5673_v26 = vmul.f32 %v17823_v51, %v5475_v31  ;;  %v5676_v46 = vmul.f32 %v17823_v51, %v5478_v9 }
 0x548   : > { %v5896_v4 = vsel %vm5378_vm4, %v5670_v58, 0.0  ;;  %v5893_v38 = vsel %vm5378_vm4, %v5669_v2, 0.0  ;;  %v5902_v41 = vsel %vm5378_vm4, %v5672_v62, 0.0  ;;  %v5675_v17 = vmul.f32 %v17823_v51, %v5477_v3  ;;  %v5493_v58 = vld [vmem:[%s19686_s3 + $0x130] sm:$0xff]  ;;  %v5495_v62 = vld [vmem:[%s19686_s3 + $0x140] sm:$0xff] }
 0x549   : > { %5861 = vadd.xlane.f32.xlu1 %v5860_v45  ;;  %5858 = vadd.xlane.f32.xlu0 %v5857_v11  ;;  %v5899_v39 = vsel %vm5378_vm4, %v5671_v49, 0.0  ;;  %v5908_v53 = vsel %vm5378_vm4, %v5674_v13, 0.0  ;;  %v5905_v55 = vsel %vm5378_vm4, %v5673_v26, 0.0  ;;  %v5914_v5 = vsel %vm5378_vm4, %v5676_v46, 0.0  ;;  %v5484_v11 = vld [vmem:[%s19686_s3 + $0xe8] sm:$0xff]  ;;  %v5497_v13 = vld [vmem:[%s19686_s3 + $0x150] sm:$0xff] }
 0x54a   : > { %v5911_v37 = vsel %vm5378_vm4, %v5675_v17, 0.0  ;;  %v5678_v23 = vmul.f32 %v17823_v51, %v5480_v7  ;;  %v5677_v19 = vmul.f32 %v17823_v51, %v5479_v27  ;;  %v5680_v18 = vmul.f32 %v17823_v51, %v5482_v22  ;;  %v5499_v46 = vld [vmem:[%s19686_s3 + $0x160] sm:$0xff] }
 0x54b   : > { %v5679_v45 = vmul.f32 %v17823_v51, %v5481_v1  ;;  %v5682_v40 = vmul.f32 %v17823_v51, %v5484_v11 }
 0x54c   : > { %v5920_v48 = vsel %vm5378_vm4, %v5678_v23, 0.0  ;;  %v5917_v44 = vsel %vm5378_vm4, %v5677_v19, 0.0  ;;  %v5926_v12 = vsel %vm5378_vm4, %v5680_v18, 0.0  ;;  %v5501_v23 = vld [vmem:[%s19686_s3 + $0x170] sm:$0xff]  ;;  %v5503_v18 = vld [vmem:[%s19686_s3 + $0x180] sm:$0xff] }
 0x54d   : > { %5867 = vadd.xlane.f32.xlu1 %v5866_v35  ;;  %5864 = vadd.xlane.f32.xlu0 %v5863_v47  ;;  %v5923_v21 = vsel %vm5378_vm4, %v5679_v45, 0.0  ;;  %v5681_v35 = vmul.f32 %v17823_v51, %v5483_v24  ;;  %v5486_v47 = vld [vmem:[%s19686_s3 + $0xf8] sm:$0xff]  ;;  %v5932_v14 = vsel %vm5378_vm4, %v5682_v40, 0.0  ;;  %v5505_v40 = vld [vmem:[%s19686_s3 + $0x190] sm:$0xff] }
 0x54e   : > { %v5684_v6 = vmul.f32 %v17823_v51, %v5486_v47 }
 0x54f   : > { %v5929_v25 = vsel %vm5378_vm4, %v5681_v35, 0.0 }
 0x550   : > { %v5938_v56 = vsel %vm5378_vm4, %v5684_v6, 0.0  ;;  %v5507_v6 = vld [vmem:[%s19686_s3 + $0x1a0] sm:$0xff] }
 0x551   : > { %5873 = vadd.xlane.f32.xlu1 %v5872_v59  ;;  %5870 = vadd.xlane.f32.xlu0 %v5869_v16  ;;  %v5683_v59 = vmul.f32 %v17823_v51, %v5485_v28  ;;  %v5488_v16 = vld [vmem:[%s19686_s3 + $0x108] sm:$0xff] }
 0x552   : > { %v5686_v15 = vmul.f32 %v17823_v51, %v5488_v16 }
 0x553   : > { %v5935_v54 = vsel %vm5378_vm4, %v5683_v59, 0.0 }
 0x554   : > { %v5944_v42 = vsel %vm5378_vm4, %v5686_v15, 0.0  ;;  %v5509_v15 = vld [vmem:[%s19686_s3 + $0x1b0] sm:$0xff] }
 0x555   : > { %5879 = vadd.xlane.f32.xlu1 %v5878_v61  ;;  %5876 = vadd.xlane.f32.xlu0 %v5875_v0  ;;  %v5685_v61 = vmul.f32 %v17823_v51, %v5487_v8  ;;  %v5490_v0 = vld [vmem:[%s19686_s3 + $0x118] sm:$0xff] }
 0x556   : > { %v5688_v29 = vmul.f32 %v17823_v51, %v5490_v0 }
 0x557   : > { %v5941_v36 = vsel %vm5378_vm4, %v5685_v61, 0.0 }
 0x558   : > { %v5950_v33 = vsel %vm5378_vm4, %v5688_v29, 0.0  ;;  %v5511_v29 = vld [vmem:[%s19686_s3 + $0x1c0] sm:$0xff] }
 0x559   : > { %5885 = vadd.xlane.f32.xlu1 %v5884_v60  ;;  %5882 = vadd.xlane.f32.xlu0 %v5881_v63  ;;  %v5687_v60 = vmul.f32 %v17823_v51, %v5489_v43  ;;  %v5492_v63 = vld [vmem:[%s19686_s3 + $0x128] sm:$0xff] }
 0x55a   : > { %v5690_v20 = vmul.f32 %v17823_v51, %v5492_v63 }
 0x55b   : > { %v5947_v30 = vsel %vm5378_vm4, %v5687_v60, 0.0 }
 0x55c   : > { %v5956_v2 = vsel %vm5378_vm4, %v5690_v20, 0.0  ;;  %v5513_v20 = vld [vmem:[%s19686_s3 + $0x1d0] sm:$0xff] }
 0x55d   : > { %5891 = vadd.xlane.f32.xlu1 %v5890_v50  ;;  %5888 = vadd.xlane.f32.xlu0 %v5887_v10  ;;  %v5689_v50 = vmul.f32 %v17823_v51, %v5491_v52  ;;  %v5494_v10 = vld [vmem:[%s19686_s3 + $0x138] sm:$0xff] }
 0x55e   : > { %v5692_v34 = vmul.f32 %v17823_v51, %v5494_v10 }
 0x55f   : > { %v5953_v57 = vsel %vm5378_vm4, %v5689_v50, 0.0 }
 0x560   : > { %v5962_v49 = vsel %vm5378_vm4, %v5692_v34, 0.0  ;;  %v5515_v34 = vld [vmem:[%s19686_s3 + $0x1e0] sm:$0xff] }
 0x561   : > { %5897 = vadd.xlane.f32.xlu1 %v5896_v4  ;;  %5894 = vadd.xlane.f32.xlu0 %v5893_v38  ;;  %v5691_v4 = vmul.f32 %v17823_v51, %v5493_v58  ;;  %v5496_v38 = vld [vmem:[%s19686_s3 + $0x148] sm:$0xff] }
 0x562   : > { %v5694_v31 = vmul.f32 %v17823_v51, %v5496_v38 }
 0x563   : > { %v5959_v32 = vsel %vm5378_vm4, %v5691_v4, 0.0 }
 0x564   : > { %v5968_v26 = vsel %vm5378_vm4, %v5694_v31, 0.0  ;;  %v5517_v31 = vld [vmem:[%s19686_s3 + $0x1f0] sm:$0xff] }
 0x565   : > { %5903 = vadd.xlane.f32.xlu1 %v5902_v41  ;;  %5900 = vadd.xlane.f32.xlu0 %v5899_v39  ;;  %v5693_v41 = vmul.f32 %v17823_v51, %v5495_v62  ;;  %v5498_v39 = vld [vmem:[%s19686_s3 + $0x158] sm:$0xff] }
 0x566   : > { %v5696_v3 = vmul.f32 %v17823_v51, %v5498_v39 }
 0x567   : > { %v5965_v9 = vsel %vm5378_vm4, %v5693_v41, 0.0 }
 0x568   : > { %v5974_v17 = vsel %vm5378_vm4, %v5696_v3, 0.0  ;;  %v5519_v3 = vld [vmem:[%s19686_s3 + $0x200] sm:$0xff] }
 0x569   : > { %5909 = vadd.xlane.f32.xlu1 %v5908_v53  ;;  %5906 = vadd.xlane.f32.xlu0 %v5905_v55  ;;  %v5695_v53 = vmul.f32 %v17823_v51, %v5497_v13  ;;  %v5500_v55 = vld [vmem:[%s19686_s3 + $0x168] sm:$0xff] }
 0x56a   : > { %v5698_v27 = vmul.f32 %v17823_v51, %v5500_v55 }
 0x56b   : > { %v5971_v7 = vsel %vm5378_vm4, %v5695_v53, 0.0 }
 0x56c   : > { %v5980_v19 = vsel %vm5378_vm4, %v5698_v27, 0.0  ;;  %v5521_v27 = vld [vmem:[%s19686_s3 + $0x210] sm:$0xff] }
 0x56d   : > { %5915 = vadd.xlane.f32.xlu1 %v5914_v5  ;;  %5912 = vadd.xlane.f32.xlu0 %v5911_v37  ;;  %v5697_v5 = vmul.f32 %v17823_v51, %v5499_v46  ;;  %v5502_v37 = vld [vmem:[%s19686_s3 + $0x178] sm:$0xff] }
 0x56e   : > { %v5700_v1 = vmul.f32 %v17823_v51, %v5502_v37 }
 0x56f   : > { %v5977_v22 = vsel %vm5378_vm4, %v5697_v5, 0.0 }
 0x570   : > { %v5986_v45 = vsel %vm5378_vm4, %v5700_v1, 0.0  ;;  %v5523_v1 = vld [vmem:[%s19686_s3 + $0x220] sm:$0xff] }
 0x571   : > { %5921 = vadd.xlane.f32.xlu1 %v5920_v48  ;;  %5918 = vadd.xlane.f32.xlu0 %v5917_v44  ;;  %v5699_v48 = vmul.f32 %v17823_v51, %v5501_v23  ;;  %v5504_v44 = vld [vmem:[%s19686_s3 + $0x188] sm:$0xff] }
 0x572   : > { %v5702_v24 = vmul.f32 %v17823_v51, %v5504_v44 }
 0x573   : > { %v5983_v11 = vsel %vm5378_vm4, %v5699_v48, 0.0 }
 0x574   : > { %v5992_v35 = vsel %vm5378_vm4, %v5702_v24, 0.0  ;;  %v10367_v24 = vld [vmem:[%s19689_s6] sm:$0xff]  }
 0x575   : > { %5927 = vadd.xlane.f32.xlu1 %v5926_v12  ;;  %5924 = vadd.xlane.f32.xlu0 %v5923_v21  ;;  %v5701_v12 = vmul.f32 %v17823_v51, %v5503_v18  ;;  %v5506_v21 = vld [vmem:[%s19686_s3 + $0x198] sm:$0xff] }
 0x576   : > { %v5704_v28 = vmul.f32 %v17823_v51, %v5506_v21  ;;  %v5525_v21 = vld [vmem:[%s19686_s3 + $0x230] sm:$0xff] }
 0x577   : > { %v5989_v47 = vsel %vm5378_vm4, %v5701_v12, 0.0  ;;  %v5526_v12 = vld [vmem:[%s19686_s3 + $0x238] sm:$0xff] }
 0x578   : > { %v5998_v59 = vsel %vm5378_vm4, %v5704_v28, 0.0 }
 0x579   : > { %5933 = vadd.xlane.f32.xlu1 %v5932_v14  ;;  %5930 = vadd.xlane.f32.xlu0 %v5929_v25  ;;  %v5703_v14 = vmul.f32 %v17823_v51, %v5505_v40  ;;  %v5508_v25 = vld [vmem:[%s19686_s3 + $0x1a8] sm:$0xff] }
 0x57a   : > { %v5706_v8 = vmul.f32 %v17823_v51, %v5508_v25  ;;  %v5723_v25 = vmul.f32 %v17823_v51, %v5525_v21 }
 0x57b   : > { %v5995_v16 = vsel %vm5378_vm4, %v5703_v14, 0.0  ;;  %v5724_v14 = vmul.f32 %v17823_v51, %v5526_v12 }
 0x57c   : > { %v6004_v61 = vsel %vm5378_vm4, %v5706_v8, 0.0 }
 0x57d   : > { %5939 = vadd.xlane.f32.xlu1 %v5938_v56  ;;  %5936 = vadd.xlane.f32.xlu0 %v5935_v54  ;;  %v5705_v56 = vmul.f32 %v17823_v51, %v5507_v6  ;;  %v5510_v54 = vld [vmem:[%s19686_s3 + $0x1b8] sm:$0xff]  ;;  %v5528_v6 = vld [vmem:[%s19686_s3 + $0x248] sm:$0xff] }
 0x57e   : > { %v5708_v43 = vmul.f32 %v17823_v51, %v5510_v54 }
 0x57f   : > { %v6001_v0 = vsel %vm5378_vm4, %v5705_v56, 0.0 }
 0x580   : > { %v6010_v60 = vsel %vm5378_vm4, %v5708_v43, 0.0  ;;  %v6055_v43 = vsel %vm5378_vm4, %v5723_v25, 0.0 }
 0x581   : > { %5945 = vadd.xlane.f32.xlu1 %v5944_v42  ;;  %5942 = vadd.xlane.f32.xlu0 %v5941_v36  ;;  %v5707_v42 = vmul.f32 %v17823_v51, %v5509_v15  ;;  %v5512_v36 = vld [vmem:[%s19686_s3 + $0x1c8] sm:$0xff] }
 0x582   : > { %v5710_v52 = vmul.f32 %v17823_v51, %v5512_v36 }
 0x583   : > { %v6007_v63 = vsel %vm5378_vm4, %v5707_v42, 0.0  ;;  %v5726_v42 = vmul.f32 %v17823_v51, %v5528_v6 }
 0x584   : > { %v6016_v50 = vsel %vm5378_vm4, %v5710_v52, 0.0  ;;  %v5530_v52 = vld [vmem:[%s19686_s3 + $0x258] sm:$0xff] }
 0x585   : > { %5951 = vadd.xlane.f32.xlu1 %v5950_v33  ;;  %5948 = vadd.xlane.f32.xlu0 %v5947_v30  ;;  %v5709_v33 = vmul.f32 %v17823_v51, %v5511_v29  ;;  %v5514_v30 = vld [vmem:[%s19686_s3 + $0x1d8] sm:$0xff]  ;;  %v10751_v29 = vld [vmem:[%s19689_s6 + $0x10] sm:$0xff]  }
 0x586   : > { %v5712_v58 = vmul.f32 %v17823_v51, %v5514_v30 }
 0x587   : > { %v6013_v10 = vsel %vm5378_vm4, %v5709_v33, 0.0  ;;  %v5529_v33 = vld [vmem:[%s19686_s3 + $0x250] sm:$0xff] }
 0x588   : > { %v6022_v4 = vsel %vm5378_vm4, %v5712_v58, 0.0  ;;  %v10377_v58 = vunpack.c.h.bf16 %v10751_v29 }
 0x589   : > { %5957 = vadd.xlane.f32.xlu1 %v5956_v2  ;;  %5954 = vadd.xlane.f32.xlu0 %v5953_v57  ;;  %v5711_v2 = vmul.f32 %v17823_v51, %v5513_v20  ;;  %v5516_v57 = vld [vmem:[%s19686_s3 + $0x1e8] sm:$0xff] }
 0x58a   : > { %v5714_v62 = vmul.f32 %v17823_v51, %v5516_v57  ;;  %v6064_v57 = vsel %vm5378_vm4, %v5726_v42, 0.0 }
 0x58b   : > { %v6019_v38 = vsel %vm5378_vm4, %v5711_v2, 0.0  ;;  %v10376_v2 = vunpack.c.l.bf16 %v10751_v29  ;;  %v5538_v29 = vld [vmem:[%s19686_s3 + $0x298] sm:$0xff] }
 0x58c   : > { %v6028_v41 = vsel %vm5378_vm4, %v5714_v62, 0.0  ;;  %v10752_v62 = vld [vmem:[%s19689_s6 + $0x18] sm:$0xff]  }
 0x58d   : > { %5963 = vadd.xlane.f32.xlu1 %v5962_v49  ;;  %5960 = vadd.xlane.f32.xlu0 %v5959_v32  ;;  %v5713_v49 = vmul.f32 %v17823_v51, %v5515_v34  ;;  %v5518_v32 = vld [vmem:[%s19686_s3 + $0x1f8] sm:$0xff] }
 0x58e   : > { %v5716_v13 = vmul.f32 %v17823_v51, %v5518_v32 }
 0x58f   : > { %v6025_v39 = vsel %vm5378_vm4, %v5713_v49, 0.0 }
 0x590   : > { %v6034_v53 = vsel %vm5378_vm4, %v5716_v13, 0.0 }
 0x591   : > { %5969 = vadd.xlane.f32.xlu1 %v5968_v26  ;;  %5966 = vadd.xlane.f32.xlu0 %v5965_v9  ;;  %v5715_v26 = vmul.f32 %v17823_v51, %v5517_v31  ;;  %v5520_v9 = vld [vmem:[%s19686_s3 + $0x208] sm:$0xff] }
 0x592   : > { %v5718_v46 = vmul.f32 %v17823_v51, %v5520_v9  ;;  %v5532_v31 = vld [vmem:[%s19686_s3 + $0x268] sm:$0xff] }
 0x593   : > { %v6031_v55 = vsel %vm5378_vm4, %v5715_v26, 0.0 }
 0x594   : > { %v6040_v5 = vsel %vm5378_vm4, %v5718_v46, 0.0 }
 0x595   : > { %5975 = vadd.xlane.f32.xlu1 %v5974_v17  ;;  %5972 = vadd.xlane.f32.xlu0 %v5971_v7  ;;  %v5717_v17 = vmul.f32 %v17823_v51, %v5519_v3  ;;  %v5522_v7 = vld [vmem:[%s19686_s3 + $0x218] sm:$0xff]  ;;  %v10381_v3 = vunpack.c.h.bf16 %v10752_v62 }
 0x596   : > { %v5720_v23 = vmul.f32 %v17823_v51, %v5522_v7 }
 0x597   : > { %v6037_v37 = vsel %vm5378_vm4, %v5717_v17, 0.0  ;;  %v5730_v17 = vmul.f32 %v17823_v51, %v5532_v31 }
 0x598   : > { %v6046_v48 = vsel %vm5378_vm4, %v5720_v23, 0.0  ;;  %v5534_v23 = vld [vmem:[%s19686_s3 + $0x278] sm:$0xff] }
 0x599   : > { %5981 = vadd.xlane.f32.xlu1 %v5980_v19  ;;  %5978 = vadd.xlane.f32.xlu0 %v5977_v22  ;;  %v5719_v19 = vmul.f32 %v17823_v51, %v5521_v27  ;;  %v5524_v22 = vld [vmem:[%s19686_s3 + $0x228] sm:$0xff]  ;;  %v10753_v27 = vld [vmem:[%s19689_s6 + $0x20] sm:$0xff]   ;;  %v5732_v12 = vmul.f32 %v17823_v51, %v5534_v23 }
 0x59a   : > { %v5722_v18 = vmul.f32 %v17823_v51, %v5524_v22 }
 0x59b   : > { %v6043_v44 = vsel %vm5378_vm4, %v5719_v19, 0.0  ;;  %v5533_v19 = vld [vmem:[%s19686_s3 + $0x270] sm:$0xff] }
 0x59c   : > { %v5731_v21 = vmul.f32 %v17823_v51, %v5533_v19 }
 0x59d   : > { %5987 = vadd.xlane.f32.xlu1 %v5986_v45  ;;  %5984 = vadd.xlane.f32.xlu0 %v5983_v11  ;;  %v5721_v45 = vmul.f32 %v17823_v51, %v5523_v1  ;;  %v10750_v11 = vld [vmem:[%s19689_s6 + $0x8] sm:$0xff]  }
 0x59e   : > { %v10372_v40 = vunpack.c.l.bf16 %v10750_v11  ;;  %v10373_v15 = vunpack.c.h.bf16 %v10750_v11  ;;  %v6076_v11 = vsel %vm5378_vm4, %v5730_v17, 0.0 }
 0x59f   : > { %v6049_v28 = vsel %vm5378_vm4, %v5721_v45, 0.0  ;;  %v10384_v45 = vunpack.c.l.bf16 %v10753_v27 }
 0x5a1   : > { %5993 = vadd.xlane.f32.xlu1 %v5992_v35  ;;  %5990 = vadd.xlane.f32.xlu0 %v5989_v47  ;;  %v10368_v35 = vunpack.c.l.bf16 %v10367_v24  ;;  %v6052_v47 = vsel %vm5378_vm4, %v5722_v18, 0.0  ;;  %v10385_v18 = vunpack.c.h.bf16 %v10753_v27  ;;  %v5542_v27 = vld [vmem:[%s19686_s3 + $0x2b8] sm:$0xff] }
 0x5a5   : > { %5999 = vadd.xlane.f32.xlu1 %v5998_v59  ;;  %5996 = vadd.xlane.f32.xlu0 %v5995_v16  ;;  %v5527_v59 = vld [vmem:[%s19686_s3 + $0x240] sm:$0xff] }
 0x5a6   : > { %v5725_v36 = vmul.f32 %v17823_v51, %v5527_v59 }
 0x5a8   : > { %v6061_v34 = vsel %vm5378_vm4, %v5725_v36, 0.0 }
 0x5a9   : > { %6005 = vadd.xlane.f32.xlu1 %v6004_v61  ;;  %6002 = vadd.xlane.f32.xlu0 %v6001_v0  ;;  %v10369_v61 = vunpack.c.h.bf16 %v10367_v24  ;;  %v6058_v0 = vsel %vm5378_vm4, %v5724_v14, 0.0  ;;  %v5535_v14 = vld [vmem:[%s19686_s3 + $0x280] sm:$0xff] }
 0x5ad   : > { %6011 = vadd.xlane.f32.xlu1 %v6010_v60  ;;  %6008 = vadd.xlane.f32.xlu0 %v6007_v63 }
 0x5b1   : > { %6017 = vadd.xlane.f32.xlu1 %v6016_v50  ;;  %6014 = vadd.xlane.f32.xlu0 %v6013_v10 }
 0x5b5   : > { %6023 = vadd.xlane.f32.xlu1 %v6022_v4  ;;  %6020 = vadd.xlane.f32.xlu0 %v6019_v38  ;;  %v5728_v4 = vmul.f32 %v17823_v51, %v5530_v52  ;;  %v5727_v38 = vmul.f32 %v17823_v51, %v5529_v33 }
 0x5b7   : > { %v6067_v46 = vsel %vm5378_vm4, %v5727_v38, 0.0 }
 0x5b9   : > { %6029 = vadd.xlane.f32.xlu1 %v6028_v41  ;;  %6026 = vadd.xlane.f32.xlu0 %v6025_v39  ;;  %v5531_v41 = vld [vmem:[%s19686_s3 + $0x260] sm:$0xff] }
 0x5ba   : > { %v5729_v7 = vmul.f32 %v17823_v51, %v5531_v41 }
 0x5bc   : > { %v6073_v24 = vsel %vm5378_vm4, %v5729_v7, 0.0 }
 0x5bd   : > { %6035 = vadd.xlane.f32.xlu1 %v6034_v53  ;;  %6032 = vadd.xlane.f32.xlu0 %v6031_v55  ;;  %v10380_v53 = vunpack.c.l.bf16 %v10752_v62  ;;  %v6070_v55 = vsel %vm5378_vm4, %v5728_v4, 0.0  ;;  %v5540_v62 = vld [vmem:[%s19686_s3 + $0x2a8] sm:$0xff] }
 0x5c1   : > { %6041 = vadd.xlane.f32.xlu1 %v6040_v5  ;;  %6038 = vadd.xlane.f32.xlu0 %v6037_v37 }
 0x5c5   : > { %6047 = vadd.xlane.f32.xlu1 %v6046_v48  ;;  %6044 = vadd.xlane.f32.xlu0 %v6043_v44 }
 0x5c9   : > { %6053 = vadd.xlane.f32.xlu1 %v6052_v47  ;;  %6050 = vadd.xlane.f32.xlu0 %v6049_v28  ;;  %v5536_v28 = vld [vmem:[%s19686_s3 + $0x288] sm:$0xff] }
 0x5ca   : > { %v5853_v16 = vpop.xlane.xlu1 %5852  ;;  %v5847_v8 = vpop.xlane.xlu0 %5846 }
 0x5cb   : > { %v6807_v56 = vmul.f32 %v10372_v40, %v5853_v16  ;;  %v6805_v54 = vmul.f32 %v10368_v35, %v5847_v8  ;;  %v10754_v40 = vld [vmem:[%s19689_s6 + $0x28] sm:$0xff]  }
 0x5cc   : > { %v10389_v8 = vunpack.c.h.bf16 %v10754_v40 }
 0x5cd   : > { %v10176_v60 = vpack.c.bf16 %v6807_v56, %v6807_v56  ;;  %v10174_v63 = vpack.c.bf16 %v6805_v54, %v6805_v54  ;;  %6059 = vadd.xlane.f32.xlu1 %v6058_v0  ;;  %6056 = vadd.xlane.f32.xlu0 %v6055_v43  ;;  %v10388_v56 = vunpack.c.l.bf16 %v10754_v40  ;;  %v6082_v54 = vsel %vm5378_vm4, %v5732_v12, 0.0  ;;  %v10755_v43 = vld [vmem:[%s19689_s6 + $0x30] sm:$0xff]   ;;  %v5544_v40 = vld [vmem:[%s19686_s3 + $0x2c8] sm:$0xff] }
 0x5ce   : > { %v5856_v30 = vpop.xlane.xlu1 %5855  ;;  %v5850_v20 = vpop.xlane.xlu0 %5849  ;;  %v5733_v0 = vmul.f32 %v17823_v51, %v5535_v14 }
 0x5cf   : > { %7768 = vst.msk [vmem:[#allocation4 + $0x8] sm:$0xf] %vm7765_vm5, %v10176_v60  ;;  %7766 = vst.msk [vmem:[#allocation4] sm:$0xf] %vm7765_vm5, %v10174_v63  ;;  %v6808_v50 = vmul.f32 %v10373_v15, %v5856_v30  ;;  %v6806_v10 = vmul.f32 %v10369_v61, %v5850_v20  ;;  %v6079_v15 = vsel %vm5378_vm4, %v5731_v21, 0.0  ;;  %v5734_v61 = vmul.f32 %v17823_v51, %v5536_v28  ;;  %v5537_v60 = vld [vmem:[%s19686_s3 + $0x290] sm:$0xff] }
 0x5d0   : > { %v10393_v20 = vunpack.c.h.bf16 %v10755_v43 }
 0x5d1   : > { %v10177_v49 = vpack.c.bf16 %v6808_v50, %v6808_v50  ;;  %v10175_v32 = vpack.c.bf16 %v6806_v10, %v6806_v10  ;;  %6065 = vadd.xlane.f32.xlu1 %v6064_v57  ;;  %6062 = vadd.xlane.f32.xlu0 %v6061_v34  ;;  %v10392_v50 = vunpack.c.l.bf16 %v10755_v43  ;;  %v6088_v10 = vsel %vm5378_vm4, %v5734_v61, 0.0  ;;  %v10756_v34 = vld [vmem:[%s19689_s6 + $0x38] sm:$0xff]  }
 0x5d2   : > { %v5862_v39 = vpop.xlane.xlu1 %5861  ;;  %v5859_v13 = vpop.xlane.xlu0 %5858  ;;  %v5735_v57 = vmul.f32 %v17823_v51, %v5537_v60  ;;  %v5546_v43 = vld [vmem:[%s19686_s3 + $0x2d8] sm:$0xff] }
 0x5d3   : > { %7769 = vst.msk [vmem:[#allocation4 + $0xc] sm:$0xf] %vm7765_vm5, %v10177_v49  ;;  %7767 = vst.msk [vmem:[#allocation4 + $0x4] sm:$0xf] %vm7765_vm5, %v10175_v32  ;;  %v6810_v26 = vmul.f32 %v10377_v58, %v5862_v39  ;;  %v6809_v9 = vmul.f32 %v10376_v2, %v5859_v13  ;;  %v6085_v58 = vsel %vm5378_vm4, %v5733_v0, 0.0  ;;  %v5736_v2 = vmul.f32 %v17823_v51, %v5538_v29  ;;  %v5539_v49 = vld [vmem:[%s19686_s3 + $0x2a0] sm:$0xff] }
 0x5d4   : > { %v10397_v13 = vunpack.c.h.bf16 %v10756_v34 }
 0x5d5   : > { %v10179_v5 = vpack.c.bf16 %v6810_v26, %v6810_v26  ;;  %v10178_v37 = vpack.c.bf16 %v6809_v9, %v6809_v9  ;;  %6071 = vadd.xlane.f32.xlu1 %v6070_v55  ;;  %6068 = vadd.xlane.f32.xlu0 %v6067_v46  ;;  %v10396_v26 = vunpack.c.l.bf16 %v10756_v34  ;;  %v6094_v9 = vsel %vm5378_vm4, %v5736_v2, 0.0  ;;  %v10757_v46 = vld [vmem:[%s19689_s6 + $0x40] sm:$0xff]   ;;  %v5548_v34 = vld [vmem:[%s19686_s3 + $0x2e8] sm:$0xff] }
 0x5d6   : > { %v5868_v22 = vpop.xlane.xlu1 %5867  ;;  %v5865_v1 = vpop.xlane.xlu0 %5864  ;;  %v5737_v55 = vmul.f32 %v17823_v51, %v5539_v49 }
 0x5d7   : > { %7771 = vst.msk [vmem:[#allocation4 + $0x14] sm:$0xf] %vm7765_vm5, %v10179_v5  ;;  %7770 = vst.msk [vmem:[#allocation4 + $0x10] sm:$0xf] %vm7765_vm5, %v10178_v37  ;;  %v6812_v48 = vmul.f32 %v10381_v3, %v5868_v22  ;;  %v6811_v44 = vmul.f32 %v10380_v53, %v5865_v1  ;;  %v6091_v3 = vsel %vm5378_vm4, %v5735_v57, 0.0  ;;  %v5738_v53 = vmul.f32 %v17823_v51, %v5540_v62  ;;  %v5541_v5 = vld [vmem:[%s19686_s3 + $0x2b0] sm:$0xff] }
 0x5d8   : > { %v10401_v1 = vunpack.c.h.bf16 %v10757_v46 }
 0x5d9   : > { %v10181_v35 = vpack.c.bf16 %v6812_v48, %v6812_v48  ;;  %v10180_v47 = vpack.c.bf16 %v6811_v44, %v6811_v44  ;;  %6077 = vadd.xlane.f32.xlu1 %v6076_v11  ;;  %6074 = vadd.xlane.f32.xlu0 %v6073_v24  ;;  %v10400_v48 = vunpack.c.l.bf16 %v10757_v46  ;;  %v6100_v44 = vsel %vm5378_vm4, %v5738_v53, 0.0  ;;  %v10758_v24 = vld [vmem:[%s19689_s6 + $0x48] sm:$0xff]   ;;  %v5550_v46 = vld [vmem:[%s19686_s3 + $0x2f8] sm:$0xff] }
 0x5da   : > { %v5874_v25 = vpop.xlane.xlu1 %5873  ;;  %v5871_v6 = vpop.xlane.xlu0 %5870  ;;  %v5739_v11 = vmul.f32 %v17823_v51, %v5541_v5 }
 0x5db   : > { %7773 = vst.msk [vmem:[#allocation4 + $0x1c] sm:$0xf] %vm7765_vm5, %v10181_v35  ;;  %7772 = vst.msk [vmem:[#allocation4 + $0x18] sm:$0xf] %vm7765_vm5, %v10180_v47  ;;  %v6814_v59 = vmul.f32 %v10385_v18, %v5874_v25  ;;  %v6813_v16 = vmul.f32 %v10384_v45, %v5871_v6  ;;  %v6097_v18 = vsel %vm5378_vm4, %v5737_v55, 0.0  ;;  %v5740_v45 = vmul.f32 %v17823_v51, %v5542_v27  ;;  %v5543_v35 = vld [vmem:[%s19686_s3 + $0x2c0] sm:$0xff] }
 0x5dc   : > { %v10405_v6 = vunpack.c.h.bf16 %v10758_v24 }
 0x5dd   : > { %v10183_v42 = vpack.c.bf16 %v6814_v59, %v6814_v59  ;;  %v10182_v36 = vpack.c.bf16 %v6813_v16, %v6813_v16  ;;  %6083 = vadd.xlane.f32.xlu1 %v6082_v54  ;;  %6080 = vadd.xlane.f32.xlu0 %v6079_v15  ;;  %v10404_v59 = vunpack.c.l.bf16 %v10758_v24  ;;  %v6106_v16 = vsel %vm5378_vm4, %v5740_v45, 0.0  ;;  %v10759_v15 = vld [vmem:[%s19689_s6 + $0x50] sm:$0xff]   ;;  %v10762_v45 = vld [vmem:[%s19689_s6 + $0x68] sm:$0xff]  }
 0x5de   : > { %v5880_v63 = vpop.xlane.xlu1 %5879  ;;  %v5877_v52 = vpop.xlane.xlu0 %5876  ;;  %v5741_v54 = vmul.f32 %v17823_v51, %v5543_v35 }
 0x5df   : > { %7775 = vst.msk [vmem:[#allocation4 + $0x24] sm:$0xf] %vm7765_vm5, %v10183_v42  ;;  %7774 = vst.msk [vmem:[#allocation4 + $0x20] sm:$0xf] %vm7765_vm5, %v10182_v36  ;;  %v6816_v33 = vmul.f32 %v10389_v8, %v5880_v63  ;;  %v6815_v30 = vmul.f32 %v10388_v56, %v5877_v52  ;;  %v6103_v8 = vsel %vm5378_vm4, %v5739_v11, 0.0  ;;  %v5742_v56 = vmul.f32 %v17823_v51, %v5544_v40  ;;  %v5545_v42 = vld [vmem:[%s19686_s3 + $0x2d0] sm:$0xff] }
 0x5e0   : > { %v10409_v52 = vunpack.c.h.bf16 %v10759_v15 }
 0x5e1   : > { %v10185_v4 = vpack.c.bf16 %v6816_v33, %v6816_v33  ;;  %v10184_v38 = vpack.c.bf16 %v6815_v30, %v6815_v30  ;;  %6089 = vadd.xlane.f32.xlu1 %v6088_v10  ;;  %6086 = vadd.xlane.f32.xlu0 %v6085_v58  ;;  %v10408_v33 = vunpack.c.l.bf16 %v10759_v15  ;;  %v6112_v30 = vsel %vm5378_vm4, %v5742_v56, 0.0  ;;  %v10760_v58 = vld [vmem:[%s19689_s6 + $0x58] sm:$0xff]  }
 0x5e2   : > { %v5886_v32 = vpop.xlane.xlu1 %5885  ;;  %v5883_v31 = vpop.xlane.xlu0 %5882  ;;  %v5743_v10 = vmul.f32 %v17823_v51, %v5545_v42  ;;  %v5554_v15 = vld [vmem:[%s19686_s3 + $0x318] sm:$0xff]  ;;  %v5373_v42 = vld [vmem:[%s19690_s7] sm:$0x1] }
 0x5e3   : > { %7777 = vst.msk [vmem:[#allocation4 + $0x2c] sm:$0xf] %vm7765_vm5, %v10185_v4  ;;  %7776 = vst.msk [vmem:[#allocation4 + $0x28] sm:$0xf] %vm7765_vm5, %v10184_v38  ;;  %v6818_v41 = vmul.f32 %v10393_v20, %v5886_v32  ;;  %v6817_v39 = vmul.f32 %v10392_v50, %v5883_v31  ;;  %v6109_v20 = vsel %vm5378_vm4, %v5741_v54, 0.0  ;;  %v5744_v50 = vmul.f32 %v17823_v51, %v5546_v43  ;;  %v5547_v4 = vld [vmem:[%s19686_s3 + $0x2e0] sm:$0xff] }
 0x5e4   : > { %v10413_v31 = vunpack.c.h.bf16 %v10760_v58 }
 0x5e5   : > { %v10187_v17 = vpack.c.bf16 %v6818_v41, %v6818_v41  ;;  %v10186_v7 = vpack.c.bf16 %v6817_v39, %v6817_v39  ;;  %6095 = vadd.xlane.f32.xlu1 %v6094_v9  ;;  %6092 = vadd.xlane.f32.xlu0 %v6091_v3  ;;  %v10412_v41 = vunpack.c.l.bf16 %v10760_v58  ;;  %v6118_v39 = vsel %vm5378_vm4, %v5744_v50, 0.0  ;;  %v10761_v3 = vld [vmem:[%s19689_s6 + $0x60] sm:$0xff]  }
 0x5e6   : > { %v5892_v37 = vpop.xlane.xlu1 %5891  ;;  %v5889_v23 = vpop.xlane.xlu0 %5888  ;;  %v5745_v9 = vmul.f32 %v17823_v51, %v5547_v4  ;;  %v5555_v4 = vld [vmem:[%s19686_s3 + $0x320] sm:$0xff] }
 0x5e7   : > { %7779 = vst.msk [vmem:[#allocation4 + $0x34] sm:$0xf] %vm7765_vm5, %v10187_v17  ;;  %7778 = vst.msk [vmem:[#allocation4 + $0x30] sm:$0xf] %vm7765_vm5, %v10186_v7  ;;  %v6820_v19 = vmul.f32 %v10397_v13, %v5892_v37  ;;  %v6819_v22 = vmul.f32 %v10396_v26, %v5889_v23  ;;  %v6115_v13 = vsel %vm5378_vm4, %v5743_v10, 0.0  ;;  %v5746_v26 = vmul.f32 %v17823_v51, %v5548_v34  ;;  %v5549_v17 = vld [vmem:[%s19686_s3 + $0x2f0] sm:$0xff] }
 0x5e8   : > { %v10417_v23 = vunpack.c.h.bf16 %v10761_v3  ;;  %v10764_v10 = vld [vmem:[%s19689_s6 + $0x78] sm:$0xff]   ;;  %v5556_v34 = vld [vmem:[%s19686_s3 + $0x328] sm:$0xff] }
 0x5e9   : > { %v10189_v12 = vpack.c.bf16 %v6820_v19, %v6820_v19  ;;  %v10188_v21 = vpack.c.bf16 %v6819_v22, %v6819_v22  ;;  %6101 = vadd.xlane.f32.xlu1 %v6100_v44  ;;  %6098 = vadd.xlane.f32.xlu0 %v6097_v18  ;;  %v10416_v19 = vunpack.c.l.bf16 %v10761_v3  ;;  %v5552_v22 = vld [vmem:[%s19686_s3 + $0x308] sm:$0xff]  ;;  %v5748_v44 = vmul.f32 %v17823_v51, %v5550_v46 }
 0x5ea   : > { %v5898_v47 = vpop.xlane.xlu1 %5897  ;;  %v5895_v28 = vpop.xlane.xlu0 %5894  ;;  %v5747_v18 = vmul.f32 %v17823_v51, %v5549_v17  ;;  %v5750_v35 = vmul.f32 %v17823_v51, %v5552_v22  ;;  %v5753_v3 = vmul.f32 %v17823_v51, %v5555_v4  ;;  %v5558_v17 = vld [vmem:[%s19686_s3 + $0x338] sm:$0xff] }
 0x5eb   : > { %7781 = vst.msk [vmem:[#allocation4 + $0x3c] sm:$0xf] %vm7765_vm5, %v10189_v12  ;;  %7780 = vst.msk [vmem:[#allocation4 + $0x38] sm:$0xf] %vm7765_vm5, %v10188_v21  ;;  %v6822_v14 = vmul.f32 %v10401_v1, %v5898_v47  ;;  %v6821_v25 = vmul.f32 %v10400_v48, %v5895_v28  ;;  %v6124_v1 = vsel %vm5378_vm4, %v5746_v26, 0.0  ;;  %v6121_v48 = vsel %vm5378_vm4, %v5745_v9, 0.0 }
 0x5ec   : > { %v5551_v12 = vld [vmem:[%s19686_s3 + $0x300] sm:$0xff]  ;;  %v5754_v9 = vmul.f32 %v17823_v51, %v5556_v34 }
 0x5ed   : > { %v10191_v61 = vpack.c.bf16 %v6822_v14, %v6822_v14  ;;  %v10190_v0 = vpack.c.bf16 %v6821_v25, %v6821_v25  ;;  %6107 = vadd.xlane.f32.xlu1 %v6106_v16  ;;  %6104 = vadd.xlane.f32.xlu0 %v6103_v8  ;;  %v10421_v14 = vunpack.c.h.bf16 %v10762_v45  ;;  %v10420_v25 = vunpack.c.l.bf16 %v10762_v45  ;;  %v10763_v8 = vld [vmem:[%s19689_s6 + $0x70] sm:$0xff]   ;;  %v10766_v45 = vld [vmem:[%s19689_s6 + $0x88] sm:$0xff]  }
 0x5ee   : > { %v5904_v36 = vpop.xlane.xlu1 %5903  ;;  %v5901_v29 = vpop.xlane.xlu0 %5900  ;;  %v5749_v16 = vmul.f32 %v17823_v51, %v5551_v12  ;;  %v5560_v12 = vld [vmem:[%s19686_s3 + $0x348] sm:$0xff] }
 0x5ef   : > { %7783 = vst.msk [vmem:[#allocation4 + $0x44] sm:$0xf] %vm7765_vm5, %v10191_v61  ;;  %7782 = vst.msk [vmem:[#allocation4 + $0x40] sm:$0xf] %vm7765_vm5, %v10190_v0  ;;  %v6824_v60 = vmul.f32 %v10405_v6, %v5904_v36  ;;  %v6823_v63 = vmul.f32 %v10404_v59, %v5901_v29  ;;  %v6130_v6 = vsel %vm5378_vm4, %v5748_v44, 0.0  ;;  %v6127_v59 = vsel %vm5378_vm4, %v5747_v18, 0.0 }
 0x5f0   : > { %v5553_v61 = vld [vmem:[%s19686_s3 + $0x310] sm:$0xff]  ;;  %v6136_v36 = vsel %vm5378_vm4, %v5750_v35, 0.0  ;;  %v5756_v44 = vmul.f32 %v17823_v51, %v5558_v17 }
 0x5f1   : > { %v10193_v2 = vpack.c.bf16 %v6824_v60, %v6824_v60  ;;  %v10192_v57 = vpack.c.bf16 %v6823_v63, %v6823_v63  ;;  %6113 = vadd.xlane.f32.xlu1 %v6112_v30  ;;  %6110 = vadd.xlane.f32.xlu0 %v6109_v20  ;;  %v10425_v63 = vunpack.c.h.bf16 %v10763_v8  ;;  %v6133_v30 = vsel %vm5378_vm4, %v5749_v16, 0.0 }
 0x5f2   : > { %v5910_v38 = vpop.xlane.xlu1 %5909  ;;  %v5907_v62 = vpop.xlane.xlu0 %5906  ;;  %v5752_v20 = vmul.f32 %v17823_v51, %v5554_v15  ;;  %v5751_v50 = vmul.f32 %v17823_v51, %v5553_v61  ;;  %v5758_v16 = vmul.f32 %v17823_v51, %v5560_v12  ;;  %v5562_v61 = vld [vmem:[%s19686_s3 + $0x358] sm:$0xff] }
 0x5f3   : > { %7785 = vst.msk [vmem:[#allocation4 + $0x4c] sm:$0xf] %vm7765_vm5, %v10193_v2  ;;  %7784 = vst.msk [vmem:[#allocation4 + $0x48] sm:$0xf] %vm7765_vm5, %v10192_v57  ;;  %v6826_v49 = vmul.f32 %v10409_v52, %v5910_v38  ;;  %v6825_v32 = vmul.f32 %v10408_v33, %v5907_v62  ;;  %v10424_v52 = vunpack.c.l.bf16 %v10763_v8 }
 0x5f4   : > { %v6139_v26 = vsel %vm5378_vm4, %v5751_v50, 0.0  ;;  %v10768_v50 = vld [vmem:[%s19689_s6 + $0x98] sm:$0xff]  }
 0x5f5   : > { %v10195_v53 = vpack.c.bf16 %v6826_v49, %v6826_v49  ;;  %v10194_v55 = vpack.c.bf16 %v6825_v32, %v6825_v32  ;;  %6119 = vadd.xlane.f32.xlu1 %v6118_v39  ;;  %6116 = vadd.xlane.f32.xlu0 %v6115_v13  ;;  %v10428_v39 = vunpack.c.l.bf16 %v10764_v10  ;;  %v6142_v13 = vsel %vm5378_vm4, %v5752_v20, 0.0 }
 0x5f6   : > { %v5916_v7 = vpop.xlane.xlu1 %5915  ;;  %v5913_v27 = vpop.xlane.xlu0 %5912 }
 0x5f7   : > { %7787 = vst.msk [vmem:[#allocation4 + $0x54] sm:$0xf] %vm7765_vm5, %v10195_v53  ;;  %7786 = vst.msk [vmem:[#allocation4 + $0x50] sm:$0xf] %vm7765_vm5, %v10194_v55  ;;  %v6828_v5 = vmul.f32 %v10413_v31, %v5916_v7  ;;  %v6827_v37 = vmul.f32 %v10412_v41, %v5913_v27  ;;  %v10429_v41 = vunpack.c.h.bf16 %v10764_v10  ;;  %v10765_v53 = vld [vmem:[%s19689_s6 + $0x80] sm:$0xff]   ;;  %v5557_v7 = vld [vmem:[%s19686_s3 + $0x330] sm:$0xff] }
 0x5f8   : > { %v10432_v22 = vunpack.c.l.bf16 %v10765_v53  ;;  %v5755_v18 = vmul.f32 %v17823_v51, %v5557_v7 }
 0x5f9   : > { %v10197_v11 = vpack.c.bf16 %v6828_v5, %v6828_v5  ;;  %v10196_v24 = vpack.c.bf16 %v6827_v37, %v6827_v37  ;;  %6125 = vadd.xlane.f32.xlu1 %v6124_v1  ;;  %6122 = vadd.xlane.f32.xlu0 %v6121_v48  ;;  %v6148_v1 = vsel %vm5378_vm4, %v5754_v9, 0.0  ;;  %v6145_v48 = vsel %vm5378_vm4, %v5753_v3, 0.0 }
 0x5fa   : > { %v5922_v21 = vpop.xlane.xlu1 %5921  ;;  %v5919_v40 = vpop.xlane.xlu0 %5918 }
 0x5fb   : > { %7789 = vst.msk [vmem:[#allocation4 + $0x5c] sm:$0xf] %vm7765_vm5, %v10197_v11  ;;  %7788 = vst.msk [vmem:[#allocation4 + $0x58] sm:$0xf] %vm7765_vm5, %v10196_v24  ;;  %v6830_v47 = vmul.f32 %v10417_v23, %v5922_v21  ;;  %v6829_v28 = vmul.f32 %v10416_v19, %v5919_v40  ;;  %v10433_v19 = vunpack.c.h.bf16 %v10765_v53  ;;  %v5559_v21 = vld [vmem:[%s19686_s3 + $0x340] sm:$0xff]  ;;  %v5566_v53 = vld [vmem:[%s19686_s3 + $0x378] sm:$0xff] }
 0x5fc   : > { %v5757_v8 = vmul.f32 %v17823_v51, %v5559_v21 }
 0x5fd   : > { %v10199_v56 = vpack.c.bf16 %v6830_v47, %v6830_v47  ;;  %v10198_v54 = vpack.c.bf16 %v6829_v28, %v6829_v28  ;;  %6131 = vadd.xlane.f32.xlu1 %v6130_v6  ;;  %6128 = vadd.xlane.f32.xlu0 %v6127_v59  ;;  %v6154_v6 = vsel %vm5378_vm4, %v5756_v44, 0.0  ;;  %v6151_v59 = vsel %vm5378_vm4, %v5755_v18, 0.0 }
 0x5fe   : > { %v5928_v0 = vpop.xlane.xlu1 %5927  ;;  %v5925_v43 = vpop.xlane.xlu0 %5924 }
 0x5ff   : > { %7791 = vst.msk [vmem:[#allocation4 + $0x64] sm:$0xf] %vm7765_vm5, %v10199_v56  ;;  %7790 = vst.msk [vmem:[#allocation4 + $0x60] sm:$0xf] %vm7765_vm5, %v10198_v54  ;;  %v6832_v29 = vmul.f32 %v10421_v14, %v5928_v0  ;;  %v6831_v60 = vmul.f32 %v10420_v25, %v5925_v43  ;;  %v10437_v14 = vunpack.c.h.bf16 %v10766_v45  ;;  %v10436_v25 = vunpack.c.l.bf16 %v10766_v45  ;;  %v10767_v56 = vld [vmem:[%s19689_s6 + $0x90] sm:$0xff]   ;;  %v5568_v45 = vld [vmem:[%s19686_s3 + $0x388] sm:$0xff] }
 0x600   : > { %v5448_v33 = vpop.f32.mrf.mxu0  ;;  %v5561_v0 = vld [vmem:[%s19686_s3 + $0x350] sm:$0xff] }
 0x601   : > { %v10201_v58 = vpack.c.bf16 %v6832_v29, %v6832_v29  ;;  %v10200_v2 = vpack.c.bf16 %v6831_v60, %v6831_v60  ;;  %v5452_v57 = vadd.f32 %v5448_v33, %v5373_v42  ;;  %6137 = vadd.xlane.f32.xlu1 %v6136_v36  ;;  %6134 = vadd.xlane.f32.xlu0 %v6133_v30  ;;  %v10441_v60 = vunpack.c.h.bf16 %v10767_v56 }
 0x602   : > { %v5934_v38 = vpop.xlane.xlu1 %5933  ;;  %v5931_v62 = vpop.xlane.xlu0 %5930  ;;  %v6157_v33 = vsel %vm5378_vm4, %v5757_v8, 0.0  ;;  %v5760_v30 = vmul.f32 %v17823_v51, %v5562_v61  ;;  %v5759_v20 = vmul.f32 %v17823_v51, %v5561_v0 }
 0x603   : > { %7793 = vst.msk [vmem:[#allocation4 + $0x6c] sm:$0xf] %vm7765_vm5, %v10201_v58  ;;  %7792 = vst.msk [vmem:[#allocation4 + $0x68] sm:$0xf] %vm7765_vm5, %v10200_v2  ;;  %v6834_v49 = vmul.f32 %v10425_v63, %v5934_v38  ;;  %v6833_v32 = vmul.f32 %v10424_v52, %v5931_v62  ;;  %v12102_v31 = vpop.f32.mrf.mxu0  ;;  %v10440_v63 = vunpack.c.l.bf16 %v10767_v56  ;;  %v6160_v52 = vsel %vm5378_vm4, %v5758_v16, 0.0  ;;  %v5564_v2 = vld [vmem:[%s19686_s3 + $0x368] sm:$0xff] }
 0x604   : > { %5454 = vst.msk [vmem:[#allocation5] sm:$0x1] %vm5453_vm6, %v5452_v57  ;;  %v5563_v57 = vld [vmem:[%s19686_s3 + $0x360] sm:$0xff]  ;;  %v6166_v31 = vsel %vm5378_vm4, %v5760_v30, 0.0  ;;  %v5570_v56 = vld [vmem:[%s19686_s3 + $0x398] sm:$0xff] }
 0x605   : > { %v10203_v55 = vpack.c.bf16 %v6834_v49, %v6834_v49  ;;  %v10202_v46 = vpack.c.bf16 %v6833_v32, %v6833_v32  ;;  %6143 = vadd.xlane.f32.xlu1 %v6142_v13  ;;  %6140 = vadd.xlane.f32.xlu0 %v6139_v26  ;;  %v10445_v49 = vunpack.c.h.bf16 %v10768_v50  ;;  %v10444_v32 = vunpack.c.l.bf16 %v10768_v50  ;;  %v10769_v26 = vld [vmem:[%s19689_s6 + $0xa0] sm:$0xff]   ;;  %v5572_v50 = vld [vmem:[%s19686_s3 + $0x3a8] sm:$0xff] }
 0x606   : > { %v5940_v27 = vpop.xlane.xlu1 %5939  ;;  %v5937_v5 = vpop.xlane.xlu0 %5936  ;;  %v5761_v13 = vmul.f32 %v17823_v51, %v5563_v57 }
 0x607   : > { %7795 = vst.msk [vmem:[#allocation4 + $0x74] sm:$0xf] %vm7765_vm5, %v10203_v55  ;;  %7794 = vst.msk [vmem:[#allocation4 + $0x70] sm:$0xf] %vm7765_vm5, %v10202_v46  ;;  %v6836_v37 = vmul.f32 %v10429_v41, %v5940_v27  ;;  %v6835_v23 = vmul.f32 %v10428_v39, %v5937_v5  ;;  %v6163_v41 = vsel %vm5378_vm4, %v5759_v20, 0.0  ;;  %v5762_v39 = vmul.f32 %v17823_v51, %v5564_v2  ;;  %v5565_v55 = vld [vmem:[%s19686_s3 + $0x370] sm:$0xff] }
 0x608   : > { %v10449_v5 = vunpack.c.h.bf16 %v10769_v26 }
 0x609   : > { %v10205_v11 = vpack.c.bf16 %v6836_v37, %v6836_v37  ;;  %v10204_v24 = vpack.c.bf16 %v6835_v23, %v6835_v23  ;;  %6149 = vadd.xlane.f32.xlu1 %v6148_v1  ;;  %6146 = vadd.xlane.f32.xlu0 %v6145_v48  ;;  %v10448_v37 = vunpack.c.l.bf16 %v10769_v26  ;;  %v6172_v23 = vsel %vm5378_vm4, %v5762_v39, 0.0  ;;  %v10770_v48 = vld [vmem:[%s19689_s6 + $0xa8] sm:$0xff]   ;;  %v5574_v26 = vld [vmem:[%s19686_s3 + $0x3b8] sm:$0xff] }
 0x60a   : > { %v5946_v40 = vpop.xlane.xlu1 %5945  ;;  %v5943_v35 = vpop.xlane.xlu0 %5942  ;;  %v5763_v1 = vmul.f32 %v17823_v51, %v5565_v55 }
 0x60b   : > { %7797 = vst.msk [vmem:[#allocation4 + $0x7c] sm:$0xf] %vm7765_vm5, %v10205_v11  ;;  %7796 = vst.msk [vmem:[#allocation4 + $0x78] sm:$0xf] %vm7765_vm5, %v10204_v24  ;;  %v6838_v47 = vmul.f32 %v10433_v19, %v5946_v40  ;;  %v6837_v28 = vmul.f32 %v10432_v22, %v5943_v35  ;;  %v6169_v19 = vsel %vm5378_vm4, %v5761_v13, 0.0  ;;  %v5764_v22 = vmul.f32 %v17823_v51, %v5566_v53  ;;  %v5567_v11 = vld [vmem:[%s19686_s3 + $0x380] sm:$0xff] }
 0x60c   : > { %v10453_v35 = vunpack.c.h.bf16 %v10770_v48 }
 0x60d   : > { %v10207_v54 = vpack.c.bf16 %v6838_v47, %v6838_v47  ;;  %v10206_v15 = vpack.c.bf16 %v6837_v28, %v6837_v28  ;;  %6155 = vadd.xlane.f32.xlu1 %v6154_v6  ;;  %6152 = vadd.xlane.f32.xlu0 %v6151_v59  ;;  %v10452_v47 = vunpack.c.l.bf16 %v10770_v48  ;;  %v6178_v28 = vsel %vm5378_vm4, %v5764_v22, 0.0  ;;  %v10771_v59 = vld [vmem:[%s19689_s6 + $0xb0] sm:$0xff]   ;;  %v5576_v48 = vld [vmem:[%s19686_s3 + $0x3c8] sm:$0xff] }
 0x60e   : > { %v5952_v43 = vpop.xlane.xlu1 %5951  ;;  %v5949_v42 = vpop.xlane.xlu0 %5948  ;;  %v5765_v6 = vmul.f32 %v17823_v51, %v5567_v11 }
 0x60f   : > { %7799 = vst.msk [vmem:[#allocation4 + $0x84] sm:$0xf] %vm7765_vm5, %v10207_v54  ;;  %7798 = vst.msk [vmem:[#allocation4 + $0x80] sm:$0xf] %vm7765_vm5, %v10206_v15  ;;  %v6840_v36 = vmul.f32 %v10437_v14, %v5952_v43  ;;  %v6839_v29 = vmul.f32 %v10436_v25, %v5949_v42  ;;  %v6175_v14 = vsel %vm5378_vm4, %v5763_v1, 0.0  ;;  %v5766_v25 = vmul.f32 %v17823_v51, %v5568_v45  ;;  %v5569_v54 = vld [vmem:[%s19686_s3 + $0x390] sm:$0xff] }
 0x610   : > { %v10457_v42 = vunpack.c.h.bf16 %v10771_v59 }
 0x611   : > { %v10209_v10 = vpack.c.bf16 %v6840_v36, %v6840_v36  ;;  %v10208_v58 = vpack.c.bf16 %v6839_v29, %v6839_v29  ;;  %6161 = vadd.xlane.f32.xlu1 %v6160_v52  ;;  %6158 = vadd.xlane.f32.xlu0 %v6157_v33  ;;  %v10456_v36 = vunpack.c.l.bf16 %v10771_v59  ;;  %v6184_v29 = vsel %vm5378_vm4, %v5766_v25, 0.0  ;;  %v10772_v33 = vld [vmem:[%s19689_s6 + $0xb8] sm:$0xff]  }
 0x612   : > { %v5958_v34 = vpop.xlane.xlu1 %5957  ;;  %v5955_v4 = vpop.xlane.xlu0 %5954  ;;  %v5767_v52 = vmul.f32 %v17823_v51, %v5569_v54  ;;  %v5578_v59 = vld [vmem:[%s19686_s3 + $0x3d8] sm:$0xff] }
 0x613   : > { %7801 = vst.msk [vmem:[#allocation4 + $0x8c] sm:$0xf] %vm7765_vm5, %v10209_v10  ;;  %7800 = vst.msk [vmem:[#allocation4 + $0x88] sm:$0xf] %vm7765_vm5, %v10208_v58  ;;  %v6842_v38 = vmul.f32 %v10441_v60, %v5958_v34  ;;  %v6841_v62 = vmul.f32 %v10440_v63, %v5955_v4  ;;  %v6181_v60 = vsel %vm5378_vm4, %v5765_v6, 0.0  ;;  %v5768_v63 = vmul.f32 %v17823_v51, %v5570_v56  ;;  %v5571_v10 = vld [vmem:[%s19686_s3 + $0x3a0] sm:$0xff] }
 0x614   : > { %v10461_v4 = vunpack.c.h.bf16 %v10772_v33 }
 0x615   : > { %v10211_v9 = vpack.c.bf16 %v6842_v38, %v6842_v38  ;;  %v10210_v3 = vpack.c.bf16 %v6841_v62, %v6841_v62  ;;  %6167 = vadd.xlane.f32.xlu1 %v6166_v31  ;;  %6164 = vadd.xlane.f32.xlu0 %v6163_v41  ;;  %v10460_v38 = vunpack.c.l.bf16 %v10772_v33  ;;  %v6190_v62 = vsel %vm5378_vm4, %v5768_v63, 0.0  ;;  %v10773_v41 = vld [vmem:[%s19689_s6 + $0xc0] sm:$0xff]   ;;  %v5580_v33 = vld [vmem:[%s19686_s3 + $0x3e8] sm:$0xff] }
 0x616   : > { %v5964_v46 = vpop.xlane.xlu1 %5963  ;;  %v5961_v17 = vpop.xlane.xlu0 %5960  ;;  %v5769_v31 = vmul.f32 %v17823_v51, %v5571_v10 }
 0x617   : > { %7803 = vst.msk [vmem:[#allocation4 + $0x94] sm:$0xf] %vm7765_vm5, %v10211_v9  ;;  %7802 = vst.msk [vmem:[#allocation4 + $0x90] sm:$0xf] %vm7765_vm5, %v10210_v3  ;;  %v6844_v7 = vmul.f32 %v10445_v49, %v5964_v46  ;;  %v6843_v27 = vmul.f32 %v10444_v32, %v5961_v17  ;;  %v6187_v49 = vsel %vm5378_vm4, %v5767_v52, 0.0  ;;  %v5770_v32 = vmul.f32 %v17823_v51, %v5572_v50  ;;  %v5573_v9 = vld [vmem:[%s19686_s3 + $0x3b0] sm:$0xff] }
 0x618   : > { %v10465_v17 = vunpack.c.h.bf16 %v10773_v41 }
 0x619   : > { %v10213_v44 = vpack.c.bf16 %v6844_v7, %v6844_v7  ;;  %v10212_v18 = vpack.c.bf16 %v6843_v27, %v6843_v27  ;;  %6173 = vadd.xlane.f32.xlu1 %v6172_v23  ;;  %6170 = vadd.xlane.f32.xlu0 %v6169_v19  ;;  %v10464_v7 = vunpack.c.l.bf16 %v10773_v41  ;;  %v6196_v27 = vsel %vm5378_vm4, %v5770_v32, 0.0  ;;  %v10774_v19 = vld [vmem:[%s19689_s6 + $0xc8] sm:$0xff]   ;;  %v5582_v41 = vld [vmem:[%s19686_s3 + $0x3f8] sm:$0xff] }
 0x61a   : > { %v5970_v24 = vpop.xlane.xlu1 %5969  ;;  %v5967_v12 = vpop.xlane.xlu0 %5966  ;;  %v5771_v23 = vmul.f32 %v17823_v51, %v5573_v9 }
 0x61b   : > { %7805 = vst.msk [vmem:[#allocation4 + $0x9c] sm:$0xf] %vm7765_vm5, %v10213_v44  ;;  %7804 = vst.msk [vmem:[#allocation4 + $0x98] sm:$0xf] %vm7765_vm5, %v10212_v18  ;;  %v6846_v21 = vmul.f32 %v10449_v5, %v5970_v24  ;;  %v6845_v40 = vmul.f32 %v10448_v37, %v5967_v12  ;;  %v6193_v5 = vsel %vm5378_vm4, %v5769_v31, 0.0  ;;  %v5772_v37 = vmul.f32 %v17823_v51, %v5574_v26  ;;  %v5575_v44 = vld [vmem:[%s19686_s3 + $0x3c0] sm:$0xff] }
 0x61c   : > { %v10469_v12 = vunpack.c.h.bf16 %v10774_v19 }
 0x61d   : > { %v10215_v16 = vpack.c.bf16 %v6846_v21, %v6846_v21  ;;  %v10214_v8 = vpack.c.bf16 %v6845_v40, %v6845_v40  ;;  %6179 = vadd.xlane.f32.xlu1 %v6178_v28  ;;  %6176 = vadd.xlane.f32.xlu0 %v6175_v14  ;;  %v10468_v21 = vunpack.c.l.bf16 %v10774_v19  ;;  %v6202_v40 = vsel %vm5378_vm4, %v5772_v37, 0.0  ;;  %v10775_v14 = vld [vmem:[%s19689_s6 + $0xd0] sm:$0xff]   ;;  %v5584_v19 = vld [vmem:[%s19686_s3 + $0x408] sm:$0xff] }
 0x61e   : > { %v5976_v15 = vpop.xlane.xlu1 %5975  ;;  %v5973_v61 = vpop.xlane.xlu0 %5972  ;;  %v5773_v28 = vmul.f32 %v17823_v51, %v5575_v44 }
 0x61f   : > { %7807 = vst.msk [vmem:[#allocation4 + $0xa4] sm:$0xf] %vm7765_vm5, %v10215_v16  ;;  %7806 = vst.msk [vmem:[#allocation4 + $0xa0] sm:$0xf] %vm7765_vm5, %v10214_v8  ;;  %v6848_v0 = vmul.f32 %v10453_v35, %v5976_v15  ;;  %v6847_v43 = vmul.f32 %v10452_v47, %v5973_v61  ;;  %v6199_v35 = vsel %vm5378_vm4, %v5771_v23, 0.0  ;;  %v5774_v47 = vmul.f32 %v17823_v51, %v5576_v48  ;;  %v5577_v16 = vld [vmem:[%s19686_s3 + $0x3d0] sm:$0xff] }
 0x620   : > { %v10473_v61 = vunpack.c.h.bf16 %v10775_v14 }
 0x621   : > { %v10217_v30 = vpack.c.bf16 %v6848_v0, %v6848_v0  ;;  %v10216_v20 = vpack.c.bf16 %v6847_v43, %v6847_v43  ;;  %6185 = vadd.xlane.f32.xlu1 %v6184_v29  ;;  %6182 = vadd.xlane.f32.xlu0 %v6181_v60  ;;  %v10472_v0 = vunpack.c.l.bf16 %v10775_v14  ;;  %v6208_v43 = vsel %vm5378_vm4, %v5774_v47, 0.0  ;;  %v10776_v60 = vld [vmem:[%s19689_s6 + $0xd8] sm:$0xff]  }
 0x622   : > { %v5982_v58 = vpop.xlane.xlu1 %5981  ;;  %v5979_v2 = vpop.xlane.xlu0 %5978  ;;  %v5775_v29 = vmul.f32 %v17823_v51, %v5577_v16  ;;  %v5586_v14 = vld [vmem:[%s19686_s3 + $0x418] sm:$0xff] }
 0x623   : > { %7809 = vst.msk [vmem:[#allocation4 + $0xac] sm:$0xf] %vm7765_vm5, %v10217_v30  ;;  %7808 = vst.msk [vmem:[#allocation4 + $0xa8] sm:$0xf] %vm7765_vm5, %v10216_v20  ;;  %v6850_v57 = vmul.f32 %v10457_v42, %v5982_v58  ;;  %v6849_v34 = vmul.f32 %v10456_v36, %v5979_v2  ;;  %v6205_v42 = vsel %vm5378_vm4, %v5773_v28, 0.0  ;;  %v5776_v36 = vmul.f32 %v17823_v51, %v5578_v59  ;;  %v5579_v30 = vld [vmem:[%s19686_s3 + $0x3e0] sm:$0xff] }
 0x624   : > { %v10477_v2 = vunpack.c.h.bf16 %v10776_v60 }
 0x625   : > { %v10219_v39 = vpack.c.bf16 %v6850_v57, %v6850_v57  ;;  %v10218_v13 = vpack.c.bf16 %v6849_v34, %v6849_v34  ;;  %6191 = vadd.xlane.f32.xlu1 %v6190_v62  ;;  %6188 = vadd.xlane.f32.xlu0 %v6187_v49  ;;  %v10476_v57 = vunpack.c.l.bf16 %v10776_v60  ;;  %v6214_v34 = vsel %vm5378_vm4, %v5776_v36, 0.0  ;;  %v10777_v49 = vld [vmem:[%s19689_s6 + $0xe0] sm:$0xff]   ;;  %v5588_v60 = vld [vmem:[%s19686_s3 + $0x428] sm:$0xff] }
 0x626   : > { %v5988_v3 = vpop.xlane.xlu1 %5987  ;;  %v5985_v53 = vpop.xlane.xlu0 %5984  ;;  %v5777_v62 = vmul.f32 %v17823_v51, %v5579_v30 }
 0x627   : > { %7811 = vst.msk [vmem:[#allocation4 + $0xb4] sm:$0xf] %vm7765_vm5, %v10219_v39  ;;  %7810 = vst.msk [vmem:[#allocation4 + $0xb0] sm:$0xf] %vm7765_vm5, %v10218_v13  ;;  %v6852_v55 = vmul.f32 %v10461_v4, %v5988_v3  ;;  %v6851_v46 = vmul.f32 %v10460_v38, %v5985_v53  ;;  %v6211_v4 = vsel %vm5378_vm4, %v5775_v29, 0.0  ;;  %v5778_v38 = vmul.f32 %v17823_v51, %v5580_v33  ;;  %v5581_v39 = vld [vmem:[%s19686_s3 + $0x3f0] sm:$0xff] }
 0x628   : > { %v10481_v53 = vunpack.c.h.bf16 %v10777_v49 }
 0x629   : > { %v10221_v22 = vpack.c.bf16 %v6852_v55, %v6852_v55  ;;  %v10220_v1 = vpack.c.bf16 %v6851_v46, %v6851_v46  ;;  %6197 = vadd.xlane.f32.xlu1 %v6196_v27  ;;  %6194 = vadd.xlane.f32.xlu0 %v6193_v5  ;;  %v10480_v55 = vunpack.c.l.bf16 %v10777_v49  ;;  %v6220_v46 = vsel %vm5378_vm4, %v5778_v38, 0.0  ;;  %v10778_v5 = vld [vmem:[%s19689_s6 + $0xe8] sm:$0xff]   ;;  %v5590_v49 = vld [vmem:[%s19686_s3 + $0x438] sm:$0xff] }
 0x62a   : > { %v5994_v18 = vpop.xlane.xlu1 %5993  ;;  %v5991_v45 = vpop.xlane.xlu0 %5990  ;;  %v5779_v27 = vmul.f32 %v17823_v51, %v5581_v39 }
 0x62b   : > { %7813 = vst.msk [vmem:[#allocation4 + $0xbc] sm:$0xf] %vm7765_vm5, %v10221_v22  ;;  %7812 = vst.msk [vmem:[#allocation4 + $0xb8] sm:$0xf] %vm7765_vm5, %v10220_v1  ;;  %v6854_v11 = vmul.f32 %v10465_v17, %v5994_v18  ;;  %v6853_v24 = vmul.f32 %v10464_v7, %v5991_v45  ;;  %v6217_v17 = vsel %vm5378_vm4, %v5777_v62, 0.0  ;;  %v5780_v7 = vmul.f32 %v17823_v51, %v5582_v41  ;;  %v5583_v22 = vld [vmem:[%s19686_s3 + $0x400] sm:$0xff] }
 0x62c   : > { %v10485_v45 = vunpack.c.h.bf16 %v10778_v5 }
 0x62d   : > { %v10223_v25 = vpack.c.bf16 %v6854_v11, %v6854_v11  ;;  %v10222_v6 = vpack.c.bf16 %v6853_v24, %v6853_v24  ;;  %6203 = vadd.xlane.f32.xlu1 %v6202_v40  ;;  %6200 = vadd.xlane.f32.xlu0 %v6199_v35  ;;  %v10484_v11 = vunpack.c.l.bf16 %v10778_v5  ;;  %v6226_v24 = vsel %vm5378_vm4, %v5780_v7, 0.0  ;;  %v10779_v35 = vld [vmem:[%s19689_s6 + $0xf0] sm:$0xff]   ;;  %v5592_v5 = vld [vmem:[%s19686_s3 + $0x448] sm:$0xff] }
 0x62e   : > { %v6000_v8 = vpop.xlane.xlu1 %5999  ;;  %v5997_v56 = vpop.xlane.xlu0 %5996  ;;  %v5781_v40 = vmul.f32 %v17823_v51, %v5583_v22 }
 0x62f   : > { %7815 = vst.msk [vmem:[#allocation4 + $0xc4] sm:$0xf] %vm7765_vm5, %v10223_v25  ;;  %7814 = vst.msk [vmem:[#allocation4 + $0xc0] sm:$0xf] %vm7765_vm5, %v10222_v6  ;;  %v6856_v54 = vmul.f32 %v10469_v12, %v6000_v8  ;;  %v6855_v15 = vmul.f32 %v10468_v21, %v5997_v56  ;;  %v6223_v12 = vsel %vm5378_vm4, %v5779_v27, 0.0  ;;  %v5782_v21 = vmul.f32 %v17823_v51, %v5584_v19  ;;  %v5585_v25 = vld [vmem:[%s19686_s3 + $0x410] sm:$0xff] }
 0x630   : > { %v10489_v56 = vunpack.c.h.bf16 %v10779_v35 }
 0x631   : > { %v10225_v63 = vpack.c.bf16 %v6856_v54, %v6856_v54  ;;  %v10224_v52 = vpack.c.bf16 %v6855_v15, %v6855_v15  ;;  %6209 = vadd.xlane.f32.xlu1 %v6208_v43  ;;  %6206 = vadd.xlane.f32.xlu0 %v6205_v42  ;;  %v10488_v54 = vunpack.c.l.bf16 %v10779_v35  ;;  %v6232_v15 = vsel %vm5378_vm4, %v5782_v21, 0.0  ;;  %v10780_v42 = vld [vmem:[%s19689_s6 + $0xf8] sm:$0xff]  }
 0x632   : > { %v6006_v20 = vpop.xlane.xlu1 %6005  ;;  %v6003_v50 = vpop.xlane.xlu0 %6002  ;;  %v5783_v43 = vmul.f32 %v17823_v51, %v5585_v25  ;;  %v5594_v35 = vld [vmem:[%s19686_s3 + $0x458] sm:$0xff] }
 0x633   : > { %7817 = vst.msk [vmem:[#allocation4 + $0xcc] sm:$0xf] %vm7765_vm5, %v10225_v63  ;;  %7816 = vst.msk [vmem:[#allocation4 + $0xc8] sm:$0xf] %vm7765_vm5, %v10224_v52  ;;  %v6858_v10 = vmul.f32 %v10473_v61, %v6006_v20  ;;  %v6857_v58 = vmul.f32 %v10472_v0, %v6003_v50  ;;  %v6229_v61 = vsel %vm5378_vm4, %v5781_v40, 0.0  ;;  %v5784_v0 = vmul.f32 %v17823_v51, %v5586_v14  ;;  %v5587_v63 = vld [vmem:[%s19686_s3 + $0x420] sm:$0xff] }
 0x634   : > { %v10493_v50 = vunpack.c.h.bf16 %v10780_v42 }
 0x635   : > { %v10227_v32 = vpack.c.bf16 %v6858_v10, %v6858_v10  ;;  %v10226_v31 = vpack.c.bf16 %v6857_v58, %v6857_v58  ;;  %6215 = vadd.xlane.f32.xlu1 %v6214_v34  ;;  %6212 = vadd.xlane.f32.xlu0 %v6211_v4  ;;  %v10492_v10 = vunpack.c.l.bf16 %v10780_v42  ;;  %v6238_v58 = vsel %vm5378_vm4, %v5784_v0, 0.0  ;;  %v10781_v4 = vld [vmem:[%s19689_s6 + $0x100] sm:$0xff]   ;;  %v5596_v42 = vld [vmem:[%s19686_s3 + $0x468] sm:$0xff] }
 0x636   : > { %v6012_v13 = vpop.xlane.xlu1 %6011  ;;  %v6009_v26 = vpop.xlane.xlu0 %6008  ;;  %v5785_v34 = vmul.f32 %v17823_v51, %v5587_v63 }
 0x637   : > { %7819 = vst.msk [vmem:[#allocation4 + $0xd4] sm:$0xf] %vm7765_vm5, %v10227_v32  ;;  %7818 = vst.msk [vmem:[#allocation4 + $0xd0] sm:$0xf] %vm7765_vm5, %v10226_v31  ;;  %v6860_v9 = vmul.f32 %v10477_v2, %v6012_v13  ;;  %v6859_v3 = vmul.f32 %v10476_v57, %v6009_v26  ;;  %v6235_v2 = vsel %vm5378_vm4, %v5783_v43, 0.0  ;;  %v5786_v57 = vmul.f32 %v17823_v51, %v5588_v60  ;;  %v5589_v32 = vld [vmem:[%s19686_s3 + $0x430] sm:$0xff] }
 0x638   : > { %v10497_v26 = vunpack.c.h.bf16 %v10781_v4 }
 0x639   : > { %v10229_v37 = vpack.c.bf16 %v6860_v9, %v6860_v9  ;;  %v10228_v23 = vpack.c.bf16 %v6859_v3, %v6859_v3  ;;  %6221 = vadd.xlane.f32.xlu1 %v6220_v46  ;;  %6218 = vadd.xlane.f32.xlu0 %v6217_v17  ;;  %v10496_v9 = vunpack.c.l.bf16 %v10781_v4  ;;  %v6244_v3 = vsel %vm5378_vm4, %v5786_v57, 0.0  ;;  %v10782_v17 = vld [vmem:[%s19689_s6 + $0x108] sm:$0xff]   ;;  %v5598_v4 = vld [vmem:[%s19686_s3 + $0x478] sm:$0xff] }
 0x63a   : > { %v6018_v1 = vpop.xlane.xlu1 %6017  ;;  %v6015_v48 = vpop.xlane.xlu0 %6014  ;;  %v5787_v46 = vmul.f32 %v17823_v51, %v5589_v32 }
 0x63b   : > { %7821 = vst.msk [vmem:[#allocation4 + $0xdc] sm:$0xf] %vm7765_vm5, %v10229_v37  ;;  %7820 = vst.msk [vmem:[#allocation4 + $0xd8] sm:$0xf] %vm7765_vm5, %v10228_v23  ;;  %v6862_v44 = vmul.f32 %v10481_v53, %v6018_v1  ;;  %v6861_v18 = vmul.f32 %v10480_v55, %v6015_v48  ;;  %v6241_v53 = vsel %vm5378_vm4, %v5785_v34, 0.0  ;;  %v5788_v55 = vmul.f32 %v17823_v51, %v5590_v49  ;;  %v5591_v37 = vld [vmem:[%s19686_s3 + $0x440] sm:$0xff] }
 0x63c   : > { %v10501_v48 = vunpack.c.h.bf16 %v10782_v17 }
 0x63d   : > { %v10231_v47 = vpack.c.bf16 %v6862_v44, %v6862_v44  ;;  %v10230_v28 = vpack.c.bf16 %v6861_v18, %v6861_v18  ;;  %6227 = vadd.xlane.f32.xlu1 %v6226_v24  ;;  %6224 = vadd.xlane.f32.xlu0 %v6223_v12  ;;  %v10500_v44 = vunpack.c.l.bf16 %v10782_v17  ;;  %v6250_v18 = vsel %vm5378_vm4, %v5788_v55, 0.0  ;;  %v10783_v12 = vld [vmem:[%s19689_s6 + $0x110] sm:$0xff]   ;;  %v5600_v17 = vld [vmem:[%s19686_s3 + $0x488] sm:$0xff] }
 0x63e   : > { %v6024_v6 = vpop.xlane.xlu1 %6023  ;;  %v6021_v59 = vpop.xlane.xlu0 %6020  ;;  %v5789_v24 = vmul.f32 %v17823_v51, %v5591_v37 }
 0x63f   : > { %7823 = vst.msk [vmem:[#allocation4 + $0xe4] sm:$0xf] %vm7765_vm5, %v10231_v47  ;;  %7822 = vst.msk [vmem:[#allocation4 + $0xe0] sm:$0xf] %vm7765_vm5, %v10230_v28  ;;  %v6864_v16 = vmul.f32 %v10485_v45, %v6024_v6  ;;  %v6863_v8 = vmul.f32 %v10484_v11, %v6021_v59  ;;  %v6247_v45 = vsel %vm5378_vm4, %v5787_v46, 0.0  ;;  %v5790_v11 = vmul.f32 %v17823_v51, %v5592_v5  ;;  %v5593_v47 = vld [vmem:[%s19686_s3 + $0x450] sm:$0xff] }
 0x640   : > { %v10505_v59 = vunpack.c.h.bf16 %v10783_v12 }
 0x641   : > { %v10233_v36 = vpack.c.bf16 %v6864_v16, %v6864_v16  ;;  %v10232_v29 = vpack.c.bf16 %v6863_v8, %v6863_v8  ;;  %6233 = vadd.xlane.f32.xlu1 %v6232_v15  ;;  %6230 = vadd.xlane.f32.xlu0 %v6229_v61  ;;  %v10504_v16 = vunpack.c.l.bf16 %v10783_v12  ;;  %v6256_v8 = vsel %vm5378_vm4, %v5790_v11, 0.0  ;;  %v10784_v61 = vld [vmem:[%s19689_s6 + $0x118] sm:$0xff]  }
 0x642   : > { %v6030_v52 = vpop.xlane.xlu1 %6029  ;;  %v6027_v33 = vpop.xlane.xlu0 %6026  ;;  %v5791_v15 = vmul.f32 %v17823_v51, %v5593_v47  ;;  %v5602_v12 = vld [vmem:[%s19686_s3 + $0x498] sm:$0xff] }
 0x643   : > { %7825 = vst.msk [vmem:[#allocation4 + $0xec] sm:$0xf] %vm7765_vm5, %v10233_v36  ;;  %7824 = vst.msk [vmem:[#allocation4 + $0xe8] sm:$0xf] %vm7765_vm5, %v10232_v29  ;;  %v6866_v30 = vmul.f32 %v10489_v56, %v6030_v52  ;;  %v6865_v20 = vmul.f32 %v10488_v54, %v6027_v33  ;;  %v6253_v56 = vsel %vm5378_vm4, %v5789_v24, 0.0  ;;  %v5792_v54 = vmul.f32 %v17823_v51, %v5594_v35  ;;  %v5595_v36 = vld [vmem:[%s19686_s3 + $0x460] sm:$0xff] }
 0x644   : > { %v10509_v33 = vunpack.c.h.bf16 %v10784_v61 }
 0x645   : > { %v10235_v38 = vpack.c.bf16 %v6866_v30, %v6866_v30  ;;  %v10234_v62 = vpack.c.bf16 %v6865_v20, %v6865_v20  ;;  %6239 = vadd.xlane.f32.xlu1 %v6238_v58  ;;  %6236 = vadd.xlane.f32.xlu0 %v6235_v2  ;;  %v10508_v30 = vunpack.c.l.bf16 %v10784_v61  ;;  %v6262_v20 = vsel %vm5378_vm4, %v5792_v54, 0.0  ;;  %v10785_v2 = vld [vmem:[%s19689_s6 + $0x120] sm:$0xff]   ;;  %v5604_v61 = vld [vmem:[%s19686_s3 + $0x4a8] sm:$0xff] }
 0x646   : > { %v6036_v31 = vpop.xlane.xlu1 %6035  ;;  %v6033_v41 = vpop.xlane.xlu0 %6032  ;;  %v5793_v58 = vmul.f32 %v17823_v51, %v5595_v36 }
 0x647   : > { %7827 = vst.msk [vmem:[#allocation4 + $0xf4] sm:$0xf] %vm7765_vm5, %v10235_v38  ;;  %7826 = vst.msk [vmem:[#allocation4 + $0xf0] sm:$0xf] %vm7765_vm5, %v10234_v62  ;;  %v6868_v39 = vmul.f32 %v10493_v50, %v6036_v31  ;;  %v6867_v13 = vmul.f32 %v10492_v10, %v6033_v41  ;;  %v6259_v50 = vsel %vm5378_vm4, %v5791_v15, 0.0  ;;  %v5794_v10 = vmul.f32 %v17823_v51, %v5596_v42  ;;  %v5597_v38 = vld [vmem:[%s19686_s3 + $0x470] sm:$0xff] }
 0x648   : > { %v10513_v41 = vunpack.c.h.bf16 %v10785_v2 }
 0x649   : > { %v10237_v7 = vpack.c.bf16 %v6868_v39, %v6868_v39  ;;  %v10236_v27 = vpack.c.bf16 %v6867_v13, %v6867_v13  ;;  %6245 = vadd.xlane.f32.xlu1 %v6244_v3  ;;  %6242 = vadd.xlane.f32.xlu0 %v6241_v53  ;;  %v10512_v39 = vunpack.c.l.bf16 %v10785_v2  ;;  %v6268_v13 = vsel %vm5378_vm4, %v5794_v10, 0.0  ;;  %v10786_v53 = vld [vmem:[%s19689_s6 + $0x128] sm:$0xff]   ;;  %v5606_v2 = vld [vmem:[%s19686_s3 + $0x4b8] sm:$0xff] }
 0x64a   : > { %v6042_v23 = vpop.xlane.xlu1 %6041  ;;  %v6039_v19 = vpop.xlane.xlu0 %6038  ;;  %v5795_v3 = vmul.f32 %v17823_v51, %v5597_v38 }
 0x64b   : > { %7829 = vst.msk [vmem:[#allocation4 + $0xfc] sm:$0xf] %vm7765_vm5, %v10237_v7  ;;  %7828 = vst.msk [vmem:[#allocation4 + $0xf8] sm:$0xf] %vm7765_vm5, %v10236_v27  ;;  %v6870_v22 = vmul.f32 %v10497_v26, %v6042_v23  ;;  %v6869_v1 = vmul.f32 %v10496_v9, %v6039_v19  ;;  %v6265_v26 = vsel %vm5378_vm4, %v5793_v58, 0.0  ;;  %v5796_v9 = vmul.f32 %v17823_v51, %v5598_v4  ;;  %v5599_v7 = vld [vmem:[%s19686_s3 + $0x480] sm:$0xff] }
 0x64c   : > { %v10517_v19 = vunpack.c.h.bf16 %v10786_v53 }
 0x64d   : > { %v10239_v21 = vpack.c.bf16 %v6870_v22, %v6870_v22  ;;  %v10238_v40 = vpack.c.bf16 %v6869_v1, %v6869_v1  ;;  %6251 = vadd.xlane.f32.xlu1 %v6250_v18  ;;  %6248 = vadd.xlane.f32.xlu0 %v6247_v45  ;;  %v10516_v22 = vunpack.c.l.bf16 %v10786_v53  ;;  %v6274_v1 = vsel %vm5378_vm4, %v5796_v9, 0.0  ;;  %v10787_v45 = vld [vmem:[%s19689_s6 + $0x130] sm:$0xff]   ;;  %v5608_v53 = vld [vmem:[%s19686_s3 + $0x4c8] sm:$0xff] }
 0x64e   : > { %v6048_v28 = vpop.xlane.xlu1 %6047  ;;  %v6045_v14 = vpop.xlane.xlu0 %6044  ;;  %v5797_v18 = vmul.f32 %v17823_v51, %v5599_v7 }
 0x64f   : > { %7831 = vst.msk [vmem:[#allocation4 + $0x104] sm:$0xf] %vm7765_vm5, %v10239_v21  ;;  %7830 = vst.msk [vmem:[#allocation4 + $0x100] sm:$0xf] %vm7765_vm5, %v10238_v40  ;;  %v6872_v25 = vmul.f32 %v10501_v48, %v6048_v28  ;;  %v6871_v6 = vmul.f32 %v10500_v44, %v6045_v14  ;;  %v6271_v48 = vsel %vm5378_vm4, %v5795_v3, 0.0  ;;  %v5798_v44 = vmul.f32 %v17823_v51, %v5600_v17  ;;  %v5601_v21 = vld [vmem:[%s19686_s3 + $0x490] sm:$0xff] }
 0x650   : > { %v10521_v14 = vunpack.c.h.bf16 %v10787_v45 }
 0x651   : > { %v10241_v0 = vpack.c.bf16 %v6872_v25, %v6872_v25  ;;  %v10240_v43 = vpack.c.bf16 %v6871_v6, %v6871_v6  ;;  %6257 = vadd.xlane.f32.xlu1 %v6256_v8  ;;  %6254 = vadd.xlane.f32.xlu0 %v6253_v56  ;;  %v10520_v25 = vunpack.c.l.bf16 %v10787_v45  ;;  %v6280_v6 = vsel %vm5378_vm4, %v5798_v44, 0.0  ;;  %v10788_v56 = vld [vmem:[%s19689_s6 + $0x138] sm:$0xff]  }
 0x652   : > { %v6054_v29 = vpop.xlane.xlu1 %6053  ;;  %v6051_v60 = vpop.xlane.xlu0 %6050  ;;  %v5799_v8 = vmul.f32 %v17823_v51, %v5601_v21  ;;  %v5610_v45 = vld [vmem:[%s19686_s3 + $0x4d8] sm:$0xff] }
 0x653   : > { %7833 = vst.msk [vmem:[#allocation4 + $0x10c] sm:$0xf] %vm7765_vm5, %v10241_v0  ;;  %7832 = vst.msk [vmem:[#allocation4 + $0x108] sm:$0xf] %vm7765_vm5, %v10240_v43  ;;  %v6874_v63 = vmul.f32 %v10505_v59, %v6054_v29  ;;  %v6873_v52 = vmul.f32 %v10504_v16, %v6051_v60  ;;  %v6277_v59 = vsel %vm5378_vm4, %v5797_v18, 0.0  ;;  %v5800_v16 = vmul.f32 %v17823_v51, %v5602_v12  ;;  %v5603_v0 = vld [vmem:[%s19686_s3 + $0x4a0] sm:$0xff] }
 0x654   : > { %v10525_v60 = vunpack.c.h.bf16 %v10788_v56 }
 0x655   : > { %v10243_v57 = vpack.c.bf16 %v6874_v63, %v6874_v63  ;;  %v10242_v34 = vpack.c.bf16 %v6873_v52, %v6873_v52  ;;  %6263 = vadd.xlane.f32.xlu1 %v6262_v20  ;;  %6260 = vadd.xlane.f32.xlu0 %v6259_v50  ;;  %v10524_v63 = vunpack.c.l.bf16 %v10788_v56  ;;  %v6286_v52 = vsel %vm5378_vm4, %v5800_v16, 0.0  ;;  %v10789_v50 = vld [vmem:[%s19689_s6 + $0x140] sm:$0xff]   ;;  %v5612_v56 = vld [vmem:[%s19686_s3 + $0x4e8] sm:$0xff] }
 0x656   : > { %v6060_v62 = vpop.xlane.xlu1 %6059  ;;  %v6057_v49 = vpop.xlane.xlu0 %6056  ;;  %v5801_v20 = vmul.f32 %v17823_v51, %v5603_v0 }
 0x657   : > { %7835 = vst.msk [vmem:[#allocation4 + $0x114] sm:$0xf] %vm7765_vm5, %v10243_v57  ;;  %7834 = vst.msk [vmem:[#allocation4 + $0x110] sm:$0xf] %vm7765_vm5, %v10242_v34  ;;  %v6876_v32 = vmul.f32 %v10509_v33, %v6060_v62  ;;  %v6875_v31 = vmul.f32 %v10508_v30, %v6057_v49  ;;  %v6283_v33 = vsel %vm5378_vm4, %v5799_v8, 0.0  ;;  %v5802_v30 = vmul.f32 %v17823_v51, %v5604_v61  ;;  %v5605_v57 = vld [vmem:[%s19686_s3 + $0x4b0] sm:$0xff] }
 0x658   : > { %v10529_v49 = vunpack.c.h.bf16 %v10789_v50 }
 0x659   : > { %v10245_v55 = vpack.c.bf16 %v6876_v32, %v6876_v32  ;;  %v10244_v46 = vpack.c.bf16 %v6875_v31, %v6875_v31  ;;  %6269 = vadd.xlane.f32.xlu1 %v6268_v13  ;;  %6266 = vadd.xlane.f32.xlu0 %v6265_v26  ;;  %v10528_v32 = vunpack.c.l.bf16 %v10789_v50  ;;  %v6292_v31 = vsel %vm5378_vm4, %v5802_v30, 0.0  ;;  %v10790_v26 = vld [vmem:[%s19689_s6 + $0x148] sm:$0xff]   ;;  %v5614_v50 = vld [vmem:[%s19686_s3 + $0x4f8] sm:$0xff] }
 0x65a   : > { %v6066_v27 = vpop.xlane.xlu1 %6065  ;;  %v6063_v5 = vpop.xlane.xlu0 %6062  ;;  %v5803_v13 = vmul.f32 %v17823_v51, %v5605_v57 }
 0x65b   : > { %7837 = vst.msk [vmem:[#allocation4 + $0x11c] sm:$0xf] %vm7765_vm5, %v10245_v55  ;;  %7836 = vst.msk [vmem:[#allocation4 + $0x118] sm:$0xf] %vm7765_vm5, %v10244_v46  ;;  %v6878_v37 = vmul.f32 %v10513_v41, %v6066_v27  ;;  %v6877_v23 = vmul.f32 %v10512_v39, %v6063_v5  ;;  %v6289_v41 = vsel %vm5378_vm4, %v5801_v20, 0.0  ;;  %v5804_v39 = vmul.f32 %v17823_v51, %v5606_v2  ;;  %v5607_v55 = vld [vmem:[%s19686_s3 + $0x4c0] sm:$0xff] }
 0x65c   : > { %v10533_v5 = vunpack.c.h.bf16 %v10790_v26 }
 0x65d   : > { %v10247_v11 = vpack.c.bf16 %v6878_v37, %v6878_v37  ;;  %v10246_v24 = vpack.c.bf16 %v6877_v23, %v6877_v23  ;;  %6275 = vadd.xlane.f32.xlu1 %v6274_v1  ;;  %6272 = vadd.xlane.f32.xlu0 %v6271_v48  ;;  %v10532_v37 = vunpack.c.l.bf16 %v10790_v26  ;;  %v6298_v23 = vsel %vm5378_vm4, %v5804_v39, 0.0  ;;  %v10791_v48 = vld [vmem:[%s19689_s6 + $0x150] sm:$0xff]   ;;  %v5616_v26 = vld [vmem:[%s19686_s3 + $0x508] sm:$0xff] }
 0x65e   : > { %v6072_v40 = vpop.xlane.xlu1 %6071  ;;  %v6069_v35 = vpop.xlane.xlu0 %6068  ;;  %v5805_v1 = vmul.f32 %v17823_v51, %v5607_v55 }
 0x65f   : > { %7839 = vst.msk [vmem:[#allocation4 + $0x124] sm:$0xf] %vm7765_vm5, %v10247_v11  ;;  %7838 = vst.msk [vmem:[#allocation4 + $0x120] sm:$0xf] %vm7765_vm5, %v10246_v24  ;;  %v6880_v47 = vmul.f32 %v10517_v19, %v6072_v40  ;;  %v6879_v28 = vmul.f32 %v10516_v22, %v6069_v35  ;;  %v6295_v19 = vsel %vm5378_vm4, %v5803_v13, 0.0  ;;  %v5806_v22 = vmul.f32 %v17823_v51, %v5608_v53  ;;  %v5609_v11 = vld [vmem:[%s19686_s3 + $0x4d0] sm:$0xff] }
 0x660   : > { %v10537_v35 = vunpack.c.h.bf16 %v10791_v48 }
 0x661   : > { %v10249_v54 = vpack.c.bf16 %v6880_v47, %v6880_v47  ;;  %v10248_v15 = vpack.c.bf16 %v6879_v28, %v6879_v28  ;;  %6281 = vadd.xlane.f32.xlu1 %v6280_v6  ;;  %6278 = vadd.xlane.f32.xlu0 %v6277_v59  ;;  %v10536_v47 = vunpack.c.l.bf16 %v10791_v48  ;;  %v6304_v28 = vsel %vm5378_vm4, %v5806_v22, 0.0  ;;  %v10792_v59 = vld [vmem:[%s19689_s6 + $0x158] sm:$0xff]  }
 0x662   : > { %v6078_v43 = vpop.xlane.xlu1 %6077  ;;  %v6075_v42 = vpop.xlane.xlu0 %6074  ;;  %v5807_v6 = vmul.f32 %v17823_v51, %v5609_v11  ;;  %v5618_v48 = vld [vmem:[%s19686_s3 + $0x518] sm:$0xff] }
 0x663   : > { %7841 = vst.msk [vmem:[#allocation4 + $0x12c] sm:$0xf] %vm7765_vm5, %v10249_v54  ;;  %7840 = vst.msk [vmem:[#allocation4 + $0x128] sm:$0xf] %vm7765_vm5, %v10248_v15  ;;  %v6882_v36 = vmul.f32 %v10521_v14, %v6078_v43  ;;  %v6881_v29 = vmul.f32 %v10520_v25, %v6075_v42  ;;  %v6301_v14 = vsel %vm5378_vm4, %v5805_v1, 0.0  ;;  %v5808_v25 = vmul.f32 %v17823_v51, %v5610_v45  ;;  %v5611_v54 = vld [vmem:[%s19686_s3 + $0x4e0] sm:$0xff] }
 0x664   : > { %v10541_v42 = vunpack.c.h.bf16 %v10792_v59 }
 0x665   : > { %v10251_v10 = vpack.c.bf16 %v6882_v36, %v6882_v36  ;;  %v10250_v58 = vpack.c.bf16 %v6881_v29, %v6881_v29  ;;  %6287 = vadd.xlane.f32.xlu1 %v6286_v52  ;;  %6284 = vadd.xlane.f32.xlu0 %v6283_v33  ;;  %v10540_v36 = vunpack.c.l.bf16 %v10792_v59  ;;  %v6310_v29 = vsel %vm5378_vm4, %v5808_v25, 0.0  ;;  %v10793_v33 = vld [vmem:[%s19689_s6 + $0x160] sm:$0xff]   ;;  %v5620_v59 = vld [vmem:[%s19686_s3 + $0x528] sm:$0xff] }
 0x666   : > { %v6084_v34 = vpop.xlane.xlu1 %6083  ;;  %v6081_v4 = vpop.xlane.xlu0 %6080  ;;  %v5809_v52 = vmul.f32 %v17823_v51, %v5611_v54 }
 0x667   : > { %7843 = vst.msk [vmem:[#allocation4 + $0x134] sm:$0xf] %vm7765_vm5, %v10251_v10  ;;  %7842 = vst.msk [vmem:[#allocation4 + $0x130] sm:$0xf] %vm7765_vm5, %v10250_v58  ;;  %v6884_v38 = vmul.f32 %v10525_v60, %v6084_v34  ;;  %v6883_v62 = vmul.f32 %v10524_v63, %v6081_v4  ;;  %v6307_v60 = vsel %vm5378_vm4, %v5807_v6, 0.0  ;;  %v5810_v63 = vmul.f32 %v17823_v51, %v5612_v56  ;;  %v5613_v10 = vld [vmem:[%s19686_s3 + $0x4f0] sm:$0xff] }
 0x668   : > { %v10545_v4 = vunpack.c.h.bf16 %v10793_v33 }
 0x669   : > { %v10253_v9 = vpack.c.bf16 %v6884_v38, %v6884_v38  ;;  %v10252_v3 = vpack.c.bf16 %v6883_v62, %v6883_v62  ;;  %6293 = vadd.xlane.f32.xlu1 %v6292_v31  ;;  %6290 = vadd.xlane.f32.xlu0 %v6289_v41  ;;  %v10544_v38 = vunpack.c.l.bf16 %v10793_v33  ;;  %v6316_v62 = vsel %vm5378_vm4, %v5810_v63, 0.0  ;;  %v10794_v41 = vld [vmem:[%s19689_s6 + $0x168] sm:$0xff]   ;;  %v5622_v33 = vld [vmem:[%s19686_s3 + $0x538] sm:$0xff] }
 0x66a   : > { %v6090_v46 = vpop.xlane.xlu1 %6089  ;;  %v6087_v17 = vpop.xlane.xlu0 %6086  ;;  %v5811_v31 = vmul.f32 %v17823_v51, %v5613_v10 }
 0x66b   : > { %7845 = vst.msk [vmem:[#allocation4 + $0x13c] sm:$0xf] %vm7765_vm5, %v10253_v9  ;;  %7844 = vst.msk [vmem:[#allocation4 + $0x138] sm:$0xf] %vm7765_vm5, %v10252_v3  ;;  %v6886_v7 = vmul.f32 %v10529_v49, %v6090_v46  ;;  %v6885_v27 = vmul.f32 %v10528_v32, %v6087_v17  ;;  %v6313_v49 = vsel %vm5378_vm4, %v5809_v52, 0.0  ;;  %v5812_v32 = vmul.f32 %v17823_v51, %v5614_v50  ;;  %v5615_v9 = vld [vmem:[%s19686_s3 + $0x500] sm:$0xff] }
 0x66c   : > { %v10549_v17 = vunpack.c.h.bf16 %v10794_v41 }
 0x66d   : > { %v10255_v44 = vpack.c.bf16 %v6886_v7, %v6886_v7  ;;  %v10254_v18 = vpack.c.bf16 %v6885_v27, %v6885_v27  ;;  %6299 = vadd.xlane.f32.xlu1 %v6298_v23  ;;  %6296 = vadd.xlane.f32.xlu0 %v6295_v19  ;;  %v10548_v7 = vunpack.c.l.bf16 %v10794_v41  ;;  %v6322_v27 = vsel %vm5378_vm4, %v5812_v32, 0.0  ;;  %v10795_v19 = vld [vmem:[%s19689_s6 + $0x170] sm:$0xff]   ;;  %v5624_v41 = vld [vmem:[%s19686_s3 + $0x548] sm:$0xff] }
 0x66e   : > { %v6096_v24 = vpop.xlane.xlu1 %6095  ;;  %v6093_v12 = vpop.xlane.xlu0 %6092  ;;  %v5813_v23 = vmul.f32 %v17823_v51, %v5615_v9 }
 0x66f   : > { %7847 = vst.msk [vmem:[#allocation4 + $0x144] sm:$0xf] %vm7765_vm5, %v10255_v44  ;;  %7846 = vst.msk [vmem:[#allocation4 + $0x140] sm:$0xf] %vm7765_vm5, %v10254_v18  ;;  %v6888_v21 = vmul.f32 %v10533_v5, %v6096_v24  ;;  %v6887_v40 = vmul.f32 %v10532_v37, %v6093_v12  ;;  %v6319_v5 = vsel %vm5378_vm4, %v5811_v31, 0.0  ;;  %v5814_v37 = vmul.f32 %v17823_v51, %v5616_v26  ;;  %v5617_v44 = vld [vmem:[%s19686_s3 + $0x510] sm:$0xff] }
 0x670   : > { %v10553_v12 = vunpack.c.h.bf16 %v10795_v19 }
 0x671   : > { %v10257_v16 = vpack.c.bf16 %v6888_v21, %v6888_v21  ;;  %v10256_v8 = vpack.c.bf16 %v6887_v40, %v6887_v40  ;;  %6305 = vadd.xlane.f32.xlu1 %v6304_v28  ;;  %6302 = vadd.xlane.f32.xlu0 %v6301_v14  ;;  %v10552_v21 = vunpack.c.l.bf16 %v10795_v19  ;;  %v6328_v40 = vsel %vm5378_vm4, %v5814_v37, 0.0  ;;  %v10796_v14 = vld [vmem:[%s19689_s6 + $0x178] sm:$0xff]  }
 0x672   : > { %v6102_v15 = vpop.xlane.xlu1 %6101  ;;  %v6099_v61 = vpop.xlane.xlu0 %6098  ;;  %v5815_v28 = vmul.f32 %v17823_v51, %v5617_v44  ;;  %v5626_v19 = vld [vmem:[%s19686_s3 + $0x558] sm:$0xff] }
 0x673   : > { %7849 = vst.msk [vmem:[#allocation4 + $0x14c] sm:$0xf] %vm7765_vm5, %v10257_v16  ;;  %7848 = vst.msk [vmem:[#allocation4 + $0x148] sm:$0xf] %vm7765_vm5, %v10256_v8  ;;  %v6890_v0 = vmul.f32 %v10537_v35, %v6102_v15  ;;  %v6889_v43 = vmul.f32 %v10536_v47, %v6099_v61  ;;  %v6325_v35 = vsel %vm5378_vm4, %v5813_v23, 0.0  ;;  %v5816_v47 = vmul.f32 %v17823_v51, %v5618_v48  ;;  %v5619_v16 = vld [vmem:[%s19686_s3 + $0x520] sm:$0xff] }
 0x674   : > { %v10557_v61 = vunpack.c.h.bf16 %v10796_v14 }
 0x675   : > { %v10259_v30 = vpack.c.bf16 %v6890_v0, %v6890_v0  ;;  %v10258_v20 = vpack.c.bf16 %v6889_v43, %v6889_v43  ;;  %6311 = vadd.xlane.f32.xlu1 %v6310_v29  ;;  %6308 = vadd.xlane.f32.xlu0 %v6307_v60  ;;  %v10556_v0 = vunpack.c.l.bf16 %v10796_v14  ;;  %v6334_v43 = vsel %vm5378_vm4, %v5816_v47, 0.0  ;;  %v10797_v60 = vld [vmem:[%s19689_s6 + $0x180] sm:$0xff]   ;;  %v5628_v14 = vld [vmem:[%s19686_s3 + $0x568] sm:$0xff] }
 0x676   : > { %v6108_v58 = vpop.xlane.xlu1 %6107  ;;  %v6105_v2 = vpop.xlane.xlu0 %6104  ;;  %v5817_v29 = vmul.f32 %v17823_v51, %v5619_v16 }
 0x677   : > { %7851 = vst.msk [vmem:[#allocation4 + $0x154] sm:$0xf] %vm7765_vm5, %v10259_v30  ;;  %7850 = vst.msk [vmem:[#allocation4 + $0x150] sm:$0xf] %vm7765_vm5, %v10258_v20  ;;  %v6892_v57 = vmul.f32 %v10541_v42, %v6108_v58  ;;  %v6891_v34 = vmul.f32 %v10540_v36, %v6105_v2  ;;  %v6331_v42 = vsel %vm5378_vm4, %v5815_v28, 0.0  ;;  %v5818_v36 = vmul.f32 %v17823_v51, %v5620_v59  ;;  %v5621_v30 = vld [vmem:[%s19686_s3 + $0x530] sm:$0xff] }
 0x678   : > { %v10561_v2 = vunpack.c.h.bf16 %v10797_v60 }
 0x679   : > { %v10261_v39 = vpack.c.bf16 %v6892_v57, %v6892_v57  ;;  %v10260_v13 = vpack.c.bf16 %v6891_v34, %v6891_v34  ;;  %6317 = vadd.xlane.f32.xlu1 %v6316_v62  ;;  %6314 = vadd.xlane.f32.xlu0 %v6313_v49  ;;  %v10560_v57 = vunpack.c.l.bf16 %v10797_v60  ;;  %v6340_v34 = vsel %vm5378_vm4, %v5818_v36, 0.0  ;;  %v10798_v49 = vld [vmem:[%s19689_s6 + $0x188] sm:$0xff]   ;;  %v5630_v60 = vld [vmem:[%s19686_s3 + $0x578] sm:$0xff] }
 0x67a   : > { %v6114_v3 = vpop.xlane.xlu1 %6113  ;;  %v6111_v53 = vpop.xlane.xlu0 %6110  ;;  %v5819_v62 = vmul.f32 %v17823_v51, %v5621_v30 }
 0x67b   : > { %7853 = vst.msk [vmem:[#allocation4 + $0x15c] sm:$0xf] %vm7765_vm5, %v10261_v39  ;;  %7852 = vst.msk [vmem:[#allocation4 + $0x158] sm:$0xf] %vm7765_vm5, %v10260_v13  ;;  %v6894_v55 = vmul.f32 %v10545_v4, %v6114_v3  ;;  %v6893_v46 = vmul.f32 %v10544_v38, %v6111_v53  ;;  %v6337_v4 = vsel %vm5378_vm4, %v5817_v29, 0.0  ;;  %v5820_v38 = vmul.f32 %v17823_v51, %v5622_v33  ;;  %v5623_v39 = vld [vmem:[%s19686_s3 + $0x540] sm:$0xff] }
 0x67c   : > { %v10565_v53 = vunpack.c.h.bf16 %v10798_v49 }
 0x67d   : > { %v10263_v22 = vpack.c.bf16 %v6894_v55, %v6894_v55  ;;  %v10262_v1 = vpack.c.bf16 %v6893_v46, %v6893_v46  ;;  %6323 = vadd.xlane.f32.xlu1 %v6322_v27  ;;  %6320 = vadd.xlane.f32.xlu0 %v6319_v5  ;;  %v10564_v55 = vunpack.c.l.bf16 %v10798_v49  ;;  %v6346_v46 = vsel %vm5378_vm4, %v5820_v38, 0.0  ;;  %v10799_v5 = vld [vmem:[%s19689_s6 + $0x190] sm:$0xff]   ;;  %v5632_v49 = vld [vmem:[%s19686_s3 + $0x588] sm:$0xff] }
 0x67e   : > { %v6120_v18 = vpop.xlane.xlu1 %6119  ;;  %v6117_v45 = vpop.xlane.xlu0 %6116  ;;  %v5821_v27 = vmul.f32 %v17823_v51, %v5623_v39 }
 0x67f   : > { %7855 = vst.msk [vmem:[#allocation4 + $0x164] sm:$0xf] %vm7765_vm5, %v10263_v22  ;;  %7854 = vst.msk [vmem:[#allocation4 + $0x160] sm:$0xf] %vm7765_vm5, %v10262_v1  ;;  %v6896_v11 = vmul.f32 %v10549_v17, %v6120_v18  ;;  %v6895_v24 = vmul.f32 %v10548_v7, %v6117_v45  ;;  %v6343_v17 = vsel %vm5378_vm4, %v5819_v62, 0.0  ;;  %v5822_v7 = vmul.f32 %v17823_v51, %v5624_v41  ;;  %v5625_v22 = vld [vmem:[%s19686_s3 + $0x550] sm:$0xff] }
 0x680   : > { %v10569_v45 = vunpack.c.h.bf16 %v10799_v5 }
 0x681   : > { %v10265_v25 = vpack.c.bf16 %v6896_v11, %v6896_v11  ;;  %v10264_v6 = vpack.c.bf16 %v6895_v24, %v6895_v24  ;;  %6329 = vadd.xlane.f32.xlu1 %v6328_v40  ;;  %6326 = vadd.xlane.f32.xlu0 %v6325_v35  ;;  %v10568_v11 = vunpack.c.l.bf16 %v10799_v5  ;;  %v6352_v24 = vsel %vm5378_vm4, %v5822_v7, 0.0  ;;  %v10800_v35 = vld [vmem:[%s19689_s6 + $0x198] sm:$0xff]  }
 0x682   : > { %v6126_v8 = vpop.xlane.xlu1 %6125  ;;  %v6123_v56 = vpop.xlane.xlu0 %6122  ;;  %v5823_v40 = vmul.f32 %v17823_v51, %v5625_v22  ;;  %v5634_v5 = vld [vmem:[%s19686_s3 + $0x598] sm:$0xff] }
 0x683   : > { %7857 = vst.msk [vmem:[#allocation4 + $0x16c] sm:$0xf] %vm7765_vm5, %v10265_v25  ;;  %7856 = vst.msk [vmem:[#allocation4 + $0x168] sm:$0xf] %vm7765_vm5, %v10264_v6  ;;  %v6898_v54 = vmul.f32 %v10553_v12, %v6126_v8  ;;  %v6897_v15 = vmul.f32 %v10552_v21, %v6123_v56  ;;  %v6349_v12 = vsel %vm5378_vm4, %v5821_v27, 0.0  ;;  %v5824_v21 = vmul.f32 %v17823_v51, %v5626_v19  ;;  %v5627_v25 = vld [vmem:[%s19686_s3 + $0x560] sm:$0xff] }
 0x684   : > { %v10573_v56 = vunpack.c.h.bf16 %v10800_v35 }
 0x685   : > { %v10267_v63 = vpack.c.bf16 %v6898_v54, %v6898_v54  ;;  %v10266_v52 = vpack.c.bf16 %v6897_v15, %v6897_v15  ;;  %6335 = vadd.xlane.f32.xlu1 %v6334_v43  ;;  %6332 = vadd.xlane.f32.xlu0 %v6331_v42  ;;  %v10572_v54 = vunpack.c.l.bf16 %v10800_v35  ;;  %v6358_v15 = vsel %vm5378_vm4, %v5824_v21, 0.0  ;;  %v10801_v42 = vld [vmem:[%s19689_s6 + $0x1a0] sm:$0xff]   ;;  %v5636_v35 = vld [vmem:[%s19686_s3 + $0x5a8] sm:$0xff] }
 0x686   : > { %v6132_v20 = vpop.xlane.xlu1 %6131  ;;  %v6129_v50 = vpop.xlane.xlu0 %6128  ;;  %v5825_v43 = vmul.f32 %v17823_v51, %v5627_v25 }
 0x687   : > { %7859 = vst.msk [vmem:[#allocation4 + $0x174] sm:$0xf] %vm7765_vm5, %v10267_v63  ;;  %7858 = vst.msk [vmem:[#allocation4 + $0x170] sm:$0xf] %vm7765_vm5, %v10266_v52  ;;  %v6900_v10 = vmul.f32 %v10557_v61, %v6132_v20  ;;  %v6899_v58 = vmul.f32 %v10556_v0, %v6129_v50  ;;  %v6355_v61 = vsel %vm5378_vm4, %v5823_v40, 0.0  ;;  %v5826_v0 = vmul.f32 %v17823_v51, %v5628_v14  ;;  %v5629_v63 = vld [vmem:[%s19686_s3 + $0x570] sm:$0xff] }
 0x688   : > { %v10577_v50 = vunpack.c.h.bf16 %v10801_v42 }
 0x689   : > { %v10269_v32 = vpack.c.bf16 %v6900_v10, %v6900_v10  ;;  %v10268_v31 = vpack.c.bf16 %v6899_v58, %v6899_v58  ;;  %6341 = vadd.xlane.f32.xlu1 %v6340_v34  ;;  %6338 = vadd.xlane.f32.xlu0 %v6337_v4  ;;  %v10576_v10 = vunpack.c.l.bf16 %v10801_v42  ;;  %v6364_v58 = vsel %vm5378_vm4, %v5826_v0, 0.0  ;;  %v10802_v4 = vld [vmem:[%s19689_s6 + $0x1a8] sm:$0xff]   ;;  %v5638_v42 = vld [vmem:[%s19686_s3 + $0x5b8] sm:$0xff] }
 0x68a   : > { %v6138_v13 = vpop.xlane.xlu1 %6137  ;;  %v6135_v26 = vpop.xlane.xlu0 %6134  ;;  %v5827_v34 = vmul.f32 %v17823_v51, %v5629_v63 }
 0x68b   : > { %7861 = vst.msk [vmem:[#allocation4 + $0x17c] sm:$0xf] %vm7765_vm5, %v10269_v32  ;;  %7860 = vst.msk [vmem:[#allocation4 + $0x178] sm:$0xf] %vm7765_vm5, %v10268_v31  ;;  %v6902_v9 = vmul.f32 %v10561_v2, %v6138_v13  ;;  %v6901_v3 = vmul.f32 %v10560_v57, %v6135_v26  ;;  %v6361_v2 = vsel %vm5378_vm4, %v5825_v43, 0.0  ;;  %v5828_v57 = vmul.f32 %v17823_v51, %v5630_v60  ;;  %v5631_v32 = vld [vmem:[%s19686_s3 + $0x580] sm:$0xff] }
 0x68c   : > { %v10581_v26 = vunpack.c.h.bf16 %v10802_v4 }
 0x68d   : > { %v10271_v37 = vpack.c.bf16 %v6902_v9, %v6902_v9  ;;  %v10270_v23 = vpack.c.bf16 %v6901_v3, %v6901_v3  ;;  %6347 = vadd.xlane.f32.xlu1 %v6346_v46  ;;  %6344 = vadd.xlane.f32.xlu0 %v6343_v17  ;;  %v10580_v9 = vunpack.c.l.bf16 %v10802_v4  ;;  %v6370_v3 = vsel %vm5378_vm4, %v5828_v57, 0.0  ;;  %v10803_v17 = vld [vmem:[%s19689_s6 + $0x1b0] sm:$0xff]   ;;  %v5640_v4 = vld [vmem:[%s19686_s3 + $0x5c8] sm:$0xff] }
 0x68e   : > { %v6144_v1 = vpop.xlane.xlu1 %6143  ;;  %v6141_v48 = vpop.xlane.xlu0 %6140  ;;  %v5829_v46 = vmul.f32 %v17823_v51, %v5631_v32 }
 0x68f   : > { %7863 = vst.msk [vmem:[#allocation4 + $0x184] sm:$0xf] %vm7765_vm5, %v10271_v37  ;;  %7862 = vst.msk [vmem:[#allocation4 + $0x180] sm:$0xf] %vm7765_vm5, %v10270_v23  ;;  %v6904_v44 = vmul.f32 %v10565_v53, %v6144_v1  ;;  %v6903_v18 = vmul.f32 %v10564_v55, %v6141_v48  ;;  %v6367_v53 = vsel %vm5378_vm4, %v5827_v34, 0.0  ;;  %v5830_v55 = vmul.f32 %v17823_v51, %v5632_v49  ;;  %v5633_v37 = vld [vmem:[%s19686_s3 + $0x590] sm:$0xff] }
 0x690   : > { %v10585_v48 = vunpack.c.h.bf16 %v10803_v17 }
 0x691   : > { %v10273_v47 = vpack.c.bf16 %v6904_v44, %v6904_v44  ;;  %v10272_v28 = vpack.c.bf16 %v6903_v18, %v6903_v18  ;;  %6353 = vadd.xlane.f32.xlu1 %v6352_v24  ;;  %6350 = vadd.xlane.f32.xlu0 %v6349_v12  ;;  %v10584_v44 = vunpack.c.l.bf16 %v10803_v17  ;;  %v6376_v18 = vsel %vm5378_vm4, %v5830_v55, 0.0  ;;  %v10804_v12 = vld [vmem:[%s19689_s6 + $0x1b8] sm:$0xff]  }
 0x692   : > { %v6150_v6 = vpop.xlane.xlu1 %6149  ;;  %v6147_v59 = vpop.xlane.xlu0 %6146  ;;  %v5831_v24 = vmul.f32 %v17823_v51, %v5633_v37  ;;  %v5642_v17 = vld [vmem:[%s19686_s3 + $0x5d8] sm:$0xff] }
 0x693   : > { %7865 = vst.msk [vmem:[#allocation4 + $0x18c] sm:$0xf] %vm7765_vm5, %v10273_v47  ;;  %7864 = vst.msk [vmem:[#allocation4 + $0x188] sm:$0xf] %vm7765_vm5, %v10272_v28  ;;  %v6906_v16 = vmul.f32 %v10569_v45, %v6150_v6  ;;  %v6905_v8 = vmul.f32 %v10568_v11, %v6147_v59  ;;  %v6373_v45 = vsel %vm5378_vm4, %v5829_v46, 0.0  ;;  %v5832_v11 = vmul.f32 %v17823_v51, %v5634_v5  ;;  %v5635_v47 = vld [vmem:[%s19686_s3 + $0x5a0] sm:$0xff] }
 0x694   : > { %v10589_v59 = vunpack.c.h.bf16 %v10804_v12 }
 0x695   : > { %v10275_v36 = vpack.c.bf16 %v6906_v16, %v6906_v16  ;;  %v10274_v29 = vpack.c.bf16 %v6905_v8, %v6905_v8  ;;  %6359 = vadd.xlane.f32.xlu1 %v6358_v15  ;;  %6356 = vadd.xlane.f32.xlu0 %v6355_v61  ;;  %v10588_v16 = vunpack.c.l.bf16 %v10804_v12  ;;  %v6382_v8 = vsel %vm5378_vm4, %v5832_v11, 0.0  ;;  %v10805_v61 = vld [vmem:[%s19689_s6 + $0x1c0] sm:$0xff]   ;;  %v5644_v12 = vld [vmem:[%s19686_s3 + $0x5e8] sm:$0xff] }
 0x696   : > { %v6156_v52 = vpop.xlane.xlu1 %6155  ;;  %v6153_v33 = vpop.xlane.xlu0 %6152  ;;  %v5833_v15 = vmul.f32 %v17823_v51, %v5635_v47 }
 0x697   : > { %7867 = vst.msk [vmem:[#allocation4 + $0x194] sm:$0xf] %vm7765_vm5, %v10275_v36  ;;  %7866 = vst.msk [vmem:[#allocation4 + $0x190] sm:$0xf] %vm7765_vm5, %v10274_v29  ;;  %v6908_v30 = vmul.f32 %v10573_v56, %v6156_v52  ;;  %v6907_v20 = vmul.f32 %v10572_v54, %v6153_v33  ;;  %v6379_v56 = vsel %vm5378_vm4, %v5831_v24, 0.0  ;;  %v5834_v54 = vmul.f32 %v17823_v51, %v5636_v35  ;;  %v5637_v36 = vld [vmem:[%s19686_s3 + $0x5b0] sm:$0xff] }
 0x698   : > { %v10593_v33 = vunpack.c.h.bf16 %v10805_v61 }
 0x699   : > { %v10277_v38 = vpack.c.bf16 %v6908_v30, %v6908_v30  ;;  %v10276_v62 = vpack.c.bf16 %v6907_v20, %v6907_v20  ;;  %6365 = vadd.xlane.f32.xlu1 %v6364_v58  ;;  %6362 = vadd.xlane.f32.xlu0 %v6361_v2  ;;  %v10592_v30 = vunpack.c.l.bf16 %v10805_v61  ;;  %v6388_v20 = vsel %vm5378_vm4, %v5834_v54, 0.0  ;;  %v10806_v2 = vld [vmem:[%s19689_s6 + $0x1c8] sm:$0xff]   ;;  %v5646_v61 = vld [vmem:[%s19686_s3 + $0x5f8] sm:$0xff] }
 0x69a   : > { %v6162_v31 = vpop.xlane.xlu1 %6161  ;;  %v6159_v41 = vpop.xlane.xlu0 %6158  ;;  %v5835_v58 = vmul.f32 %v17823_v51, %v5637_v36 }
 0x69b   : > { %7869 = vst.msk [vmem:[#allocation4 + $0x19c] sm:$0xf] %vm7765_vm5, %v10277_v38  ;;  %7868 = vst.msk [vmem:[#allocation4 + $0x198] sm:$0xf] %vm7765_vm5, %v10276_v62  ;;  %v6910_v39 = vmul.f32 %v10577_v50, %v6162_v31  ;;  %v6909_v13 = vmul.f32 %v10576_v10, %v6159_v41  ;;  %v6385_v50 = vsel %vm5378_vm4, %v5833_v15, 0.0  ;;  %v5836_v10 = vmul.f32 %v17823_v51, %v5638_v42  ;;  %v5639_v38 = vld [vmem:[%s19686_s3 + $0x5c0] sm:$0xff] }
 0x69c   : > { %v10597_v41 = vunpack.c.h.bf16 %v10806_v2 }
 0x69d   : > { %v10279_v7 = vpack.c.bf16 %v6910_v39, %v6910_v39  ;;  %v10278_v27 = vpack.c.bf16 %v6909_v13, %v6909_v13  ;;  %6371 = vadd.xlane.f32.xlu1 %v6370_v3  ;;  %6368 = vadd.xlane.f32.xlu0 %v6367_v53  ;;  %v10596_v39 = vunpack.c.l.bf16 %v10806_v2  ;;  %v6394_v13 = vsel %vm5378_vm4, %v5836_v10, 0.0  ;;  %v10807_v53 = vld [vmem:[%s19689_s6 + $0x1d0] sm:$0xff]  }
 0x69e   : > { %v6168_v23 = vpop.xlane.xlu1 %6167  ;;  %v6165_v19 = vpop.xlane.xlu0 %6164  ;;  %v5837_v3 = vmul.f32 %v17823_v51, %v5639_v38 }
 0x69f   : > { %7871 = vst.msk [vmem:[#allocation4 + $0x1a4] sm:$0xf] %vm7765_vm5, %v10279_v7  ;;  %7870 = vst.msk [vmem:[#allocation4 + $0x1a0] sm:$0xf] %vm7765_vm5, %v10278_v27  ;;  %v6912_v22 = vmul.f32 %v10581_v26, %v6168_v23  ;;  %v6911_v1 = vmul.f32 %v10580_v9, %v6165_v19  ;;  %v6391_v26 = vsel %vm5378_vm4, %v5835_v58, 0.0  ;;  %v5838_v9 = vmul.f32 %v17823_v51, %v5640_v4  ;;  %v5641_v7 = vld [vmem:[%s19686_s3 + $0x5d0] sm:$0xff] }
 0x6a0   : > { %v10601_v19 = vunpack.c.h.bf16 %v10807_v53 }
 0x6a1   : > { %v10281_v21 = vpack.c.bf16 %v6912_v22, %v6912_v22  ;;  %v10280_v40 = vpack.c.bf16 %v6911_v1, %v6911_v1  ;;  %6377 = vadd.xlane.f32.xlu1 %v6376_v18  ;;  %6374 = vadd.xlane.f32.xlu0 %v6373_v45  ;;  %v10600_v22 = vunpack.c.l.bf16 %v10807_v53  ;;  %v6400_v1 = vsel %vm5378_vm4, %v5838_v9, 0.0  ;;  %v10808_v45 = vld [vmem:[%s19689_s6 + $0x1d8] sm:$0xff]  }
 0x6a2   : > { %v6174_v28 = vpop.xlane.xlu1 %6173  ;;  %v6171_v14 = vpop.xlane.xlu0 %6170  ;;  %v5839_v18 = vmul.f32 %v17823_v51, %v5641_v7 }
 0x6a3   : > { %7873 = vst.msk [vmem:[#allocation4 + $0x1ac] sm:$0xf] %vm7765_vm5, %v10281_v21  ;;  %7872 = vst.msk [vmem:[#allocation4 + $0x1a8] sm:$0xf] %vm7765_vm5, %v10280_v40  ;;  %v6914_v25 = vmul.f32 %v10585_v48, %v6174_v28  ;;  %v6913_v6 = vmul.f32 %v10584_v44, %v6171_v14  ;;  %v6397_v48 = vsel %vm5378_vm4, %v5837_v3, 0.0  ;;  %v5840_v44 = vmul.f32 %v17823_v51, %v5642_v17  ;;  %v5643_v21 = vld [vmem:[%s19686_s3 + $0x5e0] sm:$0xff] }
 0x6a4   : > { %v10605_v14 = vunpack.c.h.bf16 %v10808_v45 }
 0x6a5   : > { %v10283_v0 = vpack.c.bf16 %v6914_v25, %v6914_v25  ;;  %v10282_v43 = vpack.c.bf16 %v6913_v6, %v6913_v6  ;;  %6383 = vadd.xlane.f32.xlu1 %v6382_v8  ;;  %6380 = vadd.xlane.f32.xlu0 %v6379_v56  ;;  %v10604_v25 = vunpack.c.l.bf16 %v10808_v45  ;;  %v6406_v6 = vsel %vm5378_vm4, %v5840_v44, 0.0  ;;  %v10809_v56 = vld [vmem:[%s19689_s6 + $0x1e0] sm:$0xff]  }
 0x6a6   : > { %v6180_v29 = vpop.xlane.xlu1 %6179  ;;  %v6177_v60 = vpop.xlane.xlu0 %6176  ;;  %v5841_v8 = vmul.f32 %v17823_v51, %v5643_v21  ;;  %v10814_v21 = vld [vmem:[%s19689_s6 + $0x208] sm:$0xff]  }
 0x6a7   : > { %7875 = vst.msk [vmem:[#allocation4 + $0x1b4] sm:$0xf] %vm7765_vm5, %v10283_v0  ;;  %7874 = vst.msk [vmem:[#allocation4 + $0x1b0] sm:$0xf] %vm7765_vm5, %v10282_v43  ;;  %v6916_v63 = vmul.f32 %v10589_v59, %v6180_v29  ;;  %v6915_v52 = vmul.f32 %v10588_v16, %v6177_v60  ;;  %v6403_v59 = vsel %vm5378_vm4, %v5839_v18, 0.0  ;;  %v5842_v16 = vmul.f32 %v17823_v51, %v5644_v12  ;;  %v5645_v0 = vld [vmem:[%s19686_s3 + $0x5f0] sm:$0xff] }
 0x6a8   : > { %v10609_v60 = vunpack.c.h.bf16 %v10809_v56 }
 0x6a9   : > { %v10285_v57 = vpack.c.bf16 %v6916_v63, %v6916_v63  ;;  %v10284_v34 = vpack.c.bf16 %v6915_v52, %v6915_v52  ;;  %6389 = vadd.xlane.f32.xlu1 %v6388_v20  ;;  %6386 = vadd.xlane.f32.xlu0 %v6385_v50  ;;  %v10608_v63 = vunpack.c.l.bf16 %v10809_v56  ;;  %v6412_v52 = vsel %vm5378_vm4, %v5842_v16, 0.0  ;;  %v10810_v50 = vld [vmem:[%s19689_s6 + $0x1e8] sm:$0xff]   ;;  %v10815_v16 = vld [vmem:[%s19689_s6 + $0x210] sm:$0xff]  }
 0x6aa   : > { %v6186_v62 = vpop.xlane.xlu1 %6185  ;;  %v6183_v49 = vpop.xlane.xlu0 %6182  ;;  %v5843_v20 = vmul.f32 %v17823_v51, %v5645_v0  ;;  %v10613_v38 = vunpack.c.h.bf16 %v10810_v50 }
 0x6ab   : > { %7877 = vst.msk [vmem:[#allocation4 + $0x1bc] sm:$0xf] %vm7765_vm5, %v10285_v57  ;;  %7876 = vst.msk [vmem:[#allocation4 + $0x1b8] sm:$0xf] %vm7765_vm5, %v10284_v34  ;;  %v6918_v32 = vmul.f32 %v10593_v33, %v6186_v62  ;;  %v6917_v31 = vmul.f32 %v10592_v30, %v6183_v49  ;;  %v6409_v33 = vsel %vm5378_vm4, %v5841_v8, 0.0  ;;  %v5844_v30 = vmul.f32 %v17823_v51, %v5646_v61 }
 0x6ac   : > { %v10612_v62 = vunpack.c.l.bf16 %v10810_v50  ;;  %v6415_v49 = vsel %vm5378_vm4, %v5843_v20, 0.0 }
 0x6ad   : > { %v10287_v55 = vpack.c.bf16 %v6918_v32, %v6918_v32  ;;  %v10286_v46 = vpack.c.bf16 %v6917_v31, %v6917_v31  ;;  %6395 = vadd.xlane.f32.xlu1 %v6394_v13  ;;  %6392 = vadd.xlane.f32.xlu0 %v6391_v26  ;;  %v6418_v51 = vsel %vm5378_vm4, %v5844_v30, 0.0  ;;  %v10811_v32 = vld [vmem:[%s19689_s6 + $0x1f0] sm:$0xff]  }
 0x6ae   : > { %v6192_v27 = vpop.xlane.xlu1 %6191  ;;  %v6189_v5 = vpop.xlane.xlu0 %6188  ;;  %v10617_v3 = vunpack.c.h.bf16 %v10811_v32  ;;  %v10616_v53 = vunpack.c.l.bf16 %v10811_v32 }
 0x6af   : > { %7879 = vst.msk [vmem:[#allocation4 + $0x1c4] sm:$0xf] %vm7765_vm5, %v10287_v55  ;;  %7878 = vst.msk [vmem:[#allocation4 + $0x1c0] sm:$0xf] %vm7765_vm5, %v10286_v46  ;;  %v6920_v37 = vmul.f32 %v10597_v41, %v6192_v27  ;;  %v6919_v23 = vmul.f32 %v10596_v39, %v6189_v5  ;;  %v10812_v55 = vld [vmem:[%s19689_s6 + $0x1f8] sm:$0xff]  }
 0x6b1   : > { %v10289_v11 = vpack.c.bf16 %v6920_v37, %v6920_v37  ;;  %v10288_v24 = vpack.c.bf16 %v6919_v23, %v6919_v23  ;;  %6401 = vadd.xlane.f32.xlu1 %v6400_v1  ;;  %6398 = vadd.xlane.f32.xlu0 %v6397_v48  ;;  %v10621_v23 = vunpack.c.h.bf16 %v10812_v55 }
 0x6b2   : > { %v6198_v40 = vpop.xlane.xlu1 %6197  ;;  %v6195_v35 = vpop.xlane.xlu0 %6194 }
 0x6b3   : > { %7881 = vst.msk [vmem:[#allocation4 + $0x1cc] sm:$0xf] %vm7765_vm5, %v10289_v11  ;;  %7880 = vst.msk [vmem:[#allocation4 + $0x1c8] sm:$0xf] %vm7765_vm5, %v10288_v24  ;;  %v6922_v47 = vmul.f32 %v10601_v19, %v6198_v40  ;;  %v6921_v28 = vmul.f32 %v10600_v22, %v6195_v35  ;;  %v10620_v19 = vunpack.c.l.bf16 %v10812_v55  ;;  %v10813_v22 = vld [vmem:[%s19689_s6 + $0x200] sm:$0xff]  }
 0x6b4   : > { %v10625_v24 = vunpack.c.h.bf16 %v10813_v22  ;;  %v10624_v12 = vunpack.c.l.bf16 %v10813_v22 }
 0x6b5   : > { %v10291_v54 = vpack.c.bf16 %v6922_v47, %v6922_v47  ;;  %v10290_v15 = vpack.c.bf16 %v6921_v28, %v6921_v28  ;;  %6407 = vadd.xlane.f32.xlu1 %v6406_v6  ;;  %6404 = vadd.xlane.f32.xlu0 %v6403_v59  ;;  %v10629_v6 = vunpack.c.h.bf16 %v10814_v21  ;;  %v10628_v59 = vunpack.c.l.bf16 %v10814_v21 }
 0x6b6   : > { %v6204_v43 = vpop.xlane.xlu1 %6203  ;;  %v6201_v42 = vpop.xlane.xlu0 %6200 }
 0x6b7   : > { %7883 = vst.msk [vmem:[#allocation4 + $0x1d4] sm:$0xf] %vm7765_vm5, %v10291_v54  ;;  %7882 = vst.msk [vmem:[#allocation4 + $0x1d0] sm:$0xf] %vm7765_vm5, %v10290_v15  ;;  %v6924_v36 = vmul.f32 %v10605_v14, %v6204_v43  ;;  %v6923_v29 = vmul.f32 %v10604_v25, %v6201_v42  ;;  %v10633_v43 = vunpack.c.h.bf16 %v10815_v16  ;;  %v10632_v42 = vunpack.c.l.bf16 %v10815_v16 }
 0x6b9   : > { %v10293_v10 = vpack.c.bf16 %v6924_v36, %v6924_v36  ;;  %v10292_v58 = vpack.c.bf16 %v6923_v29, %v6923_v29  ;;  %6413 = vadd.xlane.f32.xlu1 %v6412_v52  ;;  %6410 = vadd.xlane.f32.xlu0 %v6409_v33  ;;  %v10816_v36 = vld [vmem:[%s19689_s6 + $0x218] sm:$0xff]  }
 0x6ba   : > { %v6210_v2 = vpop.xlane.xlu1 %6209  ;;  %v6207_v57 = vpop.xlane.xlu0 %6206  ;;  %v10637_v20 = vunpack.c.h.bf16 %v10816_v36  ;;  %v10636_v50 = vunpack.c.l.bf16 %v10816_v36 }
 0x6bb   : > { %7885 = vst.msk [vmem:[#allocation4 + $0x1dc] sm:$0xf] %vm7765_vm5, %v10293_v10  ;;  %7884 = vst.msk [vmem:[#allocation4 + $0x1d8] sm:$0xf] %vm7765_vm5, %v10292_v58  ;;  %v6926_v34 = vmul.f32 %v10609_v60, %v6210_v2  ;;  %v6925_v4 = vmul.f32 %v10608_v63, %v6207_v57  ;;  %v10817_v10 = vld [vmem:[%s19689_s6 + $0x220] sm:$0xff]  }
 0x6bd   : > { %v10295_v31 = vpack.c.bf16 %v6926_v34, %v6926_v34  ;;  %v10294_v41 = vpack.c.bf16 %v6925_v4, %v6925_v4  ;;  %6419 = vadd.xlane.f32.xlu1 %v6418_v51  ;;  %6416 = vadd.xlane.f32.xlu0 %v6415_v49  ;;  %v10640_v51 = vunpack.c.l.bf16 %v10817_v10  ;;  %v10818_v49 = vld [vmem:[%s19689_s6 + $0x228] sm:$0xff]  }
 0x6be   : > { %v6216_v39 = vpop.xlane.xlu1 %6215  ;;  %v6213_v13 = vpop.xlane.xlu0 %6212 }
 0x6bf   : > { %7887 = vst.msk [vmem:[#allocation4 + $0x1e4] sm:$0xf] %vm7765_vm5, %v10295_v31  ;;  %7886 = vst.msk [vmem:[#allocation4 + $0x1e0] sm:$0xf] %vm7765_vm5, %v10294_v41  ;;  %v6928_v26 = vmul.f32 %v10613_v38, %v6216_v39  ;;  %v6927_v9 = vmul.f32 %v10612_v62, %v6213_v13  ;;  %v10641_v62 = vunpack.c.h.bf16 %v10817_v10 }
 0x6c1   : > { %v10297_v46 = vpack.c.bf16 %v6928_v26, %v6928_v26  ;;  %v10296_v17 = vpack.c.bf16 %v6927_v9, %v6927_v9  ;;  %v10645_v9 = vunpack.c.h.bf16 %v10818_v49 }
 0x6c2   : > { %v6222_v7 = vpop.xlane.xlu1 %6221  ;;  %v6219_v27 = vpop.xlane.xlu0 %6218 }
 0x6c3   : > { %7889 = vst.msk [vmem:[#allocation4 + $0x1ec] sm:$0xf] %vm7765_vm5, %v10297_v46  ;;  %7888 = vst.msk [vmem:[#allocation4 + $0x1e8] sm:$0xf] %vm7765_vm5, %v10296_v17  ;;  %v6930_v5 = vmul.f32 %v10617_v3, %v6222_v7  ;;  %v6929_v37 = vmul.f32 %v10616_v53, %v6219_v27  ;;  %v10644_v3 = vunpack.c.l.bf16 %v10818_v49  ;;  %v10819_v53 = vld [vmem:[%s19689_s6 + $0x230] sm:$0xff]  }
 0x6c5   : > { %v10299_v1 = vpack.c.bf16 %v6930_v5, %v6930_v5  ;;  %v10298_v48 = vpack.c.bf16 %v6929_v37, %v6929_v37  ;;  %v10649_v37 = vunpack.c.h.bf16 %v10819_v53 }
 0x6c6   : > { %v6228_v44 = vpop.xlane.xlu1 %6227  ;;  %v6225_v18 = vpop.xlane.xlu0 %6224 }
 0x6c7   : > { %7891 = vst.msk [vmem:[#allocation4 + $0x1f4] sm:$0xf] %vm7765_vm5, %v10299_v1  ;;  %7890 = vst.msk [vmem:[#allocation4 + $0x1f0] sm:$0xf] %vm7765_vm5, %v10298_v48  ;;  %v6932_v45 = vmul.f32 %v10621_v23, %v6228_v44  ;;  %v6931_v11 = vmul.f32 %v10620_v19, %v6225_v18  ;;  %v10648_v23 = vunpack.c.l.bf16 %v10819_v53  ;;  %v10820_v19 = vld [vmem:[%s19689_s6 + $0x238] sm:$0xff]  }
 0x6c9   : > { %v10301_v40 = vpack.c.bf16 %v6932_v45, %v6932_v45  ;;  %v10300_v35 = vpack.c.bf16 %v6931_v11, %v6931_v11  ;;  %v10653_v11 = vunpack.c.h.bf16 %v10820_v19 }
 0x6ca   : > { %v6234_v47 = vpop.xlane.xlu1 %6233  ;;  %v6231_v28 = vpop.xlane.xlu0 %6230 }
 0x6cb   : > { %7893 = vst.msk [vmem:[#allocation4 + $0x1fc] sm:$0xf] %vm7765_vm5, %v10301_v40  ;;  %7892 = vst.msk [vmem:[#allocation4 + $0x1f8] sm:$0xf] %vm7765_vm5, %v10300_v35  ;;  %v6934_v14 = vmul.f32 %v10625_v24, %v6234_v47  ;;  %v6933_v25 = vmul.f32 %v10624_v12, %v6231_v28  ;;  %v10652_v24 = vunpack.c.l.bf16 %v10820_v19  ;;  %v10821_v12 = vld [vmem:[%s19689_s6 + $0x240] sm:$0xff]  }
 0x6cd   : > { %v10303_v8 = vpack.c.bf16 %v6934_v14, %v6934_v14  ;;  %v10302_v56 = vpack.c.bf16 %v6933_v25, %v6933_v25  ;;  %v10657_v25 = vunpack.c.h.bf16 %v10821_v12 }
 0x6ce   : > { %v6240_v54 = vpop.xlane.xlu1 %6239  ;;  %v6237_v15 = vpop.xlane.xlu0 %6236 }
 0x6cf   : > { %7895 = vst.msk [vmem:[#allocation4 + $0x204] sm:$0xf] %vm7765_vm5, %v10303_v8  ;;  %7894 = vst.msk [vmem:[#allocation4 + $0x200] sm:$0xf] %vm7765_vm5, %v10302_v56  ;;  %v6936_v61 = vmul.f32 %v10629_v6, %v6240_v54  ;;  %v6935_v0 = vmul.f32 %v10628_v59, %v6237_v15  ;;  %v10656_v6 = vunpack.c.l.bf16 %v10821_v12  ;;  %v10822_v59 = vld [vmem:[%s19689_s6 + $0x248] sm:$0xff]  }
 0x6d1   : > { %v10305_v29 = vpack.c.bf16 %v6936_v61, %v6936_v61  ;;  %v10304_v60 = vpack.c.bf16 %v6935_v0, %v6935_v0  ;;  %v10661_v0 = vunpack.c.h.bf16 %v10822_v59 }
 0x6d2   : > { %v6246_v63 = vpop.xlane.xlu1 %6245  ;;  %v6243_v52 = vpop.xlane.xlu0 %6242 }
 0x6d3   : > { %7897 = vst.msk [vmem:[#allocation4 + $0x20c] sm:$0xf] %vm7765_vm5, %v10305_v29  ;;  %7896 = vst.msk [vmem:[#allocation4 + $0x208] sm:$0xf] %vm7765_vm5, %v10304_v60  ;;  %v6938_v33 = vmul.f32 %v10633_v43, %v6246_v63  ;;  %v6937_v30 = vmul.f32 %v10632_v42, %v6243_v52  ;;  %v10660_v43 = vunpack.c.l.bf16 %v10822_v59  ;;  %v10823_v42 = vld [vmem:[%s19689_s6 + $0x250] sm:$0xff]  }
 0x6d5   : > { %v10307_v58 = vpack.c.bf16 %v6938_v33, %v6938_v33  ;;  %v10306_v2 = vpack.c.bf16 %v6937_v30, %v6937_v30  ;;  %v10665_v30 = vunpack.c.h.bf16 %v10823_v42 }
 0x6d6   : > { %v6252_v57 = vpop.xlane.xlu1 %6251  ;;  %v6249_v34 = vpop.xlane.xlu0 %6248 }
 0x6d7   : > { %7899 = vst.msk [vmem:[#allocation4 + $0x214] sm:$0xf] %vm7765_vm5, %v10307_v58  ;;  %7898 = vst.msk [vmem:[#allocation4 + $0x210] sm:$0xf] %vm7765_vm5, %v10306_v2  ;;  %v6940_v4 = vmul.f32 %v10637_v20, %v6252_v57  ;;  %v6939_v38 = vmul.f32 %v10636_v50, %v6249_v34  ;;  %v10664_v20 = vunpack.c.l.bf16 %v10823_v42  ;;  %v10824_v50 = vld [vmem:[%s19689_s6 + $0x258] sm:$0xff]  }
 0x6d9   : > { %v10309_v32 = vpack.c.bf16 %v6940_v4, %v6940_v4  ;;  %v10308_v31 = vpack.c.bf16 %v6939_v38, %v6939_v38  ;;  %v10669_v38 = vunpack.c.h.bf16 %v10824_v50 }
 0x6da   : > { %v6258_v41 = vpop.xlane.xlu1 %6257  ;;  %v6255_v39 = vpop.xlane.xlu0 %6254 }
 0x6db   : > { %7901 = vst.msk [vmem:[#allocation4 + $0x21c] sm:$0xf] %vm7765_vm5, %v10309_v32  ;;  %7900 = vst.msk [vmem:[#allocation4 + $0x218] sm:$0xf] %vm7765_vm5, %v10308_v31  ;;  %v6942_v13 = vmul.f32 %v10641_v62, %v6258_v41  ;;  %v6941_v26 = vmul.f32 %v10640_v51, %v6255_v39  ;;  %v10668_v62 = vunpack.c.l.bf16 %v10824_v50  ;;  %v10825_v51 = vld [vmem:[%s19689_s6 + $0x260] sm:$0xff]  }
 0x6dd   : > { %v10311_v55 = vpack.c.bf16 %v6942_v13, %v6942_v13  ;;  %v10310_v46 = vpack.c.bf16 %v6941_v26, %v6941_v26  ;;  %v10673_v26 = vunpack.c.h.bf16 %v10825_v51 }
 0x6de   : > { %v6264_v17 = vpop.xlane.xlu1 %6263  ;;  %v6261_v7 = vpop.xlane.xlu0 %6260 }
 0x6df   : > { %7903 = vst.msk [vmem:[#allocation4 + $0x224] sm:$0xf] %vm7765_vm5, %v10311_v55  ;;  %7902 = vst.msk [vmem:[#allocation4 + $0x220] sm:$0xf] %vm7765_vm5, %v10310_v46  ;;  %v6944_v27 = vmul.f32 %v10645_v9, %v6264_v17  ;;  %v6943_v5 = vmul.f32 %v10644_v3, %v6261_v7  ;;  %v10672_v9 = vunpack.c.l.bf16 %v10825_v51  ;;  %v10826_v3 = vld [vmem:[%s19689_s6 + $0x268] sm:$0xff]  }
 0x6e1   : > { %v10313_v22 = vpack.c.bf16 %v6944_v27, %v6944_v27  ;;  %v10312_v1 = vpack.c.bf16 %v6943_v5, %v6943_v5  ;;  %v10677_v5 = vunpack.c.h.bf16 %v10826_v3 }
 0x6e2   : > { %v6270_v48 = vpop.xlane.xlu1 %6269  ;;  %v6267_v44 = vpop.xlane.xlu0 %6266 }
 0x6e3   : > { %7905 = vst.msk [vmem:[#allocation4 + $0x22c] sm:$0xf] %vm7765_vm5, %v10313_v22  ;;  %7904 = vst.msk [vmem:[#allocation4 + $0x228] sm:$0xf] %vm7765_vm5, %v10312_v1  ;;  %v6946_v18 = vmul.f32 %v10649_v37, %v6270_v48  ;;  %v6945_v45 = vmul.f32 %v10648_v23, %v6267_v44  ;;  %v10676_v37 = vunpack.c.l.bf16 %v10826_v3  ;;  %v10827_v23 = vld [vmem:[%s19689_s6 + $0x270] sm:$0xff]  }
 0x6e5   : > { %v10315_v21 = vpack.c.bf16 %v6946_v18, %v6946_v18  ;;  %v10314_v40 = vpack.c.bf16 %v6945_v45, %v6945_v45  ;;  %v10681_v45 = vunpack.c.h.bf16 %v10827_v23 }
 0x6e6   : > { %v6276_v35 = vpop.xlane.xlu1 %6275  ;;  %v6273_v47 = vpop.xlane.xlu0 %6272 }
 0x6e7   : > { %7907 = vst.msk [vmem:[#allocation4 + $0x234] sm:$0xf] %vm7765_vm5, %v10315_v21  ;;  %7906 = vst.msk [vmem:[#allocation4 + $0x230] sm:$0xf] %vm7765_vm5, %v10314_v40  ;;  %v6948_v28 = vmul.f32 %v10653_v11, %v6276_v35  ;;  %v6947_v14 = vmul.f32 %v10652_v24, %v6273_v47  ;;  %v10680_v11 = vunpack.c.l.bf16 %v10827_v23  ;;  %v10828_v24 = vld [vmem:[%s19689_s6 + $0x278] sm:$0xff]  }
 0x6e9   : > { %v10317_v16 = vpack.c.bf16 %v6948_v28, %v6948_v28  ;;  %v10316_v8 = vpack.c.bf16 %v6947_v14, %v6947_v14  ;;  %v10685_v14 = vunpack.c.h.bf16 %v10828_v24 }
 0x6ea   : > { %v6282_v56 = vpop.xlane.xlu1 %6281  ;;  %v6279_v54 = vpop.xlane.xlu0 %6278 }
 0x6eb   : > { %7909 = vst.msk [vmem:[#allocation4 + $0x23c] sm:$0xf] %vm7765_vm5, %v10317_v16  ;;  %7908 = vst.msk [vmem:[#allocation4 + $0x238] sm:$0xf] %vm7765_vm5, %v10316_v8  ;;  %v6950_v15 = vmul.f32 %v10657_v25, %v6282_v56  ;;  %v6949_v61 = vmul.f32 %v10656_v6, %v6279_v54  ;;  %v10684_v25 = vunpack.c.l.bf16 %v10828_v24  ;;  %v10829_v6 = vld [vmem:[%s19689_s6 + $0x280] sm:$0xff]  }
 0x6ed   : > { %v10319_v36 = vpack.c.bf16 %v6950_v15, %v6950_v15  ;;  %v10318_v29 = vpack.c.bf16 %v6949_v61, %v6949_v61  ;;  %v10689_v61 = vunpack.c.h.bf16 %v10829_v6 }
 0x6ee   : > { %v6288_v60 = vpop.xlane.xlu1 %6287  ;;  %v6285_v63 = vpop.xlane.xlu0 %6284 }
 0x6ef   : > { %7911 = vst.msk [vmem:[#allocation4 + $0x244] sm:$0xf] %vm7765_vm5, %v10319_v36  ;;  %7910 = vst.msk [vmem:[#allocation4 + $0x240] sm:$0xf] %vm7765_vm5, %v10318_v29  ;;  %v6952_v52 = vmul.f32 %v10661_v0, %v6288_v60  ;;  %v6951_v33 = vmul.f32 %v10660_v43, %v6285_v63  ;;  %v10688_v0 = vunpack.c.l.bf16 %v10829_v6  ;;  %v10830_v43 = vld [vmem:[%s19689_s6 + $0x288] sm:$0xff]  }
 0x6f1   : > { %v10321_v10 = vpack.c.bf16 %v6952_v52, %v6952_v52  ;;  %v10320_v58 = vpack.c.bf16 %v6951_v33, %v6951_v33  ;;  %v10693_v33 = vunpack.c.h.bf16 %v10830_v43 }
 0x6f2   : > { %v6294_v2 = vpop.xlane.xlu1 %6293  ;;  %v6291_v57 = vpop.xlane.xlu0 %6290 }
 0x6f3   : > { %7913 = vst.msk [vmem:[#allocation4 + $0x24c] sm:$0xf] %vm7765_vm5, %v10321_v10  ;;  %7912 = vst.msk [vmem:[#allocation4 + $0x248] sm:$0xf] %vm7765_vm5, %v10320_v58  ;;  %v6954_v34 = vmul.f32 %v10665_v30, %v6294_v2  ;;  %v6953_v4 = vmul.f32 %v10664_v20, %v6291_v57  ;;  %v10692_v30 = vunpack.c.l.bf16 %v10830_v43  ;;  %v10831_v20 = vld [vmem:[%s19689_s6 + $0x290] sm:$0xff]  }
 0x6f5   : > { %v10323_v49 = vpack.c.bf16 %v6954_v34, %v6954_v34  ;;  %v10322_v32 = vpack.c.bf16 %v6953_v4, %v6953_v4  ;;  %v10697_v4 = vunpack.c.h.bf16 %v10831_v20 }
 0x6f6   : > { %v6300_v31 = vpop.xlane.xlu1 %6299  ;;  %v6297_v41 = vpop.xlane.xlu0 %6296 }
 0x6f7   : > { %7915 = vst.msk [vmem:[#allocation4 + $0x254] sm:$0xf] %vm7765_vm5, %v10323_v49  ;;  %7914 = vst.msk [vmem:[#allocation4 + $0x250] sm:$0xf] %vm7765_vm5, %v10322_v32  ;;  %v6956_v39 = vmul.f32 %v10669_v38, %v6300_v31  ;;  %v6955_v13 = vmul.f32 %v10668_v62, %v6297_v41  ;;  %v10696_v38 = vunpack.c.l.bf16 %v10831_v20  ;;  %v10832_v62 = vld [vmem:[%s19689_s6 + $0x298] sm:$0xff]  }
 0x6f9   : > { %v10325_v53 = vpack.c.bf16 %v6956_v39, %v6956_v39  ;;  %v10324_v55 = vpack.c.bf16 %v6955_v13, %v6955_v13  ;;  %v10701_v13 = vunpack.c.h.bf16 %v10832_v62 }
 0x6fa   : > { %v6306_v46 = vpop.xlane.xlu1 %6305  ;;  %v6303_v17 = vpop.xlane.xlu0 %6302 }
 0x6fb   : > { %7917 = vst.msk [vmem:[#allocation4 + $0x25c] sm:$0xf] %vm7765_vm5, %v10325_v53  ;;  %7916 = vst.msk [vmem:[#allocation4 + $0x258] sm:$0xf] %vm7765_vm5, %v10324_v55  ;;  %v6958_v7 = vmul.f32 %v10673_v26, %v6306_v46  ;;  %v6957_v27 = vmul.f32 %v10672_v9, %v6303_v17  ;;  %v10700_v26 = vunpack.c.l.bf16 %v10832_v62  ;;  %v10833_v9 = vld [vmem:[%s19689_s6 + $0x2a0] sm:$0xff]  }
 0x6fd   : > { %v10327_v19 = vpack.c.bf16 %v6958_v7, %v6958_v7  ;;  %v10326_v22 = vpack.c.bf16 %v6957_v27, %v6957_v27  ;;  %v10705_v27 = vunpack.c.h.bf16 %v10833_v9 }
 0x6fe   : > { %v6312_v1 = vpop.xlane.xlu1 %6311  ;;  %v6309_v48 = vpop.xlane.xlu0 %6308 }
 0x6ff   : > { %7919 = vst.msk [vmem:[#allocation4 + $0x264] sm:$0xf] %vm7765_vm5, %v10327_v19  ;;  %7918 = vst.msk [vmem:[#allocation4 + $0x260] sm:$0xf] %vm7765_vm5, %v10326_v22  ;;  %v6960_v44 = vmul.f32 %v10677_v5, %v6312_v1  ;;  %v6959_v18 = vmul.f32 %v10676_v37, %v6309_v48  ;;  %v10704_v5 = vunpack.c.l.bf16 %v10833_v9  ;;  %v10834_v37 = vld [vmem:[%s19689_s6 + $0x2a8] sm:$0xff]  }
 0x701   : > { %v10329_v12 = vpack.c.bf16 %v6960_v44, %v6960_v44  ;;  %v10328_v21 = vpack.c.bf16 %v6959_v18, %v6959_v18  ;;  %v10709_v18 = vunpack.c.h.bf16 %v10834_v37 }
 0x702   : > { %v6318_v40 = vpop.xlane.xlu1 %6317  ;;  %v6315_v35 = vpop.xlane.xlu0 %6314 }
 0x703   : > { %7921 = vst.msk [vmem:[#allocation4 + $0x26c] sm:$0xf] %vm7765_vm5, %v10329_v12  ;;  %7920 = vst.msk [vmem:[#allocation4 + $0x268] sm:$0xf] %vm7765_vm5, %v10328_v21  ;;  %v6962_v47 = vmul.f32 %v10681_v45, %v6318_v40  ;;  %v6961_v28 = vmul.f32 %v10680_v11, %v6315_v35  ;;  %v10708_v45 = vunpack.c.l.bf16 %v10834_v37  ;;  %v10835_v11 = vld [vmem:[%s19689_s6 + $0x2b0] sm:$0xff]  }
 0x705   : > { %v10331_v59 = vpack.c.bf16 %v6962_v47, %v6962_v47  ;;  %v10330_v16 = vpack.c.bf16 %v6961_v28, %v6961_v28  ;;  %v10713_v28 = vunpack.c.h.bf16 %v10835_v11 }
 0x706   : > { %v6324_v8 = vpop.xlane.xlu1 %6323  ;;  %v6321_v56 = vpop.xlane.xlu0 %6320 }
 0x707   : > { %7923 = vst.msk [vmem:[#allocation4 + $0x274] sm:$0xf] %vm7765_vm5, %v10331_v59  ;;  %7922 = vst.msk [vmem:[#allocation4 + $0x270] sm:$0xf] %vm7765_vm5, %v10330_v16  ;;  %v6964_v54 = vmul.f32 %v10685_v14, %v6324_v8  ;;  %v6963_v15 = vmul.f32 %v10684_v25, %v6321_v56  ;;  %v10712_v14 = vunpack.c.l.bf16 %v10835_v11  ;;  %v10836_v25 = vld [vmem:[%s19689_s6 + $0x2b8] sm:$0xff]  }
 0x709   : > { %v10333_v42 = vpack.c.bf16 %v6964_v54, %v6964_v54  ;;  %v10332_v36 = vpack.c.bf16 %v6963_v15, %v6963_v15  ;;  %v10717_v15 = vunpack.c.h.bf16 %v10836_v25 }
 0x70a   : > { %v6330_v29 = vpop.xlane.xlu1 %6329  ;;  %v6327_v60 = vpop.xlane.xlu0 %6326 }
 0x70b   : > { %7925 = vst.msk [vmem:[#allocation4 + $0x27c] sm:$0xf] %vm7765_vm5, %v10333_v42  ;;  %7924 = vst.msk [vmem:[#allocation4 + $0x278] sm:$0xf] %vm7765_vm5, %v10332_v36  ;;  %v6966_v63 = vmul.f32 %v10689_v61, %v6330_v29  ;;  %v6965_v52 = vmul.f32 %v10688_v0, %v6327_v60  ;;  %v10716_v61 = vunpack.c.l.bf16 %v10836_v25  ;;  %v10837_v0 = vld [vmem:[%s19689_s6 + $0x2c0] sm:$0xff]  }
 0x70d   : > { %v10335_v50 = vpack.c.bf16 %v6966_v63, %v6966_v63  ;;  %v10334_v10 = vpack.c.bf16 %v6965_v52, %v6965_v52  ;;  %v10721_v52 = vunpack.c.h.bf16 %v10837_v0 }
 0x70e   : > { %v6336_v58 = vpop.xlane.xlu1 %6335  ;;  %v6333_v2 = vpop.xlane.xlu0 %6332 }
 0x70f   : > { %7927 = vst.msk [vmem:[#allocation4 + $0x284] sm:$0xf] %vm7765_vm5, %v10335_v50  ;;  %7926 = vst.msk [vmem:[#allocation4 + $0x280] sm:$0xf] %vm7765_vm5, %v10334_v10  ;;  %v6968_v57 = vmul.f32 %v10693_v33, %v6336_v58  ;;  %v6967_v34 = vmul.f32 %v10692_v30, %v6333_v2  ;;  %v10720_v33 = vunpack.c.l.bf16 %v10837_v0  ;;  %v10838_v30 = vld [vmem:[%s19689_s6 + $0x2c8] sm:$0xff]  }
 0x711   : > { %v10337_v51 = vpack.c.bf16 %v6968_v57, %v6968_v57  ;;  %v10336_v49 = vpack.c.bf16 %v6967_v34, %v6967_v34  ;;  %v10725_v34 = vunpack.c.h.bf16 %v10838_v30 }
 0x712   : > { %v6342_v32 = vpop.xlane.xlu1 %6341  ;;  %v6339_v31 = vpop.xlane.xlu0 %6338 }
 0x713   : > { %7929 = vst.msk [vmem:[#allocation4 + $0x28c] sm:$0xf] %vm7765_vm5, %v10337_v51  ;;  %7928 = vst.msk [vmem:[#allocation4 + $0x288] sm:$0xf] %vm7765_vm5, %v10336_v49  ;;  %v6970_v41 = vmul.f32 %v10697_v4, %v6342_v32  ;;  %v6969_v39 = vmul.f32 %v10696_v38, %v6339_v31  ;;  %v10724_v4 = vunpack.c.l.bf16 %v10838_v30  ;;  %v10839_v38 = vld [vmem:[%s19689_s6 + $0x2d0] sm:$0xff]  }
 0x715   : > { %v10339_v3 = vpack.c.bf16 %v6970_v41, %v6970_v41  ;;  %v10338_v53 = vpack.c.bf16 %v6969_v39, %v6969_v39  ;;  %v10729_v39 = vunpack.c.h.bf16 %v10839_v38 }
 0x716   : > { %v6348_v55 = vpop.xlane.xlu1 %6347  ;;  %v6345_v46 = vpop.xlane.xlu0 %6344 }
 0x717   : > { %7931 = vst.msk [vmem:[#allocation4 + $0x294] sm:$0xf] %vm7765_vm5, %v10339_v3  ;;  %7930 = vst.msk [vmem:[#allocation4 + $0x290] sm:$0xf] %vm7765_vm5, %v10338_v53  ;;  %v6972_v17 = vmul.f32 %v10701_v13, %v6348_v55  ;;  %v6971_v7 = vmul.f32 %v10700_v26, %v6345_v46  ;;  %v10728_v13 = vunpack.c.l.bf16 %v10839_v38  ;;  %v10840_v26 = vld [vmem:[%s19689_s6 + $0x2d8] sm:$0xff]  }
 0x719   : > { %v10341_v23 = vpack.c.bf16 %v6972_v17, %v6972_v17  ;;  %v10340_v19 = vpack.c.bf16 %v6971_v7, %v6971_v7  ;;  %v10733_v7 = vunpack.c.h.bf16 %v10840_v26 }
 0x71a   : > { %v6354_v22 = vpop.xlane.xlu1 %6353  ;;  %v6351_v1 = vpop.xlane.xlu0 %6350 }
 0x71b   : > { %7933 = vst.msk [vmem:[#allocation4 + $0x29c] sm:$0xf] %vm7765_vm5, %v10341_v23  ;;  %7932 = vst.msk [vmem:[#allocation4 + $0x298] sm:$0xf] %vm7765_vm5, %v10340_v19  ;;  %v6974_v48 = vmul.f32 %v10705_v27, %v6354_v22  ;;  %v6973_v44 = vmul.f32 %v10704_v5, %v6351_v1  ;;  %v10732_v27 = vunpack.c.l.bf16 %v10840_v26  ;;  %v10841_v5 = vld [vmem:[%s19689_s6 + $0x2e0] sm:$0xff]  }
 0x71d   : > { %v10343_v24 = vpack.c.bf16 %v6974_v48, %v6974_v48  ;;  %v10342_v12 = vpack.c.bf16 %v6973_v44, %v6973_v44  ;;  %v10737_v44 = vunpack.c.h.bf16 %v10841_v5 }
 0x71e   : > { %v6360_v21 = vpop.xlane.xlu1 %6359  ;;  %v6357_v40 = vpop.xlane.xlu0 %6356 }
 0x71f   : > { %7935 = vst.msk [vmem:[#allocation4 + $0x2a4] sm:$0xf] %vm7765_vm5, %v10343_v24  ;;  %7934 = vst.msk [vmem:[#allocation4 + $0x2a0] sm:$0xf] %vm7765_vm5, %v10342_v12  ;;  %v6976_v35 = vmul.f32 %v10709_v18, %v6360_v21  ;;  %v6975_v47 = vmul.f32 %v10708_v45, %v6357_v40  ;;  %v10736_v18 = vunpack.c.l.bf16 %v10841_v5  ;;  %v10842_v45 = vld [vmem:[%s19689_s6 + $0x2e8] sm:$0xff]  }
 0x721   : > { %v10345_v6 = vpack.c.bf16 %v6976_v35, %v6976_v35  ;;  %v10344_v59 = vpack.c.bf16 %v6975_v47, %v6975_v47  ;;  %v10741_v47 = vunpack.c.h.bf16 %v10842_v45 }
 0x722   : > { %v6366_v16 = vpop.xlane.xlu1 %6365  ;;  %v6363_v8 = vpop.xlane.xlu0 %6362 }
 0x723   : > { %7937 = vst.msk [vmem:[#allocation4 + $0x2ac] sm:$0xf] %vm7765_vm5, %v10345_v6  ;;  %7936 = vst.msk [vmem:[#allocation4 + $0x2a8] sm:$0xf] %vm7765_vm5, %v10344_v59  ;;  %v6978_v56 = vmul.f32 %v10713_v28, %v6366_v16  ;;  %v6977_v54 = vmul.f32 %v10712_v14, %v6363_v8  ;;  %v10740_v28 = vunpack.c.l.bf16 %v10842_v45  ;;  %v10843_v14 = vld [vmem:[%s19689_s6 + $0x2f0] sm:$0xff]  }
 0x725   : > { %v10347_v43 = vpack.c.bf16 %v6978_v56, %v6978_v56  ;;  %v10346_v42 = vpack.c.bf16 %v6977_v54, %v6977_v54  ;;  %v10745_v54 = vunpack.c.h.bf16 %v10843_v14 }
 0x726   : > { %v6372_v36 = vpop.xlane.xlu1 %6371  ;;  %v6369_v29 = vpop.xlane.xlu0 %6368 }
 0x727   : > { %7939 = vst.msk [vmem:[#allocation4 + $0x2b4] sm:$0xf] %vm7765_vm5, %v10347_v43  ;;  %7938 = vst.msk [vmem:[#allocation4 + $0x2b0] sm:$0xf] %vm7765_vm5, %v10346_v42  ;;  %v6980_v60 = vmul.f32 %v10717_v15, %v6372_v36  ;;  %v6979_v63 = vmul.f32 %v10716_v61, %v6369_v29  ;;  %v10744_v15 = vunpack.c.l.bf16 %v10843_v14  ;;  %v10844_v61 = vld [vmem:[%s19689_s6 + $0x2f8] sm:$0xff]  }
 0x729   : > { %v10349_v20 = vpack.c.bf16 %v6980_v60, %v6980_v60  ;;  %v10348_v50 = vpack.c.bf16 %v6979_v63, %v6979_v63  ;;  %v10749_v63 = vunpack.c.h.bf16 %v10844_v61 }
 0x72a   : > { %v6378_v10 = vpop.xlane.xlu1 %6377  ;;  %v6375_v58 = vpop.xlane.xlu0 %6374 }
 0x72b   : > { %7941 = vst.msk [vmem:[#allocation4 + $0x2bc] sm:$0xf] %vm7765_vm5, %v10349_v20  ;;  %7940 = vst.msk [vmem:[#allocation4 + $0x2b8] sm:$0xf] %vm7765_vm5, %v10348_v50  ;;  %v6982_v2 = vmul.f32 %v10721_v52, %v6378_v10  ;;  %v6981_v57 = vmul.f32 %v10720_v33, %v6375_v58  ;;  %v10748_v52 = vunpack.c.l.bf16 %v10844_v61 }
 0x72d   : > { %v10351_v62 = vpack.c.bf16 %v6982_v2, %v6982_v2  ;;  %v10350_v51 = vpack.c.bf16 %v6981_v57, %v6981_v57 }
 0x72e   : > { %v6384_v49 = vpop.xlane.xlu1 %6383  ;;  %v6381_v32 = vpop.xlane.xlu0 %6380 }
 0x72f   : > { %7943 = vst.msk [vmem:[#allocation4 + $0x2c4] sm:$0xf] %vm7765_vm5, %v10351_v62  ;;  %7942 = vst.msk [vmem:[#allocation4 + $0x2c0] sm:$0xf] %vm7765_vm5, %v10350_v51  ;;  %v6984_v31 = vmul.f32 %v10725_v34, %v6384_v49  ;;  %v6983_v41 = vmul.f32 %v10724_v4, %v6381_v32 }
 0x731   : > { %v10353_v9 = vpack.c.bf16 %v6984_v31, %v6984_v31  ;;  %v10352_v3 = vpack.c.bf16 %v6983_v41, %v6983_v41 }
 0x732   : > { %v6390_v53 = vpop.xlane.xlu1 %6389  ;;  %v6387_v55 = vpop.xlane.xlu0 %6386 }
 0x733   : > { %7945 = vst.msk [vmem:[#allocation4 + $0x2cc] sm:$0xf] %vm7765_vm5, %v10353_v9  ;;  %7944 = vst.msk [vmem:[#allocation4 + $0x2c8] sm:$0xf] %vm7765_vm5, %v10352_v3  ;;  %v6986_v46 = vmul.f32 %v10729_v39, %v6390_v53  ;;  %v6985_v17 = vmul.f32 %v10728_v13, %v6387_v55 }
 0x735   : > { %v10355_v37 = vpack.c.bf16 %v6986_v46, %v6986_v46  ;;  %v10354_v23 = vpack.c.bf16 %v6985_v17, %v6985_v17 }
 0x736   : > { %v6396_v19 = vpop.xlane.xlu1 %6395  ;;  %v6393_v22 = vpop.xlane.xlu0 %6392 }
 0x737   : > { %7947 = vst.msk [vmem:[#allocation4 + $0x2d4] sm:$0xf] %vm7765_vm5, %v10355_v37  ;;  %7946 = vst.msk [vmem:[#allocation4 + $0x2d0] sm:$0xf] %vm7765_vm5, %v10354_v23  ;;  %v6988_v1 = vmul.f32 %v10733_v7, %v6396_v19  ;;  %v6987_v48 = vmul.f32 %v10732_v27, %v6393_v22 }
 0x739   : > { %v10357_v11 = vpack.c.bf16 %v6988_v1, %v6988_v1  ;;  %v10356_v24 = vpack.c.bf16 %v6987_v48, %v6987_v48 }
 0x73a   : > { %v6402_v12 = vpop.xlane.xlu1 %6401  ;;  %v6399_v21 = vpop.xlane.xlu0 %6398 }
 0x73b   : > { %7949 = vst.msk [vmem:[#allocation4 + $0x2dc] sm:$0xf] %vm7765_vm5, %v10357_v11  ;;  %7948 = vst.msk [vmem:[#allocation4 + $0x2d8] sm:$0xf] %vm7765_vm5, %v10356_v24  ;;  %v6990_v40 = vmul.f32 %v10737_v44, %v6402_v12  ;;  %v6989_v35 = vmul.f32 %v10736_v18, %v6399_v21 }
 0x73d   : > { %v10359_v25 = vpack.c.bf16 %v6990_v40, %v6990_v40  ;;  %v10358_v6 = vpack.c.bf16 %v6989_v35, %v6989_v35 }
 0x73e   : > { %v6408_v59 = vpop.xlane.xlu1 %6407  ;;  %v6405_v16 = vpop.xlane.xlu0 %6404 }
 0x73f   : > { %7951 = vst.msk [vmem:[#allocation4 + $0x2e4] sm:$0xf] %vm7765_vm5, %v10359_v25  ;;  %7950 = vst.msk [vmem:[#allocation4 + $0x2e0] sm:$0xf] %vm7765_vm5, %v10358_v6  ;;  %v6992_v8 = vmul.f32 %v10741_v47, %v6408_v59  ;;  %v6991_v56 = vmul.f32 %v10740_v28, %v6405_v16 }
 0x741   : > { %v10361_v0 = vpack.c.bf16 %v6992_v8, %v6992_v8  ;;  %v10360_v43 = vpack.c.bf16 %v6991_v56, %v6991_v56 }
 0x742   : > { %v6414_v42 = vpop.xlane.xlu1 %6413  ;;  %v6411_v36 = vpop.xlane.xlu0 %6410 }
 0x743   : > { %7953 = vst.msk [vmem:[#allocation4 + $0x2ec] sm:$0xf] %vm7765_vm5, %v10361_v0  ;;  %7952 = vst.msk [vmem:[#allocation4 + $0x2e8] sm:$0xf] %vm7765_vm5, %v10360_v43  ;;  %v6994_v29 = vmul.f32 %v10745_v54, %v6414_v42  ;;  %v6993_v60 = vmul.f32 %v10744_v15, %v6411_v36 }
 0x745   : > { %v10363_v33 = vpack.c.bf16 %v6994_v29, %v6994_v29  ;;  %v10362_v30 = vpack.c.bf16 %v6993_v60, %v6993_v60 }
 0x746   : > { %v6420_v20 = vpop.xlane.xlu1 %6419  ;;  %v6417_v50 = vpop.xlane.xlu0 %6416 }
 0x747   : > { %7955 = vst.msk [vmem:[#allocation4 + $0x2f4] sm:$0xf] %vm7765_vm5, %v10363_v33  ;;  %7954 = vst.msk [vmem:[#allocation4 + $0x2f0] sm:$0xf] %vm7765_vm5, %v10362_v30  ;;  %v6996_v10 = vmul.f32 %v10749_v63, %v6420_v20  ;;  %v6995_v58 = vmul.f32 %v10748_v52, %v6417_v50 }
 0x749   : > { %v10365_v2 = vpack.c.bf16 %v6996_v10, %v6996_v10  ;;  %v10364_v57 = vpack.c.bf16 %v6995_v58, %v6995_v58 }
 0x74b   : > { %7957 = vst.msk [vmem:[#allocation4 + $0x2fc] sm:$0xf] %vm7765_vm5, %v10365_v2  ;;  %7956 = vst.msk [vmem:[#allocation4 + $0x2f8] sm:$0xf] %vm7765_vm5, %v10364_v57 }
 0x74c PF: > { %p10052_p7 = scmp.ne.s32.totalorder %s12712_s17, 1 }
 0x74e   : > { %7960 = sbr.rel (%p10052_p7) target bundleno = 2564 (0xa04), region = 80 }
 0x753   : > { %v12602_v34 = vld [vmem:[#allocation4 + $0x78] sm:$0xff]   ;;  %v21500_v51 = vld [vmem:[#allocation14_spill] sm:$0xff]  ;;  %v12606_v13 = vld [vmem:[#allocation4 + $0x70] sm:$0xff]  }
 0x754   : > { %v21498_v4 = vld [vmem:[#allocation13_spill] sm:$0xff]  ;;  %v21501_v49 = vld [vmem:[#allocation18_spill] sm:$0xff]  ;;  %11690 = vmatprep.subr.bf16.mxu0 %v12602_v34  ;;  %v12607_v26 = vld [vmem:[#allocation4 + $0xf0] sm:$0xff]  }
 0x755   : > { %v21499_v38 = vld [vmem:[#allocation17_spill] sm:$0xff]  ;;  %v7964_v32 = vpack.c.bf16 %v21501_v49, %v21500_v51  ;;  %v12608_v9 = vld [vmem:[#allocation4 + $0x30] sm:$0xff]   ;;  %v12610_v53 = vld [vmem:[#allocation4 + $0x68] sm:$0xff]  }
 0x756   : > { %v7962_v62 = vpack.c.bf16 %v21499_v38, %v21498_v4  ;;  %v12603_v31 = vld [vmem:[#allocation4 + $0xf8] sm:$0xff]   ;;  %v12609_v3 = vld [vmem:[#allocation4 + $0xb0] sm:$0xff]   ;;  %v12611_v55 = vld [vmem:[#allocation4 + $0xe8] sm:$0xff]  }
 0x757   : > { %v12604_v41 = vld [vmem:[#allocation4 + $0x38] sm:$0xff]   ;;  %11754 = vmatprep.subr.bf16.mxu1 %v12603_v31  ;;  %8961 = vmatprep.mubr.bf16.mxu1 %v7964_v32  ;;  %v12612_v46 = vld [vmem:[#allocation4 + $0x28] sm:$0xff]   ;;  %v12614_v7 = vld [vmem:[#allocation4 + $0x60] sm:$0xff]  }
 0x758   : > { %8864 = vmatprep.mubr.bf16.mxu0 %v7962_v62  ;;  %v12605_v39 = vld [vmem:[#allocation4 + $0xb8] sm:$0xff]   ;;  %11691 = vmatpush3.bf16.msra.mxu0 %v12604_v41  ;;  %v12613_v17 = vld [vmem:[#allocation4 + $0xa8] sm:$0xff]   ;;  %v12615_v27 = vld [vmem:[#allocation4 + $0xe0] sm:$0xff]  }
 0x759   : > { %11755 = vmatpush3.bf16.msra.mxu1 %v12605_v39  ;;  %11692 = vmatprep.subr.bf16.mxu0 %v12606_v13  ;;  %v12616_v5 = vld [vmem:[#allocation4 + $0x20] sm:$0xff]   ;;  %v12618_v23 = vld [vmem:[#allocation4 + $0x58] sm:$0xff]   ;;  %v12622_v48 = vld [vmem:[#allocation4 + $0x50] sm:$0xff]  }
 0x75a   : > { %11756 = vmatprep.subr.bf16.mxu1 %v12607_v26  ;;  %v12617_v37 = vld [vmem:[#allocation4 + $0xa0] sm:$0xff]   ;;  %v12619_v19 = vld [vmem:[#allocation4 + $0xd8] sm:$0xff]   ;;  %v12623_v44 = vld [vmem:[#allocation4 + $0xd0] sm:$0xff]  }
 0x75b   : > { %v12620_v22 = vld [vmem:[#allocation4 + $0x18] sm:$0xff]   ;;  %v12624_v18 = vld [vmem:[#allocation4 + $0x10] sm:$0xff]   ;;  %v12626_v11 = vld [vmem:[#allocation4 + $0x48] sm:$0xff]  }
 0x75c   : > { %11693 = vmatpush3.bf16.msra.mxu0 %v12608_v9  ;;  %v12621_v1 = vld [vmem:[#allocation4 + $0x98] sm:$0xff]   ;;  %v12625_v45 = vld [vmem:[#allocation4 + $0x90] sm:$0xff]   ;;  %v12627_v24 = vld [vmem:[#allocation4 + $0xc8] sm:$0xff]  }
 0x75d   : > { %11757 = vmatpush3.bf16.msra.mxu1 %v12609_v3  ;;  %11694 = vmatprep.subr.bf16.mxu0 %v12610_v53  ;;  %v12628_v12 = vld [vmem:[#allocation4 + $0x8] sm:$0xff]   ;;  %v12630_v40 = vld [vmem:[#allocation4 + $0x40] sm:$0xff]   ;;  %v21504_v59 = vld [vmem:[#allocation12_spill] sm:$0xff] }
 0x75e   : > { %11758 = vmatprep.subr.bf16.mxu1 %v12611_v55  ;;  %v12629_v21 = vld [vmem:[#allocation4 + $0x88] sm:$0xff]   ;;  %v12631_v35 = vld [vmem:[#allocation4 + $0xc0] sm:$0xff]   ;;  %v21505_v16 = vld [vmem:[#allocation16_spill] sm:$0xff] }
 0x75f   : > { %v12632_v47 = vld [vmem:[#allocation4] sm:$0xff]   ;;  %v21502_v14 = vld [vmem:[#allocation11_spill] sm:$0xff]  ;;  %v7963_v8 = vpack.c.bf16 %v21505_v16, %v21504_v59  ;;  %v12634_v56 = vld [vmem:[#allocation4 + $0x178] sm:$0xff]  }
 0x760   : > { %11695 = vmatpush3.bf16.msra.mxu0 %v12612_v46  ;;  %v12633_v28 = vld [vmem:[#allocation4 + $0x80] sm:$0xff]   ;;  %v21503_v25 = vld [vmem:[#allocation15_spill] sm:$0xff]  ;;  %v12635_v54 = vld [vmem:[#allocation4 + $0x138] sm:$0xff]  }
 0x761   : > { %11759 = vmatpush3.bf16.msra.mxu1 %v12613_v17  ;;  %11696 = vmatprep.subr.bf16.mxu0 %v12614_v7  ;;  %v7961_v6 = vpack.c.bf16 %v21503_v25, %v21502_v14  ;;  %v21506_v15 = vld [vmem:[#allocation21_spill] sm:$0xff]  ;;  %v21508_v42 = vld [vmem:[#allocation22_spill] sm:$0xff]  ;;  %v12638_v63 = vld [vmem:[#allocation4 + $0x170] sm:$0xff]  }
 0x762   : > { %11760 = vmatprep.subr.bf16.mxu1 %v12615_v27  ;;  %v21507_v61 = vld [vmem:[#allocation25_spill] sm:$0xff]  ;;  %v21509_v36 = vld [vmem:[#allocation26_spill] sm:$0xff]  ;;  %v12639_v52 = vld [vmem:[#allocation4 + $0x130] sm:$0xff]  }
 0x763   : > { %v7974_v0 = vpack.c.bf16 %v21507_v61, %v21506_v15  ;;  %v12636_v43 = vld [vmem:[#allocation4 + $0x1f8] sm:$0xff]   ;;  %v7976_v29 = vpack.c.bf16 %v21509_v36, %v21508_v42  ;;  %v12640_v33 = vld [vmem:[#allocation4 + $0x1f0] sm:$0xff]   ;;  %v12642_v62 = vld [vmem:[#allocation4 + $0x168] sm:$0xff]  }
 0x764   : > { %11697 = vmatpush3.bf16.msra.mxu0 %v12616_v5  ;;  %v12637_v60 = vld [vmem:[#allocation4 + $0x1b8] sm:$0xff]   ;;  %v21510_v30 = vld [vmem:[#allocation19_spill] sm:$0xff]  ;;  %v21516_v51 = vld [vmem:[#allocation30_spill] sm:$0xff] }
 0x765   : > { %11761 = vmatpush3.bf16.msra.mxu1 %v12617_v37  ;;  %11698 = vmatprep.subr.bf16.mxu0 %v12618_v23  ;;  %v21511_v20 = vld [vmem:[#allocation23_spill] sm:$0xff]  ;;  %v21512_v58 = vld [vmem:[#allocation20_spill] sm:$0xff]  ;;  %v21514_v34 = vld [vmem:[#allocation29_spill] sm:$0xff] }
 0x766   : > { %11762 = vmatprep.subr.bf16.mxu1 %v12619_v19  ;;  %v7973_v50 = vpack.c.bf16 %v21511_v20, %v21510_v30  ;;  %v12641_v10 = vld [vmem:[#allocation4 + $0x1b0] sm:$0xff]   ;;  %v21515_v4 = vld [vmem:[#allocation33_spill] sm:$0xff]  ;;  %v21517_v49 = vld [vmem:[#allocation34_spill] sm:$0xff] }
 0x767   : > { %v21513_v2 = vld [vmem:[#allocation24_spill] sm:$0xff]  ;;  %v7986_v38 = vpack.c.bf16 %v21515_v4, %v21514_v34  ;;  %v7988_v32 = vpack.c.bf16 %v21517_v49, %v21516_v51  ;;  %v12643_v31 = vld [vmem:[#allocation4 + $0x128] sm:$0xff]   ;;  %v12646_v13 = vld [vmem:[#allocation4 + $0x160] sm:$0xff]  }
 0x768   : > { %11699 = vmatpush3.bf16.msra.mxu0 %v12620_v22  ;;  %v7975_v57 = vpack.c.bf16 %v21513_v2, %v21512_v58  ;;  %v12644_v41 = vld [vmem:[#allocation4 + $0x1e8] sm:$0xff]   ;;  %v12647_v26 = vld [vmem:[#allocation4 + $0x120] sm:$0xff]   ;;  %v21520_v17 = vld [vmem:[#allocation28_spill] sm:$0xff] }
 0x769   : > { %11763 = vmatpush3.bf16.msra.mxu1 %v12621_v1  ;;  %11700 = vmatprep.subr.bf16.mxu0 %v12622_v48  ;;  %v12645_v39 = vld [vmem:[#allocation4 + $0x1a8] sm:$0xff]   ;;  %v12648_v9 = vld [vmem:[#allocation4 + $0x1e0] sm:$0xff]   ;;  %v21521_v7 = vld [vmem:[#allocation32_spill] sm:$0xff] }
 0x76a   : > { %11764 = vmatprep.subr.bf16.mxu1 %v12623_v44  ;;  %v21518_v3 = vld [vmem:[#allocation27_spill] sm:$0xff]  ;;  %v12649_v46 = vld [vmem:[#allocation4 + $0x1a0] sm:$0xff]   ;;  %v7987_v27 = vpack.c.bf16 %v21521_v7, %v21520_v17  ;;  %v12650_v19 = vld [vmem:[#allocation4 + $0x158] sm:$0xff]  }
 0x76b   : > { %v21519_v53 = vld [vmem:[#allocation31_spill] sm:$0xff]  ;;  %v21522_v5 = vld [vmem:[#allocation37_spill] sm:$0xff]  ;;  %v21524_v22 = vld [vmem:[#allocation38_spill] sm:$0xff] }
 0x76c   : > { %11701 = vmatpush3.bf16.msra.mxu0 %v12624_v18  ;;  %v7985_v55 = vpack.c.bf16 %v21519_v53, %v21518_v3  ;;  %v21523_v37 = vld [vmem:[#allocation41_spill] sm:$0xff]  ;;  %v21525_v1 = vld [vmem:[#allocation42_spill] sm:$0xff]  ;;  %v21529_v14 = vld [vmem:[#allocation40_spill] sm:$0xff] }
 0x76d   : > { %11765 = vmatpush3.bf16.msra.mxu1 %v12625_v45  ;;  %11702 = vmatprep.subr.bf16.mxu0 %v12626_v11  ;;  %v7998_v23 = vpack.c.bf16 %v21523_v37, %v21522_v5  ;;  %v8000_v48 = vpack.c.bf16 %v21525_v1, %v21524_v22  ;;  %v12651_v44 = vld [vmem:[#allocation4 + $0x118] sm:$0xff]   ;;  %v12654_v11 = vld [vmem:[#allocation4 + $0x150] sm:$0xff]   ;;  %v12659_v61 = vld [vmem:[#allocation4 + $0x108] sm:$0xff]  }
 0x76e   : > { %11766 = vmatprep.subr.bf16.mxu1 %v12627_v24  ;;  %v12652_v18 = vld [vmem:[#allocation4 + $0x1d8] sm:$0xff]   ;;  %v12655_v24 = vld [vmem:[#allocation4 + $0x110] sm:$0xff]   ;;  %v12662_v42 = vld [vmem:[#allocation4 + $0x140] sm:$0xff]  }
 0x76f   : > { %v12653_v45 = vld [vmem:[#allocation4 + $0x198] sm:$0xff]   ;;  %v12663_v36 = vld [vmem:[#allocation4 + $0x100] sm:$0xff]   ;;  %v21542_v51 = vld [vmem:[#allocation51_spill] sm:$0xff] }
 0x770   : > { %11703 = vmatpush3.bf16.msra.mxu0 %v12628_v12  ;;  %v12656_v12 = vld [vmem:[#allocation4 + $0x1d0] sm:$0xff]   ;;  %v21531_v59 = vld [vmem:[#allocation49_spill] sm:$0xff]  ;;  %v21540_v34 = vld [vmem:[#allocation54_spill] sm:$0xff] }
 0x771   : > { %11767 = vmatpush3.bf16.msra.mxu1 %v12629_v21  ;;  %11704 = vmatprep.subr.bf16.mxu0 %v12630_v40  ;;  %v21526_v21 = vld [vmem:[#allocation35_spill] sm:$0xff]  ;;  %v21536_v30 = vld [vmem:[#allocation44_spill] sm:$0xff]  ;;  %v21539_v58 = vld [vmem:[#allocation57_spill] sm:$0xff] }
 0x772   : > { %11768 = vmatprep.subr.bf16.mxu1 %v12631_v35  ;;  %v21527_v40 = vld [vmem:[#allocation39_spill] sm:$0xff]  ;;  %v21537_v20 = vld [vmem:[#allocation48_spill] sm:$0xff]  ;;  %v21541_v4 = vld [vmem:[#allocation58_spill] sm:$0xff] }
 0x773   : > { %v7997_v35 = vpack.c.bf16 %v21527_v40, %v21526_v21  ;;  %v21543_v49 = vld [vmem:[#allocation55_spill] sm:$0xff]  ;;  %v21548_v3 = vld [vmem:[#allocation62_spill] sm:$0xff]  ;;  %v21549_v53 = vld [vmem:[#allocation68_spill] sm:$0xff] }
 0x774   : > { %11705 = vmatpush3.bf16.msra.mxu0 %v12632_v47  ;;  %v12657_v47 = vld [vmem:[#allocation4 + $0x190] sm:$0xff]   ;;  %v21556_v1 = vld [vmem:[#allocation74_spill] sm:$0xff]  ;;  %v21562_v40 = vld [vmem:[#allocation81_spill] sm:$0xff] }
 0x775   : > { %11769 = vmatpush3.bf16.msra.mxu1 %v12633_v28  ;;  %11818 = vmatprep.subr.bf16.mxu0 %v12634_v56  ;;  %v21528_v28 = vld [vmem:[#allocation36_spill] sm:$0xff]  ;;  %v21532_v56 = vld [vmem:[#allocation46_spill] sm:$0xff]  ;;  %v21551_v17 = vld [vmem:[#allocation63_spill] sm:$0xff] }
 0x776   : > { %11882 = vmatprep.subr.bf16.mxu1 %v12636_v43  ;;  %v7999_v25 = vpack.c.bf16 %v21529_v14, %v21528_v28  ;;  %v12661_v43 = vld [vmem:[#allocation4 + $0x188] sm:$0xff]   ;;  %v21553_v5 = vld [vmem:[#allocation64_spill] sm:$0xff] }
 0x777   : > { %8865 = vmatmul.mubr.bf16.vlgmr.msra.gmra.mxu0 %v7961_v6  ;;  %v21530_v6 = vld [vmem:[#allocation45_spill] sm:$0xff]  ;;  %v21564_v28 = vld [vmem:[#allocation82_spill] sm:$0xff] }
 0x778   : > { %8962 = vmatmul.mubr.bf16.vlgmr.msra.gmra.mxu1 %v7963_v8  ;;  %11819 = vmatpush3.bf16.msra.mxu0 %v12635_v54  ;;  %v8010_v16 = vpack.c.bf16 %v21531_v59, %v21530_v6  ;;  %v12658_v8 = vld [vmem:[#allocation4 + $0x148] sm:$0xff]  }
 0x779   : > { %8872 = vmatprep.mubr.bf16.mxu0 %v7974_v0  ;;  %11883 = vmatpush3.bf16.msra.mxu1 %v12637_v60  ;;  %v21533_v54 = vld [vmem:[#allocation50_spill] sm:$0xff]  ;;  %v21534_v60 = vld [vmem:[#allocation43_spill] sm:$0xff] }
 0x77a   : > { %8969 = vmatprep.mubr.bf16.mxu1 %v7976_v29  ;;  %11820 = vmatprep.subr.bf16.mxu0 %v12638_v63  ;;  %v8012_v15 = vpack.c.bf16 %v21533_v54, %v21532_v56  ;;  %v12660_v0 = vld [vmem:[#allocation4 + $0x1c8] sm:$0xff]   ;;  %v12664_v29 = vld [vmem:[#allocation4 + $0x1c0] sm:$0xff]   ;;  %v21569_v56 = vld [vmem:[#allocation84_spill] sm:$0xff] }
 0x77b   : > { %11884 = vmatprep.subr.bf16.mxu1 %v12640_v33  ;;  %v21535_v63 = vld [vmem:[#allocation47_spill] sm:$0xff]  ;;  %v12665_v33 = vld [vmem:[#allocation4 + $0x180] sm:$0xff]  }
 0x77c   : > { %11821 = vmatpush3.bf16.msra.mxu0 %v12639_v52  ;;  %v8009_v52 = vpack.c.bf16 %v21535_v63, %v21534_v60  ;;  %v21565_v14 = vld [vmem:[#allocation86_spill] sm:$0xff]  ;;  %v21566_v6 = vld [vmem:[#allocation79_spill] sm:$0xff] }
 0x77d   : > { %11885 = vmatpush3.bf16.msra.mxu1 %v12641_v10  ;;  %11822 = vmatprep.subr.bf16.mxu0 %v12642_v62  ;;  %v21538_v10 = vld [vmem:[#allocation53_spill] sm:$0xff]  ;;  %v21567_v59 = vld [vmem:[#allocation83_spill] sm:$0xff] }
 0x77e   : > { %11886 = vmatprep.subr.bf16.mxu1 %v12644_v41  ;;  %v8022_v2 = vpack.c.bf16 %v21539_v58, %v21538_v10  ;;  %v12668_v62 = vld [vmem:[#allocation4 + $0x2f8] sm:$0xff]   ;;  %v12670_v63 = vld [vmem:[#allocation4 + $0x270] sm:$0xff]  }
 0x77f   : > { %8873 = vmatmul.mubr.bf16.gmra.mxu0 %v7973_v50  ;;  %v8011_v50 = vpack.c.bf16 %v21537_v20, %v21536_v30  ;;  %v21545_v41 = vld [vmem:[#allocation56_spill] sm:$0xff]  ;;  %v12674_v20 = vld [vmem:[#allocation4 + $0x268] sm:$0xff]  }
 0x780   : > { %8970 = vmatmul.mubr.bf16.gmra.mxu1 %v7975_v57  ;;  %8880 = vmatprep.mubr.bf16.mxu0 %v7986_v38  ;;  %v12666_v57 = vld [vmem:[#allocation4 + $0x278] sm:$0xff]   ;;  %v8024_v38 = vpack.c.bf16 %v21541_v4, %v21540_v34  ;;  %v12673_v30 = vld [vmem:[#allocation4 + $0x2b0] sm:$0xff]  }
 0x781   : > { %8977 = vmatprep.mubr.bf16.mxu1 %v7988_v32  ;;  %11823 = vmatpush3.bf16.msra.mxu0 %v12643_v31  ;;  %v8021_v32 = vpack.c.bf16 %v21543_v49, %v21542_v51  ;;  %v21544_v31 = vld [vmem:[#allocation52_spill] sm:$0xff]  ;;  %v21574_v10 = vld [vmem:[#allocation87_spill] sm:$0xff]  ;;  %v21580_v49 = vld [vmem:[#allocation98_spill] sm:$0xff] }
 0x782   : > { %11824 = vmatprep.subr.bf16.mxu0 %v12646_v13  ;;  %11887 = vmatpush3.bf16.msra.mxu1 %v12645_v39  ;;  %v8023_v39 = vpack.c.bf16 %v21545_v41, %v21544_v31  ;;  %v21546_v13 = vld [vmem:[#allocation61_spill] sm:$0xff]  ;;  %v21575_v58 = vld [vmem:[#allocation91_spill] sm:$0xff]  ;;  %v21577_v34 = vld [vmem:[#allocation92_spill] sm:$0xff] }
 0x783   : > { %11888 = vmatprep.subr.bf16.mxu1 %v12648_v9  ;;  %v12675_v41 = vld [vmem:[#allocation4 + $0x228] sm:$0xff]  }
 0x785   : > { %11825 = vmatpush3.bf16.msra.mxu0 %v12647_v26  ;;  %v21547_v26 = vld [vmem:[#allocation67_spill] sm:$0xff] }
 0x786   : > { %11826 = vmatprep.subr.bf16.mxu0 %v12650_v19  ;;  %11889 = vmatpush3.bf16.msra.mxu1 %v12649_v46  ;;  %v8034_v9 = vpack.c.bf16 %v21547_v26, %v21546_v13  ;;  %v21550_v46 = vld [vmem:[#allocation59_spill] sm:$0xff]  ;;  %v21555_v19 = vld [vmem:[#allocation77_spill] sm:$0xff] }
 0x787   : > { %8881 = vmatmul.mubr.bf16.gmra.mxu0 %v7985_v55  ;;  %11890 = vmatprep.subr.bf16.mxu1 %v12652_v18  ;;  %v8036_v55 = vpack.c.bf16 %v21549_v53, %v21548_v3  ;;  %v8033_v7 = vpack.c.bf16 %v21551_v17, %v21550_v46  ;;  %v21558_v18 = vld [vmem:[#allocation71_spill] sm:$0xff]  ;;  %v12678_v13 = vld [vmem:[#allocation4 + $0x260] sm:$0xff]   ;;  %v12682_v53 = vld [vmem:[#allocation4 + $0x258] sm:$0xff]  }
 0x788   : > { %8978 = vmatmul.mubr.bf16.gmra.mxu1 %v7987_v27  ;;  %8888 = vmatprep.mubr.bf16.mxu0 %v7998_v23  ;;  %v21552_v27 = vld [vmem:[#allocation60_spill] sm:$0xff]  ;;  %v21554_v23 = vld [vmem:[#allocation73_spill] sm:$0xff]  ;;  %v21583_v46 = vld [vmem:[#allocation99_spill] sm:$0xff] }
 0x789   : > { %8985 = vmatprep.mubr.bf16.mxu1 %v8000_v48  ;;  %11827 = vmatpush3.bf16.msra.mxu0 %v12651_v44  ;;  %v8035_v37 = vpack.c.bf16 %v21553_v5, %v21552_v27  ;;  %v8046_v22 = vpack.c.bf16 %v21555_v19, %v21554_v23  ;;  %v21557_v48 = vld [vmem:[#allocation78_spill] sm:$0xff]  ;;  %v21584_v27 = vld [vmem:[#allocation96_spill] sm:$0xff]  ;;  %v21586_v23 = vld [vmem:[#allocation105_spill] sm:$0xff] }
 0x78a   : > { %11828 = vmatprep.subr.bf16.mxu0 %v12654_v11  ;;  %11891 = vmatpush3.bf16.msra.mxu1 %v12653_v45  ;;  %v8048_v44 = vpack.c.bf16 %v21557_v48, %v21556_v1  ;;  %v21559_v45 = vld [vmem:[#allocation75_spill] sm:$0xff]  ;;  %v12680_v26 = vld [vmem:[#allocation4 + $0x2e0] sm:$0xff]   ;;  %v21585_v5 = vld [vmem:[#allocation100_spill] sm:$0xff] }
 0x78b   : > { %11892 = vmatprep.subr.bf16.mxu1 %v12656_v12  ;;  %v8045_v11 = vpack.c.bf16 %v21559_v45, %v21558_v18  ;;  %v21561_v12 = vld [vmem:[#allocation76_spill] sm:$0xff]  ;;  %v12681_v3 = vld [vmem:[#allocation4 + $0x2a0] sm:$0xff]  }
 0x78c   : > { %v21587_v19 = vld [vmem:[#allocation109_spill] sm:$0xff]  ;;  %v21588_v1 = vld [vmem:[#allocation106_spill] sm:$0xff] }
 0x78d   : > { %11829 = vmatpush3.bf16.msra.mxu0 %v12655_v24  ;;  %v21560_v24 = vld [vmem:[#allocation72_spill] sm:$0xff]  ;;  %v21589_v48 = vld [vmem:[#allocation110_spill] sm:$0xff] }
 0x78e   : > { %11830 = vmatprep.subr.bf16.mxu0 %v12658_v8  ;;  %11893 = vmatpush3.bf16.msra.mxu1 %v12657_v47  ;;  %v8047_v21 = vpack.c.bf16 %v21561_v12, %v21560_v24  ;;  %v21568_v8 = vld [vmem:[#allocation80_spill] sm:$0xff] }
 0x78f   : > { %8889 = vmatmul.mubr.bf16.gmra.mxu0 %v7997_v35  ;;  %11894 = vmatprep.subr.bf16.mxu1 %v12660_v0  ;;  %v21563_v35 = vld [vmem:[#allocation85_spill] sm:$0xff]  ;;  %v7967_v54 = vpack.c.bf16 %v21569_v56, %v21568_v8  ;;  %v12688_v24 = vld [vmem:[#allocation4 + $0x2d0] sm:$0xff]  }
 0x790   : > { %8986 = vmatmul.mubr.bf16.gmra.mxu1 %v7999_v25  ;;  %8896 = vmatprep.mubr.bf16.mxu0 %v8010_v16  ;;  %v7966_v47 = vpack.c.bf16 %v21563_v35, %v21562_v40  ;;  %v7968_v25 = vpack.c.bf16 %v21565_v14, %v21564_v28  ;;  %v7965_v16 = vpack.c.bf16 %v21567_v59, %v21566_v6  ;;  %v21570_v0 = vld [vmem:[#allocation89_spill] sm:$0xff]  ;;  %v12687_v12 = vld [vmem:[#allocation4 + $0x210] sm:$0xff]   ;;  %v12690_v40 = vld [vmem:[#allocation4 + $0x248] sm:$0xff]  }
 0x791   : > { %8993 = vmatprep.mubr.bf16.mxu1 %v8012_v15  ;;  %11831 = vmatpush3.bf16.msra.mxu0 %v12659_v61  ;;  %v12667_v15 = vld [vmem:[#allocation4 + $0x238] sm:$0xff]   ;;  %v21590_v35 = vld [vmem:[#allocation103_spill] sm:$0xff] }
 0x792   : > { %11832 = vmatprep.subr.bf16.mxu0 %v12662_v42  ;;  %11895 = vmatpush3.bf16.msra.mxu1 %v12661_v43  ;;  %v12669_v61 = vld [vmem:[#allocation4 + $0x2b8] sm:$0xff]   ;;  %v12692_v14 = vld [vmem:[#allocation4 + $0x2c8] sm:$0xff]  }
 0x793   : > { %11896 = vmatprep.subr.bf16.mxu1 %v12664_v29  ;;  %v21571_v43 = vld [vmem:[#allocation93_spill] sm:$0xff]  ;;  %v21573_v29 = vld [vmem:[#allocation94_spill] sm:$0xff]  ;;  %v21593_v6 = vld [vmem:[#allocation108_spill] sm:$0xff] }
 0x794   : > { %v7978_v42 = vpack.c.bf16 %v21571_v43, %v21570_v0  ;;  %v12683_v18 = vld [vmem:[#allocation4 + $0x218] sm:$0xff]   ;;  %v12691_v0 = vld [vmem:[#allocation4 + $0x208] sm:$0xff]  }
 0x795   : > { %11833 = vmatpush3.bf16.msra.mxu0 %v12663_v36  ;;  %v21572_v36 = vld [vmem:[#allocation90_spill] sm:$0xff]  ;;  %v12685_v45 = vld [vmem:[#allocation4 + $0x298] sm:$0xff]  }
 0x796   : > { %11946 = vmatprep.subr.bf16.mxu0 %v12666_v57  ;;  %11897 = vmatpush3.bf16.msra.mxu1 %v12665_v33  ;;  %v7980_v60 = vpack.c.bf16 %v21573_v29, %v21572_v36  ;;  %v12671_v33 = vld [vmem:[#allocation4 + $0x230] sm:$0xff]   ;;  %v21595_v8 = vld [vmem:[#allocation117_spill] sm:$0xff]  ;;  %v12693_v43 = vld [vmem:[#allocation4 + $0x288] sm:$0xff]  }
 0x797   : > { %8897 = vmatmul.mubr.bf16.gmra.mxu0 %v8009_v52  ;;  %12010 = vmatprep.subr.bf16.mxu1 %v12668_v62  ;;  %v12672_v52 = vld [vmem:[#allocation4 + $0x2f0] sm:$0xff]   ;;  %v21579_v62 = vld [vmem:[#allocation101_spill] sm:$0xff] }
 0x798   : > { %8994 = vmatmul.mubr.bf16.gmra.mxu1 %v8011_v50  ;;  %8904 = vmatprep.mubr.bf16.mxu0 %v8022_v2  ;;  %v12676_v50 = vld [vmem:[#allocation4 + $0x2e8] sm:$0xff]   ;;  %v7977_v2 = vpack.c.bf16 %v21575_v58, %v21574_v10  ;;  %v21576_v57 = vld [vmem:[#allocation88_spill] sm:$0xff]  ;;  %v12696_v36 = vld [vmem:[#allocation4 + $0x2c0] sm:$0xff]  }
 0x799   : > { %9001 = vmatprep.mubr.bf16.mxu1 %v8024_v38  ;;  %v7979_v4 = vpack.c.bf16 %v21577_v34, %v21576_v57  ;;  %v21578_v38 = vld [vmem:[#allocation97_spill] sm:$0xff]  ;;  %v21604_v57 = vld [vmem:[#allocation122_spill] sm:$0xff] }
 0x79a   : > { %v7990_v51 = vpack.c.bf16 %v21579_v62, %v21578_v38  ;;  %v12695_v29 = vld [vmem:[#allocation4 + $0x200] sm:$0xff]   ;;  %v21606_v38 = vld [vmem:[#allocation119_spill] sm:$0xff] }
 0x79b   : > { %v21602_v10 = vld [vmem:[#allocation121_spill] sm:$0xff]  ;;  %v21605_v34 = vld [vmem:[#allocation126_spill] sm:$0xff]  ;;  %v21607_v62 = vld [vmem:[#allocation123_spill] sm:$0xff] }
 0x79c   : > { %v21603_v58 = vld [vmem:[#allocation125_spill] sm:$0xff] }
 0x79f   : > { %8905 = vmatmul.mubr.bf16.gmra.mxu0 %v8021_v32  ;;  %v21581_v32 = vld [vmem:[#allocation102_spill] sm:$0xff] }
 0x7a0   : > { %9002 = vmatmul.mubr.bf16.gmra.mxu1 %v8023_v39  ;;  %8912 = vmatprep.mubr.bf16.mxu0 %v8034_v9  ;;  %v7992_v31 = vpack.c.bf16 %v21581_v32, %v21580_v49  ;;  %v12677_v39 = vld [vmem:[#allocation4 + $0x2a8] sm:$0xff]   ;;  %v12679_v9 = vld [vmem:[#allocation4 + $0x220] sm:$0xff]   ;;  %v21608_v49 = vld [vmem:[#allocation120_spill] sm:$0xff] }
 0x7a1   : > { %9009 = vmatprep.mubr.bf16.mxu1 %v8036_v55  ;;  %v21582_v55 = vld [vmem:[#allocation95_spill] sm:$0xff]  ;;  %v21609_v32 = vld [vmem:[#allocation124_spill] sm:$0xff] }
 0x7a2   : > { %v7989_v17 = vpack.c.bf16 %v21583_v46, %v21582_v55  ;;  %v21615_v55 = vld [vmem:[#allocation131_spill] sm:$0xff] }
 0x7a7   : > { %8913 = vmatmul.mubr.bf16.gmra.mxu0 %v8033_v7  ;;  %v12684_v7 = vld [vmem:[#allocation4 + $0x2d8] sm:$0xff]  }
 0x7a8   : > { %9010 = vmatmul.mubr.bf16.gmra.mxu1 %v8035_v37  ;;  %8920 = vmatprep.mubr.bf16.mxu0 %v8046_v22  ;;  %v7991_v37 = vpack.c.bf16 %v21585_v5, %v21584_v27  ;;  %v8002_v22 = vpack.c.bf16 %v21587_v19, %v21586_v23  ;;  %v21618_v5 = vld [vmem:[#allocation137_spill] sm:$0xff]  ;;  %v21620_v19 = vld [vmem:[#allocation138_spill] sm:$0xff] }
 0x7a9   : > { %9017 = vmatprep.mubr.bf16.mxu1 %v8048_v44  ;;  %v8004_v44 = vpack.c.bf16 %v21589_v48, %v21588_v1  ;;  %v21622_v48 = vld [vmem:[#allocation135_spill] sm:$0xff] }
 0x7af   : > { %8921 = vmatmul.mubr.bf16.gmra.mxu0 %v8045_v11  ;;  %v12686_v11 = vld [vmem:[#allocation4 + $0x250] sm:$0xff]  }
 0x7b0   : > { %9018 = vmatmul.mubr.bf16.gmra.mxu1 %v8047_v21  ;;  %9058 = vmatprep.mubr.bf16.mxu0 %v7966_v47  ;;  %v12689_v21 = vld [vmem:[#allocation4 + $0x290] sm:$0xff]  }
 0x7b1   : > { %9155 = vmatprep.mubr.bf16.mxu1 %v7968_v25  ;;  %v21591_v47 = vld [vmem:[#allocation107_spill] sm:$0xff]  ;;  %v21592_v25 = vld [vmem:[#allocation104_spill] sm:$0xff] }
 0x7b2   : > { %v8001_v28 = vpack.c.bf16 %v21591_v47, %v21590_v35  ;;  %v8003_v59 = vpack.c.bf16 %v21593_v6, %v21592_v25  ;;  %v21628_v35 = vld [vmem:[#allocation146_spill] sm:$0xff]  ;;  %v21631_v25 = vld [vmem:[#allocation147_spill] sm:$0xff] }
 0x7b3   : > { %v21629_v47 = vld [vmem:[#allocation150_spill] sm:$0xff] }
 0x7b7   : > { %9059 = vmatmul.mubr.bf16.vlgmr.msra.gmra.mxu0 %v7965_v16  ;;  %v21594_v16 = vld [vmem:[#allocation113_spill] sm:$0xff] }
 0x7b8   : > { %9156 = vmatmul.mubr.bf16.vlgmr.msra.gmra.mxu1 %v7967_v54  ;;  %11947 = vmatpush3.bf16.msra.mxu0 %v12667_v15  ;;  %v8014_v56 = vpack.c.bf16 %v21595_v8, %v21594_v16  ;;  %v21596_v54 = vld [vmem:[#allocation114_spill] sm:$0xff]  ;;  %v21633_v16 = vld [vmem:[#allocation148_spill] sm:$0xff] }
 0x7b9   : > { %12011 = vmatpush3.bf16.msra.mxu1 %v12669_v61  ;;  %9066 = vmatprep.mubr.bf16.mxu0 %v7978_v42  ;;  %v21597_v15 = vld [vmem:[#allocation118_spill] sm:$0xff] }
 0x7ba   : > { %9163 = vmatprep.mubr.bf16.mxu1 %v7980_v60  ;;  %11948 = vmatprep.subr.bf16.mxu0 %v12670_v63  ;;  %v8016_v61 = vpack.c.bf16 %v21597_v15, %v21596_v54  ;;  %v12694_v42 = vld [vmem:[#allocation4 + $0x240] sm:$0xff]   ;;  %v21598_v63 = vld [vmem:[#allocation111_spill] sm:$0xff] }
 0x7bb   : > { %12012 = vmatprep.subr.bf16.mxu1 %v12672_v52  ;;  %v12697_v60 = vld [vmem:[#allocation4 + $0x280] sm:$0xff]   ;;  %v21599_v52 = vld [vmem:[#allocation115_spill] sm:$0xff] }
 0x7bc   : > { %11949 = vmatpush3.bf16.msra.mxu0 %v12671_v33  ;;  %v8013_v33 = vpack.c.bf16 %v21599_v52, %v21598_v63  ;;  %v21635_v54 = vld [vmem:[#allocation157_spill] sm:$0xff]  ;;  %v21641_v63 = vld [vmem:[#allocation156_spill] sm:$0xff] }
 0x7bd   : > { %12013 = vmatpush3.bf16.msra.mxu1 %v12673_v30  ;;  %11950 = vmatprep.subr.bf16.mxu0 %v12674_v20  ;;  %v21600_v30 = vld [vmem:[#allocation112_spill] sm:$0xff] }
 0x7be   : > { %12014 = vmatprep.subr.bf16.mxu1 %v12676_v50  ;;  %v21601_v20 = vld [vmem:[#allocation116_spill] sm:$0xff] }
 0x7bf   : > { %9067 = vmatmul.mubr.bf16.gmra.mxu0 %v7977_v2  ;;  %v8015_v50 = vpack.c.bf16 %v21601_v20, %v21600_v30  ;;  %v8026_v2 = vpack.c.bf16 %v21603_v58, %v21602_v10  ;;  %v21643_v30 = vld [vmem:[#allocation165_spill] sm:$0xff]  ;;  %v21645_v10 = vld [vmem:[#allocation166_spill] sm:$0xff] }
 0x7c0   : > { %9164 = vmatmul.mubr.bf16.gmra.mxu1 %v7979_v4  ;;  %9074 = vmatprep.mubr.bf16.mxu0 %v7990_v51  ;;  %v8028_v4 = vpack.c.bf16 %v21605_v34, %v21604_v57  ;;  %v8025_v51 = vpack.c.bf16 %v21607_v62, %v21606_v38  ;;  %v21647_v57 = vld [vmem:[#allocation163_spill] sm:$0xff]  ;;  %v21649_v38 = vld [vmem:[#allocation164_spill] sm:$0xff] }
 0x7c1   : > { %9171 = vmatprep.mubr.bf16.mxu1 %v7992_v31  ;;  %11951 = vmatpush3.bf16.msra.mxu0 %v12675_v41  ;;  %v8027_v31 = vpack.c.bf16 %v21609_v32, %v21608_v49  ;;  %v21610_v41 = vld [vmem:[#allocation129_spill] sm:$0xff] }
 0x7c2   : > { %12015 = vmatpush3.bf16.msra.mxu1 %v12677_v39  ;;  %11952 = vmatprep.subr.bf16.mxu0 %v12678_v13  ;;  %v21611_v39 = vld [vmem:[#allocation133_spill] sm:$0xff] }
 0x7c3   : > { %12016 = vmatprep.subr.bf16.mxu1 %v12680_v26  ;;  %v8038_v13 = vpack.c.bf16 %v21611_v39, %v21610_v41  ;;  %v21612_v26 = vld [vmem:[#allocation130_spill] sm:$0xff]  ;;  %v21651_v49 = vld [vmem:[#allocation173_spill] sm:$0xff] }
 0x7c4   : > { %v21653_v41 = vld [vmem:[#allocation174_spill] sm:$0xff] }
 0x7c5   : > { %11953 = vmatpush3.bf16.msra.mxu0 %v12679_v9  ;;  %v21613_v9 = vld [vmem:[#allocation134_spill] sm:$0xff] }
 0x7c6   : > { %12017 = vmatpush3.bf16.msra.mxu1 %v12681_v3  ;;  %11954 = vmatprep.subr.bf16.mxu0 %v12682_v53  ;;  %v8040_v3 = vpack.c.bf16 %v21613_v9, %v21612_v26  ;;  %v21614_v53 = vld [vmem:[#allocation127_spill] sm:$0xff] }
 0x7c7   : > { %9075 = vmatmul.mubr.bf16.gmra.mxu0 %v7989_v17  ;;  %12018 = vmatprep.subr.bf16.mxu1 %v12684_v7  ;;  %v8037_v46 = vpack.c.bf16 %v21615_v55, %v21614_v53  ;;  %v21616_v17 = vld [vmem:[#allocation128_spill] sm:$0xff]  ;;  %v21655_v26 = vld [vmem:[#allocation171_spill] sm:$0xff] }
 0x7c8   : > { %9172 = vmatmul.mubr.bf16.gmra.mxu1 %v7991_v37  ;;  %9082 = vmatprep.mubr.bf16.mxu0 %v8002_v22  ;;  %v21617_v7 = vld [vmem:[#allocation132_spill] sm:$0xff]  ;;  %v21619_v37 = vld [vmem:[#allocation141_spill] sm:$0xff]  ;;  %v21621_v22 = vld [vmem:[#allocation142_spill] sm:$0xff] }
 0x7c9   : > { %9179 = vmatprep.mubr.bf16.mxu1 %v8004_v44  ;;  %11955 = vmatpush3.bf16.msra.mxu0 %v12683_v18  ;;  %v8039_v27 = vpack.c.bf16 %v21617_v7, %v21616_v17  ;;  %v8050_v23 = vpack.c.bf16 %v21619_v37, %v21618_v5  ;;  %v8052_v1 = vpack.c.bf16 %v21621_v22, %v21620_v19  ;;  %v21623_v44 = vld [vmem:[#allocation139_spill] sm:$0xff]  ;;  %v21657_v53 = vld [vmem:[#allocation172_spill] sm:$0xff]  ;;  %v21659_v17 = vld [vmem:[#allocation181_spill] sm:$0xff] }
 0x7ca   : > { %12019 = vmatpush3.bf16.msra.mxu1 %v12685_v45  ;;  %11956 = vmatprep.subr.bf16.mxu0 %v12686_v11  ;;  %v8049_v18 = vpack.c.bf16 %v21623_v44, %v21622_v48  ;;  %v21624_v45 = vld [vmem:[#allocation136_spill] sm:$0xff]  ;;  %v21661_v5 = vld [vmem:[#allocation182_spill] sm:$0xff]  ;;  %v21663_v19 = vld [vmem:[#allocation179_spill] sm:$0xff] }
 0x7cb   : > { %12020 = vmatprep.subr.bf16.mxu1 %v12688_v24  ;;  %v21625_v11 = vld [vmem:[#allocation140_spill] sm:$0xff] }
 0x7cc   : > { %v8051_v24 = vpack.c.bf16 %v21625_v11, %v21624_v45  ;;  %v21665_v48 = vld [vmem:[#allocation180_spill] sm:$0xff]  ;;  %v21667_v45 = vld [vmem:[#allocation189_spill] sm:$0xff] }
 0x7cd   : > { %11957 = vmatpush3.bf16.msra.mxu0 %v12687_v12  ;;  %v21626_v12 = vld [vmem:[#allocation145_spill] sm:$0xff] }
 0x7ce   : > { %12021 = vmatpush3.bf16.msra.mxu1 %v12689_v21  ;;  %11958 = vmatprep.subr.bf16.mxu0 %v12690_v40  ;;  %v21627_v21 = vld [vmem:[#allocation149_spill] sm:$0xff] }
 0x7cf   : > { %9083 = vmatmul.mubr.bf16.gmra.mxu0 %v8001_v28  ;;  %12022 = vmatprep.subr.bf16.mxu1 %v12692_v14  ;;  %v7970_v40 = vpack.c.bf16 %v21627_v21, %v21626_v12  ;;  %v7972_v28 = vpack.c.bf16 %v21629_v47, %v21628_v35  ;;  %v21630_v14 = vld [vmem:[#allocation143_spill] sm:$0xff]  ;;  %v21669_v12 = vld [vmem:[#allocation190_spill] sm:$0xff] }
 0x7d0   : > { %9180 = vmatmul.mubr.bf16.gmra.mxu1 %v8003_v59  ;;  %9090 = vmatprep.mubr.bf16.mxu0 %v8014_v56  ;;  %v7969_v6 = vpack.c.bf16 %v21631_v25, %v21630_v14  ;;  %v21632_v59 = vld [vmem:[#allocation144_spill] sm:$0xff]  ;;  %v21634_v56 = vld [vmem:[#allocation153_spill] sm:$0xff]  ;;  %v21671_v35 = vld [vmem:[#allocation187_spill] sm:$0xff] }
 0x7d1   : > { %9187 = vmatprep.mubr.bf16.mxu1 %v8016_v61  ;;  %11959 = vmatpush3.bf16.msra.mxu0 %v12691_v0  ;;  %v7971_v8 = vpack.c.bf16 %v21633_v16, %v21632_v59  ;;  %v7982_v15 = vpack.c.bf16 %v21635_v54, %v21634_v56  ;;  %v21636_v61 = vld [vmem:[#allocation154_spill] sm:$0xff]  ;;  %v21673_v14 = vld [vmem:[#allocation188_spill] sm:$0xff]  ;;  %v21675_v59 = vld [vmem:[#allocation197_spill] sm:$0xff] }
 0x7d2   : > { %12023 = vmatpush3.bf16.msra.mxu1 %v12693_v43  ;;  %11960 = vmatprep.subr.bf16.mxu0 %v12694_v42  ;;  %v21637_v0 = vld [vmem:[#allocation158_spill] sm:$0xff]  ;;  %v21638_v42 = vld [vmem:[#allocation151_spill] sm:$0xff] }
 0x7d3   : > { %12024 = vmatprep.subr.bf16.mxu1 %v12696_v36  ;;  %v7984_v43 = vpack.c.bf16 %v21637_v0, %v21636_v61  ;;  %v21639_v36 = vld [vmem:[#allocation155_spill] sm:$0xff]  ;;  %v21677_v56 = vld [vmem:[#allocation198_spill] sm:$0xff] }
 0x7d4   : > { %v21679_v61 = vld [vmem:[#allocation195_spill] sm:$0xff] }
 0x7d5   : > { %11961 = vmatpush3.bf16.msra.mxu0 %v12695_v29  ;;  %v7981_v29 = vpack.c.bf16 %v21639_v36, %v21638_v42  ;;  %v21681_v42 = vld [vmem:[#allocation196_spill] sm:$0xff] }
 0x7d6   : > { %12025 = vmatpush3.bf16.msra.mxu1 %v12697_v60  ;;  %v21640_v60 = vld [vmem:[#allocation152_spill] sm:$0xff] }
 0x7d7   : > { %9091 = vmatmul.mubr.bf16.gmra.mxu0 %v8013_v33  ;;  %v7983_v52 = vpack.c.bf16 %v21641_v63, %v21640_v60  ;;  %v21642_v33 = vld [vmem:[#allocation161_spill] sm:$0xff] }
 0x7d8   : > { %9188 = vmatmul.mubr.bf16.gmra.mxu1 %v8015_v50  ;;  %9098 = vmatprep.mubr.bf16.mxu0 %v8026_v2  ;;  %v7994_v20 = vpack.c.bf16 %v21643_v30, %v21642_v33  ;;  %v21644_v50 = vld [vmem:[#allocation162_spill] sm:$0xff]  ;;  %v21646_v2 = vld [vmem:[#allocation159_spill] sm:$0xff]  ;;  %v21683_v60 = vld [vmem:[#allocation205_spill] sm:$0xff] }
 0x7d9   : > { %9195 = vmatprep.mubr.bf16.mxu1 %v8028_v4  ;;  %v7996_v58 = vpack.c.bf16 %v21645_v10, %v21644_v50  ;;  %v7993_v34 = vpack.c.bf16 %v21647_v57, %v21646_v2  ;;  %v21648_v4 = vld [vmem:[#allocation160_spill] sm:$0xff]  ;;  %v21685_v33 = vld [vmem:[#allocation206_spill] sm:$0xff]  ;;  %v21687_v50 = vld [vmem:[#allocation203_spill] sm:$0xff] }
 0x7da   : > { %v7995_v62 = vpack.c.bf16 %v21649_v38, %v21648_v4  ;;  %v21689_v2 = vld [vmem:[#allocation204_spill] sm:$0xff]  ;;  %v19457_v38 = vld [vmem:[#allocation5] ss:$0 sm:$0xff] }
 0x7df   : > { %9099 = vmatmul.mubr.bf16.gmra.mxu0 %v8025_v51  ;;  %v21650_v51 = vld [vmem:[#allocation169_spill] sm:$0xff] }
 0x7e0   : > { %9196 = vmatmul.mubr.bf16.gmra.mxu1 %v8027_v31  ;;  %9106 = vmatprep.mubr.bf16.mxu0 %v8038_v13  ;;  %v8006_v32 = vpack.c.bf16 %v21651_v49, %v21650_v51  ;;  %v21652_v31 = vld [vmem:[#allocation170_spill] sm:$0xff]  ;;  %v21654_v13 = vld [vmem:[#allocation167_spill] sm:$0xff] }
 0x7e1   : > { %9203 = vmatprep.mubr.bf16.mxu1 %v8040_v3  ;;  %v8008_v39 = vpack.c.bf16 %v21653_v41, %v21652_v31  ;;  %v8005_v9 = vpack.c.bf16 %v21655_v26, %v21654_v13  ;;  %v21656_v3 = vld [vmem:[#allocation168_spill] sm:$0xff] }
 0x7e2   : > { %v8007_v55 = vpack.c.bf16 %v21657_v53, %v21656_v3 }
 0x7e7   : > { %9107 = vmatmul.mubr.bf16.gmra.mxu0 %v8037_v46  ;;  %v21658_v46 = vld [vmem:[#allocation177_spill] sm:$0xff] }
 0x7e8   : > { %9204 = vmatmul.mubr.bf16.gmra.mxu1 %v8039_v27  ;;  %9114 = vmatprep.mubr.bf16.mxu0 %v8050_v23  ;;  %v8018_v7 = vpack.c.bf16 %v21659_v17, %v21658_v46  ;;  %v21660_v27 = vld [vmem:[#allocation178_spill] sm:$0xff]  ;;  %v21662_v23 = vld [vmem:[#allocation175_spill] sm:$0xff] }
 0x7e9   : > { %9211 = vmatprep.mubr.bf16.mxu1 %v8052_v1  ;;  %v8020_v37 = vpack.c.bf16 %v21661_v5, %v21660_v27  ;;  %v8017_v22 = vpack.c.bf16 %v21663_v19, %v21662_v23  ;;  %v21664_v1 = vld [vmem:[#allocation176_spill] sm:$0xff] }
 0x7ea   : > { %v8019_v44 = vpack.c.bf16 %v21665_v48, %v21664_v1 }
 0x7ef   : > { %9115 = vmatmul.mubr.bf16.gmra.mxu0 %v8049_v18  ;;  %v21666_v18 = vld [vmem:[#allocation185_spill] sm:$0xff] }
 0x7f0   : > { %9212 = vmatmul.mubr.bf16.gmra.mxu1 %v8051_v24  ;;  %9252 = vmatprep.mubr.bf16.mxu0 %v7970_v40  ;;  %v8030_v11 = vpack.c.bf16 %v21667_v45, %v21666_v18  ;;  %v21668_v24 = vld [vmem:[#allocation186_spill] sm:$0xff]  ;;  %v21670_v40 = vld [vmem:[#allocation183_spill] sm:$0xff] }
 0x7f1   : > { %9349 = vmatprep.mubr.bf16.mxu1 %v7972_v28  ;;  %v8032_v21 = vpack.c.bf16 %v21669_v12, %v21668_v24  ;;  %v8029_v47 = vpack.c.bf16 %v21671_v35, %v21670_v40  ;;  %v21672_v28 = vld [vmem:[#allocation184_spill] sm:$0xff] }
 0x7f2   : > { %v8031_v25 = vpack.c.bf16 %v21673_v14, %v21672_v28 }
 0x7f7   : > { %9253 = vmatmul.mubr.bf16.vlgmr.msra.gmra.mxu0 %v7969_v6  ;;  %v21674_v6 = vld [vmem:[#allocation193_spill] sm:$0xff] }
 0x7f8   : > { %9350 = vmatmul.mubr.bf16.vlgmr.msra.gmra.mxu1 %v7971_v8  ;;  %9260 = vmatprep.mubr.bf16.mxu0 %v7982_v15  ;;  %v8042_v16 = vpack.c.bf16 %v21675_v59, %v21674_v6  ;;  %v21676_v8 = vld [vmem:[#allocation194_spill] sm:$0xff]  ;;  %v21678_v15 = vld [vmem:[#allocation191_spill] sm:$0xff] }
 0x7f9   : > { %9357 = vmatprep.mubr.bf16.mxu1 %v7984_v43  ;;  %v8044_v54 = vpack.c.bf16 %v21677_v56, %v21676_v8  ;;  %v8041_v0 = vpack.c.bf16 %v21679_v61, %v21678_v15  ;;  %v21680_v43 = vld [vmem:[#allocation192_spill] sm:$0xff] }
 0x7fa   : > { %v8043_v36 = vpack.c.bf16 %v21681_v42, %v21680_v43 }
 0x7ff   : > { %9261 = vmatmul.mubr.bf16.gmra.mxu0 %v7981_v29  ;;  %v21682_v29 = vld [vmem:[#allocation201_spill] sm:$0xff] }
 0x800   : > { %9358 = vmatmul.mubr.bf16.gmra.mxu1 %v7983_v52  ;;  %9268 = vmatprep.mubr.bf16.mxu0 %v7994_v20  ;;  %v8054_v63 = vpack.c.bf16 %v21683_v60, %v21682_v29  ;;  %v21684_v52 = vld [vmem:[#allocation202_spill] sm:$0xff]  ;;  %v21686_v20 = vld [vmem:[#allocation199_spill] sm:$0xff] }
 0x801   : > { %9365 = vmatprep.mubr.bf16.mxu1 %v7996_v58  ;;  %v8056_v30 = vpack.c.bf16 %v21685_v33, %v21684_v52  ;;  %v8053_v10 = vpack.c.bf16 %v21687_v50, %v21686_v20  ;;  %v21688_v58 = vld [vmem:[#allocation200_spill] sm:$0xff] }
 0x802   : > { %v8055_v57 = vpack.c.bf16 %v21689_v2, %v21688_v58 }
 0x807   : > { %9269 = vmatmul.mubr.bf16.gmra.mxu0 %v7993_v34 }
 0x808   : > { %9366 = vmatmul.mubr.bf16.gmra.mxu1 %v7995_v62  ;;  %9276 = vmatprep.mubr.bf16.mxu0 %v8006_v32 }
 0x809   : > { %9373 = vmatprep.mubr.bf16.mxu1 %v8008_v39 }
 0x80f   : > { %9277 = vmatmul.mubr.bf16.gmra.mxu0 %v8005_v9 }
 0x810   : > { %9374 = vmatmul.mubr.bf16.gmra.mxu1 %v8007_v55  ;;  %9284 = vmatprep.mubr.bf16.mxu0 %v8018_v7 }
 0x811   : > { %9381 = vmatprep.mubr.bf16.mxu1 %v8020_v37 }
 0x817   : > { %9285 = vmatmul.mubr.bf16.gmra.mxu0 %v8017_v22 }
 0x818   : > { %9382 = vmatmul.mubr.bf16.gmra.mxu1 %v8019_v44  ;;  %9292 = vmatprep.mubr.bf16.mxu0 %v8030_v11 }
 0x819   : > { %9389 = vmatprep.mubr.bf16.mxu1 %v8032_v21 }
 0x81f   : > { %9293 = vmatmul.mubr.bf16.gmra.mxu0 %v8029_v47 }
 0x820   : > { %9390 = vmatmul.mubr.bf16.gmra.mxu1 %v8031_v25  ;;  %9300 = vmatprep.mubr.bf16.mxu0 %v8042_v16 }
 0x821   : > { %9397 = vmatprep.mubr.bf16.mxu1 %v8044_v54 }
 0x827   : > { %9301 = vmatmul.mubr.bf16.gmra.mxu0 %v8041_v0 }
 0x828   : > { %9398 = vmatmul.mubr.bf16.gmra.mxu1 %v8043_v36  ;;  %9308 = vmatprep.mubr.bf16.mxu0 %v8054_v63 }
 0x829   : > { %9405 = vmatprep.mubr.bf16.mxu1 %v8056_v30 }
 0x82f   : > { %9309 = vmatmul.mubr.bf16.gmra.mxu0 %v8053_v10 }
 0x830   : > { %9406 = vmatmul.mubr.bf16.gmra.mxu1 %v8055_v57 }
 0x837   : > { %v11706_v34 = vpop.f32.mrf.mxu0 }
 0x838   : > { %v11770_v4 = vpop.f32.mrf.mxu1 }
 0x839   : > { %v11707_v62 = vpop.f32.mrf.mxu0 }
 0x83a   : > { %v11708_v51 = vadd.f32 %v11707_v62, %v11706_v34  ;;  %v11771_v49 = vpop.f32.mrf.mxu1 }
 0x83b   : > { %v11772_v32 = vadd.f32 %v11771_v49, %v11770_v4  ;;  %v11709_v31 = vpop.f32.mrf.mxu0 }
 0x83c   : > { %v8867_v41 = vadd.f32 %v11708_v51, %v19457_v38  ;;  %v11773_v39 = vpop.f32.mrf.mxu1 }
 0x83d   : > { %v11710_v13 = vpop.f32.mrf.mxu0 }
 0x83e   : > { %v19460_v26 = vadd.f32 %v11772_v32, %v8867_v41  ;;  %v11711_v9 = vadd.f32 %v11710_v13, %v11709_v31  ;;  %v11774_v3 = vpop.f32.mrf.mxu1 }
 0x83f   : > { %v11775_v53 = vadd.f32 %v11774_v3, %v11773_v39  ;;  %v11712_v55 = vpop.f32.mrf.mxu0 }
 0x840   : > { %v8870_v46 = vadd.f32 %v11711_v9, %v19457_v38  ;;  %v11776_v17 = vpop.f32.mrf.mxu1 }
 0x841   : > { %v11713_v7 = vpop.f32.mrf.mxu0 }
 0x842   : > { %v19463_v27 = vadd.f32 %v11775_v53, %v8870_v46  ;;  %v11714_v5 = vadd.f32 %v11713_v7, %v11712_v55  ;;  %v11777_v37 = vpop.f32.mrf.mxu1 }
 0x843   : > { %v11778_v23 = vadd.f32 %v11777_v37, %v11776_v17  ;;  %v11715_v19 = vpop.f32.mrf.mxu0 }
 0x844   : > { %v8875_v22 = vadd.f32 %v11714_v5, %v19457_v38  ;;  %v11779_v1 = vpop.f32.mrf.mxu1 }
 0x845   : > { %v11716_v48 = vpop.f32.mrf.mxu0 }
 0x846   : > { %v19466_v44 = vadd.f32 %v11778_v23, %v8875_v22  ;;  %v11717_v18 = vadd.f32 %v11716_v48, %v11715_v19  ;;  %v11780_v45 = vpop.f32.mrf.mxu1 }
 0x847   : > { %v11781_v11 = vadd.f32 %v11780_v45, %v11779_v1  ;;  %v11718_v24 = vpop.f32.mrf.mxu0 }
 0x848   : > { %v8878_v12 = vadd.f32 %v11717_v18, %v19457_v38  ;;  %v11782_v21 = vpop.f32.mrf.mxu1 }
 0x849   : > { %v11719_v40 = vpop.f32.mrf.mxu0 }
 0x84a   : > { %v19469_v35 = vadd.f32 %v11781_v11, %v8878_v12  ;;  %v11720_v47 = vadd.f32 %v11719_v40, %v11718_v24  ;;  %v11783_v28 = vpop.f32.mrf.mxu1 }
 0x84b   : > { %v11784_v14 = vadd.f32 %v11783_v28, %v11782_v21  ;;  %v11721_v25 = vpop.f32.mrf.mxu0 }
 0x84c   : > { %v8883_v6 = vadd.f32 %v11720_v47, %v19457_v38  ;;  %v11785_v59 = vpop.f32.mrf.mxu1 }
 0x84d   : > { %v11722_v16 = vpop.f32.mrf.mxu0 }
 0x84e   : > { %v19472_v8 = vadd.f32 %v11784_v14, %v8883_v6  ;;  %v11723_v56 = vadd.f32 %v11722_v16, %v11721_v25  ;;  %v11786_v54 = vpop.f32.mrf.mxu1 }
 0x84f   : > { %v11787_v15 = vadd.f32 %v11786_v54, %v11785_v59  ;;  %v11724_v61 = vpop.f32.mrf.mxu0 }
 0x850   : > { %v8886_v0 = vadd.f32 %v11723_v56, %v19457_v38  ;;  %v11788_v43 = vpop.f32.mrf.mxu1 }
 0x851   : > { %v11725_v42 = vpop.f32.mrf.mxu0 }
 0x852   : > { %v19475_v36 = vadd.f32 %v11787_v15, %v8886_v0  ;;  %v11726_v29 = vadd.f32 %v11725_v42, %v11724_v61  ;;  %v11789_v60 = vpop.f32.mrf.mxu1 }
 0x853   : > { %v11790_v63 = vadd.f32 %v11789_v60, %v11788_v43  ;;  %v11727_v52 = vpop.f32.mrf.mxu0 }
 0x854   : > { %v8891_v33 = vadd.f32 %v11726_v29, %v19457_v38  ;;  %v11791_v30 = vpop.f32.mrf.mxu1 }
 0x855   : > { %v11728_v20 = vpop.f32.mrf.mxu0 }
 0x856   : > { %v19478_v50 = vadd.f32 %v11790_v63, %v8891_v33  ;;  %v11729_v10 = vadd.f32 %v11728_v20, %v11727_v52  ;;  %v11792_v58 = vpop.f32.mrf.mxu1 }
 0x857   : > { %v11793_v2 = vadd.f32 %v11792_v58, %v11791_v30  ;;  %v11730_v57 = vpop.f32.mrf.mxu0 }
 0x858   : > { %v8894_v34 = vadd.f32 %v11729_v10, %v19457_v38  ;;  %v11794_v4 = vpop.f32.mrf.mxu1 }
 0x859   : > { %v11731_v62 = vpop.f32.mrf.mxu0 }
 0x85a   : > { %v19481_v51 = vadd.f32 %v11793_v2, %v8894_v34  ;;  %v11732_v49 = vadd.f32 %v11731_v62, %v11730_v57  ;;  %v11795_v32 = vpop.f32.mrf.mxu1 }
 0x85b   : > { %v11796_v31 = vadd.f32 %v11795_v32, %v11794_v4  ;;  %v11733_v41 = vpop.f32.mrf.mxu0 }
 0x85c   : > { %v8899_v39 = vadd.f32 %v11732_v49, %v19457_v38  ;;  %v11797_v13 = vpop.f32.mrf.mxu1 }
 0x85d   : > { %v11734_v9 = vpop.f32.mrf.mxu0 }
 0x85e   : > { %v19484_v3 = vadd.f32 %v11796_v31, %v8899_v39  ;;  %v11735_v53 = vadd.f32 %v11734_v9, %v11733_v41  ;;  %v11798_v55 = vpop.f32.mrf.mxu1 }
 0x85f   : > { %v11799_v46 = vadd.f32 %v11798_v55, %v11797_v13  ;;  %v11736_v17 = vpop.f32.mrf.mxu0 }
 0x860   : > { %v8902_v7 = vadd.f32 %v11735_v53, %v19457_v38  ;;  %v11800_v5 = vpop.f32.mrf.mxu1 }
 0x861   : > { %v11737_v37 = vpop.f32.mrf.mxu0 }
 0x862   : > { %v19487_v23 = vadd.f32 %v11799_v46, %v8902_v7  ;;  %v11738_v19 = vadd.f32 %v11737_v37, %v11736_v17  ;;  %v11801_v22 = vpop.f32.mrf.mxu1 }
 0x863   : > { %v11802_v1 = vadd.f32 %v11801_v22, %v11800_v5  ;;  %v11739_v48 = vpop.f32.mrf.mxu0 }
 0x864   : > { %v8907_v18 = vadd.f32 %v11738_v19, %v19457_v38  ;;  %v11803_v45 = vpop.f32.mrf.mxu1 }
 0x865   : > { %v11740_v11 = vpop.f32.mrf.mxu0 }
 0x866   : > { %v19490_v24 = vadd.f32 %v11802_v1, %v8907_v18  ;;  %v11741_v12 = vadd.f32 %v11740_v11, %v11739_v48  ;;  %v11804_v21 = vpop.f32.mrf.mxu1 }
 0x867   : > { %v11805_v40 = vadd.f32 %v11804_v21, %v11803_v45  ;;  %v11742_v47 = vpop.f32.mrf.mxu0 }
 0x868   : > { %v8910_v28 = vadd.f32 %v11741_v12, %v19457_v38  ;;  %v11806_v14 = vpop.f32.mrf.mxu1 }
 0x869   : > { %v11743_v25 = vpop.f32.mrf.mxu0 }
 0x86a   : > { %v19493_v6 = vadd.f32 %v11805_v40, %v8910_v28  ;;  %v11744_v59 = vadd.f32 %v11743_v25, %v11742_v47  ;;  %v11807_v16 = vpop.f32.mrf.mxu1 }
 0x86b   : > { %v11808_v56 = vadd.f32 %v11807_v16, %v11806_v14  ;;  %v11745_v54 = vpop.f32.mrf.mxu0 }
 0x86c   : > { %v8915_v15 = vadd.f32 %v11744_v59, %v19457_v38  ;;  %v11809_v61 = vpop.f32.mrf.mxu1 }
 0x86d   : > { %v11746_v0 = vpop.f32.mrf.mxu0 }
 0x86e   : > { %v19496_v43 = vadd.f32 %v11808_v56, %v8915_v15  ;;  %v11747_v42 = vadd.f32 %v11746_v0, %v11745_v54  ;;  %v11810_v29 = vpop.f32.mrf.mxu1 }
 0x86f   : > { %v11811_v60 = vadd.f32 %v11810_v29, %v11809_v61  ;;  %v11748_v63 = vpop.f32.mrf.mxu0 }
 0x870   : > { %v8918_v52 = vadd.f32 %v11747_v42, %v19457_v38  ;;  %v11812_v33 = vpop.f32.mrf.mxu1 }
 0x871   : > { %v11749_v30 = vpop.f32.mrf.mxu0 }
 0x872   : > { %v19499_v20 = vadd.f32 %v11811_v60, %v8918_v52  ;;  %v11750_v10 = vadd.f32 %v11749_v30, %v11748_v63  ;;  %v11813_v58 = vpop.f32.mrf.mxu1 }
 0x873   : > { %v11814_v2 = vadd.f32 %v11813_v58, %v11812_v33  ;;  %v11751_v57 = vpop.f32.mrf.mxu0 }
 0x874   : > { %v8923_v34 = vadd.f32 %v11750_v10, %v19457_v38  ;;  %v11815_v4 = vpop.f32.mrf.mxu1 }
 0x875   : > { %v11752_v62 = vpop.f32.mrf.mxu0 }
 0x876   : > { %v19502_v49 = vadd.f32 %v11814_v2, %v8923_v34  ;;  %v11753_v32 = vadd.f32 %v11752_v62, %v11751_v57  ;;  %v11816_v31 = vpop.f32.mrf.mxu1 }
 0x877   : > { %v11817_v41 = vadd.f32 %v11816_v31, %v11815_v4  ;;  %v11834_v39 = vpop.f32.mrf.mxu0 }
 0x878   : > { %v8926_v13 = vadd.f32 %v11753_v32, %v19457_v38  ;;  %v11898_v9 = vpop.f32.mrf.mxu1 }
 0x879   : > { %v11835_v53 = vpop.f32.mrf.mxu0 }
 0x87a   : > { %v19505_v55 = vadd.f32 %v11817_v41, %v8926_v13  ;;  %v11836_v46 = vadd.f32 %v11835_v53, %v11834_v39  ;;  %v11899_v17 = vpop.f32.mrf.mxu1 }
 0x87b   : > { %v11900_v7 = vadd.f32 %v11899_v17, %v11898_v9  ;;  %v11837_v5 = vpop.f32.mrf.mxu0 }
 0x87c   : > { %v9061_v37 = vadd.f32 %v11836_v46, %v19460_v26  ;;  %v11901_v19 = vpop.f32.mrf.mxu1 }
 0x87d   : > { %v11838_v22 = vpop.f32.mrf.mxu0 }
 0x87e   : > { %v19508_v1 = vadd.f32 %v11900_v7, %v9061_v37  ;;  %v11839_v48 = vadd.f32 %v11838_v22, %v11837_v5  ;;  %v11902_v18 = vpop.f32.mrf.mxu1 }
 0x87f   : > { %v11903_v45 = vadd.f32 %v11902_v18, %v11901_v19  ;;  %v11840_v11 = vpop.f32.mrf.mxu0 }
 0x880   : > { %v9064_v38 = vadd.f32 %v11839_v48, %v19463_v27  ;;  %v11904_v12 = vpop.f32.mrf.mxu1 }
 0x881   : > { %v11841_v21 = vpop.f32.mrf.mxu0 }
 0x882   : > { %v19511_v40 = vadd.f32 %v11903_v45, %v9064_v38  ;;  %v11842_v47 = vadd.f32 %v11841_v21, %v11840_v11  ;;  %v11905_v28 = vpop.f32.mrf.mxu1 }
 0x883   : > { %v11906_v14 = vadd.f32 %v11905_v28, %v11904_v12  ;;  %v11843_v25 = vpop.f32.mrf.mxu0 }
 0x884   : > { %v9069_v26 = vadd.f32 %v11842_v47, %v19466_v44  ;;  %v11907_v59 = vpop.f32.mrf.mxu1 }
 0x885   : > { %v11844_v16 = vpop.f32.mrf.mxu0 }
 0x886   : > { %v19514_v56 = vadd.f32 %v11906_v14, %v9069_v26  ;;  %v11845_v54 = vadd.f32 %v11844_v16, %v11843_v25  ;;  %v11908_v15 = vpop.f32.mrf.mxu1 }
 0x887   : > { %v11909_v61 = vadd.f32 %v11908_v15, %v11907_v59  ;;  %v11846_v0 = vpop.f32.mrf.mxu0 }
 0x888   : > { %v9072_v27 = vadd.f32 %v11845_v54, %v19469_v35  ;;  %v11910_v42 = vpop.f32.mrf.mxu1 }
 0x889   : > { %v11847_v29 = vpop.f32.mrf.mxu0 }
 0x88a   : > { %v19517_v60 = vadd.f32 %v11909_v61, %v9072_v27  ;;  %v11848_v63 = vadd.f32 %v11847_v29, %v11846_v0  ;;  %v11911_v52 = vpop.f32.mrf.mxu1 }
 0x88b   : > { %v11912_v33 = vadd.f32 %v11911_v52, %v11910_v42  ;;  %v11849_v30 = vpop.f32.mrf.mxu0 }
 0x88c   : > { %v9077_v44 = vadd.f32 %v11848_v63, %v19472_v8  ;;  %v11913_v10 = vpop.f32.mrf.mxu1 }
 0x88d   : > { %v11850_v58 = vpop.f32.mrf.mxu0 }
 0x88e   : > { %v19520_v2 = vadd.f32 %v11912_v33, %v9077_v44  ;;  %v11851_v57 = vadd.f32 %v11850_v58, %v11849_v30  ;;  %v11914_v34 = vpop.f32.mrf.mxu1 }
 0x88f   : > { %v11915_v4 = vadd.f32 %v11914_v34, %v11913_v10  ;;  %v11852_v62 = vpop.f32.mrf.mxu0 }
 0x890   : > { %v9080_v35 = vadd.f32 %v11851_v57, %v19475_v36  ;;  %v11916_v32 = vpop.f32.mrf.mxu1 }
 0x891   : > { %v11853_v31 = vpop.f32.mrf.mxu0 }
 0x892   : > { %v19523_v41 = vadd.f32 %v11915_v4, %v9080_v35  ;;  %v11854_v39 = vadd.f32 %v11853_v31, %v11852_v62  ;;  %v11917_v13 = vpop.f32.mrf.mxu1 }
 0x893   : > { %v11918_v9 = vadd.f32 %v11917_v13, %v11916_v32  ;;  %v11855_v53 = vpop.f32.mrf.mxu0 }
 0x894   : > { %v9085_v8 = vadd.f32 %v11854_v39, %v19478_v50  ;;  %v11919_v46 = vpop.f32.mrf.mxu1 }
 0x895   : > { %v11856_v17 = vpop.f32.mrf.mxu0 }
 0x896   : > { %v19526_v7 = vadd.f32 %v11918_v9, %v9085_v8  ;;  %v11857_v5 = vadd.f32 %v11856_v17, %v11855_v53  ;;  %v11920_v37 = vpop.f32.mrf.mxu1 }
 0x897   : > { %v11921_v19 = vadd.f32 %v11920_v37, %v11919_v46  ;;  %v11858_v22 = vpop.f32.mrf.mxu0 }
 0x898   : > { %v9088_v36 = vadd.f32 %v11857_v5, %v19481_v51  ;;  %v11922_v48 = vpop.f32.mrf.mxu1 }
 0x899   : > { %v11859_v18 = vpop.f32.mrf.mxu0 }
 0x89a   : > { %v19529_v45 = vadd.f32 %v11921_v19, %v9088_v36  ;;  %v11860_v11 = vadd.f32 %v11859_v18, %v11858_v22  ;;  %v11923_v38 = vpop.f32.mrf.mxu1 }
 0x89b   : > { %v11924_v12 = vadd.f32 %v11923_v38, %v11922_v48  ;;  %v11861_v21 = vpop.f32.mrf.mxu0 }
 0x89c   : > { %v9093_v50 = vadd.f32 %v11860_v11, %v19484_v3  ;;  %v11925_v47 = vpop.f32.mrf.mxu1 }
 0x89d   : > { %v11862_v28 = vpop.f32.mrf.mxu0 }
 0x89e   : > { %v19532_v14 = vadd.f32 %v11924_v12, %v9093_v50  ;;  %v11863_v25 = vadd.f32 %v11862_v28, %v11861_v21  ;;  %v11926_v26 = vpop.f32.mrf.mxu1 }
 0x89f   : > { %v11927_v59 = vadd.f32 %v11926_v26, %v11925_v47  ;;  %v11864_v16 = vpop.f32.mrf.mxu0 }
 0x8a0   : > { %v9096_v51 = vadd.f32 %v11863_v25, %v19487_v23  ;;  %v11928_v54 = vpop.f32.mrf.mxu1 }
 0x8a1   : > { %v11865_v15 = vpop.f32.mrf.mxu0 }
 0x8a2   : > { %v19535_v61 = vadd.f32 %v11927_v59, %v9096_v51  ;;  %v11866_v0 = vadd.f32 %v11865_v15, %v11864_v16  ;;  %v11929_v27 = vpop.f32.mrf.mxu1  ;;  %v9430_v16 = vld [vmem:[%s19692_s9] sm:$0xff] }
 0x8a3   : > { %v11930_v42 = vadd.f32 %v11929_v27, %v11928_v54  ;;  %v11867_v29 = vpop.f32.mrf.mxu0  ;;  %12135 = vmatprep.mubr.msk.f32.mxu0 %vm1438_vm1, %v9430_v16 }
 0x8a4   : > { %v9101_v3 = vadd.f32 %v11866_v0, %v19490_v24  ;;  %v11931_v63 = vpop.f32.mrf.mxu1 }
 0x8a5   : > { %v11868_v52 = vpop.f32.mrf.mxu0 }
 0x8a6   : > { %v19538_v33 = vadd.f32 %v11930_v42, %v9101_v3  ;;  %v11869_v30 = vadd.f32 %v11868_v52, %v11867_v29  ;;  %v11932_v44 = vpop.f32.mrf.mxu1  ;;  %v9432_v42 = vld [vmem:[%s19693_s10] sm:$0xff] }
 0x8a7   : > { %v11933_v10 = vadd.f32 %v11932_v44, %v11931_v63  ;;  %v11870_v58 = vpop.f32.mrf.mxu0  ;;  %v12726_v63 = vmov 0   ;;  %v9433_v44 = vld [vmem:[%s19693_s10 + $0x8] sm:$0xf] }
 0x8a8   : > { %v9104_v23 = vadd.f32 %v11869_v30, %v19493_v6  ;;  %v11934_v57 = vpop.f32.mrf.mxu1  ;;  %12601 = vset.pattern.permute.xlu0 %v12726_v63 }
 0x8a9   : > { %v11871_v34 = vpop.f32.mrf.mxu0  ;;  %9436 = vperm.xlu0 %12601, %v9432_v42  }
 0x8aa   : > { %v19541_v4 = vadd.f32 %v11933_v10, %v9104_v23  ;;  %v11872_v62 = vadd.f32 %v11871_v34, %v11870_v58  ;;  %v11935_v35 = vpop.f32.mrf.mxu1 }
 0x8ab   : > { %v11936_v32 = vadd.f32 %v11935_v35, %v11934_v57  ;;  %v11873_v31 = vpop.f32.mrf.mxu0 }
 0x8ac   : > { %v9109_v24 = vadd.f32 %v11872_v62, %v19496_v43  ;;  %v11937_v39 = vpop.f32.mrf.mxu1 }
 0x8ad   : > { %v11874_v13 = vpop.f32.mrf.mxu0  ;;  %9441 = vperm.xlu0 %12601, %v9433_v44  }
 0x8ae   : > { %v19544_v9 = vadd.f32 %v11936_v32, %v9109_v24  ;;  %v11875_v53 = vadd.f32 %v11874_v13, %v11873_v31  ;;  %v11938_v8 = vpop.f32.mrf.mxu1 }
 0x8af   : > { %v11939_v46 = vadd.f32 %v11938_v8, %v11937_v39  ;;  %v11876_v17 = vpop.f32.mrf.mxu0 }
 0x8b0   : > { %v9112_v6 = vadd.f32 %v11875_v53, %v19499_v20  ;;  %v11940_v5 = vpop.f32.mrf.mxu1 }
 0x8b1   : > { %v11877_v37 = vpop.f32.mrf.mxu0 }
 0x8b2   : > { %v19547_v19 = vadd.f32 %v11939_v46, %v9112_v6  ;;  %v11878_v22 = vadd.f32 %v11877_v37, %v11876_v17  ;;  %v11941_v36 = vpop.f32.mrf.mxu1 }
 0x8b3   : > { %v11942_v48 = vadd.f32 %v11941_v36, %v11940_v5  ;;  %v19549_v18 = vpop.f32.mrf.mxu0 }
 0x8b4   : > { %v9117_v43 = vadd.f32 %v11878_v22, %v19502_v49  ;;  %v19552_v11 = vpop.f32.mrf.mxu1 }
 0x8b5   : > { %v19554_v38 = vpop.f32.mrf.mxu0 }
 0x8b6   : > { %v19556_v12 = vadd.f32 %v11942_v48, %v9117_v43  ;;  %v19558_v21 = vpop.f32.mrf.mxu1 }
 0x8b7   : > { %v11962_v20 = vpop.f32.mrf.mxu0 }
 0x8b8   : > { %v12026_v50 = vpop.f32.mrf.mxu1 }
 0x8b9   : > { %v11963_v47 = vpop.f32.mrf.mxu0 }
 0x8ba   : > { %v11964_v28 = vadd.f32 %v11963_v47, %v11962_v20  ;;  %v12027_v25 = vpop.f32.mrf.mxu1 }
 0x8bb   : > { %v12028_v26 = vadd.f32 %v12027_v25, %v12026_v50  ;;  %v11965_v59 = vpop.f32.mrf.mxu0 }
 0x8bc   : > { %v9255_v49 = vadd.f32 %v11964_v28, %v19508_v1  ;;  %v12029_v51 = vpop.f32.mrf.mxu1 }
 0x8bd   : > { %v11966_v54 = vpop.f32.mrf.mxu0 }
 0x8be   : > { %v19565_v15 = vadd.f32 %v12028_v26, %v9255_v49  ;;  %v11967_v0 = vadd.f32 %v11966_v54, %v11965_v59  ;;  %v12030_v27 = vpop.f32.mrf.mxu1 }
 0x8bf   : > { %v12031_v29 = vadd.f32 %v12030_v27, %v12029_v51  ;;  %v11968_v3 = vpop.f32.mrf.mxu0 }
 0x8c0   : > { %v9258_v52 = vadd.f32 %v11967_v0, %v19511_v40  ;;  %v12032_v30 = vpop.f32.mrf.mxu1 }
 0x8c1   : > { %v11969_v1 = vpop.f32.mrf.mxu0 }
 0x8c2   : > { %v19574_v10 = vadd.f32 %v12031_v29, %v9258_v52  ;;  %v11970_v58 = vadd.f32 %v11969_v1, %v11968_v3  ;;  %v12033_v23 = vpop.f32.mrf.mxu1 }
 0x8c3   : > { %v12034_v57 = vadd.f32 %v12033_v23, %v12032_v30  ;;  %v11971_v34 = vpop.f32.mrf.mxu0 }
 0x8c4   : > { %v9263_v62 = vadd.f32 %v11970_v58, %v19514_v56  ;;  %v12035_v35 = vpop.f32.mrf.mxu1 }
 0x8c5   : > { %v11972_v32 = vpop.f32.mrf.mxu0 }
 0x8c6   : > { %v19577_v31 = vadd.f32 %v12034_v57, %v9263_v62  ;;  %v11973_v40 = vadd.f32 %v11972_v32, %v11971_v34  ;;  %v12036_v24 = vpop.f32.mrf.mxu1 }
 0x8c7   : > { %v12037_v39 = vadd.f32 %v12036_v24, %v12035_v35  ;;  %v11974_v13 = vpop.f32.mrf.mxu0 }
 0x8c8   : > { %v9266_v53 = vadd.f32 %v11973_v40, %v19517_v60  ;;  %v12038_v8 = vpop.f32.mrf.mxu1 }
 0x8c9   : > { %v11975_v46 = vpop.f32.mrf.mxu0 }
 0x8ca   : > { %v19580_v17 = vadd.f32 %v12037_v39, %v9266_v53  ;;  %v11976_v6 = vadd.f32 %v11975_v46, %v11974_v13  ;;  %v12039_v5 = vpop.f32.mrf.mxu1 }
 0x8cb   : > { %v12040_v37 = vadd.f32 %v12039_v5, %v12038_v8  ;;  %v11977_v22 = vpop.f32.mrf.mxu0 }
 0x8cc   : > { %v9271_v56 = vadd.f32 %v11976_v6, %v19520_v2  ;;  %v12041_v36 = vpop.f32.mrf.mxu1 }
 0x8cd   : > { %v11978_v48 = vpop.f32.mrf.mxu0 }
 0x8ce   : > { %v19583_v43 = vadd.f32 %v12040_v37, %v9271_v56  ;;  %v11979_v20 = vadd.f32 %v11978_v48, %v11977_v22  ;;  %v12042_v50 = vpop.f32.mrf.mxu1  ;;  %v11881_v56 = vadd.f32 %v19554_v38, %v19549_v18 }
 0x8cf   : > { %v12043_v47 = vadd.f32 %v12042_v50, %v12041_v36  ;;  %v11980_v28 = vpop.f32.mrf.mxu0 }
 0x8d0   : > { %v9274_v60 = vadd.f32 %v11979_v20, %v19523_v41  ;;  %v12044_v25 = vpop.f32.mrf.mxu1 }
 0x8d1   : > { %v11981_v26 = vpop.f32.mrf.mxu0 }
 0x8d2   : > { %v19586_v59 = vadd.f32 %v12043_v47, %v9274_v60  ;;  %v11982_v16 = vadd.f32 %v11981_v26, %v11980_v28  ;;  %v12045_v49 = vpop.f32.mrf.mxu1  ;;  %v9120_v47 = vadd.f32 %v11881_v56, %v19505_v55  ;;  %v11945_v26 = vadd.f32 %v19558_v21, %v19552_v11 }
 0x8d3   : > { %v12046_v51 = vadd.f32 %v12045_v49, %v12044_v25  ;;  %v11983_v54 = vpop.f32.mrf.mxu0 }
 0x8d4   : > { %v9279_v2 = vadd.f32 %v11982_v16, %v19526_v7  ;;  %v12047_v0 = vpop.f32.mrf.mxu1 }
 0x8d5   : > { %v11984_v27 = vpop.f32.mrf.mxu0 }
 0x8d6   : > { %v19589_v42 = vadd.f32 %v12046_v51, %v9279_v2  ;;  %v11985_v29 = vadd.f32 %v11984_v27, %v11983_v54  ;;  %v12048_v3 = vpop.f32.mrf.mxu1  ;;  %v9217_v51 = vadd.f32 %v11945_v26, %v9120_v47 }
 0x8d7   : > { %v19591_v63 = vpop.f32.mrf.mxu0  ;;  %v12049_v52 = vadd.f32 %v12048_v3, %v12047_v0 }
 0x8d8   : > { %v9282_v41 = vadd.f32 %v11985_v29, %v19529_v45  ;;  %v19594_v30 = vpop.f32.mrf.mxu1 }
 0x8d9   : > { %v19596_v1 = vpop.f32.mrf.mxu0 }
 0x8da   : > { %v19598_v44 = vadd.f32 %v12049_v52, %v9282_v41  ;;  %v19600_v58 = vpop.f32.mrf.mxu1 }
 0x8db   : > { %v11989_v7 = vpop.f32.mrf.mxu0 }
 0x8dc   : > { %v19602_v23 = vpop.f32.mrf.mxu1 }
 0x8dd   : > { %v11990_v57 = vpop.f32.mrf.mxu0 }
 0x8de   : > { %v19604_v34 = vpop.f32.mrf.mxu1 }
 0x8df   : > { %v11992_v62 = vpop.f32.mrf.mxu0 }
 0x8e0   : > { %v12056_v35 = vpop.f32.mrf.mxu1 }
 0x8e1   : > { %v11993_v32 = vpop.f32.mrf.mxu0 }
 0x8e2   : > { %v12057_v40 = vpop.f32.mrf.mxu1 }
 0x8e3   : > { %v11995_v45 = vpop.f32.mrf.mxu0 }
 0x8e4   : > { %v12059_v24 = vpop.f32.mrf.mxu1 }
 0x8e5   : > { %v11996_v39 = vpop.f32.mrf.mxu0 }
 0x8e6   : > { %v12060_v13 = vpop.f32.mrf.mxu1 }
 0x8e7   : > { %v11998_v53 = vpop.f32.mrf.mxu0 }
 0x8e8   : > { %v12062_v8 = vpop.f32.mrf.mxu1 }
 0x8e9   : > { %v11999_v46 = vpop.f32.mrf.mxu0 }
 0x8ea   : > { %v12063_v6 = vpop.f32.mrf.mxu1  ;;  %v12000_v3 = vadd.f32 %v11999_v46, %v11998_v53 }
 0x8eb   : > { %v12001_v5 = vpop.f32.mrf.mxu0 }
 0x8ec   : > { %v12065_v37 = vpop.f32.mrf.mxu1  ;;  %v9303_v11 = vadd.f32 %v12000_v3, %v19544_v9  ;;  %v11991_v9 = vadd.f32 %v11990_v57, %v11989_v7  ;;  %v12055_v7 = vadd.f32 %v19604_v34, %v19602_v23  ;;  %v9418_v34 = vmax.f32 %v19583_v43, 0.0 }
 0x8ed   : > { %v12002_v22 = vpop.f32.mrf.mxu0  ;;  %v9414_v43 = vmax.f32 %v19565_v15, 0.0 }
 0x8ee   : > { %v12066_v36 = vpop.f32.mrf.mxu1  ;;  %v12003_v54 = vadd.f32 %v12002_v22, %v12001_v5  ;;  %v11994_v5 = vadd.f32 %v11993_v32, %v11992_v62  ;;  %v9290_v62 = vadd.f32 %v11991_v9, %v19535_v61 }
 0x8ef   : > { %v12004_v48 = vpop.f32.mrf.mxu0  ;;  %v12067_v56 = vadd.f32 %v12066_v36, %v12065_v37  ;;  %v12061_v37 = vadd.f32 %v12060_v13, %v12059_v24 }
 0x8f0   : > { %v12068_v20 = vpop.f32.mrf.mxu1  ;;  %v9306_v55 = vadd.f32 %v12003_v54, %v19547_v19  ;;  %v9387_v57 = vadd.f32 %v12055_v7, %v9290_v62 }
 0x8f1   : > { %v12005_v50 = vpop.f32.mrf.mxu0 }
 0x8f2   : > { %v12006_v28 = vadd.f32 %v12005_v50, %v12004_v48  ;;  %v12069_v60 = vpop.f32.mrf.mxu1  ;;  %v11997_v50 = vadd.f32 %v11996_v39, %v11995_v45  ;;  %v9403_v21 = vadd.f32 %v12067_v56, %v9306_v55  ;;  %v9295_v45 = vadd.f32 %v11994_v5, %v19538_v33 }
 0x8f3   : > { %v12007_v25 = vpop.f32.mrf.mxu0  ;;  %v12070_v38 = vadd.f32 %v12069_v60, %v12068_v20 }
 0x8f4   : > { %v12071_v16 = vpop.f32.mrf.mxu1  ;;  %v9311_v2 = vadd.f32 %v12006_v28, %v19556_v12  ;;  %v12064_v12 = vadd.f32 %v12063_v6, %v12062_v8  ;;  %v9298_v53 = vadd.f32 %v11997_v50, %v19541_v4  ;;  %v9427_v46 = vmax.f32 %v9403_v21, 0.0 }
 0x8f5   : > { %v12008_v49 = vpop.f32.mrf.mxu0  ;;  %v12058_v8 = vadd.f32 %v12057_v40, %v12056_v35  ;;  %v11988_v4 = vadd.f32 %v19596_v1, %v19591_v63  ;;  %v12052_v63 = vadd.f32 %v19600_v58, %v19594_v30  ;;  %v9423_v1 = vmax.f32 %v9387_v57, 0.0 }
 0x8f6   : > { %v12009_v0 = vadd.f32 %v12008_v49, %v12007_v25  ;;  %v12072_v18 = vpop.f32.mrf.mxu1  ;;  %v9408_v41 = vadd.f32 %v12070_v38, %v9311_v2  ;;  %v9400_v19 = vadd.f32 %v12064_v12, %v9303_v11  ;;  %v9395_v39 = vadd.f32 %v12061_v37, %v9298_v53 }
 0x8f7   : > { %v12073_v29 = vadd.f32 %v12072_v18, %v12071_v16  ;;  %v9392_v32 = vadd.f32 %v12058_v8, %v9295_v45  ;;  %v9287_v33 = vadd.f32 %v11988_v4, %v19532_v14  ;;  %v9421_v14 = vmax.f32 %v19598_v44, 0.0 }
 0x8f8   : > { %v9314_v27 = vadd.f32 %v12009_v0, %v9217_v51  ;;  %v9428_v47 = vmax.f32 %v9408_v41, 0.0  ;;  %v9426_v22 = vmax.f32 %v9400_v19, 0.0  ;;  %v9425_v6 = vmax.f32 %v9395_v39, 0.0 }
 0x8f9   : > { %v9424_v35 = vmax.f32 %v9392_v32, 0.0  ;;  %v9384_v61 = vadd.f32 %v12052_v63, %v9287_v33  ;;  %v9420_v30 = vmax.f32 %v19589_v42, 0.0  ;;  %v9419_v58 = vmax.f32 %v19586_v59, 0.0 }
 0x8fa   : > { %v9411_v52 = vadd.f32 %v12073_v29, %v9314_v27  ;;  %v9417_v44 = vmax.f32 %v19580_v17, 0.0  ;;  %v9416_v42 = vmax.f32 %v19577_v31, 0.0  ;;  %v9415_v59 = vmax.f32 %v19574_v10, 0.0  ;;  %v9431_v31 = vld [vmem:[%s19692_s9 + $0x8] sm:$0xf] }
 0x8fb   : > { %v9422_v23 = vmax.f32 %v9384_v61, 0.0 }
 0x8fc   : > { %v9429_v48 = vmax.f32 %v9411_v52, 0.0 }
 0x8fe   : > { %12103 = vmatprep.subr.msk.mxu0 %vm1438_vm1, %v9429_v48 }
 0x8ff   : > { %12104 = vmatpush3.xpose.msk.msra.mxu0 %vm1438_vm1, %v9429_v48 }
 0x900   : > { %12105 = vmatprep.subr.msk.mxu0 %vm1438_vm1, %v9428_v47 }
 0x903   : > { %12106 = vmatpush3.xpose.msk.msra.mxu0 %vm1438_vm1, %v9428_v47 }
 0x904   : > { %12107 = vmatprep.subr.msk.mxu0 %vm1438_vm1, %v9427_v46 }
 0x907   : > { %12108 = vmatpush3.xpose.msk.msra.mxu0 %vm1438_vm1, %v9427_v46 }
 0x908   : > { %12109 = vmatprep.subr.msk.mxu0 %vm1438_vm1, %v9426_v22 }
 0x90b   : > { %12110 = vmatpush3.xpose.msk.msra.mxu0 %vm1438_vm1, %v9426_v22 }
 0x90c   : > { %12111 = vmatprep.subr.msk.mxu0 %vm1438_vm1, %v9425_v6 }
 0x90f   : > { %12112 = vmatpush3.xpose.msk.msra.mxu0 %vm1438_vm1, %v9425_v6 }
 0x910   : > { %12113 = vmatprep.subr.msk.mxu0 %vm1438_vm1, %v9424_v35 }
 0x913   : > { %12114 = vmatpush3.xpose.msk.msra.mxu0 %vm1438_vm1, %v9424_v35 }
 0x914   : > { %12115 = vmatprep.subr.msk.mxu0 %vm1438_vm1, %v9423_v1 }
 0x917   : > { %12116 = vmatpush3.xpose.msk.msra.mxu0 %vm1438_vm1, %v9423_v1 }
 0x918   : > { %12117 = vmatprep.subr.msk.mxu0 %vm1438_vm1, %v9422_v23 }
 0x91b   : > { %12118 = vmatpush3.xpose.msk.msra.mxu0 %vm1438_vm1, %v9422_v23 }
 0x91c   : > { %12119 = vmatprep.subr.msk.mxu0 %vm1438_vm1, %v9421_v14 }
 0x91f   : > { %12120 = vmatpush3.xpose.msk.msra.mxu0 %vm1438_vm1, %v9421_v14 }
 0x920   : > { %12121 = vmatprep.subr.msk.mxu0 %vm1438_vm1, %v9420_v30 }
 0x923   : > { %12122 = vmatpush3.xpose.msk.msra.mxu0 %vm1438_vm1, %v9420_v30 }
 0x924   : > { %12123 = vmatprep.subr.msk.mxu0 %vm1438_vm1, %v9419_v58  ;;  %v9437_v17 = vpop.permute.xlu0 %9436 }
 0x927   : > { %12124 = vmatpush3.xpose.msk.msra.mxu0 %vm1438_vm1, %v9419_v58 }
 0x928   : > { %12125 = vmatprep.subr.msk.mxu0 %vm1438_vm1, %v9418_v34  ;;  %v9442_v10 = vpop.permute.xlu0 %9441 }
 0x92b   : > { %12126 = vmatpush3.xpose.msk.msra.mxu0 %vm1438_vm1, %v9418_v34 }
 0x92c   : > { %12127 = vmatprep.subr.msk.mxu0 %vm1438_vm1, %v9417_v44 }
 0x92f   : > { %12128 = vmatpush3.xpose.msk.msra.mxu0 %vm1438_vm1, %v9417_v44 }
 0x930   : > { %12129 = vmatprep.subr.msk.mxu0 %vm1438_vm1, %v9416_v42 }
 0x933   : > { %12130 = vmatpush3.xpose.msk.msra.mxu0 %vm1438_vm1, %v9416_v42 }
 0x934   : > { %12131 = vmatprep.subr.msk.mxu0 %vm1438_vm1, %v9415_v59 }
 0x937   : > { %12132 = vmatpush3.xpose.msk.msra.mxu0 %vm1438_vm1, %v9415_v59 }
 0x938   : > { %12133 = vmatprep.subr.msk.mxu0 %vm1438_vm1, %v9414_v43 }
 0x93b   : > { %12134 = vmatpush3.xpose.msk.msra.mxu0 %vm1438_vm1, %v9414_v43 }
 0x93e   : > { %12136 = vmatmul.mubr.msk.f32.vlgmr.msra.gmra.mxu0 %vm1438_vm1, %v9431_v31 }
 0x9fe   : > { %v12137_v40 = vpop.f32.mrf.mxu0 }
 0x9ff   : > { %v9570_v24 = vadd.f32 %v12137_v40, %v9442_v10 }
 0xa00   : > { %v9564_v13 = vpop.f32.mrf.mxu0 }
 0xa01   : > { %9574 = vst [vmem:[%s19694_s11 + $0x8] sm:$0xf] %v9570_v24  ;;  %v9565_v15 = vadd.f32 %v9564_v13, %v9437_v17 }
 0xa03   : > { %9573 = vst [vmem:[%s19694_s11] sm:$0xff] %v9565_v15 }
 0xa04 PF: > { %s21_s19 = sadd.s32 1, %s12720_s19   ;;  %s21690_s17 = smov %s12716_s18 }
 0xa05   : > { %p18_p8 = scmp.ge.s32.totalorder %s21_s19, 4   ;;  %s21691_s18 = smov %s21693_s20 }
 0xa07   :  { %20 = sbr.rel (!%p18_p8) target bundleno = 2 (0x2), region = 110 }

</bundles_post_ra>
